<compile_context>
chip_gen: v5e
topology: v5e:2x2
jax: 0.10.0
libtpu: 0.0.40
codegen_flags: <defaults>
</compile_context>

<pallas_src>
import numpy as np
import jax
import jax.numpy as jnp
from jax.experimental import pallas as pl
from jax.experimental.pallas import tpu as pltpu

# ----------------------- model hyper-parameters ------------------------------
B          = 2          # batch
NSTACK     = 10         # hard-coded torch.stack([inputs] * 10, dim=2)
A          = 8          # continuous action dim (get_shape_from_act_space)
H          = 32         # args.intention_hidden_size
I_SZ       = 16         # args.intention_size
LAYER_N    = 2          # args.layer_N (=1) * 2
PRED_STEPS = 20
N_BLOCKS   = 2
T          = N_BLOCKS * PRED_STEPS
R          = B * NSTACK
HI         = H + I_SZ
EPS        = 1e-5       # nn.LayerNorm default eps
UNROLL     = 4          # manual unroll of the in-kernel rollout loop


# ------------------------------ kernel ---------------------------------------
def decoder_kernel(last_pred_ref, intention_ref,
                   w_gru_ref, b_gru_ref,
                   ln_h_g_ref, ln_h_b_ref,
                   xenc_w_ref, xenc_b_ref,
                   fc1_w_ref, fc1_b_ref,
                   fc2_w_ref, fc2_b_ref,
                   fc3_w_ref, fc3_b_ref,
                   fc4_w_ref, fc4_b_ref,
                   out_ref,
                   cat_ref):
    f32 = jnp.float32
    H2, H3 = 2 * H, 3 * H

    # ---- hoisted weight loads and bias broadcasts (loop-invariant) ----
    w_gru = w_gru_ref[...]                                       # (A+H, 4H)
    b_gru = jnp.broadcast_to(b_gru_ref[...], (R, 4 * H))
    ln_h_g = jnp.broadcast_to(ln_h_g_ref[...], (R, H))
    ln_h_b = jnp.broadcast_to(ln_h_b_ref[...], (R, H))
    xenc_w = [xenc_w_ref[i] for i in range(LAYER_N)]
    xenc_b = [jnp.broadcast_to(xenc_b_ref[i], (R, H)) for i in range(LAYER_N)]
    fc1_w = [fc1_w_ref[i] for i in range(LAYER_N)]
    fc1_b = [jnp.broadcast_to(fc1_b_ref[i], (R, HI)) for i in range(LAYER_N)]
    fc2_w = fc2_w_ref[...]
    fc2_b = jnp.broadcast_to(fc2_b_ref[...], (R, H))
    fc3_w = [fc3_w_ref[i] for i in range(LAYER_N)]
    fc3_b = [jnp.broadcast_to(fc3_b_ref[i], (R, H)) for i in range(LAYER_N)]
    fc4_w = fc4_w_ref[...]
    fc4_b = jnp.broadcast_to(fc4_b_ref[...], (R, A))

    # Constant half of the [xe | intention] concat, written exactly once.
    cat_ref[...] = jnp.concatenate(
        [jnp.zeros((R, H), f32), intention_ref[...]], axis=-1)

    def step(x, h, t_idx):
        # input LayerNorm over the action dim (gain/bias pre-folded into w_gru)
        m = jnp.mean(x, axis=-1, keepdims=True)
        v = jnp.mean((x - m) ** 2, axis=-1, keepdims=True)
        x_norm = (x - m) * jax.lax.rsqrt(v + EPS)

        # ---- fused GRU cell: ONE MXU push -> [ (gi+gh)_rz | gi_n | gh_n ] ----
        xh = jnp.concatenate([x_norm, h], axis=-1)               # (R, A+H)
        g = jnp.dot(xh, w_gru, preferred_element_type=f32) + b_gru  # (R, 4H)
        rz = jax.nn.sigmoid(g[:, :H2])
        r = rz[:, :H]
        z = rz[:, H:]
        n = jnp.tanh(g[:, H2:H3] + r * g[:, H3:])
        h = (1.0 - z) * n + z * h

        # hidden LayerNorm + x_enc residual stack
        m2 = jnp.mean(h, axis=-1, keepdims=True)
        v2 = jnp.mean((h - m2) ** 2, axis=-1, keepdims=True)
        xe = (h - m2) * jax.lax.rsqrt(v2 + EPS) * ln_h_g + ln_h_b
        inp0 = xe
        for i in range(LAYER_N):
            xe = jax.nn.relu(jnp.dot(xe, xenc_w[i],
                                     preferred_element_type=f32) + xenc_b[i])
        xe = xe + inp0

        # concat with intention: constant half already resident in cat_ref.
        # TODO(synk): nn.Dropout(0.5) implemented as identity (eval-mode semantics).
        cat_ref[:, :H] = xe
        hc = cat_ref[...]                                        # (R, H+I)

        inp1 = hc
        for i in range(LAYER_N):
            hc = jax.nn.relu(jnp.dot(hc, fc1_w[i],
                                     preferred_element_type=f32) + fc1_b[i])
        hc = hc + inp1

        hc = jax.nn.relu(jnp.dot(hc, fc2_w, preferred_element_type=f32) + fc2_b)

        inp2 = hc
        for i in range(LAYER_N):
            hc = jax.nn.relu(jnp.dot(hc, fc3_w[i],
                                     preferred_element_type=f32) + fc3_b[i])
        hc = hc + inp2

        dx = jax.nn.relu(jnp.dot(hc, fc4_w, preferred_element_type=f32) + fc4_b)
        x = x + dx
        # VMEM-resident output slab; single HBM writeback at kernel end.
        out_ref[pl.ds(t_idx, 1)] = x[None]
        return x, h

    h = jnp.zeros((R, H), f32)                  # hidden_states = None -> zeros
    for blk in range(N_BLOCKS):                 # static: 2 rollout blocks
        x = last_pred_ref[blk]                  # reset autoregressive x per block

        def body(it, carry, _blk=blk):
            x, h = carry
            base = _blk * PRED_STEPS + it * UNROLL
            for u in range(UNROLL):             # moderate unroll -> LLO visibility
                x, h = step(x, h, base + u)
            return x, h

        x, h = jax.lax.fori_loop(0, PRED_STEPS // UNROLL, body, (x, h))


# ------------------------------ wrapper ---------------------------------------
def _fuse_gru_weights(p):
    """Fold the input LayerNorm gain/bias into the GRU input weights and pack
    [w_ih ; w_hh] into one block-structured (A+H, 4H) weight whose matmul
    yields [ (gi+gh)_{r,z} | gi_n | gh_n ] in a single MXU push."""
    H2 = 2 * H
    g_in = p['ln_in_g'][0]                       # (A,)
    w_ih = p['w_ih'] * g_in[:, None]             # LN gain folded into w_ih
    lnb = p['ln_in_b'] @ p['w_ih']               # (1, 3H): LN bias folded
    w_hh = p['w_hh']

    w = jnp.zeros((A + H, 4 * H), jnp.float32)
    w = w.at[:A, :H2].set(w_ih[:, :H2])          # gi_{r,z}
    w = w.at[A:, :H2].set(w_hh[:, :H2])          # gh_{r,z}  (summed by the matmul)
    w = w.at[:A, H2:3 * H].set(w_ih[:, H2:])     # gi_n
    w = w.at[A:, 3 * H:].set(w_hh[:, H2:])       # gh_n

    b_rz = p['b_ih'][:, :H2] + p['b_hh'][:, :H2] + lnb[:, :H2]
    b_in = p['b_ih'][:, H2:] + lnb[:, H2:]
    b_hn = p['b_hh'][:, H2:]
    b = jnp.concatenate([b_rz, b_in, b_hn], axis=-1)   # (1, 4H)
    return w, b


@jax.jit
def decoder_forward(intention, inputs, p):
    """intention: (B, NSTACK, I_SZ); inputs: (B, T, A) -> (B, T, NSTACK, A)."""
    x = jnp.transpose(inputs, (1, 0, 2)).astype(jnp.float32)      # (T, B, A)
    x = jnp.broadcast_to(x[:, :, None, :], (T, B, NSTACK, A))     # stack * 10
    x_flat = x.reshape(T, R, A)
    last_pred = x_flat[0::PRED_STEPS]                             # (N_BLOCKS, R, A)
    intention_flat = intention.reshape(R, I_SZ).astype(jnp.float32)

    w_gru, b_gru = _fuse_gru_weights(p)

    # Single invocation (no grid): all operands fit comfortably in VMEM, so the
    # whole rollout runs inside one kernel with one input DMA set and one
    # output DMA.
    out = pl.pallas_call(
        decoder_kernel,
        out_shape=jax.ShapeDtypeStruct((T, R, A), jnp.float32),
        scratch_shapes=[pltpu.VMEM((R, HI), jnp.float32)],        # [xe | intention]
    )(last_pred, intention_flat, w_gru, b_gru,
      p['ln_h_g'], p['ln_h_b'],
      p['xenc_w'], p['xenc_b'],
      p['fc1_w'], p['fc1_b'],
      p['fc2_w'], p['fc2_b'],
      p['fc3_w'], p['fc3_b'],
      p['fc4_w'], p['fc4_b'])

    preds = out.reshape(T, B, NSTACK, A)
    return jnp.transpose(preds, (1, 0, 2, 3))                     # (B, T, 10, A)


# ------------------------- deterministic parameters ---------------------------
def make_params(key):
    keys = jax.random.split(key, 8)

    def xav(k, shape):
        std = np.sqrt(2.0 / (shape[-2] + shape[-1]))
        return (std * jax.random.normal(k, shape)).astype(jnp.float32)

    p = {}
    p['w_ih'] = xav(keys[0], (A, 3 * H))            # GRU weight_ih (pre-transposed)
    p['w_hh'] = xav(keys[1], (H, 3 * H))            # GRU weight_hh (pre-transposed)
    p['b_ih'] = jnp.zeros((1, 3 * H), jnp.float32)  # GRU biases init to 0
    p['b_hh'] = jnp.zeros((1, 3 * H), jnp.float32)
    p['ln_in_g'] = jnp.ones((1, A), jnp.float32)
    p['ln_in_b'] = jnp.zeros((1, A), jnp.float32)
    p['ln_h_g'] = jnp.ones((1, H), jnp.float32)
    p['ln_h_b'] = jnp.zeros((1, H), jnp.float32)
    p['xenc_w'] = xav(keys[2], (LAYER_N, H, H))
    p['xenc_b'] = jnp.full((LAYER_N, 1, H), 0.1, jnp.float32)   # bias const 0.1
    p['fc1_w'] = xav(keys[3], (LAYER_N, HI, HI))
    p['fc1_b'] = jnp.full((LAYER_N, 1, HI), 0.1, jnp.float32)
    p['fc2_w'] = xav(keys[4], (HI, H))
    p['fc2_b'] = jnp.full((1, H), 0.1, jnp.float32)
    p['fc3_w'] = xav(keys[5], (LAYER_N, H, H))
    p['fc3_b'] = jnp.full((LAYER_N, 1, H), 0.1, jnp.float32)
    p['fc4_w'] = xav(keys[6], (H, A))
    p['fc4_b'] = jnp.full((1, A), 0.1, jnp.float32)
    return p


# ------------------------------ pure-JAX reference ----------------------------
def reference_forward(intention, inputs, p):
    hp = lambda a, b: jnp.dot(a, b, precision=jax.lax.Precision.HIGHEST)

    def ln(x, g, b):
        m = jnp.mean(x, -1, keepdims=True)
        v = jnp.mean((x - m) ** 2, -1, keepdims=True)
        return (x - m) / jnp.sqrt(v + EPS) * g + b

    x_all = jnp.transpose(inputs, (1, 0, 2)).astype(jnp.float32)
    x_all = jnp.broadcast_to(x_all[:, :, None, :], (T, B, NSTACK, A)).reshape(T, R, A)
    intent = intention.reshape(R, I_SZ).astype(jnp.float32)
    h_state = jnp.zeros((R, H), jnp.float32)
    preds = np.zeros((T, R, A), np.float32)
    for bi in range(N_BLOCKS):
        x = x_all[bi * PRED_STEPS]
        for s in range(PRED_STEPS):
            xt = ln(x, p['ln_in_g'], p['ln_in_b'])
            gi = hp(xt, p['w_ih']) + p['b_ih']
            gh = hp(h_state, p['w_hh']) + p['b_hh']
            r = jax.nn.sigmoid(gi[:, :H] + gh[:, :H])
            z = jax.nn.sigmoid(gi[:, H:2 * H] + gh[:, H:2 * H])
            n = jnp.tanh(gi[:, 2 * H:] + r * gh[:, 2 * H:])
            h_state = (1.0 - z) * n + z * h_state
            xe = ln(h_state, p['ln_h_g'], p['ln_h_b'])
            inp0 = xe
            for i in range(LAYER_N):
                xe = jax.nn.relu(hp(xe, p['xenc_w'][i]) + p['xenc_b'][i])
            xe = xe + inp0
            hh = jnp.concatenate([xe, intent], -1)
            inp1 = hh
            for i in range(LAYER_N):
                hh = jax.nn.relu(hp(hh, p['fc1_w'][i]) + p['fc1_b'][i])
            hh = hh + inp1
            hh = jax.nn.relu(hp(hh, p['fc2_w']) + p['fc2_b'])
            inp2 = hh
            for i in range(LAYER_N):
                hh = jax.nn.relu(hp(hh, p['fc3_w'][i]) + p['fc3_b'][i])
            hh = hh + inp2
            dx = jax.nn.relu(hp(hh, p['fc4_w']) + p['fc4_b'])
            x = x + dx
            preds[s + bi * PRED_STEPS] = np.asarray(x)
    preds = jnp.asarray(preds).reshape(T, B, NSTACK, A)
    return jnp.transpose(preds, (1, 0, 2, 3))


# ---------------------------------- main ---------------------------------------
if __name__ == "__main__":
    key = jax.random.PRNGKey(0)
    k_in, k_int, k_p = jax.random.split(key, 3)
    inputs = jax.random.normal(k_in, (B, T, A), jnp.float32)
    intention = jax.random.normal(k_int, (B, NSTACK, I_SZ), jnp.float32)
    params = make_params(k_p)

    out = decoder_forward(intention, inputs, params)
    out = jax.block_until_ready(out)

    ref = reference_forward(intention, inputs, params)
    np.testing.assert_allclose(np.asarray(out), np.asarray(ref),
                               rtol=1e-2, atol=1e-2)
    print("KERNEL_OK")
</pallas_src>

<mosaic_0001>
module attributes {stable_mosaic.version = 11 : i64} {
  func.func @decoder_kernel(%arg0: memref<2x20x8xf32, #tpu.memory_space<vmem>>, %arg1: memref<20x16xf32, #tpu.memory_space<vmem>>, %arg2: memref<40x128xf32, #tpu.memory_space<vmem>>, %arg3: memref<1x128xf32, #tpu.memory_space<vmem>>, %arg4: memref<1x32xf32, #tpu.memory_space<vmem>>, %arg5: memref<1x32xf32, #tpu.memory_space<vmem>>, %arg6: memref<2x32x32xf32, #tpu.memory_space<vmem>>, %arg7: memref<2x1x32xf32, #tpu.memory_space<vmem>>, %arg8: memref<2x48x48xf32, #tpu.memory_space<vmem>>, %arg9: memref<2x1x48xf32, #tpu.memory_space<vmem>>, %arg10: memref<48x32xf32, #tpu.memory_space<vmem>>, %arg11: memref<1x32xf32, #tpu.memory_space<vmem>>, %arg12: memref<2x32x32xf32, #tpu.memory_space<vmem>>, %arg13: memref<2x1x32xf32, #tpu.memory_space<vmem>>, %arg14: memref<32x8xf32, #tpu.memory_space<vmem>>, %arg15: memref<1x8xf32, #tpu.memory_space<vmem>>, %arg16: memref<40x20x8xf32, #tpu.memory_space<vmem>>, %arg17: memref<20x48xf32, #tpu.memory_space<vmem>>) attributes {dimension_semantics = [], scalar_prefetch = 0 : i64, scratch_operands = 1 : i64, tpu.core_type = #tpu.core_type<tc>} {
    %c0 = arith.constant 0 : index
    %c0_0 = arith.constant 0 : index
    %0 = vector.load %arg2[%c0, %c0_0] : memref<40x128xf32, #tpu.memory_space<vmem>>, vector<40x128xf32>
    %c0_1 = arith.constant 0 : index
    %c0_2 = arith.constant 0 : index
    %1 = vector.load %arg3[%c0_1, %c0_2] : memref<1x128xf32, #tpu.memory_space<vmem>>, vector<1x128xf32>
    %2 = vector.shape_cast %1 : vector<1x128xf32> to vector<1x128xf32>
    %3 = vector.broadcast %2 : vector<1x128xf32> to vector<20x128xf32>
    %c0_3 = arith.constant 0 : index
    %c0_4 = arith.constant 0 : index
    %4 = vector.load %arg4[%c0_3, %c0_4] : memref<1x32xf32, #tpu.memory_space<vmem>>, vector<1x32xf32>
    %5 = vector.shape_cast %4 : vector<1x32xf32> to vector<1x32xf32>
    %6 = vector.broadcast %5 : vector<1x32xf32> to vector<20x32xf32>
    %c0_5 = arith.constant 0 : index
    %c0_6 = arith.constant 0 : index
    %7 = vector.load %arg5[%c0_5, %c0_6] : memref<1x32xf32, #tpu.memory_space<vmem>>, vector<1x32xf32>
    %8 = vector.shape_cast %7 : vector<1x32xf32> to vector<1x32xf32>
    %9 = vector.broadcast %8 : vector<1x32xf32> to vector<20x32xf32>
    %c0_7 = arith.constant 0 : index
    %c0_8 = arith.constant 0 : index
    %c0_9 = arith.constant 0 : index
    %10 = vector.load %arg6[%c0_7, %c0_8, %c0_9] : memref<2x32x32xf32, #tpu.memory_space<vmem>>, vector<1x32x32xf32>
    %11 = vector.shape_cast %10 : vector<1x32x32xf32> to vector<32x32xf32>
    %c1 = arith.constant 1 : index
    %c0_10 = arith.constant 0 : index
    %c0_11 = arith.constant 0 : index
    %12 = vector.load %arg6[%c1, %c0_10, %c0_11] : memref<2x32x32xf32, #tpu.memory_space<vmem>>, vector<1x32x32xf32>
    %13 = vector.shape_cast %12 : vector<1x32x32xf32> to vector<32x32xf32>
    %c0_12 = arith.constant 0 : index
    %c0_13 = arith.constant 0 : index
    %c0_14 = arith.constant 0 : index
    %14 = vector.load %arg7[%c0_12, %c0_13, %c0_14] : memref<2x1x32xf32, #tpu.memory_space<vmem>>, vector<1x1x32xf32>
    %15 = vector.shape_cast %14 : vector<1x1x32xf32> to vector<1x32xf32>
    %16 = vector.shape_cast %15 : vector<1x32xf32> to vector<1x32xf32>
    %17 = vector.broadcast %16 : vector<1x32xf32> to vector<20x32xf32>
    %c1_15 = arith.constant 1 : index
    %c0_16 = arith.constant 0 : index
    %c0_17 = arith.constant 0 : index
    %18 = vector.load %arg7[%c1_15, %c0_16, %c0_17] : memref<2x1x32xf32, #tpu.memory_space<vmem>>, vector<1x1x32xf32>
    %19 = vector.shape_cast %18 : vector<1x1x32xf32> to vector<1x32xf32>
    %20 = vector.shape_cast %19 : vector<1x32xf32> to vector<1x32xf32>
    %21 = vector.broadcast %20 : vector<1x32xf32> to vector<20x32xf32>
    %c0_18 = arith.constant 0 : index
    %c0_19 = arith.constant 0 : index
    %c0_20 = arith.constant 0 : index
    %22 = vector.load %arg8[%c0_18, %c0_19, %c0_20] : memref<2x48x48xf32, #tpu.memory_space<vmem>>, vector<1x48x48xf32>
    %23 = vector.shape_cast %22 : vector<1x48x48xf32> to vector<48x48xf32>
    %c1_21 = arith.constant 1 : index
    %c0_22 = arith.constant 0 : index
    %c0_23 = arith.constant 0 : index
    %24 = vector.load %arg8[%c1_21, %c0_22, %c0_23] : memref<2x48x48xf32, #tpu.memory_space<vmem>>, vector<1x48x48xf32>
    %25 = vector.shape_cast %24 : vector<1x48x48xf32> to vector<48x48xf32>
    %c0_24 = arith.constant 0 : index
    %c0_25 = arith.constant 0 : index
    %c0_26 = arith.constant 0 : index
    %26 = vector.load %arg9[%c0_24, %c0_25, %c0_26] : memref<2x1x48xf32, #tpu.memory_space<vmem>>, vector<1x1x48xf32>
    %27 = vector.shape_cast %26 : vector<1x1x48xf32> to vector<1x48xf32>
    %28 = vector.shape_cast %27 : vector<1x48xf32> to vector<1x48xf32>
    %29 = vector.broadcast %28 : vector<1x48xf32> to vector<20x48xf32>
    %c1_27 = arith.constant 1 : index
    %c0_28 = arith.constant 0 : index
    %c0_29 = arith.constant 0 : index
    %30 = vector.load %arg9[%c1_27, %c0_28, %c0_29] : memref<2x1x48xf32, #tpu.memory_space<vmem>>, vector<1x1x48xf32>
    %31 = vector.shape_cast %30 : vector<1x1x48xf32> to vector<1x48xf32>
    %32 = vector.shape_cast %31 : vector<1x48xf32> to vector<1x48xf32>
    %33 = vector.broadcast %32 : vector<1x48xf32> to vector<20x48xf32>
    %c0_30 = arith.constant 0 : index
    %c0_31 = arith.constant 0 : index
    %34 = vector.load %arg10[%c0_30, %c0_31] : memref<48x32xf32, #tpu.memory_space<vmem>>, vector<48x32xf32>
    %c0_32 = arith.constant 0 : index
    %c0_33 = arith.constant 0 : index
    %35 = vector.load %arg11[%c0_32, %c0_33] : memref<1x32xf32, #tpu.memory_space<vmem>>, vector<1x32xf32>
    %36 = vector.shape_cast %35 : vector<1x32xf32> to vector<1x32xf32>
    %37 = vector.broadcast %36 : vector<1x32xf32> to vector<20x32xf32>
    %c0_34 = arith.constant 0 : index
    %c0_35 = arith.constant 0 : index
    %c0_36 = arith.constant 0 : index
    %38 = vector.load %arg12[%c0_34, %c0_35, %c0_36] : memref<2x32x32xf32, #tpu.memory_space<vmem>>, vector<1x32x32xf32>
    %39 = vector.shape_cast %38 : vector<1x32x32xf32> to vector<32x32xf32>
    %c1_37 = arith.constant 1 : index
    %c0_38 = arith.constant 0 : index
    %c0_39 = arith.constant 0 : index
    %40 = vector.load %arg12[%c1_37, %c0_38, %c0_39] : memref<2x32x32xf32, #tpu.memory_space<vmem>>, vector<1x32x32xf32>
    %41 = vector.shape_cast %40 : vector<1x32x32xf32> to vector<32x32xf32>
    %c0_40 = arith.constant 0 : index
    %c0_41 = arith.constant 0 : index
    %c0_42 = arith.constant 0 : index
    %42 = vector.load %arg13[%c0_40, %c0_41, %c0_42] : memref<2x1x32xf32, #tpu.memory_space<vmem>>, vector<1x1x32xf32>
    %43 = vector.shape_cast %42 : vector<1x1x32xf32> to vector<1x32xf32>
    %44 = vector.shape_cast %43 : vector<1x32xf32> to vector<1x32xf32>
    %45 = vector.broadcast %44 : vector<1x32xf32> to vector<20x32xf32>
    %c1_43 = arith.constant 1 : index
    %c0_44 = arith.constant 0 : index
    %c0_45 = arith.constant 0 : index
    %46 = vector.load %arg13[%c1_43, %c0_44, %c0_45] : memref<2x1x32xf32, #tpu.memory_space<vmem>>, vector<1x1x32xf32>
    %47 = vector.shape_cast %46 : vector<1x1x32xf32> to vector<1x32xf32>
    %48 = vector.shape_cast %47 : vector<1x32xf32> to vector<1x32xf32>
    %49 = vector.broadcast %48 : vector<1x32xf32> to vector<20x32xf32>
    %c0_46 = arith.constant 0 : index
    %c0_47 = arith.constant 0 : index
    %50 = vector.load %arg14[%c0_46, %c0_47] : memref<32x8xf32, #tpu.memory_space<vmem>>, vector<32x8xf32>
    %c0_48 = arith.constant 0 : index
    %c0_49 = arith.constant 0 : index
    %51 = vector.load %arg15[%c0_48, %c0_49] : memref<1x8xf32, #tpu.memory_space<vmem>>, vector<1x8xf32>
    %52 = vector.shape_cast %51 : vector<1x8xf32> to vector<1x8xf32>
    %53 = vector.broadcast %52 : vector<1x8xf32> to vector<20x8xf32>
    %cst = arith.constant 0.000000e+00 : f32
    %54 = vector.broadcast %cst : f32 to vector<20x32xf32>
    %c0_50 = arith.constant 0 : index
    %c0_51 = arith.constant 0 : index
    %55 = vector.load %arg1[%c0_50, %c0_51] : memref<20x16xf32, #tpu.memory_space<vmem>>, vector<20x16xf32>
    %56 = tpu.concatenate %54, %55 in 1 : vector<20x32xf32>, vector<20x16xf32> -> vector<20x48xf32>
    %c0_52 = arith.constant 0 : index
    %c0_53 = arith.constant 0 : index
    %57 = vector.load %arg17[%c0_52, %c0_53] : memref<20x48xf32, #tpu.memory_space<vmem>>, vector<20x48xf32>
    tpu.vector_store %arg17[%c0_52, %c0_53], %56 {strides = array<i32>} : memref<20x48xf32, #tpu.memory_space<vmem>>, vector<20x48xf32>,
    %cst_54 = arith.constant 0.000000e+00 : f32
    %58 = vector.broadcast %cst_54 : f32 to vector<20x32xf32>
    %c0_55 = arith.constant 0 : index
    %c0_56 = arith.constant 0 : index
    %c0_57 = arith.constant 0 : index
    %59 = vector.load %arg0[%c0_55, %c0_56, %c0_57] : memref<2x20x8xf32, #tpu.memory_space<vmem>>, vector<1x20x8xf32>
    %60 = vector.shape_cast %59 : vector<1x20x8xf32> to vector<20x8xf32>
    %c0_i32 = arith.constant 0 : i32
    %c5_i32 = arith.constant 5 : i32
    %61 = arith.addi %c0_i32, %c5_i32 : i32
    %c1_i32 = arith.constant 1 : i32
    %62:2 = scf.for %arg18 = %c0_i32 to %61 step %c1_i32 iter_args(%arg19 = %60, %arg20 = %58) -> (vector<20x8xf32>, vector<20x32xf32>)  : i32 {
      %c4_i32 = arith.constant 4 : i32
      %67 = arith.muli %arg18, %c4_i32 : i32
      %c0_i32_66 = arith.constant 0 : i32
      %68 = arith.addi %c0_i32_66, %67 : i32
      %c0_i32_67 = arith.constant 0 : i32
      %69 = arith.addi %68, %c0_i32_67 : i32
      %cst_68 = arith.constant dense<0.000000e+00> : vector<20xf32>
      %70 = vector.multi_reduction <add>, %arg19, %cst_68 [1] : vector<20x8xf32> to vector<20xf32>
      %71 = vector.shape_cast %70 : vector<20xf32> to vector<20x1xf32>
      %cst_69 = arith.constant 8.000000e+00 : f32
      %72 = vector.broadcast %cst_69 : f32 to vector<20x1xf32>
      %73 = arith.divf %71, %72 : vector<20x1xf32>
      %74 = vector.broadcast %73 : vector<20x1xf32> to vector<20x8xf32>
      %75 = arith.subf %arg19, %74 : vector<20x8xf32>
      %76 = arith.mulf %75, %75 : vector<20x8xf32>
      %cst_70 = arith.constant dense<0.000000e+00> : vector<20xf32>
      %77 = vector.multi_reduction <add>, %76, %cst_70 [1] : vector<20x8xf32> to vector<20xf32>
      %78 = vector.shape_cast %77 : vector<20xf32> to vector<20x1xf32>
      %cst_71 = arith.constant 8.000000e+00 : f32
      %79 = vector.broadcast %cst_71 : f32 to vector<20x1xf32>
      %80 = arith.divf %78, %79 : vector<20x1xf32>
      %81 = vector.broadcast %73 : vector<20x1xf32> to vector<20x8xf32>
      %82 = arith.subf %arg19, %81 : vector<20x8xf32>
      %cst_72 = arith.constant 9.99999974E-6 : f32
      %83 = vector.broadcast %cst_72 : f32 to vector<20x1xf32>
      %84 = arith.addf %80, %83 : vector<20x1xf32>
      %85 = math.rsqrt %84 : vector<20x1xf32>
      %86 = vector.broadcast %85 : vector<20x1xf32> to vector<20x8xf32>
      %87 = arith.mulf %82, %86 : vector<20x8xf32>
      %88 = tpu.concatenate %87, %arg20 in 1 : vector<20x8xf32>, vector<20x32xf32> -> vector<20x40xf32>
      %cst_73 = arith.constant dense<0.000000e+00> : vector<20x128xf32>
      %89 = tpu.matmul %88, %0, %cst_73 {dimension_numbers = #tpu.dot_dimension_numbers<[1], [0], [0], [1], [0, 0, 1, 1], [], []>} : vector<20x40xf32>, vector<40x128xf32>, vector<20x128xf32> -> vector<20x128xf32>
      %90 = arith.addf %89, %3 : vector<20x128xf32>
      %91 = vector.extract_strided_slice %90 {offsets = [0, 0], sizes = [20, 64], strides = [1, 1]} : vector<20x128xf32> to vector<20x64xf32>
      %92 = arith.negf %91 : vector<20x64xf32>
      %93 = math.exp %92 : vector<20x64xf32>
      %cst_74 = arith.constant 1.000000e+00 : f32
      %94 = vector.broadcast %cst_74 : f32 to vector<20x64xf32>
      %95 = arith.addf %94, %93 : vector<20x64xf32>
      %96 = arith.divf %94, %95 : vector<20x64xf32>
      %97 = vector.extract_strided_slice %96 {offsets = [0, 0], sizes = [20, 32], strides = [1, 1]} : vector<20x64xf32> to vector<20x32xf32>
      %98 = vector.extract_strided_slice %96 {offsets = [0, 32], sizes = [20, 32], strides = [1, 1]} : vector<20x64xf32> to vector<20x32xf32>
      %99 = vector.extract_strided_slice %90 {offsets = [0, 64], sizes = [20, 32], strides = [1, 1]} : vector<20x128xf32> to vector<20x32xf32>
      %100 = vector.extract_strided_slice %90 {offsets = [0, 96], sizes = [20, 32], strides = [1, 1]} : vector<20x128xf32> to vector<20x32xf32>
      %101 = arith.mulf %97, %100 : vector<20x32xf32>
      %102 = arith.addf %99, %101 : vector<20x32xf32>
      %103 = math.tanh %102 : vector<20x32xf32>
      %cst_75 = arith.constant 1.000000e+00 : f32
      %104 = vector.broadcast %cst_75 : f32 to vector<20x32xf32>
      %105 = arith.subf %104, %98 : vector<20x32xf32>
      %106 = arith.mulf %105, %103 : vector<20x32xf32>
      %107 = arith.mulf %98, %arg20 : vector<20x32xf32>
      %108 = arith.addf %106, %107 : vector<20x32xf32>
      %cst_76 = arith.constant dense<0.000000e+00> : vector<20xf32>
      %109 = vector.multi_reduction <add>, %108, %cst_76 [1] : vector<20x32xf32> to vector<20xf32>
      %110 = vector.shape_cast %109 : vector<20xf32> to vector<20x1xf32>
      %cst_77 = arith.constant 3.200000e+01 : f32
      %111 = vector.broadcast %cst_77 : f32 to vector<20x1xf32>
      %112 = arith.divf %110, %111 : vector<20x1xf32>
      %113 = vector.broadcast %112 : vector<20x1xf32> to vector<20x32xf32>
      %114 = arith.subf %108, %113 : vector<20x32xf32>
      %115 = arith.mulf %114, %114 : vector<20x32xf32>
      %cst_78 = arith.constant dense<0.000000e+00> : vector<20xf32>
      %116 = vector.multi_reduction <add>, %115, %cst_78 [1] : vector<20x32xf32> to vector<20xf32>
      %117 = vector.shape_cast %116 : vector<20xf32> to vector<20x1xf32>
      %cst_79 = arith.constant 3.200000e+01 : f32
      %118 = vector.broadcast %cst_79 : f32 to vector<20x1xf32>
      %119 = arith.divf %117, %118 : vector<20x1xf32>
      %120 = vector.broadcast %112 : vector<20x1xf32> to vector<20x32xf32>
      %121 = arith.subf %108, %120 : vector<20x32xf32>
      %cst_80 = arith.constant 9.99999974E-6 : f32
      %122 = vector.broadcast %cst_80 : f32 to vector<20x1xf32>
      %123 = arith.addf %119, %122 : vector<20x1xf32>
      %124 = math.rsqrt %123 : vector<20x1xf32>
      %125 = vector.broadcast %124 : vector<20x1xf32> to vector<20x32xf32>
      %126 = arith.mulf %121, %125 : vector<20x32xf32>
      %127 = arith.mulf %126, %6 : vector<20x32xf32>
      %128 = arith.addf %127, %9 : vector<20x32xf32>
      %cst_81 = arith.constant dense<0.000000e+00> : vector<20x32xf32>
      %129 = tpu.matmul %128, %11, %cst_81 {dimension_numbers = #tpu.dot_dimension_numbers<[1], [0], [0], [1], [0, 0, 1, 1], [], []>} : vector<20x32xf32>, vector<32x32xf32>, vector<20x32xf32> -> vector<20x32xf32>
      %130 = arith.addf %129, %17 : vector<20x32xf32>
      %cst_82 = arith.constant 0.000000e+00 : f32
      %131 = vector.broadcast %cst_82 : f32 to vector<20x32xf32>
      %132 = arith.maximumf %130, %131 : vector<20x32xf32>
      %cst_83 = arith.constant dense<0.000000e+00> : vector<20x32xf32>
      %133 = tpu.matmul %132, %13, %cst_83 {dimension_numbers = #tpu.dot_dimension_numbers<[1], [0], [0], [1], [0, 0, 1, 1], [], []>} : vector<20x32xf32>, vector<32x32xf32>, vector<20x32xf32> -> vector<20x32xf32>
      %134 = arith.addf %133, %21 : vector<20x32xf32>
      %cst_84 = arith.constant 0.000000e+00 : f32
      %135 = vector.broadcast %cst_84 : f32 to vector<20x32xf32>
      %136 = arith.maximumf %134, %135 : vector<20x32xf32>
      %137 = arith.addf %136, %128 : vector<20x32xf32>
      %c0_85 = arith.constant 0 : index
      %c0_86 = arith.constant 0 : index
      %138 = vector.load %arg17[%c0_85, %c0_86] : memref<20x48xf32, #tpu.memory_space<vmem>>, vector<20x32xf32>
      tpu.vector_store %arg17[%c0_85, %c0_86], %137 {strides = array<i32>} : memref<20x48xf32, #tpu.memory_space<vmem>>, vector<20x32xf32>,
      %c0_87 = arith.constant 0 : index
      %c0_88 = arith.constant 0 : index
      %139 = vector.load %arg17[%c0_87, %c0_88] : memref<20x48xf32, #tpu.memory_space<vmem>>, vector<20x48xf32>
      %cst_89 = arith.constant dense<0.000000e+00> : vector<20x48xf32>
      %140 = tpu.matmul %139, %23, %cst_89 {dimension_numbers = #tpu.dot_dimension_numbers<[1], [0], [0], [1], [0, 0, 1, 1], [], []>} : vector<20x48xf32>, vector<48x48xf32>, vector<20x48xf32> -> vector<20x48xf32>
      %141 = arith.addf %140, %29 : vector<20x48xf32>
      %cst_90 = arith.constant 0.000000e+00 : f32
      %142 = vector.broadcast %cst_90 : f32 to vector<20x48xf32>
      %143 = arith.maximumf %141, %142 : vector<20x48xf32>
      %cst_91 = arith.constant dense<0.000000e+00> : vector<20x48xf32>
      %144 = tpu.matmul %143, %25, %cst_91 {dimension_numbers = #tpu.dot_dimension_numbers<[1], [0], [0], [1], [0, 0, 1, 1], [], []>} : vector<20x48xf32>, vector<48x48xf32>, vector<20x48xf32> -> vector<20x48xf32>
      %145 = arith.addf %144, %33 : vector<20x48xf32>
      %cst_92 = arith.constant 0.000000e+00 : f32
      %146 = vector.broadcast %cst_92 : f32 to vector<20x48xf32>
      %147 = arith.maximumf %145, %146 : vector<20x48xf32>
      %148 = arith.addf %147, %139 : vector<20x48xf32>
      %cst_93 = arith.constant dense<0.000000e+00> : vector<20x32xf32>
      %149 = tpu.matmul %148, %34, %cst_93 {dimension_numbers = #tpu.dot_dimension_numbers<[1], [0], [0], [1], [0, 0, 1, 1], [], []>} : vector<20x48xf32>, vector<48x32xf32>, vector<20x32xf32> -> vector<20x32xf32>
      %150 = arith.addf %149, %37 : vector<20x32xf32>
      %cst_94 = arith.constant 0.000000e+00 : f32
      %151 = vector.broadcast %cst_94 : f32 to vector<20x32xf32>
      %152 = arith.maximumf %150, %151 : vector<20x32xf32>
      %cst_95 = arith.constant dense<0.000000e+00> : vector<20x32xf32>
      %153 = tpu.matmul %152, %39, %cst_95 {dimension_numbers = #tpu.dot_dimension_numbers<[1], [0], [0], [1], [0, 0, 1, 1], [], []>} : vector<20x32xf32>, vector<32x32xf32>, vector<20x32xf32> -> vector<20x32xf32>
      %154 = arith.addf %153, %45 : vector<20x32xf32>
      %cst_96 = arith.constant 0.000000e+00 : f32
      %155 = vector.broadcast %cst_96 : f32 to vector<20x32xf32>
      %156 = arith.maximumf %154, %155 : vector<20x32xf32>
      %cst_97 = arith.constant dense<0.000000e+00> : vector<20x32xf32>
      %157 = tpu.matmul %156, %41, %cst_97 {dimension_numbers = #tpu.dot_dimension_numbers<[1], [0], [0], [1], [0, 0, 1, 1], [], []>} : vector<20x32xf32>, vector<32x32xf32>, vector<20x32xf32> -> vector<20x32xf32>
      %158 = arith.addf %157, %49 : vector<20x32xf32>
      %cst_98 = arith.constant 0.000000e+00 : f32
      %159 = vector.broadcast %cst_98 : f32 to vector<20x32xf32>
      %160 = arith.maximumf %158, %159 : vector<20x32xf32>
      %161 = arith.addf %160, %152 : vector<20x32xf32>
      %cst_99 = arith.constant dense<0.000000e+00> : vector<20x8xf32>
      %162 = tpu.matmul %161, %50, %cst_99 {dimension_numbers = #tpu.dot_dimension_numbers<[1], [0], [0], [1], [0, 0, 1, 1], [], []>} : vector<20x32xf32>, vector<32x8xf32>, vector<20x8xf32> -> vector<20x8xf32>
      %163 = arith.addf %162, %53 : vector<20x8xf32>
      %cst_100 = arith.constant 0.000000e+00 : f32
      %164 = vector.broadcast %cst_100 : f32 to vector<20x8xf32>
      %165 = arith.maximumf %163, %164 : vector<20x8xf32>
      %166 = arith.addf %arg19, %165 : vector<20x8xf32>
      %167 = vector.shape_cast %166 : vector<20x8xf32> to vector<1x20x8xf32>
      %168 = arith.index_cast %69 : i32 to index
      %c0_101 = arith.constant 0 : index
      %c0_102 = arith.constant 0 : index
      %169 = vector.load %arg16[%168, %c0_101, %c0_102] : memref<40x20x8xf32, #tpu.memory_space<vmem>>, vector<1x20x8xf32>
      tpu.vector_store %arg16[%168, %c0_101, %c0_102], %167 {strides = array<i32>} : memref<40x20x8xf32, #tpu.memory_space<vmem>>, vector<1x20x8xf32>,
      %c1_i32_103 = arith.constant 1 : i32
      %170 = arith.addi %68, %c1_i32_103 : i32
      %cst_104 = arith.constant dense<0.000000e+00> : vector<20xf32>
      %171 = vector.multi_reduction <add>, %166, %cst_104 [1] : vector<20x8xf32> to vector<20xf32>
      %172 = vector.shape_cast %171 : vector<20xf32> to vector<20x1xf32>
      %cst_105 = arith.constant 8.000000e+00 : f32
      %173 = vector.broadcast %cst_105 : f32 to vector<20x1xf32>
      %174 = arith.divf %172, %173 : vector<20x1xf32>
      %175 = vector.broadcast %174 : vector<20x1xf32> to vector<20x8xf32>
      %176 = arith.subf %166, %175 : vector<20x8xf32>
      %177 = arith.mulf %176, %176 : vector<20x8xf32>
      %cst_106 = arith.constant dense<0.000000e+00> : vector<20xf32>
      %178 = vector.multi_reduction <add>, %177, %cst_106 [1] : vector<20x8xf32> to vector<20xf32>
      %179 = vector.shape_cast %178 : vector<20xf32> to vector<20x1xf32>
      %cst_107 = arith.constant 8.000000e+00 : f32
      %180 = vector.broadcast %cst_107 : f32 to vector<20x1xf32>
      %181 = arith.divf %179, %180 : vector<20x1xf32>
      %182 = vector.broadcast %174 : vector<20x1xf32> to vector<20x8xf32>
      %183 = arith.subf %166, %182 : vector<20x8xf32>
      %cst_108 = arith.constant 9.99999974E-6 : f32
      %184 = vector.broadcast %cst_108 : f32 to vector<20x1xf32>
      %185 = arith.addf %181, %184 : vector<20x1xf32>
      %186 = math.rsqrt %185 : vector<20x1xf32>
      %187 = vector.broadcast %186 : vector<20x1xf32> to vector<20x8xf32>
      %188 = arith.mulf %183, %187 : vector<20x8xf32>
      %189 = tpu.concatenate %188, %108 in 1 : vector<20x8xf32>, vector<20x32xf32> -> vector<20x40xf32>
      %cst_109 = arith.constant dense<0.000000e+00> : vector<20x128xf32>
      %190 = tpu.matmul %189, %0, %cst_109 {dimension_numbers = #tpu.dot_dimension_numbers<[1], [0], [0], [1], [0, 0, 1, 1], [], []>} : vector<20x40xf32>, vector<40x128xf32>, vector<20x128xf32> -> vector<20x128xf32>
      %191 = arith.addf %190, %3 : vector<20x128xf32>
      %192 = vector.extract_strided_slice %191 {offsets = [0, 0], sizes = [20, 64], strides = [1, 1]} : vector<20x128xf32> to vector<20x64xf32>
      %193 = arith.negf %192 : vector<20x64xf32>
      %194 = math.exp %193 : vector<20x64xf32>
      %cst_110 = arith.constant 1.000000e+00 : f32
      %195 = vector.broadcast %cst_110 : f32 to vector<20x64xf32>
      %196 = arith.addf %195, %194 : vector<20x64xf32>
      %197 = arith.divf %195, %196 : vector<20x64xf32>
      %198 = vector.extract_strided_slice %197 {offsets = [0, 0], sizes = [20, 32], strides = [1, 1]} : vector<20x64xf32> to vector<20x32xf32>
      %199 = vector.extract_strided_slice %197 {offsets = [0, 32], sizes = [20, 32], strides = [1, 1]} : vector<20x64xf32> to vector<20x32xf32>
      %200 = vector.extract_strided_slice %191 {offsets = [0, 64], sizes = [20, 32], strides = [1, 1]} : vector<20x128xf32> to vector<20x32xf32>
      %201 = vector.extract_strided_slice %191 {offsets = [0, 96], sizes = [20, 32], strides = [1, 1]} : vector<20x128xf32> to vector<20x32xf32>
      %202 = arith.mulf %198, %201 : vector<20x32xf32>
      %203 = arith.addf %200, %202 : vector<20x32xf32>
      %204 = math.tanh %203 : vector<20x32xf32>
      %cst_111 = arith.constant 1.000000e+00 : f32
      %205 = vector.broadcast %cst_111 : f32 to vector<20x32xf32>
      %206 = arith.subf %205, %199 : vector<20x32xf32>
      %207 = arith.mulf %206, %204 : vector<20x32xf32>
      %208 = arith.mulf %199, %108 : vector<20x32xf32>
      %209 = arith.addf %207, %208 : vector<20x32xf32>
      %cst_112 = arith.constant dense<0.000000e+00> : vector<20xf32>
      %210 = vector.multi_reduction <add>, %209, %cst_112 [1] : vector<20x32xf32> to vector<20xf32>
      %211 = vector.shape_cast %210 : vector<20xf32> to vector<20x1xf32>
      %cst_113 = arith.constant 3.200000e+01 : f32
      %212 = vector.broadcast %cst_113 : f32 to vector<20x1xf32>
      %213 = arith.divf %211, %212 : vector<20x1xf32>
      %214 = vector.broadcast %213 : vector<20x1xf32> to vector<20x32xf32>
      %215 = arith.subf %209, %214 : vector<20x32xf32>
      %216 = arith.mulf %215, %215 : vector<20x32xf32>
      %cst_114 = arith.constant dense<0.000000e+00> : vector<20xf32>
      %217 = vector.multi_reduction <add>, %216, %cst_114 [1] : vector<20x32xf32> to vector<20xf32>
      %218 = vector.shape_cast %217 : vector<20xf32> to vector<20x1xf32>
      %cst_115 = arith.constant 3.200000e+01 : f32
      %219 = vector.broadcast %cst_115 : f32 to vector<20x1xf32>
      %220 = arith.divf %218, %219 : vector<20x1xf32>
      %221 = vector.broadcast %213 : vector<20x1xf32> to vector<20x32xf32>
      %222 = arith.subf %209, %221 : vector<20x32xf32>
      %cst_116 = arith.constant 9.99999974E-6 : f32
      %223 = vector.broadcast %cst_116 : f32 to vector<20x1xf32>
      %224 = arith.addf %220, %223 : vector<20x1xf32>
      %225 = math.rsqrt %224 : vector<20x1xf32>
      %226 = vector.broadcast %225 : vector<20x1xf32> to vector<20x32xf32>
      %227 = arith.mulf %222, %226 : vector<20x32xf32>
      %228 = arith.mulf %227, %6 : vector<20x32xf32>
      %229 = arith.addf %228, %9 : vector<20x32xf32>
      %cst_117 = arith.constant dense<0.000000e+00> : vector<20x32xf32>
      %230 = tpu.matmul %229, %11, %cst_117 {dimension_numbers = #tpu.dot_dimension_numbers<[1], [0], [0], [1], [0, 0, 1, 1], [], []>} : vector<20x32xf32>, vector<32x32xf32>, vector<20x32xf32> -> vector<20x32xf32>
      %231 = arith.addf %230, %17 : vector<20x32xf32>
      %cst_118 = arith.constant 0.000000e+00 : f32
      %232 = vector.broadcast %cst_118 : f32 to vector<20x32xf32>
      %233 = arith.maximumf %231, %232 : vector<20x32xf32>
      %cst_119 = arith.constant dense<0.000000e+00> : vector<20x32xf32>
      %234 = tpu.matmul %233, %13, %cst_119 {dimension_numbers = #tpu.dot_dimension_numbers<[1], [0], [0], [1], [0, 0, 1, 1], [], []>} : vector<20x32xf32>, vector<32x32xf32>, vector<20x32xf32> -> vector<20x32xf32>
      %235 = arith.addf %234, %21 : vector<20x32xf32>
      %cst_120 = arith.constant 0.000000e+00 : f32
      %236 = vector.broadcast %cst_120 : f32 to vector<20x32xf32>
      %237 = arith.maximumf %235, %236 : vector<20x32xf32>
      %238 = arith.addf %237, %229 : vector<20x32xf32>
      %c0_121 = arith.constant 0 : index
      %c0_122 = arith.constant 0 : index
      %239 = vector.load %arg17[%c0_121, %c0_122] : memref<20x48xf32, #tpu.memory_space<vmem>>, vector<20x32xf32>
      tpu.vector_store %arg17[%c0_121, %c0_122], %238 {strides = array<i32>} : memref<20x48xf32, #tpu.memory_space<vmem>>, vector<20x32xf32>,
      %c0_123 = arith.constant 0 : index
      %c0_124 = arith.constant 0 : index
      %240 = vector.load %arg17[%c0_123, %c0_124] : memref<20x48xf32, #tpu.memory_space<vmem>>, vector<20x48xf32>
      %cst_125 = arith.constant dense<0.000000e+00> : vector<20x48xf32>
      %241 = tpu.matmul %240, %23, %cst_125 {dimension_numbers = #tpu.dot_dimension_numbers<[1], [0], [0], [1], [0, 0, 1, 1], [], []>} : vector<20x48xf32>, vector<48x48xf32>, vector<20x48xf32> -> vector<20x48xf32>
      %242 = arith.addf %241, %29 : vector<20x48xf32>
      %cst_126 = arith.constant 0.000000e+00 : f32
      %243 = vector.broadcast %cst_126 : f32 to vector<20x48xf32>
      %244 = arith.maximumf %242, %243 : vector<20x48xf32>
      %cst_127 = arith.constant dense<0.000000e+00> : vector<20x48xf32>
      %245 = tpu.matmul %244, %25, %cst_127 {dimension_numbers = #tpu.dot_dimension_numbers<[1], [0], [0], [1], [0, 0, 1, 1], [], []>} : vector<20x48xf32>, vector<48x48xf32>, vector<20x48xf32> -> vector<20x48xf32>
      %246 = arith.addf %245, %33 : vector<20x48xf32>
      %cst_128 = arith.constant 0.000000e+00 : f32
      %247 = vector.broadcast %cst_128 : f32 to vector<20x48xf32>
      %248 = arith.maximumf %246, %247 : vector<20x48xf32>
      %249 = arith.addf %248, %240 : vector<20x48xf32>
      %cst_129 = arith.constant dense<0.000000e+00> : vector<20x32xf32>
      %250 = tpu.matmul %249, %34, %cst_129 {dimension_numbers = #tpu.dot_dimension_numbers<[1], [0], [0], [1], [0, 0, 1, 1], [], []>} : vector<20x48xf32>, vector<48x32xf32>, vector<20x32xf32> -> vector<20x32xf32>
      %251 = arith.addf %250, %37 : vector<20x32xf32>
      %cst_130 = arith.constant 0.000000e+00 : f32
      %252 = vector.broadcast %cst_130 : f32 to vector<20x32xf32>
      %253 = arith.maximumf %251, %252 : vector<20x32xf32>
      %cst_131 = arith.constant dense<0.000000e+00> : vector<20x32xf32>
      %254 = tpu.matmul %253, %39, %cst_131 {dimension_numbers = #tpu.dot_dimension_numbers<[1], [0], [0], [1], [0, 0, 1, 1], [], []>} : vector<20x32xf32>, vector<32x32xf32>, vector<20x32xf32> -> vector<20x32xf32>
      %255 = arith.addf %254, %45 : vector<20x32xf32>
      %cst_132 = arith.constant 0.000000e+00 : f32
      %256 = vector.broadcast %cst_132 : f32 to vector<20x32xf32>
      %257 = arith.maximumf %255, %256 : vector<20x32xf32>
      %cst_133 = arith.constant dense<0.000000e+00> : vector<20x32xf32>
      %258 = tpu.matmul %257, %41, %cst_133 {dimension_numbers = #tpu.dot_dimension_numbers<[1], [0], [0], [1], [0, 0, 1, 1], [], []>} : vector<20x32xf32>, vector<32x32xf32>, vector<20x32xf32> -> vector<20x32xf32>
      %259 = arith.addf %258, %49 : vector<20x32xf32>
      %cst_134 = arith.constant 0.000000e+00 : f32
      %260 = vector.broadcast %cst_134 : f32 to vector<20x32xf32>
      %261 = arith.maximumf %259, %260 : vector<20x32xf32>
      %262 = arith.addf %261, %253 : vector<20x32xf32>
      %cst_135 = arith.constant dense<0.000000e+00> : vector<20x8xf32>
      %263 = tpu.matmul %262, %50, %cst_135 {dimension_numbers = #tpu.dot_dimension_numbers<[1], [0], [0], [1], [0, 0, 1, 1], [], []>} : vector<20x32xf32>, vector<32x8xf32>, vector<20x8xf32> -> vector<20x8xf32>
      %264 = arith.addf %263, %53 : vector<20x8xf32>
      %cst_136 = arith.constant 0.000000e+00 : f32
      %265 = vector.broadcast %cst_136 : f32 to vector<20x8xf32>
      %266 = arith.maximumf %264, %265 : vector<20x8xf32>
      %267 = arith.addf %166, %266 : vector<20x8xf32>
      %268 = vector.shape_cast %267 : vector<20x8xf32> to vector<1x20x8xf32>
      %269 = arith.index_cast %170 : i32 to index
      %c0_137 = arith.constant 0 : index
      %c0_138 = arith.constant 0 : index
      %270 = vector.load %arg16[%269, %c0_137, %c0_138] : memref<40x20x8xf32, #tpu.memory_space<vmem>>, vector<1x20x8xf32>
      tpu.vector_store %arg16[%269, %c0_137, %c0_138], %268 {strides = array<i32>} : memref<40x20x8xf32, #tpu.memory_space<vmem>>, vector<1x20x8xf32>,
      %c2_i32 = arith.constant 2 : i32
      %271 = arith.addi %68, %c2_i32 : i32
      %cst_139 = arith.constant dense<0.000000e+00> : vector<20xf32>
      %272 = vector.multi_reduction <add>, %267, %cst_139 [1] : vector<20x8xf32> to vector<20xf32>
      %273 = vector.shape_cast %272 : vector<20xf32> to vector<20x1xf32>
      %cst_140 = arith.constant 8.000000e+00 : f32
      %274 = vector.broadcast %cst_140 : f32 to vector<20x1xf32>
      %275 = arith.divf %273, %274 : vector<20x1xf32>
      %276 = vector.broadcast %275 : vector<20x1xf32> to vector<20x8xf32>
      %277 = arith.subf %267, %276 : vector<20x8xf32>
      %278 = arith.mulf %277, %277 : vector<20x8xf32>
      %cst_141 = arith.constant dense<0.000000e+00> : vector<20xf32>
      %279 = vector.multi_reduction <add>, %278, %cst_141 [1] : vector<20x8xf32> to vector<20xf32>
      %280 = vector.shape_cast %279 : vector<20xf32> to vector<20x1xf32>
      %cst_142 = arith.constant 8.000000e+00 : f32
      %281 = vector.broadcast %cst_142 : f32 to vector<20x1xf32>
      %282 = arith.divf %280, %281 : vector<20x1xf32>
      %283 = vector.broadcast %275 : vector<20x1xf32> to vector<20x8xf32>
      %284 = arith.subf %267, %283 : vector<20x8xf32>
      %cst_143 = arith.constant 9.99999974E-6 : f32
      %285 = vector.broadcast %cst_143 : f32 to vector<20x1xf32>
      %286 = arith.addf %282, %285 : vector<20x1xf32>
      %287 = math.rsqrt %286 : vector<20x1xf32>
      %288 = vector.broadcast %287 : vector<20x1xf32> to vector<20x8xf32>
      %289 = arith.mulf %284, %288 : vector<20x8xf32>
      %290 = tpu.concatenate %289, %209 in 1 : vector<20x8xf32>, vector<20x32xf32> -> vector<20x40xf32>
      %cst_144 = arith.constant dense<0.000000e+00> : vector<20x128xf32>
      %291 = tpu.matmul %290, %0, %cst_144 {dimension_numbers = #tpu.dot_dimension_numbers<[1], [0], [0], [1], [0, 0, 1, 1], [], []>} : vector<20x40xf32>, vector<40x128xf32>, vector<20x128xf32> -> vector<20x128xf32>
      %292 = arith.addf %291, %3 : vector<20x128xf32>
      %293 = vector.extract_strided_slice %292 {offsets = [0, 0], sizes = [20, 64], strides = [1, 1]} : vector<20x128xf32> to vector<20x64xf32>
      %294 = arith.negf %293 : vector<20x64xf32>
      %295 = math.exp %294 : vector<20x64xf32>
      %cst_145 = arith.constant 1.000000e+00 : f32
      %296 = vector.broadcast %cst_145 : f32 to vector<20x64xf32>
      %297 = arith.addf %296, %295 : vector<20x64xf32>
      %298 = arith.divf %296, %297 : vector<20x64xf32>
      %299 = vector.extract_strided_slice %298 {offsets = [0, 0], sizes = [20, 32], strides = [1, 1]} : vector<20x64xf32> to vector<20x32xf32>
      %300 = vector.extract_strided_slice %298 {offsets = [0, 32], sizes = [20, 32], strides = [1, 1]} : vector<20x64xf32> to vector<20x32xf32>
      %301 = vector.extract_strided_slice %292 {offsets = [0, 64], sizes = [20, 32], strides = [1, 1]} : vector<20x128xf32> to vector<20x32xf32>
      %302 = vector.extract_strided_slice %292 {offsets = [0, 96], sizes = [20, 32], strides = [1, 1]} : vector<20x128xf32> to vector<20x32xf32>
      %303 = arith.mulf %299, %302 : vector<20x32xf32>
      %304 = arith.addf %301, %303 : vector<20x32xf32>
      %305 = math.tanh %304 : vector<20x32xf32>
      %cst_146 = arith.constant 1.000000e+00 : f32
      %306 = vector.broadcast %cst_146 : f32 to vector<20x32xf32>
      %307 = arith.subf %306, %300 : vector<20x32xf32>
      %308 = arith.mulf %307, %305 : vector<20x32xf32>
      %309 = arith.mulf %300, %209 : vector<20x32xf32>
      %310 = arith.addf %308, %309 : vector<20x32xf32>
      %cst_147 = arith.constant dense<0.000000e+00> : vector<20xf32>
      %311 = vector.multi_reduction <add>, %310, %cst_147 [1] : vector<20x32xf32> to vector<20xf32>
      %312 = vector.shape_cast %311 : vector<20xf32> to vector<20x1xf32>
      %cst_148 = arith.constant 3.200000e+01 : f32
      %313 = vector.broadcast %cst_148 : f32 to vector<20x1xf32>
      %314 = arith.divf %312, %313 : vector<20x1xf32>
      %315 = vector.broadcast %314 : vector<20x1xf32> to vector<20x32xf32>
      %316 = arith.subf %310, %315 : vector<20x32xf32>
      %317 = arith.mulf %316, %316 : vector<20x32xf32>
      %cst_149 = arith.constant dense<0.000000e+00> : vector<20xf32>
      %318 = vector.multi_reduction <add>, %317, %cst_149 [1] : vector<20x32xf32> to vector<20xf32>
      %319 = vector.shape_cast %318 : vector<20xf32> to vector<20x1xf32>
      %cst_150 = arith.constant 3.200000e+01 : f32
      %320 = vector.broadcast %cst_150 : f32 to vector<20x1xf32>
      %321 = arith.divf %319, %320 : vector<20x1xf32>
      %322 = vector.broadcast %314 : vector<20x1xf32> to vector<20x32xf32>
      %323 = arith.subf %310, %322 : vector<20x32xf32>
      %cst_151 = arith.constant 9.99999974E-6 : f32
      %324 = vector.broadcast %cst_151 : f32 to vector<20x1xf32>
      %325 = arith.addf %321, %324 : vector<20x1xf32>
      %326 = math.rsqrt %325 : vector<20x1xf32>
      %327 = vector.broadcast %326 : vector<20x1xf32> to vector<20x32xf32>
      %328 = arith.mulf %323, %327 : vector<20x32xf32>
      %329 = arith.mulf %328, %6 : vector<20x32xf32>
      %330 = arith.addf %329, %9 : vector<20x32xf32>
      %cst_152 = arith.constant dense<0.000000e+00> : vector<20x32xf32>
      %331 = tpu.matmul %330, %11, %cst_152 {dimension_numbers = #tpu.dot_dimension_numbers<[1], [0], [0], [1], [0, 0, 1, 1], [], []>} : vector<20x32xf32>, vector<32x32xf32>, vector<20x32xf32> -> vector<20x32xf32>
      %332 = arith.addf %331, %17 : vector<20x32xf32>
      %cst_153 = arith.constant 0.000000e+00 : f32
      %333 = vector.broadcast %cst_153 : f32 to vector<20x32xf32>
      %334 = arith.maximumf %332, %333 : vector<20x32xf32>
      %cst_154 = arith.constant dense<0.000000e+00> : vector<20x32xf32>
      %335 = tpu.matmul %334, %13, %cst_154 {dimension_numbers = #tpu.dot_dimension_numbers<[1], [0], [0], [1], [0, 0, 1, 1], [], []>} : vector<20x32xf32>, vector<32x32xf32>, vector<20x32xf32> -> vector<20x32xf32>
      %336 = arith.addf %335, %21 : vector<20x32xf32>
      %cst_155 = arith.constant 0.000000e+00 : f32
      %337 = vector.broadcast %cst_155 : f32 to vector<20x32xf32>
      %338 = arith.maximumf %336, %337 : vector<20x32xf32>
      %339 = arith.addf %338, %330 : vector<20x32xf32>
      %c0_156 = arith.constant 0 : index
      %c0_157 = arith.constant 0 : index
      %340 = vector.load %arg17[%c0_156, %c0_157] : memref<20x48xf32, #tpu.memory_space<vmem>>, vector<20x32xf32>
      tpu.vector_store %arg17[%c0_156, %c0_157], %339 {strides = array<i32>} : memref<20x48xf32, #tpu.memory_space<vmem>>, vector<20x32xf32>,
      %c0_158 = arith.constant 0 : index
      %c0_159 = arith.constant 0 : index
      %341 = vector.load %arg17[%c0_158, %c0_159] : memref<20x48xf32, #tpu.memory_space<vmem>>, vector<20x48xf32>
      %cst_160 = arith.constant dense<0.000000e+00> : vector<20x48xf32>
      %342 = tpu.matmul %341, %23, %cst_160 {dimension_numbers = #tpu.dot_dimension_numbers<[1], [0], [0], [1], [0, 0, 1, 1], [], []>} : vector<20x48xf32>, vector<48x48xf32>, vector<20x48xf32> -> vector<20x48xf32>
      %343 = arith.addf %342, %29 : vector<20x48xf32>
      %cst_161 = arith.constant 0.000000e+00 : f32
      %344 = vector.broadcast %cst_161 : f32 to vector<20x48xf32>
      %345 = arith.maximumf %343, %344 : vector<20x48xf32>
      %cst_162 = arith.constant dense<0.000000e+00> : vector<20x48xf32>
      %346 = tpu.matmul %345, %25, %cst_162 {dimension_numbers = #tpu.dot_dimension_numbers<[1], [0], [0], [1], [0, 0, 1, 1], [], []>} : vector<20x48xf32>, vector<48x48xf32>, vector<20x48xf32> -> vector<20x48xf32>
      %347 = arith.addf %346, %33 : vector<20x48xf32>
      %cst_163 = arith.constant 0.000000e+00 : f32
      %348 = vector.broadcast %cst_163 : f32 to vector<20x48xf32>
      %349 = arith.maximumf %347, %348 : vector<20x48xf32>
      %350 = arith.addf %349, %341 : vector<20x48xf32>
      %cst_164 = arith.constant dense<0.000000e+00> : vector<20x32xf32>
      %351 = tpu.matmul %350, %34, %cst_164 {dimension_numbers = #tpu.dot_dimension_numbers<[1], [0], [0], [1], [0, 0, 1, 1], [], []>} : vector<20x48xf32>, vector<48x32xf32>, vector<20x32xf32> -> vector<20x32xf32>
      %352 = arith.addf %351, %37 : vector<20x32xf32>
      %cst_165 = arith.constant 0.000000e+00 : f32
      %353 = vector.broadcast %cst_165 : f32 to vector<20x32xf32>
      %354 = arith.maximumf %352, %353 : vector<20x32xf32>
      %cst_166 = arith.constant dense<0.000000e+00> : vector<20x32xf32>
      %355 = tpu.matmul %354, %39, %cst_166 {dimension_numbers = #tpu.dot_dimension_numbers<[1], [0], [0], [1], [0, 0, 1, 1], [], []>} : vector<20x32xf32>, vector<32x32xf32>, vector<20x32xf32> -> vector<20x32xf32>
      %356 = arith.addf %355, %45 : vector<20x32xf32>
      %cst_167 = arith.constant 0.000000e+00 : f32
      %357 = vector.broadcast %cst_167 : f32 to vector<20x32xf32>
      %358 = arith.maximumf %356, %357 : vector<20x32xf32>
      %cst_168 = arith.constant dense<0.000000e+00> : vector<20x32xf32>
      %359 = tpu.matmul %358, %41, %cst_168 {dimension_numbers = #tpu.dot_dimension_numbers<[1], [0], [0], [1], [0, 0, 1, 1], [], []>} : vector<20x32xf32>, vector<32x32xf32>, vector<20x32xf32> -> vector<20x32xf32>
      %360 = arith.addf %359, %49 : vector<20x32xf32>
      %cst_169 = arith.constant 0.000000e+00 : f32
      %361 = vector.broadcast %cst_169 : f32 to vector<20x32xf32>
      %362 = arith.maximumf %360, %361 : vector<20x32xf32>
      %363 = arith.addf %362, %354 : vector<20x32xf32>
      %cst_170 = arith.constant dense<0.000000e+00> : vector<20x8xf32>
      %364 = tpu.matmul %363, %50, %cst_170 {dimension_numbers = #tpu.dot_dimension_numbers<[1], [0], [0], [1], [0, 0, 1, 1], [], []>} : vector<20x32xf32>, vector<32x8xf32>, vector<20x8xf32> -> vector<20x8xf32>
      %365 = arith.addf %364, %53 : vector<20x8xf32>
      %cst_171 = arith.constant 0.000000e+00 : f32
      %366 = vector.broadcast %cst_171 : f32 to vector<20x8xf32>
      %367 = arith.maximumf %365, %366 : vector<20x8xf32>
      %368 = arith.addf %267, %367 : vector<20x8xf32>
      %369 = vector.shape_cast %368 : vector<20x8xf32> to vector<1x20x8xf32>
      %370 = arith.index_cast %271 : i32 to index
      %c0_172 = arith.constant 0 : index
      %c0_173 = arith.constant 0 : index
      %371 = vector.load %arg16[%370, %c0_172, %c0_173] : memref<40x20x8xf32, #tpu.memory_space<vmem>>, vector<1x20x8xf32>
      tpu.vector_store %arg16[%370, %c0_172, %c0_173], %369 {strides = array<i32>} : memref<40x20x8xf32, #tpu.memory_space<vmem>>, vector<1x20x8xf32>,
      %c3_i32 = arith.constant 3 : i32
      %372 = arith.addi %68, %c3_i32 : i32
      %cst_174 = arith.constant dense<0.000000e+00> : vector<20xf32>
      %373 = vector.multi_reduction <add>, %368, %cst_174 [1] : vector<20x8xf32> to vector<20xf32>
      %374 = vector.shape_cast %373 : vector<20xf32> to vector<20x1xf32>
      %cst_175 = arith.constant 8.000000e+00 : f32
      %375 = vector.broadcast %cst_175 : f32 to vector<20x1xf32>
      %376 = arith.divf %374, %375 : vector<20x1xf32>
      %377 = vector.broadcast %376 : vector<20x1xf32> to vector<20x8xf32>
      %378 = arith.subf %368, %377 : vector<20x8xf32>
      %379 = arith.mulf %378, %378 : vector<20x8xf32>
      %cst_176 = arith.constant dense<0.000000e+00> : vector<20xf32>
      %380 = vector.multi_reduction <add>, %379, %cst_176 [1] : vector<20x8xf32> to vector<20xf32>
      %381 = vector.shape_cast %380 : vector<20xf32> to vector<20x1xf32>
      %cst_177 = arith.constant 8.000000e+00 : f32
      %382 = vector.broadcast %cst_177 : f32 to vector<20x1xf32>
      %383 = arith.divf %381, %382 : vector<20x1xf32>
      %384 = vector.broadcast %376 : vector<20x1xf32> to vector<20x8xf32>
      %385 = arith.subf %368, %384 : vector<20x8xf32>
      %cst_178 = arith.constant 9.99999974E-6 : f32
      %386 = vector.broadcast %cst_178 : f32 to vector<20x1xf32>
      %387 = arith.addf %383, %386 : vector<20x1xf32>
      %388 = math.rsqrt %387 : vector<20x1xf32>
      %389 = vector.broadcast %388 : vector<20x1xf32> to vector<20x8xf32>
      %390 = arith.mulf %385, %389 : vector<20x8xf32>
      %391 = tpu.concatenate %390, %310 in 1 : vector<20x8xf32>, vector<20x32xf32> -> vector<20x40xf32>
      %cst_179 = arith.constant dense<0.000000e+00> : vector<20x128xf32>
      %392 = tpu.matmul %391, %0, %cst_179 {dimension_numbers = #tpu.dot_dimension_numbers<[1], [0], [0], [1], [0, 0, 1, 1], [], []>} : vector<20x40xf32>, vector<40x128xf32>, vector<20x128xf32> -> vector<20x128xf32>
      %393 = arith.addf %392, %3 : vector<20x128xf32>
      %394 = vector.extract_strided_slice %393 {offsets = [0, 0], sizes = [20, 64], strides = [1, 1]} : vector<20x128xf32> to vector<20x64xf32>
      %395 = arith.negf %394 : vector<20x64xf32>
      %396 = math.exp %395 : vector<20x64xf32>
      %cst_180 = arith.constant 1.000000e+00 : f32
      %397 = vector.broadcast %cst_180 : f32 to vector<20x64xf32>
      %398 = arith.addf %397, %396 : vector<20x64xf32>
      %399 = arith.divf %397, %398 : vector<20x64xf32>
      %400 = vector.extract_strided_slice %399 {offsets = [0, 0], sizes = [20, 32], strides = [1, 1]} : vector<20x64xf32> to vector<20x32xf32>
      %401 = vector.extract_strided_slice %399 {offsets = [0, 32], sizes = [20, 32], strides = [1, 1]} : vector<20x64xf32> to vector<20x32xf32>
      %402 = vector.extract_strided_slice %393 {offsets = [0, 64], sizes = [20, 32], strides = [1, 1]} : vector<20x128xf32> to vector<20x32xf32>
      %403 = vector.extract_strided_slice %393 {offsets = [0, 96], sizes = [20, 32], strides = [1, 1]} : vector<20x128xf32> to vector<20x32xf32>
      %404 = arith.mulf %400, %403 : vector<20x32xf32>
      %405 = arith.addf %402, %404 : vector<20x32xf32>
      %406 = math.tanh %405 : vector<20x32xf32>
      %cst_181 = arith.constant 1.000000e+00 : f32
      %407 = vector.broadcast %cst_181 : f32 to vector<20x32xf32>
      %408 = arith.subf %407, %401 : vector<20x32xf32>
      %409 = arith.mulf %408, %406 : vector<20x32xf32>
      %410 = arith.mulf %401, %310 : vector<20x32xf32>
      %411 = arith.addf %409, %410 : vector<20x32xf32>
      %cst_182 = arith.constant dense<0.000000e+00> : vector<20xf32>
      %412 = vector.multi_reduction <add>, %411, %cst_182 [1] : vector<20x32xf32> to vector<20xf32>
      %413 = vector.shape_cast %412 : vector<20xf32> to vector<20x1xf32>
      %cst_183 = arith.constant 3.200000e+01 : f32
      %414 = vector.broadcast %cst_183 : f32 to vector<20x1xf32>
      %415 = arith.divf %413, %414 : vector<20x1xf32>
      %416 = vector.broadcast %415 : vector<20x1xf32> to vector<20x32xf32>
      %417 = arith.subf %411, %416 : vector<20x32xf32>
      %418 = arith.mulf %417, %417 : vector<20x32xf32>
      %cst_184 = arith.constant dense<0.000000e+00> : vector<20xf32>
      %419 = vector.multi_reduction <add>, %418, %cst_184 [1] : vector<20x32xf32> to vector<20xf32>
      %420 = vector.shape_cast %419 : vector<20xf32> to vector<20x1xf32>
      %cst_185 = arith.constant 3.200000e+01 : f32
      %421 = vector.broadcast %cst_185 : f32 to vector<20x1xf32>
      %422 = arith.divf %420, %421 : vector<20x1xf32>
      %423 = vector.broadcast %415 : vector<20x1xf32> to vector<20x32xf32>
      %424 = arith.subf %411, %423 : vector<20x32xf32>
      %cst_186 = arith.constant 9.99999974E-6 : f32
      %425 = vector.broadcast %cst_186 : f32 to vector<20x1xf32>
      %426 = arith.addf %422, %425 : vector<20x1xf32>
      %427 = math.rsqrt %426 : vector<20x1xf32>
      %428 = vector.broadcast %427 : vector<20x1xf32> to vector<20x32xf32>
      %429 = arith.mulf %424, %428 : vector<20x32xf32>
      %430 = arith.mulf %429, %6 : vector<20x32xf32>
      %431 = arith.addf %430, %9 : vector<20x32xf32>
      %cst_187 = arith.constant dense<0.000000e+00> : vector<20x32xf32>
      %432 = tpu.matmul %431, %11, %cst_187 {dimension_numbers = #tpu.dot_dimension_numbers<[1], [0], [0], [1], [0, 0, 1, 1], [], []>} : vector<20x32xf32>, vector<32x32xf32>, vector<20x32xf32> -> vector<20x32xf32>
      %433 = arith.addf %432, %17 : vector<20x32xf32>
      %cst_188 = arith.constant 0.000000e+00 : f32
      %434 = vector.broadcast %cst_188 : f32 to vector<20x32xf32>
      %435 = arith.maximumf %433, %434 : vector<20x32xf32>
      %cst_189 = arith.constant dense<0.000000e+00> : vector<20x32xf32>
      %436 = tpu.matmul %435, %13, %cst_189 {dimension_numbers = #tpu.dot_dimension_numbers<[1], [0], [0], [1], [0, 0, 1, 1], [], []>} : vector<20x32xf32>, vector<32x32xf32>, vector<20x32xf32> -> vector<20x32xf32>
      %437 = arith.addf %436, %21 : vector<20x32xf32>
      %cst_190 = arith.constant 0.000000e+00 : f32
      %438 = vector.broadcast %cst_190 : f32 to vector<20x32xf32>
      %439 = arith.maximumf %437, %438 : vector<20x32xf32>
      %440 = arith.addf %439, %431 : vector<20x32xf32>
      %c0_191 = arith.constant 0 : index
      %c0_192 = arith.constant 0 : index
      %441 = vector.load %arg17[%c0_191, %c0_192] : memref<20x48xf32, #tpu.memory_space<vmem>>, vector<20x32xf32>
      tpu.vector_store %arg17[%c0_191, %c0_192], %440 {strides = array<i32>} : memref<20x48xf32, #tpu.memory_space<vmem>>, vector<20x32xf32>,
      %c0_193 = arith.constant 0 : index
      %c0_194 = arith.constant 0 : index
      %442 = vector.load %arg17[%c0_193, %c0_194] : memref<20x48xf32, #tpu.memory_space<vmem>>, vector<20x48xf32>
      %cst_195 = arith.constant dense<0.000000e+00> : vector<20x48xf32>
      %443 = tpu.matmul %442, %23, %cst_195 {dimension_numbers = #tpu.dot_dimension_numbers<[1], [0], [0], [1], [0, 0, 1, 1], [], []>} : vector<20x48xf32>, vector<48x48xf32>, vector<20x48xf32> -> vector<20x48xf32>
      %444 = arith.addf %443, %29 : vector<20x48xf32>
      %cst_196 = arith.constant 0.000000e+00 : f32
      %445 = vector.broadcast %cst_196 : f32 to vector<20x48xf32>
      %446 = arith.maximumf %444, %445 : vector<20x48xf32>
      %cst_197 = arith.constant dense<0.000000e+00> : vector<20x48xf32>
      %447 = tpu.matmul %446, %25, %cst_197 {dimension_numbers = #tpu.dot_dimension_numbers<[1], [0], [0], [1], [0, 0, 1, 1], [], []>} : vector<20x48xf32>, vector<48x48xf32>, vector<20x48xf32> -> vector<20x48xf32>
      %448 = arith.addf %447, %33 : vector<20x48xf32>
      %cst_198 = arith.constant 0.000000e+00 : f32
      %449 = vector.broadcast %cst_198 : f32 to vector<20x48xf32>
      %450 = arith.maximumf %448, %449 : vector<20x48xf32>
      %451 = arith.addf %450, %442 : vector<20x48xf32>
      %cst_199 = arith.constant dense<0.000000e+00> : vector<20x32xf32>
      %452 = tpu.matmul %451, %34, %cst_199 {dimension_numbers = #tpu.dot_dimension_numbers<[1], [0], [0], [1], [0, 0, 1, 1], [], []>} : vector<20x48xf32>, vector<48x32xf32>, vector<20x32xf32> -> vector<20x32xf32>
      %453 = arith.addf %452, %37 : vector<20x32xf32>
      %cst_200 = arith.constant 0.000000e+00 : f32
      %454 = vector.broadcast %cst_200 : f32 to vector<20x32xf32>
      %455 = arith.maximumf %453, %454 : vector<20x32xf32>
      %cst_201 = arith.constant dense<0.000000e+00> : vector<20x32xf32>
      %456 = tpu.matmul %455, %39, %cst_201 {dimension_numbers = #tpu.dot_dimension_numbers<[1], [0], [0], [1], [0, 0, 1, 1], [], []>} : vector<20x32xf32>, vector<32x32xf32>, vector<20x32xf32> -> vector<20x32xf32>
      %457 = arith.addf %456, %45 : vector<20x32xf32>
      %cst_202 = arith.constant 0.000000e+00 : f32
      %458 = vector.broadcast %cst_202 : f32 to vector<20x32xf32>
      %459 = arith.maximumf %457, %458 : vector<20x32xf32>
      %cst_203 = arith.constant dense<0.000000e+00> : vector<20x32xf32>
      %460 = tpu.matmul %459, %41, %cst_203 {dimension_numbers = #tpu.dot_dimension_numbers<[1], [0], [0], [1], [0, 0, 1, 1], [], []>} : vector<20x32xf32>, vector<32x32xf32>, vector<20x32xf32> -> vector<20x32xf32>
      %461 = arith.addf %460, %49 : vector<20x32xf32>
      %cst_204 = arith.constant 0.000000e+00 : f32
      %462 = vector.broadcast %cst_204 : f32 to vector<20x32xf32>
      %463 = arith.maximumf %461, %462 : vector<20x32xf32>
      %464 = arith.addf %463, %455 : vector<20x32xf32>
      %cst_205 = arith.constant dense<0.000000e+00> : vector<20x8xf32>
      %465 = tpu.matmul %464, %50, %cst_205 {dimension_numbers = #tpu.dot_dimension_numbers<[1], [0], [0], [1], [0, 0, 1, 1], [], []>} : vector<20x32xf32>, vector<32x8xf32>, vector<20x8xf32> -> vector<20x8xf32>
      %466 = arith.addf %465, %53 : vector<20x8xf32>
      %cst_206 = arith.constant 0.000000e+00 : f32
      %467 = vector.broadcast %cst_206 : f32 to vector<20x8xf32>
      %468 = arith.maximumf %466, %467 : vector<20x8xf32>
      %469 = arith.addf %368, %468 : vector<20x8xf32>
      %470 = vector.shape_cast %469 : vector<20x8xf32> to vector<1x20x8xf32>
      %471 = arith.index_cast %372 : i32 to index
      %c0_207 = arith.constant 0 : index
      %c0_208 = arith.constant 0 : index
      %472 = vector.load %arg16[%471, %c0_207, %c0_208] : memref<40x20x8xf32, #tpu.memory_space<vmem>>, vector<1x20x8xf32>
      tpu.vector_store %arg16[%471, %c0_207, %c0_208], %470 {strides = array<i32>} : memref<40x20x8xf32, #tpu.memory_space<vmem>>, vector<1x20x8xf32>,
      scf.yield %469, %411 : vector<20x8xf32>, vector<20x32xf32>
    }
    %c5_i32_58 = arith.constant 5 : i32
    %c1_59 = arith.constant 1 : index
    %c0_60 = arith.constant 0 : index
    %c0_61 = arith.constant 0 : index
    %63 = vector.load %arg0[%c1_59, %c0_60, %c0_61] : memref<2x20x8xf32, #tpu.memory_space<vmem>>, vector<1x20x8xf32>
    %64 = vector.shape_cast %63 : vector<1x20x8xf32> to vector<20x8xf32>
    %c0_i32_62 = arith.constant 0 : i32
    %c5_i32_63 = arith.constant 5 : i32
    %65 = arith.addi %c0_i32_62, %c5_i32_63 : i32
    %c1_i32_64 = arith.constant 1 : i32
    %66:2 = scf.for %arg18 = %c0_i32_62 to %65 step %c1_i32_64 iter_args(%arg19 = %64, %arg20 = %62#1) -> (vector<20x8xf32>, vector<20x32xf32>)  : i32 {
      %c4_i32 = arith.constant 4 : i32
      %67 = arith.muli %arg18, %c4_i32 : i32
      %c20_i32 = arith.constant 20 : i32
      %68 = arith.addi %c20_i32, %67 : i32
      %c0_i32_66 = arith.constant 0 : i32
      %69 = arith.addi %68, %c0_i32_66 : i32
      %cst_67 = arith.constant dense<0.000000e+00> : vector<20xf32>
      %70 = vector.multi_reduction <add>, %arg19, %cst_67 [1] : vector<20x8xf32> to vector<20xf32>
      %71 = vector.shape_cast %70 : vector<20xf32> to vector<20x1xf32>
      %cst_68 = arith.constant 8.000000e+00 : f32
      %72 = vector.broadcast %cst_68 : f32 to vector<20x1xf32>
      %73 = arith.divf %71, %72 : vector<20x1xf32>
      %74 = vector.broadcast %73 : vector<20x1xf32> to vector<20x8xf32>
      %75 = arith.subf %arg19, %74 : vector<20x8xf32>
      %76 = arith.mulf %75, %75 : vector<20x8xf32>
      %cst_69 = arith.constant dense<0.000000e+00> : vector<20xf32>
      %77 = vector.multi_reduction <add>, %76, %cst_69 [1] : vector<20x8xf32> to vector<20xf32>
      %78 = vector.shape_cast %77 : vector<20xf32> to vector<20x1xf32>
      %cst_70 = arith.constant 8.000000e+00 : f32
      %79 = vector.broadcast %cst_70 : f32 to vector<20x1xf32>
      %80 = arith.divf %78, %79 : vector<20x1xf32>
      %81 = vector.broadcast %73 : vector<20x1xf32> to vector<20x8xf32>
      %82 = arith.subf %arg19, %81 : vector<20x8xf32>
      %cst_71 = arith.constant 9.99999974E-6 : f32
      %83 = vector.broadcast %cst_71 : f32 to vector<20x1xf32>
      %84 = arith.addf %80, %83 : vector<20x1xf32>
      %85 = math.rsqrt %84 : vector<20x1xf32>
      %86 = vector.broadcast %85 : vector<20x1xf32> to vector<20x8xf32>
      %87 = arith.mulf %82, %86 : vector<20x8xf32>
      %88 = tpu.concatenate %87, %arg20 in 1 : vector<20x8xf32>, vector<20x32xf32> -> vector<20x40xf32>
      %cst_72 = arith.constant dense<0.000000e+00> : vector<20x128xf32>
      %89 = tpu.matmul %88, %0, %cst_72 {dimension_numbers = #tpu.dot_dimension_numbers<[1], [0], [0], [1], [0, 0, 1, 1], [], []>} : vector<20x40xf32>, vector<40x128xf32>, vector<20x128xf32> -> vector<20x128xf32>
      %90 = arith.addf %89, %3 : vector<20x128xf32>
      %91 = vector.extract_strided_slice %90 {offsets = [0, 0], sizes = [20, 64], strides = [1, 1]} : vector<20x128xf32> to vector<20x64xf32>
      %92 = arith.negf %91 : vector<20x64xf32>
      %93 = math.exp %92 : vector<20x64xf32>
      %cst_73 = arith.constant 1.000000e+00 : f32
      %94 = vector.broadcast %cst_73 : f32 to vector<20x64xf32>
      %95 = arith.addf %94, %93 : vector<20x64xf32>
      %96 = arith.divf %94, %95 : vector<20x64xf32>
      %97 = vector.extract_strided_slice %96 {offsets = [0, 0], sizes = [20, 32], strides = [1, 1]} : vector<20x64xf32> to vector<20x32xf32>
      %98 = vector.extract_strided_slice %96 {offsets = [0, 32], sizes = [20, 32], strides = [1, 1]} : vector<20x64xf32> to vector<20x32xf32>
      %99 = vector.extract_strided_slice %90 {offsets = [0, 64], sizes = [20, 32], strides = [1, 1]} : vector<20x128xf32> to vector<20x32xf32>
      %100 = vector.extract_strided_slice %90 {offsets = [0, 96], sizes = [20, 32], strides = [1, 1]} : vector<20x128xf32> to vector<20x32xf32>
      %101 = arith.mulf %97, %100 : vector<20x32xf32>
      %102 = arith.addf %99, %101 : vector<20x32xf32>
      %103 = math.tanh %102 : vector<20x32xf32>
      %cst_74 = arith.constant 1.000000e+00 : f32
      %104 = vector.broadcast %cst_74 : f32 to vector<20x32xf32>
      %105 = arith.subf %104, %98 : vector<20x32xf32>
      %106 = arith.mulf %105, %103 : vector<20x32xf32>
      %107 = arith.mulf %98, %arg20 : vector<20x32xf32>
      %108 = arith.addf %106, %107 : vector<20x32xf32>
      %cst_75 = arith.constant dense<0.000000e+00> : vector<20xf32>
      %109 = vector.multi_reduction <add>, %108, %cst_75 [1] : vector<20x32xf32> to vector<20xf32>
      %110 = vector.shape_cast %109 : vector<20xf32> to vector<20x1xf32>
      %cst_76 = arith.constant 3.200000e+01 : f32
      %111 = vector.broadcast %cst_76 : f32 to vector<20x1xf32>
      %112 = arith.divf %110, %111 : vector<20x1xf32>
      %113 = vector.broadcast %112 : vector<20x1xf32> to vector<20x32xf32>
      %114 = arith.subf %108, %113 : vector<20x32xf32>
      %115 = arith.mulf %114, %114 : vector<20x32xf32>
      %cst_77 = arith.constant dense<0.000000e+00> : vector<20xf32>
      %116 = vector.multi_reduction <add>, %115, %cst_77 [1] : vector<20x32xf32> to vector<20xf32>
      %117 = vector.shape_cast %116 : vector<20xf32> to vector<20x1xf32>
      %cst_78 = arith.constant 3.200000e+01 : f32
      %118 = vector.broadcast %cst_78 : f32 to vector<20x1xf32>
      %119 = arith.divf %117, %118 : vector<20x1xf32>
      %120 = vector.broadcast %112 : vector<20x1xf32> to vector<20x32xf32>
      %121 = arith.subf %108, %120 : vector<20x32xf32>
      %cst_79 = arith.constant 9.99999974E-6 : f32
      %122 = vector.broadcast %cst_79 : f32 to vector<20x1xf32>
      %123 = arith.addf %119, %122 : vector<20x1xf32>
      %124 = math.rsqrt %123 : vector<20x1xf32>
      %125 = vector.broadcast %124 : vector<20x1xf32> to vector<20x32xf32>
      %126 = arith.mulf %121, %125 : vector<20x32xf32>
      %127 = arith.mulf %126, %6 : vector<20x32xf32>
      %128 = arith.addf %127, %9 : vector<20x32xf32>
      %cst_80 = arith.constant dense<0.000000e+00> : vector<20x32xf32>
      %129 = tpu.matmul %128, %11, %cst_80 {dimension_numbers = #tpu.dot_dimension_numbers<[1], [0], [0], [1], [0, 0, 1, 1], [], []>} : vector<20x32xf32>, vector<32x32xf32>, vector<20x32xf32> -> vector<20x32xf32>
      %130 = arith.addf %129, %17 : vector<20x32xf32>
      %cst_81 = arith.constant 0.000000e+00 : f32
      %131 = vector.broadcast %cst_81 : f32 to vector<20x32xf32>
      %132 = arith.maximumf %130, %131 : vector<20x32xf32>
      %cst_82 = arith.constant dense<0.000000e+00> : vector<20x32xf32>
      %133 = tpu.matmul %132, %13, %cst_82 {dimension_numbers = #tpu.dot_dimension_numbers<[1], [0], [0], [1], [0, 0, 1, 1], [], []>} : vector<20x32xf32>, vector<32x32xf32>, vector<20x32xf32> -> vector<20x32xf32>
      %134 = arith.addf %133, %21 : vector<20x32xf32>
      %cst_83 = arith.constant 0.000000e+00 : f32
      %135 = vector.broadcast %cst_83 : f32 to vector<20x32xf32>
      %136 = arith.maximumf %134, %135 : vector<20x32xf32>
      %137 = arith.addf %136, %128 : vector<20x32xf32>
      %c0_84 = arith.constant 0 : index
      %c0_85 = arith.constant 0 : index
      %138 = vector.load %arg17[%c0_84, %c0_85] : memref<20x48xf32, #tpu.memory_space<vmem>>, vector<20x32xf32>
      tpu.vector_store %arg17[%c0_84, %c0_85], %137 {strides = array<i32>} : memref<20x48xf32, #tpu.memory_space<vmem>>, vector<20x32xf32>,
      %c0_86 = arith.constant 0 : index
      %c0_87 = arith.constant 0 : index
      %139 = vector.load %arg17[%c0_86, %c0_87] : memref<20x48xf32, #tpu.memory_space<vmem>>, vector<20x48xf32>
      %cst_88 = arith.constant dense<0.000000e+00> : vector<20x48xf32>
      %140 = tpu.matmul %139, %23, %cst_88 {dimension_numbers = #tpu.dot_dimension_numbers<[1], [0], [0], [1], [0, 0, 1, 1], [], []>} : vector<20x48xf32>, vector<48x48xf32>, vector<20x48xf32> -> vector<20x48xf32>
      %141 = arith.addf %140, %29 : vector<20x48xf32>
      %cst_89 = arith.constant 0.000000e+00 : f32
      %142 = vector.broadcast %cst_89 : f32 to vector<20x48xf32>
      %143 = arith.maximumf %141, %142 : vector<20x48xf32>
      %cst_90 = arith.constant dense<0.000000e+00> : vector<20x48xf32>
      %144 = tpu.matmul %143, %25, %cst_90 {dimension_numbers = #tpu.dot_dimension_numbers<[1], [0], [0], [1], [0, 0, 1, 1], [], []>} : vector<20x48xf32>, vector<48x48xf32>, vector<20x48xf32> -> vector<20x48xf32>
      %145 = arith.addf %144, %33 : vector<20x48xf32>
      %cst_91 = arith.constant 0.000000e+00 : f32
      %146 = vector.broadcast %cst_91 : f32 to vector<20x48xf32>
      %147 = arith.maximumf %145, %146 : vector<20x48xf32>
      %148 = arith.addf %147, %139 : vector<20x48xf32>
      %cst_92 = arith.constant dense<0.000000e+00> : vector<20x32xf32>
      %149 = tpu.matmul %148, %34, %cst_92 {dimension_numbers = #tpu.dot_dimension_numbers<[1], [0], [0], [1], [0, 0, 1, 1], [], []>} : vector<20x48xf32>, vector<48x32xf32>, vector<20x32xf32> -> vector<20x32xf32>
      %150 = arith.addf %149, %37 : vector<20x32xf32>
      %cst_93 = arith.constant 0.000000e+00 : f32
      %151 = vector.broadcast %cst_93 : f32 to vector<20x32xf32>
      %152 = arith.maximumf %150, %151 : vector<20x32xf32>
      %cst_94 = arith.constant dense<0.000000e+00> : vector<20x32xf32>
      %153 = tpu.matmul %152, %39, %cst_94 {dimension_numbers = #tpu.dot_dimension_numbers<[1], [0], [0], [1], [0, 0, 1, 1], [], []>} : vector<20x32xf32>, vector<32x32xf32>, vector<20x32xf32> -> vector<20x32xf32>
      %154 = arith.addf %153, %45 : vector<20x32xf32>
      %cst_95 = arith.constant 0.000000e+00 : f32
      %155 = vector.broadcast %cst_95 : f32 to vector<20x32xf32>
      %156 = arith.maximumf %154, %155 : vector<20x32xf32>
      %cst_96 = arith.constant dense<0.000000e+00> : vector<20x32xf32>
      %157 = tpu.matmul %156, %41, %cst_96 {dimension_numbers = #tpu.dot_dimension_numbers<[1], [0], [0], [1], [0, 0, 1, 1], [], []>} : vector<20x32xf32>, vector<32x32xf32>, vector<20x32xf32> -> vector<20x32xf32>
      %158 = arith.addf %157, %49 : vector<20x32xf32>
      %cst_97 = arith.constant 0.000000e+00 : f32
      %159 = vector.broadcast %cst_97 : f32 to vector<20x32xf32>
      %160 = arith.maximumf %158, %159 : vector<20x32xf32>
      %161 = arith.addf %160, %152 : vector<20x32xf32>
      %cst_98 = arith.constant dense<0.000000e+00> : vector<20x8xf32>
      %162 = tpu.matmul %161, %50, %cst_98 {dimension_numbers = #tpu.dot_dimension_numbers<[1], [0], [0], [1], [0, 0, 1, 1], [], []>} : vector<20x32xf32>, vector<32x8xf32>, vector<20x8xf32> -> vector<20x8xf32>
      %163 = arith.addf %162, %53 : vector<20x8xf32>
      %cst_99 = arith.constant 0.000000e+00 : f32
      %164 = vector.broadcast %cst_99 : f32 to vector<20x8xf32>
      %165 = arith.maximumf %163, %164 : vector<20x8xf32>
      %166 = arith.addf %arg19, %165 : vector<20x8xf32>
      %167 = vector.shape_cast %166 : vector<20x8xf32> to vector<1x20x8xf32>
      %168 = arith.index_cast %69 : i32 to index
      %c0_100 = arith.constant 0 : index
      %c0_101 = arith.constant 0 : index
      %169 = vector.load %arg16[%168, %c0_100, %c0_101] : memref<40x20x8xf32, #tpu.memory_space<vmem>>, vector<1x20x8xf32>
      tpu.vector_store %arg16[%168, %c0_100, %c0_101], %167 {strides = array<i32>} : memref<40x20x8xf32, #tpu.memory_space<vmem>>, vector<1x20x8xf32>,
      %c1_i32_102 = arith.constant 1 : i32
      %170 = arith.addi %68, %c1_i32_102 : i32
      %cst_103 = arith.constant dense<0.000000e+00> : vector<20xf32>
      %171 = vector.multi_reduction <add>, %166, %cst_103 [1] : vector<20x8xf32> to vector<20xf32>
      %172 = vector.shape_cast %171 : vector<20xf32> to vector<20x1xf32>
      %cst_104 = arith.constant 8.000000e+00 : f32
      %173 = vector.broadcast %cst_104 : f32 to vector<20x1xf32>
      %174 = arith.divf %172, %173 : vector<20x1xf32>
      %175 = vector.broadcast %174 : vector<20x1xf32> to vector<20x8xf32>
      %176 = arith.subf %166, %175 : vector<20x8xf32>
      %177 = arith.mulf %176, %176 : vector<20x8xf32>
      %cst_105 = arith.constant dense<0.000000e+00> : vector<20xf32>
      %178 = vector.multi_reduction <add>, %177, %cst_105 [1] : vector<20x8xf32> to vector<20xf32>
      %179 = vector.shape_cast %178 : vector<20xf32> to vector<20x1xf32>
      %cst_106 = arith.constant 8.000000e+00 : f32
      %180 = vector.broadcast %cst_106 : f32 to vector<20x1xf32>
      %181 = arith.divf %179, %180 : vector<20x1xf32>
      %182 = vector.broadcast %174 : vector<20x1xf32> to vector<20x8xf32>
      %183 = arith.subf %166, %182 : vector<20x8xf32>
      %cst_107 = arith.constant 9.99999974E-6 : f32
      %184 = vector.broadcast %cst_107 : f32 to vector<20x1xf32>
      %185 = arith.addf %181, %184 : vector<20x1xf32>
      %186 = math.rsqrt %185 : vector<20x1xf32>
      %187 = vector.broadcast %186 : vector<20x1xf32> to vector<20x8xf32>
      %188 = arith.mulf %183, %187 : vector<20x8xf32>
      %189 = tpu.concatenate %188, %108 in 1 : vector<20x8xf32>, vector<20x32xf32> -> vector<20x40xf32>
      %cst_108 = arith.constant dense<0.000000e+00> : vector<20x128xf32>
      %190 = tpu.matmul %189, %0, %cst_108 {dimension_numbers = #tpu.dot_dimension_numbers<[1], [0], [0], [1], [0, 0, 1, 1], [], []>} : vector<20x40xf32>, vector<40x128xf32>, vector<20x128xf32> -> vector<20x128xf32>
      %191 = arith.addf %190, %3 : vector<20x128xf32>
      %192 = vector.extract_strided_slice %191 {offsets = [0, 0], sizes = [20, 64], strides = [1, 1]} : vector<20x128xf32> to vector<20x64xf32>
      %193 = arith.negf %192 : vector<20x64xf32>
      %194 = math.exp %193 : vector<20x64xf32>
      %cst_109 = arith.constant 1.000000e+00 : f32
      %195 = vector.broadcast %cst_109 : f32 to vector<20x64xf32>
      %196 = arith.addf %195, %194 : vector<20x64xf32>
      %197 = arith.divf %195, %196 : vector<20x64xf32>
      %198 = vector.extract_strided_slice %197 {offsets = [0, 0], sizes = [20, 32], strides = [1, 1]} : vector<20x64xf32> to vector<20x32xf32>
      %199 = vector.extract_strided_slice %197 {offsets = [0, 32], sizes = [20, 32], strides = [1, 1]} : vector<20x64xf32> to vector<20x32xf32>
      %200 = vector.extract_strided_slice %191 {offsets = [0, 64], sizes = [20, 32], strides = [1, 1]} : vector<20x128xf32> to vector<20x32xf32>
      %201 = vector.extract_strided_slice %191 {offsets = [0, 96], sizes = [20, 32], strides = [1, 1]} : vector<20x128xf32> to vector<20x32xf32>
      %202 = arith.mulf %198, %201 : vector<20x32xf32>
      %203 = arith.addf %200, %202 : vector<20x32xf32>
      %204 = math.tanh %203 : vector<20x32xf32>
      %cst_110 = arith.constant 1.000000e+00 : f32
      %205 = vector.broadcast %cst_110 : f32 to vector<20x32xf32>
      %206 = arith.subf %205, %199 : vector<20x32xf32>
      %207 = arith.mulf %206, %204 : vector<20x32xf32>
      %208 = arith.mulf %199, %108 : vector<20x32xf32>
      %209 = arith.addf %207, %208 : vector<20x32xf32>
      %cst_111 = arith.constant dense<0.000000e+00> : vector<20xf32>
      %210 = vector.multi_reduction <add>, %209, %cst_111 [1] : vector<20x32xf32> to vector<20xf32>
      %211 = vector.shape_cast %210 : vector<20xf32> to vector<20x1xf32>
      %cst_112 = arith.constant 3.200000e+01 : f32
      %212 = vector.broadcast %cst_112 : f32 to vector<20x1xf32>
      %213 = arith.divf %211, %212 : vector<20x1xf32>
      %214 = vector.broadcast %213 : vector<20x1xf32> to vector<20x32xf32>
      %215 = arith.subf %209, %214 : vector<20x32xf32>
      %216 = arith.mulf %215, %215 : vector<20x32xf32>
      %cst_113 = arith.constant dense<0.000000e+00> : vector<20xf32>
      %217 = vector.multi_reduction <add>, %216, %cst_113 [1] : vector<20x32xf32> to vector<20xf32>
      %218 = vector.shape_cast %217 : vector<20xf32> to vector<20x1xf32>
      %cst_114 = arith.constant 3.200000e+01 : f32
      %219 = vector.broadcast %cst_114 : f32 to vector<20x1xf32>
      %220 = arith.divf %218, %219 : vector<20x1xf32>
      %221 = vector.broadcast %213 : vector<20x1xf32> to vector<20x32xf32>
      %222 = arith.subf %209, %221 : vector<20x32xf32>
      %cst_115 = arith.constant 9.99999974E-6 : f32
      %223 = vector.broadcast %cst_115 : f32 to vector<20x1xf32>
      %224 = arith.addf %220, %223 : vector<20x1xf32>
      %225 = math.rsqrt %224 : vector<20x1xf32>
      %226 = vector.broadcast %225 : vector<20x1xf32> to vector<20x32xf32>
      %227 = arith.mulf %222, %226 : vector<20x32xf32>
      %228 = arith.mulf %227, %6 : vector<20x32xf32>
      %229 = arith.addf %228, %9 : vector<20x32xf32>
      %cst_116 = arith.constant dense<0.000000e+00> : vector<20x32xf32>
      %230 = tpu.matmul %229, %11, %cst_116 {dimension_numbers = #tpu.dot_dimension_numbers<[1], [0], [0], [1], [0, 0, 1, 1], [], []>} : vector<20x32xf32>, vector<32x32xf32>, vector<20x32xf32> -> vector<20x32xf32>
      %231 = arith.addf %230, %17 : vector<20x32xf32>
      %cst_117 = arith.constant 0.000000e+00 : f32
      %232 = vector.broadcast %cst_117 : f32 to vector<20x32xf32>
      %233 = arith.maximumf %231, %232 : vector<20x32xf32>
      %cst_118 = arith.constant dense<0.000000e+00> : vector<20x32xf32>
      %234 = tpu.matmul %233, %13, %cst_118 {dimension_numbers = #tpu.dot_dimension_numbers<[1], [0], [0], [1], [0, 0, 1, 1], [], []>} : vector<20x32xf32>, vector<32x32xf32>, vector<20x32xf32> -> vector<20x32xf32>
      %235 = arith.addf %234, %21 : vector<20x32xf32>
      %cst_119 = arith.constant 0.000000e+00 : f32
      %236 = vector.broadcast %cst_119 : f32 to vector<20x32xf32>
      %237 = arith.maximumf %235, %236 : vector<20x32xf32>
      %238 = arith.addf %237, %229 : vector<20x32xf32>
      %c0_120 = arith.constant 0 : index
      %c0_121 = arith.constant 0 : index
      %239 = vector.load %arg17[%c0_120, %c0_121] : memref<20x48xf32, #tpu.memory_space<vmem>>, vector<20x32xf32>
      tpu.vector_store %arg17[%c0_120, %c0_121], %238 {strides = array<i32>} : memref<20x48xf32, #tpu.memory_space<vmem>>, vector<20x32xf32>,
      %c0_122 = arith.constant 0 : index
      %c0_123 = arith.constant 0 : index
      %240 = vector.load %arg17[%c0_122, %c0_123] : memref<20x48xf32, #tpu.memory_space<vmem>>, vector<20x48xf32>
      %cst_124 = arith.constant dense<0.000000e+00> : vector<20x48xf32>
      %241 = tpu.matmul %240, %23, %cst_124 {dimension_numbers = #tpu.dot_dimension_numbers<[1], [0], [0], [1], [0, 0, 1, 1], [], []>} : vector<20x48xf32>, vector<48x48xf32>, vector<20x48xf32> -> vector<20x48xf32>
      %242 = arith.addf %241, %29 : vector<20x48xf32>
      %cst_125 = arith.constant 0.000000e+00 : f32
      %243 = vector.broadcast %cst_125 : f32 to vector<20x48xf32>
      %244 = arith.maximumf %242, %243 : vector<20x48xf32>
      %cst_126 = arith.constant dense<0.000000e+00> : vector<20x48xf32>
      %245 = tpu.matmul %244, %25, %cst_126 {dimension_numbers = #tpu.dot_dimension_numbers<[1], [0], [0], [1], [0, 0, 1, 1], [], []>} : vector<20x48xf32>, vector<48x48xf32>, vector<20x48xf32> -> vector<20x48xf32>
      %246 = arith.addf %245, %33 : vector<20x48xf32>
      %cst_127 = arith.constant 0.000000e+00 : f32
      %247 = vector.broadcast %cst_127 : f32 to vector<20x48xf32>
      %248 = arith.maximumf %246, %247 : vector<20x48xf32>
      %249 = arith.addf %248, %240 : vector<20x48xf32>
      %cst_128 = arith.constant dense<0.000000e+00> : vector<20x32xf32>
      %250 = tpu.matmul %249, %34, %cst_128 {dimension_numbers = #tpu.dot_dimension_numbers<[1], [0], [0], [1], [0, 0, 1, 1], [], []>} : vector<20x48xf32>, vector<48x32xf32>, vector<20x32xf32> -> vector<20x32xf32>
      %251 = arith.addf %250, %37 : vector<20x32xf32>
      %cst_129 = arith.constant 0.000000e+00 : f32
      %252 = vector.broadcast %cst_129 : f32 to vector<20x32xf32>
      %253 = arith.maximumf %251, %252 : vector<20x32xf32>
      %cst_130 = arith.constant dense<0.000000e+00> : vector<20x32xf32>
      %254 = tpu.matmul %253, %39, %cst_130 {dimension_numbers = #tpu.dot_dimension_numbers<[1], [0], [0], [1], [0, 0, 1, 1], [], []>} : vector<20x32xf32>, vector<32x32xf32>, vector<20x32xf32> -> vector<20x32xf32>
      %255 = arith.addf %254, %45 : vector<20x32xf32>
      %cst_131 = arith.constant 0.000000e+00 : f32
      %256 = vector.broadcast %cst_131 : f32 to vector<20x32xf32>
      %257 = arith.maximumf %255, %256 : vector<20x32xf32>
      %cst_132 = arith.constant dense<0.000000e+00> : vector<20x32xf32>
      %258 = tpu.matmul %257, %41, %cst_132 {dimension_numbers = #tpu.dot_dimension_numbers<[1], [0], [0], [1], [0, 0, 1, 1], [], []>} : vector<20x32xf32>, vector<32x32xf32>, vector<20x32xf32> -> vector<20x32xf32>
      %259 = arith.addf %258, %49 : vector<20x32xf32>
      %cst_133 = arith.constant 0.000000e+00 : f32
      %260 = vector.broadcast %cst_133 : f32 to vector<20x32xf32>
      %261 = arith.maximumf %259, %260 : vector<20x32xf32>
      %262 = arith.addf %261, %253 : vector<20x32xf32>
      %cst_134 = arith.constant dense<0.000000e+00> : vector<20x8xf32>
      %263 = tpu.matmul %262, %50, %cst_134 {dimension_numbers = #tpu.dot_dimension_numbers<[1], [0], [0], [1], [0, 0, 1, 1], [], []>} : vector<20x32xf32>, vector<32x8xf32>, vector<20x8xf32> -> vector<20x8xf32>
      %264 = arith.addf %263, %53 : vector<20x8xf32>
      %cst_135 = arith.constant 0.000000e+00 : f32
      %265 = vector.broadcast %cst_135 : f32 to vector<20x8xf32>
      %266 = arith.maximumf %264, %265 : vector<20x8xf32>
      %267 = arith.addf %166, %266 : vector<20x8xf32>
      %268 = vector.shape_cast %267 : vector<20x8xf32> to vector<1x20x8xf32>
      %269 = arith.index_cast %170 : i32 to index
      %c0_136 = arith.constant 0 : index
      %c0_137 = arith.constant 0 : index
      %270 = vector.load %arg16[%269, %c0_136, %c0_137] : memref<40x20x8xf32, #tpu.memory_space<vmem>>, vector<1x20x8xf32>
      tpu.vector_store %arg16[%269, %c0_136, %c0_137], %268 {strides = array<i32>} : memref<40x20x8xf32, #tpu.memory_space<vmem>>, vector<1x20x8xf32>,
      %c2_i32 = arith.constant 2 : i32
      %271 = arith.addi %68, %c2_i32 : i32
      %cst_138 = arith.constant dense<0.000000e+00> : vector<20xf32>
      %272 = vector.multi_reduction <add>, %267, %cst_138 [1] : vector<20x8xf32> to vector<20xf32>
      %273 = vector.shape_cast %272 : vector<20xf32> to vector<20x1xf32>
      %cst_139 = arith.constant 8.000000e+00 : f32
      %274 = vector.broadcast %cst_139 : f32 to vector<20x1xf32>
      %275 = arith.divf %273, %274 : vector<20x1xf32>
      %276 = vector.broadcast %275 : vector<20x1xf32> to vector<20x8xf32>
      %277 = arith.subf %267, %276 : vector<20x8xf32>
      %278 = arith.mulf %277, %277 : vector<20x8xf32>
      %cst_140 = arith.constant dense<0.000000e+00> : vector<20xf32>
      %279 = vector.multi_reduction <add>, %278, %cst_140 [1] : vector<20x8xf32> to vector<20xf32>
      %280 = vector.shape_cast %279 : vector<20xf32> to vector<20x1xf32>
      %cst_141 = arith.constant 8.000000e+00 : f32
      %281 = vector.broadcast %cst_141 : f32 to vector<20x1xf32>
      %282 = arith.divf %280, %281 : vector<20x1xf32>
      %283 = vector.broadcast %275 : vector<20x1xf32> to vector<20x8xf32>
      %284 = arith.subf %267, %283 : vector<20x8xf32>
      %cst_142 = arith.constant 9.99999974E-6 : f32
      %285 = vector.broadcast %cst_142 : f32 to vector<20x1xf32>
      %286 = arith.addf %282, %285 : vector<20x1xf32>
      %287 = math.rsqrt %286 : vector<20x1xf32>
      %288 = vector.broadcast %287 : vector<20x1xf32> to vector<20x8xf32>
      %289 = arith.mulf %284, %288 : vector<20x8xf32>
      %290 = tpu.concatenate %289, %209 in 1 : vector<20x8xf32>, vector<20x32xf32> -> vector<20x40xf32>
      %cst_143 = arith.constant dense<0.000000e+00> : vector<20x128xf32>
      %291 = tpu.matmul %290, %0, %cst_143 {dimension_numbers = #tpu.dot_dimension_numbers<[1], [0], [0], [1], [0, 0, 1, 1], [], []>} : vector<20x40xf32>, vector<40x128xf32>, vector<20x128xf32> -> vector<20x128xf32>
      %292 = arith.addf %291, %3 : vector<20x128xf32>
      %293 = vector.extract_strided_slice %292 {offsets = [0, 0], sizes = [20, 64], strides = [1, 1]} : vector<20x128xf32> to vector<20x64xf32>
      %294 = arith.negf %293 : vector<20x64xf32>
      %295 = math.exp %294 : vector<20x64xf32>
      %cst_144 = arith.constant 1.000000e+00 : f32
      %296 = vector.broadcast %cst_144 : f32 to vector<20x64xf32>
      %297 = arith.addf %296, %295 : vector<20x64xf32>
      %298 = arith.divf %296, %297 : vector<20x64xf32>
      %299 = vector.extract_strided_slice %298 {offsets = [0, 0], sizes = [20, 32], strides = [1, 1]} : vector<20x64xf32> to vector<20x32xf32>
      %300 = vector.extract_strided_slice %298 {offsets = [0, 32], sizes = [20, 32], strides = [1, 1]} : vector<20x64xf32> to vector<20x32xf32>
      %301 = vector.extract_strided_slice %292 {offsets = [0, 64], sizes = [20, 32], strides = [1, 1]} : vector<20x128xf32> to vector<20x32xf32>
      %302 = vector.extract_strided_slice %292 {offsets = [0, 96], sizes = [20, 32], strides = [1, 1]} : vector<20x128xf32> to vector<20x32xf32>
      %303 = arith.mulf %299, %302 : vector<20x32xf32>
      %304 = arith.addf %301, %303 : vector<20x32xf32>
      %305 = math.tanh %304 : vector<20x32xf32>
      %cst_145 = arith.constant 1.000000e+00 : f32
      %306 = vector.broadcast %cst_145 : f32 to vector<20x32xf32>
      %307 = arith.subf %306, %300 : vector<20x32xf32>
      %308 = arith.mulf %307, %305 : vector<20x32xf32>
      %309 = arith.mulf %300, %209 : vector<20x32xf32>
      %310 = arith.addf %308, %309 : vector<20x32xf32>
      %cst_146 = arith.constant dense<0.000000e+00> : vector<20xf32>
      %311 = vector.multi_reduction <add>, %310, %cst_146 [1] : vector<20x32xf32> to vector<20xf32>
      %312 = vector.shape_cast %311 : vector<20xf32> to vector<20x1xf32>
      %cst_147 = arith.constant 3.200000e+01 : f32
      %313 = vector.broadcast %cst_147 : f32 to vector<20x1xf32>
      %314 = arith.divf %312, %313 : vector<20x1xf32>
      %315 = vector.broadcast %314 : vector<20x1xf32> to vector<20x32xf32>
      %316 = arith.subf %310, %315 : vector<20x32xf32>
      %317 = arith.mulf %316, %316 : vector<20x32xf32>
      %cst_148 = arith.constant dense<0.000000e+00> : vector<20xf32>
      %318 = vector.multi_reduction <add>, %317, %cst_148 [1] : vector<20x32xf32> to vector<20xf32>
      %319 = vector.shape_cast %318 : vector<20xf32> to vector<20x1xf32>
      %cst_149 = arith.constant 3.200000e+01 : f32
      %320 = vector.broadcast %cst_149 : f32 to vector<20x1xf32>
      %321 = arith.divf %319, %320 : vector<20x1xf32>
      %322 = vector.broadcast %314 : vector<20x1xf32> to vector<20x32xf32>
      %323 = arith.subf %310, %322 : vector<20x32xf32>
      %cst_150 = arith.constant 9.99999974E-6 : f32
      %324 = vector.broadcast %cst_150 : f32 to vector<20x1xf32>
      %325 = arith.addf %321, %324 : vector<20x1xf32>
      %326 = math.rsqrt %325 : vector<20x1xf32>
      %327 = vector.broadcast %326 : vector<20x1xf32> to vector<20x32xf32>
      %328 = arith.mulf %323, %327 : vector<20x32xf32>
      %329 = arith.mulf %328, %6 : vector<20x32xf32>
      %330 = arith.addf %329, %9 : vector<20x32xf32>
      %cst_151 = arith.constant dense<0.000000e+00> : vector<20x32xf32>
      %331 = tpu.matmul %330, %11, %cst_151 {dimension_numbers = #tpu.dot_dimension_numbers<[1], [0], [0], [1], [0, 0, 1, 1], [], []>} : vector<20x32xf32>, vector<32x32xf32>, vector<20x32xf32> -> vector<20x32xf32>
      %332 = arith.addf %331, %17 : vector<20x32xf32>
      %cst_152 = arith.constant 0.000000e+00 : f32
      %333 = vector.broadcast %cst_152 : f32 to vector<20x32xf32>
      %334 = arith.maximumf %332, %333 : vector<20x32xf32>
      %cst_153 = arith.constant dense<0.000000e+00> : vector<20x32xf32>
      %335 = tpu.matmul %334, %13, %cst_153 {dimension_numbers = #tpu.dot_dimension_numbers<[1], [0], [0], [1], [0, 0, 1, 1], [], []>} : vector<20x32xf32>, vector<32x32xf32>, vector<20x32xf32> -> vector<20x32xf32>
      %336 = arith.addf %335, %21 : vector<20x32xf32>
      %cst_154 = arith.constant 0.000000e+00 : f32
      %337 = vector.broadcast %cst_154 : f32 to vector<20x32xf32>
      %338 = arith.maximumf %336, %337 : vector<20x32xf32>
      %339 = arith.addf %338, %330 : vector<20x32xf32>
      %c0_155 = arith.constant 0 : index
      %c0_156 = arith.constant 0 : index
      %340 = vector.load %arg17[%c0_155, %c0_156] : memref<20x48xf32, #tpu.memory_space<vmem>>, vector<20x32xf32>
      tpu.vector_store %arg17[%c0_155, %c0_156], %339 {strides = array<i32>} : memref<20x48xf32, #tpu.memory_space<vmem>>, vector<20x32xf32>,
      %c0_157 = arith.constant 0 : index
      %c0_158 = arith.constant 0 : index
      %341 = vector.load %arg17[%c0_157, %c0_158] : memref<20x48xf32, #tpu.memory_space<vmem>>, vector<20x48xf32>
      %cst_159 = arith.constant dense<0.000000e+00> : vector<20x48xf32>
      %342 = tpu.matmul %341, %23, %cst_159 {dimension_numbers = #tpu.dot_dimension_numbers<[1], [0], [0], [1], [0, 0, 1, 1], [], []>} : vector<20x48xf32>, vector<48x48xf32>, vector<20x48xf32> -> vector<20x48xf32>
      %343 = arith.addf %342, %29 : vector<20x48xf32>
      %cst_160 = arith.constant 0.000000e+00 : f32
      %344 = vector.broadcast %cst_160 : f32 to vector<20x48xf32>
      %345 = arith.maximumf %343, %344 : vector<20x48xf32>
      %cst_161 = arith.constant dense<0.000000e+00> : vector<20x48xf32>
      %346 = tpu.matmul %345, %25, %cst_161 {dimension_numbers = #tpu.dot_dimension_numbers<[1], [0], [0], [1], [0, 0, 1, 1], [], []>} : vector<20x48xf32>, vector<48x48xf32>, vector<20x48xf32> -> vector<20x48xf32>
      %347 = arith.addf %346, %33 : vector<20x48xf32>
      %cst_162 = arith.constant 0.000000e+00 : f32
      %348 = vector.broadcast %cst_162 : f32 to vector<20x48xf32>
      %349 = arith.maximumf %347, %348 : vector<20x48xf32>
      %350 = arith.addf %349, %341 : vector<20x48xf32>
      %cst_163 = arith.constant dense<0.000000e+00> : vector<20x32xf32>
      %351 = tpu.matmul %350, %34, %cst_163 {dimension_numbers = #tpu.dot_dimension_numbers<[1], [0], [0], [1], [0, 0, 1, 1], [], []>} : vector<20x48xf32>, vector<48x32xf32>, vector<20x32xf32> -> vector<20x32xf32>
      %352 = arith.addf %351, %37 : vector<20x32xf32>
      %cst_164 = arith.constant 0.000000e+00 : f32
      %353 = vector.broadcast %cst_164 : f32 to vector<20x32xf32>
      %354 = arith.maximumf %352, %353 : vector<20x32xf32>
      %cst_165 = arith.constant dense<0.000000e+00> : vector<20x32xf32>
      %355 = tpu.matmul %354, %39, %cst_165 {dimension_numbers = #tpu.dot_dimension_numbers<[1], [0], [0], [1], [0, 0, 1, 1], [], []>} : vector<20x32xf32>, vector<32x32xf32>, vector<20x32xf32> -> vector<20x32xf32>
      %356 = arith.addf %355, %45 : vector<20x32xf32>
      %cst_166 = arith.constant 0.000000e+00 : f32
      %357 = vector.broadcast %cst_166 : f32 to vector<20x32xf32>
      %358 = arith.maximumf %356, %357 : vector<20x32xf32>
      %cst_167 = arith.constant dense<0.000000e+00> : vector<20x32xf32>
      %359 = tpu.matmul %358, %41, %cst_167 {dimension_numbers = #tpu.dot_dimension_numbers<[1], [0], [0], [1], [0, 0, 1, 1], [], []>} : vector<20x32xf32>, vector<32x32xf32>, vector<20x32xf32> -> vector<20x32xf32>
      %360 = arith.addf %359, %49 : vector<20x32xf32>
      %cst_168 = arith.constant 0.000000e+00 : f32
      %361 = vector.broadcast %cst_168 : f32 to vector<20x32xf32>
      %362 = arith.maximumf %360, %361 : vector<20x32xf32>
      %363 = arith.addf %362, %354 : vector<20x32xf32>
      %cst_169 = arith.constant dense<0.000000e+00> : vector<20x8xf32>
      %364 = tpu.matmul %363, %50, %cst_169 {dimension_numbers = #tpu.dot_dimension_numbers<[1], [0], [0], [1], [0, 0, 1, 1], [], []>} : vector<20x32xf32>, vector<32x8xf32>, vector<20x8xf32> -> vector<20x8xf32>
      %365 = arith.addf %364, %53 : vector<20x8xf32>
      %cst_170 = arith.constant 0.000000e+00 : f32
      %366 = vector.broadcast %cst_170 : f32 to vector<20x8xf32>
      %367 = arith.maximumf %365, %366 : vector<20x8xf32>
      %368 = arith.addf %267, %367 : vector<20x8xf32>
      %369 = vector.shape_cast %368 : vector<20x8xf32> to vector<1x20x8xf32>
      %370 = arith.index_cast %271 : i32 to index
      %c0_171 = arith.constant 0 : index
      %c0_172 = arith.constant 0 : index
      %371 = vector.load %arg16[%370, %c0_171, %c0_172] : memref<40x20x8xf32, #tpu.memory_space<vmem>>, vector<1x20x8xf32>
      tpu.vector_store %arg16[%370, %c0_171, %c0_172], %369 {strides = array<i32>} : memref<40x20x8xf32, #tpu.memory_space<vmem>>, vector<1x20x8xf32>,
      %c3_i32 = arith.constant 3 : i32
      %372 = arith.addi %68, %c3_i32 : i32
      %cst_173 = arith.constant dense<0.000000e+00> : vector<20xf32>
      %373 = vector.multi_reduction <add>, %368, %cst_173 [1] : vector<20x8xf32> to vector<20xf32>
      %374 = vector.shape_cast %373 : vector<20xf32> to vector<20x1xf32>
      %cst_174 = arith.constant 8.000000e+00 : f32
      %375 = vector.broadcast %cst_174 : f32 to vector<20x1xf32>
      %376 = arith.divf %374, %375 : vector<20x1xf32>
      %377 = vector.broadcast %376 : vector<20x1xf32> to vector<20x8xf32>
      %378 = arith.subf %368, %377 : vector<20x8xf32>
      %379 = arith.mulf %378, %378 : vector<20x8xf32>
      %cst_175 = arith.constant dense<0.000000e+00> : vector<20xf32>
      %380 = vector.multi_reduction <add>, %379, %cst_175 [1] : vector<20x8xf32> to vector<20xf32>
      %381 = vector.shape_cast %380 : vector<20xf32> to vector<20x1xf32>
      %cst_176 = arith.constant 8.000000e+00 : f32
      %382 = vector.broadcast %cst_176 : f32 to vector<20x1xf32>
      %383 = arith.divf %381, %382 : vector<20x1xf32>
      %384 = vector.broadcast %376 : vector<20x1xf32> to vector<20x8xf32>
      %385 = arith.subf %368, %384 : vector<20x8xf32>
      %cst_177 = arith.constant 9.99999974E-6 : f32
      %386 = vector.broadcast %cst_177 : f32 to vector<20x1xf32>
      %387 = arith.addf %383, %386 : vector<20x1xf32>
      %388 = math.rsqrt %387 : vector<20x1xf32>
      %389 = vector.broadcast %388 : vector<20x1xf32> to vector<20x8xf32>
      %390 = arith.mulf %385, %389 : vector<20x8xf32>
      %391 = tpu.concatenate %390, %310 in 1 : vector<20x8xf32>, vector<20x32xf32> -> vector<20x40xf32>
      %cst_178 = arith.constant dense<0.000000e+00> : vector<20x128xf32>
      %392 = tpu.matmul %391, %0, %cst_178 {dimension_numbers = #tpu.dot_dimension_numbers<[1], [0], [0], [1], [0, 0, 1, 1], [], []>} : vector<20x40xf32>, vector<40x128xf32>, vector<20x128xf32> -> vector<20x128xf32>
      %393 = arith.addf %392, %3 : vector<20x128xf32>
      %394 = vector.extract_strided_slice %393 {offsets = [0, 0], sizes = [20, 64], strides = [1, 1]} : vector<20x128xf32> to vector<20x64xf32>
      %395 = arith.negf %394 : vector<20x64xf32>
      %396 = math.exp %395 : vector<20x64xf32>
      %cst_179 = arith.constant 1.000000e+00 : f32
      %397 = vector.broadcast %cst_179 : f32 to vector<20x64xf32>
      %398 = arith.addf %397, %396 : vector<20x64xf32>
      %399 = arith.divf %397, %398 : vector<20x64xf32>
      %400 = vector.extract_strided_slice %399 {offsets = [0, 0], sizes = [20, 32], strides = [1, 1]} : vector<20x64xf32> to vector<20x32xf32>
      %401 = vector.extract_strided_slice %399 {offsets = [0, 32], sizes = [20, 32], strides = [1, 1]} : vector<20x64xf32> to vector<20x32xf32>
      %402 = vector.extract_strided_slice %393 {offsets = [0, 64], sizes = [20, 32], strides = [1, 1]} : vector<20x128xf32> to vector<20x32xf32>
      %403 = vector.extract_strided_slice %393 {offsets = [0, 96], sizes = [20, 32], strides = [1, 1]} : vector<20x128xf32> to vector<20x32xf32>
      %404 = arith.mulf %400, %403 : vector<20x32xf32>
      %405 = arith.addf %402, %404 : vector<20x32xf32>
      %406 = math.tanh %405 : vector<20x32xf32>
      %cst_180 = arith.constant 1.000000e+00 : f32
      %407 = vector.broadcast %cst_180 : f32 to vector<20x32xf32>
      %408 = arith.subf %407, %401 : vector<20x32xf32>
      %409 = arith.mulf %408, %406 : vector<20x32xf32>
      %410 = arith.mulf %401, %310 : vector<20x32xf32>
      %411 = arith.addf %409, %410 : vector<20x32xf32>
      %cst_181 = arith.constant dense<0.000000e+00> : vector<20xf32>
      %412 = vector.multi_reduction <add>, %411, %cst_181 [1] : vector<20x32xf32> to vector<20xf32>
      %413 = vector.shape_cast %412 : vector<20xf32> to vector<20x1xf32>
      %cst_182 = arith.constant 3.200000e+01 : f32
      %414 = vector.broadcast %cst_182 : f32 to vector<20x1xf32>
      %415 = arith.divf %413, %414 : vector<20x1xf32>
      %416 = vector.broadcast %415 : vector<20x1xf32> to vector<20x32xf32>
      %417 = arith.subf %411, %416 : vector<20x32xf32>
      %418 = arith.mulf %417, %417 : vector<20x32xf32>
      %cst_183 = arith.constant dense<0.000000e+00> : vector<20xf32>
      %419 = vector.multi_reduction <add>, %418, %cst_183 [1] : vector<20x32xf32> to vector<20xf32>
      %420 = vector.shape_cast %419 : vector<20xf32> to vector<20x1xf32>
      %cst_184 = arith.constant 3.200000e+01 : f32
      %421 = vector.broadcast %cst_184 : f32 to vector<20x1xf32>
      %422 = arith.divf %420, %421 : vector<20x1xf32>
      %423 = vector.broadcast %415 : vector<20x1xf32> to vector<20x32xf32>
      %424 = arith.subf %411, %423 : vector<20x32xf32>
      %cst_185 = arith.constant 9.99999974E-6 : f32
      %425 = vector.broadcast %cst_185 : f32 to vector<20x1xf32>
      %426 = arith.addf %422, %425 : vector<20x1xf32>
      %427 = math.rsqrt %426 : vector<20x1xf32>
      %428 = vector.broadcast %427 : vector<20x1xf32> to vector<20x32xf32>
      %429 = arith.mulf %424, %428 : vector<20x32xf32>
      %430 = arith.mulf %429, %6 : vector<20x32xf32>
      %431 = arith.addf %430, %9 : vector<20x32xf32>
      %cst_186 = arith.constant dense<0.000000e+00> : vector<20x32xf32>
      %432 = tpu.matmul %431, %11, %cst_186 {dimension_numbers = #tpu.dot_dimension_numbers<[1], [0], [0], [1], [0, 0, 1, 1], [], []>} : vector<20x32xf32>, vector<32x32xf32>, vector<20x32xf32> -> vector<20x32xf32>
      %433 = arith.addf %432, %17 : vector<20x32xf32>
      %cst_187 = arith.constant 0.000000e+00 : f32
      %434 = vector.broadcast %cst_187 : f32 to vector<20x32xf32>
      %435 = arith.maximumf %433, %434 : vector<20x32xf32>
      %cst_188 = arith.constant dense<0.000000e+00> : vector<20x32xf32>
      %436 = tpu.matmul %435, %13, %cst_188 {dimension_numbers = #tpu.dot_dimension_numbers<[1], [0], [0], [1], [0, 0, 1, 1], [], []>} : vector<20x32xf32>, vector<32x32xf32>, vector<20x32xf32> -> vector<20x32xf32>
      %437 = arith.addf %436, %21 : vector<20x32xf32>
      %cst_189 = arith.constant 0.000000e+00 : f32
      %438 = vector.broadcast %cst_189 : f32 to vector<20x32xf32>
      %439 = arith.maximumf %437, %438 : vector<20x32xf32>
      %440 = arith.addf %439, %431 : vector<20x32xf32>
      %c0_190 = arith.constant 0 : index
      %c0_191 = arith.constant 0 : index
      %441 = vector.load %arg17[%c0_190, %c0_191] : memref<20x48xf32, #tpu.memory_space<vmem>>, vector<20x32xf32>
      tpu.vector_store %arg17[%c0_190, %c0_191], %440 {strides = array<i32>} : memref<20x48xf32, #tpu.memory_space<vmem>>, vector<20x32xf32>,
      %c0_192 = arith.constant 0 : index
      %c0_193 = arith.constant 0 : index
      %442 = vector.load %arg17[%c0_192, %c0_193] : memref<20x48xf32, #tpu.memory_space<vmem>>, vector<20x48xf32>
      %cst_194 = arith.constant dense<0.000000e+00> : vector<20x48xf32>
      %443 = tpu.matmul %442, %23, %cst_194 {dimension_numbers = #tpu.dot_dimension_numbers<[1], [0], [0], [1], [0, 0, 1, 1], [], []>} : vector<20x48xf32>, vector<48x48xf32>, vector<20x48xf32> -> vector<20x48xf32>
      %444 = arith.addf %443, %29 : vector<20x48xf32>
      %cst_195 = arith.constant 0.000000e+00 : f32
      %445 = vector.broadcast %cst_195 : f32 to vector<20x48xf32>
      %446 = arith.maximumf %444, %445 : vector<20x48xf32>
      %cst_196 = arith.constant dense<0.000000e+00> : vector<20x48xf32>
      %447 = tpu.matmul %446, %25, %cst_196 {dimension_numbers = #tpu.dot_dimension_numbers<[1], [0], [0], [1], [0, 0, 1, 1], [], []>} : vector<20x48xf32>, vector<48x48xf32>, vector<20x48xf32> -> vector<20x48xf32>
      %448 = arith.addf %447, %33 : vector<20x48xf32>
      %cst_197 = arith.constant 0.000000e+00 : f32
      %449 = vector.broadcast %cst_197 : f32 to vector<20x48xf32>
      %450 = arith.maximumf %448, %449 : vector<20x48xf32>
      %451 = arith.addf %450, %442 : vector<20x48xf32>
      %cst_198 = arith.constant dense<0.000000e+00> : vector<20x32xf32>
      %452 = tpu.matmul %451, %34, %cst_198 {dimension_numbers = #tpu.dot_dimension_numbers<[1], [0], [0], [1], [0, 0, 1, 1], [], []>} : vector<20x48xf32>, vector<48x32xf32>, vector<20x32xf32> -> vector<20x32xf32>
      %453 = arith.addf %452, %37 : vector<20x32xf32>
      %cst_199 = arith.constant 0.000000e+00 : f32
      %454 = vector.broadcast %cst_199 : f32 to vector<20x32xf32>
      %455 = arith.maximumf %453, %454 : vector<20x32xf32>
      %cst_200 = arith.constant dense<0.000000e+00> : vector<20x32xf32>
      %456 = tpu.matmul %455, %39, %cst_200 {dimension_numbers = #tpu.dot_dimension_numbers<[1], [0], [0], [1], [0, 0, 1, 1], [], []>} : vector<20x32xf32>, vector<32x32xf32>, vector<20x32xf32> -> vector<20x32xf32>
      %457 = arith.addf %456, %45 : vector<20x32xf32>
      %cst_201 = arith.constant 0.000000e+00 : f32
      %458 = vector.broadcast %cst_201 : f32 to vector<20x32xf32>
      %459 = arith.maximumf %457, %458 : vector<20x32xf32>
      %cst_202 = arith.constant dense<0.000000e+00> : vector<20x32xf32>
      %460 = tpu.matmul %459, %41, %cst_202 {dimension_numbers = #tpu.dot_dimension_numbers<[1], [0], [0], [1], [0, 0, 1, 1], [], []>} : vector<20x32xf32>, vector<32x32xf32>, vector<20x32xf32> -> vector<20x32xf32>
      %461 = arith.addf %460, %49 : vector<20x32xf32>
      %cst_203 = arith.constant 0.000000e+00 : f32
      %462 = vector.broadcast %cst_203 : f32 to vector<20x32xf32>
      %463 = arith.maximumf %461, %462 : vector<20x32xf32>
      %464 = arith.addf %463, %455 : vector<20x32xf32>
      %cst_204 = arith.constant dense<0.000000e+00> : vector<20x8xf32>
      %465 = tpu.matmul %464, %50, %cst_204 {dimension_numbers = #tpu.dot_dimension_numbers<[1], [0], [0], [1], [0, 0, 1, 1], [], []>} : vector<20x32xf32>, vector<32x8xf32>, vector<20x8xf32> -> vector<20x8xf32>
      %466 = arith.addf %465, %53 : vector<20x8xf32>
      %cst_205 = arith.constant 0.000000e+00 : f32
      %467 = vector.broadcast %cst_205 : f32 to vector<20x8xf32>
      %468 = arith.maximumf %466, %467 : vector<20x8xf32>
      %469 = arith.addf %368, %468 : vector<20x8xf32>
      %470 = vector.shape_cast %469 : vector<20x8xf32> to vector<1x20x8xf32>
      %471 = arith.index_cast %372 : i32 to index
      %c0_206 = arith.constant 0 : index
      %c0_207 = arith.constant 0 : index
      %472 = vector.load %arg16[%471, %c0_206, %c0_207] : memref<40x20x8xf32, #tpu.memory_space<vmem>>, vector<1x20x8xf32>
      tpu.vector_store %arg16[%471, %c0_206, %c0_207], %470 {strides = array<i32>} : memref<40x20x8xf32, #tpu.memory_space<vmem>>, vector<1x20x8xf32>,
      scf.yield %469, %411 : vector<20x8xf32>, vector<20x32xf32>
    }
    %c5_i32_65 = arith.constant 5 : i32
    return
  }
}

</mosaic_0001>

<bundles_post_ra>
// kernel: decoder_forward.1
= control target key start
LH: loop header
LB: loop body
LE: loop exit
PB: predicated region body
PF: predicated region fallthrough
CT: control target
= control target key end

     0   :  { %s6401_s26 = smov 32   ;;  %vm159_vm0 = vcmask 261120   ;;  %vm163_vm1 = vcmask 392192   ;;  %vm166_vm2 = vcmask 388096   ;;  %s8670_s1 = inlined_call_operand.vmem [shape: f32[20,16], index: 1, kind: input, shape index: {}]   ;;  %s8671_s3 = inlined_call_operand.vmem [shape: f32[1,128], index: 3, kind: input, shape index: {}]   ;;  %s8672_s4 = inlined_call_operand.vmem [shape: f32[1,32], index: 4, kind: input, shape index: {}]   ;;  %s8673_s5 = inlined_call_operand.vmem [shape: f32[1,32], index: 5, kind: input, shape index: {}]   ;;  %s8674_s7 = inlined_call_operand.vmem [shape: f32[2,1,32], index: 7, kind: input, shape index: {}]   ;;  %s8675_s16 = inlined_call_operand.vmem [shape: f32[40,20,8], index: 16, kind: output, shape index: {}]   ;;  %s8676_s9 = inlined_call_operand.vmem [shape: f32[2,1,48], index: 9, kind: input, shape index: {}]   ;;  %s8677_s11 = inlined_call_operand.vmem [shape: f32[1,32], index: 11, kind: input, shape index: {}]   ;;  %s8678_s13 = inlined_call_operand.vmem [shape: f32[2,1,32], index: 13, kind: input, shape index: {}]   ;;  %s8679_s15 = inlined_call_operand.vmem [shape: f32[1,8], index: 15, kind: input, shape index: {}]   ;;  %s8680_s2 = inlined_call_operand.vmem [shape: f32[40,128], index: 2, kind: input, shape index: {}]   ;;  %s8681_s6 = inlined_call_operand.vmem [shape: f32[2,32,32], index: 6, kind: input, shape index: {}]   ;;  %s8682_s8 = inlined_call_operand.vmem [shape: f32[2,48,48], index: 8, kind: input, shape index: {}]   ;;  %s8683_s10 = inlined_call_operand.vmem [shape: f32[48,32], index: 10, kind: input, shape index: {}]   ;;  %s8684_s12 = inlined_call_operand.vmem [shape: f32[2,32,32], index: 12, kind: input, shape index: {}]   ;;  %s8685_s14 = inlined_call_operand.vmem [shape: f32[32,8], index: 14, kind: input, shape index: {}]   ;;  %s8686_s0 = inlined_call_operand.vmem [shape: f32[2,20,8], index: 0, kind: input, shape index: {}]  }
   0x1   :  { %8787 = sst [smem:[#allocation35_spill]] %s8670_s1  ;;  %v6509_v3 = vld [vmem:[%s8680_s2] sm:$0xff]  ;;  %v6514_v4 = vld [vmem:[%s8680_s2 + $0x8] sm:$0xff]  ;;  %v6519_v5 = vld [vmem:[%s8680_s2 + $0x10] sm:$0xff] }
   0x2   :  { %s8788_s23 = sld [smem:[#allocation35_spill]]  ;;  %v6524_v6 = vld [vmem:[%s8680_s2 + $0x18] sm:$0xff]  ;;  %v6529_v7 = vld [vmem:[%s8680_s2 + $0x20] sm:$0xff]  ;;  %v6554_v12 = vld [vmem:[%s8681_s6 + $0x8] sm:$0xff] }
   0x3   :  { %v6534_v8 = vld [vmem:[%s8671_s3] ss:$0 sm:$0xff]  ;;  %8793 = vst [vmem:[#allocation7_spill] sm:$0xff] %v6554_v12  ;;  %v6559_v13 = vld [vmem:[%s8681_s6 + $0x10] sm:$0xff]  ;;  %v6564_v14 = vld [vmem:[%s8681_s6 + $0x18] sm:$0xff] }
   0x4   :  { %8789 = vst [vmem:[#allocation3_spill] sm:$0xff] %v6534_v8  ;;  %v6539_v9 = vld [vmem:[%s8672_s4] ss:$0 sm:$0xff]  ;;  %v6574_v16 = vld [vmem:[%s8681_s6 + $0x28] sm:$0xff]  ;;  %v6579_v17 = vld [vmem:[%s8681_s6 + $0x30] sm:$0xff] }
   0x5   :  { %8790 = vst [vmem:[#allocation4_spill] sm:$0xff] %v6539_v9  ;;  %v6544_v10 = vld [vmem:[%s8673_s5] ss:$0 sm:$0xff]  ;;  %v6584_v18 = vld [vmem:[%s8681_s6 + $0x38] sm:$0xff]  ;;  %v6594_v20 = vld [vmem:[%s8674_s7 + $0x1] ss:$0 sm:$0xff] }
   0x6   :  { %8791 = vst [vmem:[#allocation5_spill] sm:$0xff] %v6544_v10  ;;  %v6549_v11 = vld [vmem:[%s8681_s6] sm:$0xff]  ;;  %v6604_v22 = vld [vmem:[%s8682_s8 + $0x8] sm:$0xff]  ;;  %v6609_v23 = vld [vmem:[%s8682_s8 + $0x10] sm:$0xff] }
   0x7   :  { %8792 = vst [vmem:[#allocation6_spill] sm:$0xff] %v6549_v11  ;;  %v6569_v15 = vld [vmem:[%s8681_s6 + $0x20] sm:$0xff]  ;;  %v6614_v24 = vld [vmem:[%s8682_s8 + $0x18] sm:$0xff]  ;;  %v6624_v26 = vld [vmem:[%s8682_s8 + $0x28] sm:$0xff] }
   0x8   :  { %v144_v0 = vld [vmem:[%s8788_s23] sm:$0xff]  ;;  %v146_v1 = vld [vmem:[%s8788_s23 + $0x10] sm:$0xf]  ;;  %v145_v2 = vld [vmem:[%s8788_s23 + $0x8] sm:$0xff]  ;;  %8794 = vst [vmem:[#allocation8_spill] sm:$0xff] %v6559_v13 }
   0x9   :  { %150 = vrot.lane.b32.xlu0 %v144_v0, %s6401_s26  ;;  %154 = vrot.lane.b32.xlu1 %v146_v1, %s6401_s26  ;;  %v6589_v19 = vld [vmem:[%s8674_s7] ss:$0 sm:$0xff]  ;;  %v6629_v27 = vld [vmem:[%s8682_s8 + $0x30] sm:$0xff] }
   0xa   :  { %v6599_v21 = vld [vmem:[%s8682_s8] sm:$0xff]  ;;  %v6634_v28 = vld [vmem:[%s8682_s8 + $0x38] sm:$0xff]  ;;  %v6644_v30 = vld [vmem:[%s8682_s8 + $0x48] sm:$0xff] }
   0xb   :  { %v6619_v25 = vld [vmem:[%s8682_s8 + $0x20] sm:$0xff]  ;;  %v6649_v31 = vld [vmem:[%s8682_s8 + $0x50] sm:$0xff]  ;;  %v6654_v32 = vld [vmem:[%s8682_s8 + $0x58] sm:$0xff] }
   0xc   :  { %v6639_v29 = vld [vmem:[%s8682_s8 + $0x40] sm:$0xff]  ;;  %v6674_v36 = vld [vmem:[%s8683_s10 + $0x8] sm:$0xff]  ;;  %v6679_v37 = vld [vmem:[%s8683_s10 + $0x10] sm:$0xff] }
   0xd   :  { %v6659_v33 = vld [vmem:[%s8676_s9] ss:$0 sm:$0xff]  ;;  %v6664_v34 = vld [vmem:[%s8676_s9 + $0x1] ss:$0 sm:$0xff]  ;;  %8796 = vst [vmem:[#allocation10_spill] sm:$0xff] %v6674_v36  ;;  %v6684_v38 = vld [vmem:[%s8683_s10 + $0x18] sm:$0xff] }
   0xe   :  { %v6669_v35 = vld [vmem:[%s8683_s10] sm:$0xff]  ;;  %8797 = vst [vmem:[#allocation11_spill] sm:$0xff] %v6679_v37  ;;  %v6694_v40 = vld [vmem:[%s8683_s10 + $0x28] sm:$0xff]  ;;  %v6714_v44 = vld [vmem:[%s8684_s12 + $0x10] sm:$0xff] }
   0xf   :  { %8795 = vst [vmem:[#allocation9_spill] sm:$0xff] %v6669_v35  ;;  %v6689_v39 = vld [vmem:[%s8683_s10 + $0x20] sm:$0xff]  ;;  %v6709_v43 = vld [vmem:[%s8684_s12 + $0x8] sm:$0xff]  ;;  %v6719_v45 = vld [vmem:[%s8684_s12 + $0x18] sm:$0xff] }
  0x10   :  { %8798 = vst [vmem:[#allocation12_spill] sm:$0xff] %v6684_v38  ;;  %v6699_v41 = vld [vmem:[%s8677_s11] ss:$0 sm:$0xff]  ;;  %v6729_v47 = vld [vmem:[%s8684_s12 + $0x28] sm:$0xff]  ;;  %v6734_v48 = vld [vmem:[%s8684_s12 + $0x30] sm:$0xff] }
  0x11   :  { %152 = vrot.lane.b32.xlu0 %v145_v2, %s6401_s26  ;;  %v6704_v42 = vld [vmem:[%s8684_s12] sm:$0xff]  ;;  %8800 = vst [vmem:[#allocation14_spill] sm:$0xff] %v6709_v43  ;;  %v6739_v49 = vld [vmem:[%s8684_s12 + $0x38] sm:$0xff]  ;;  %v6759_v53 = vld [vmem:[%s8685_s14 + $0x8] sm:$0xff]  ;;  %v6790_v2 = vmov 0.0  }
  0x12   :  { %8799 = vst [vmem:[#allocation13_spill] sm:$0xff] %v6704_v42  ;;  %v6724_v46 = vld [vmem:[%s8684_s12 + $0x20] sm:$0xff]  ;;  %v6764_v54 = vld [vmem:[%s8685_s14 + $0x10] sm:$0xff]  ;;  %v6769_v55 = vld [vmem:[%s8685_s14 + $0x18] sm:$0xff] }
  0x13   :  { %8801 = vst [vmem:[#allocation15_spill] sm:$0xff] %v6714_v44  ;;  %v6744_v50 = vld [vmem:[%s8678_s13] ss:$0 sm:$0xff]  ;;  %v6749_v51 = vld [vmem:[%s8678_s13 + $0x1] ss:$0 sm:$0xff]  ;;  %v169_v58 = vld [vmem:[%s8686_s0 + $0x8] sm:$0xff]  }
  0x14   :  { %8802 = vst [vmem:[#allocation16_spill] sm:$0xff] %v6719_v45  ;;  %v6754_v52 = vld [vmem:[%s8685_s14] sm:$0xff]  ;;  %v170_v59 = vld [vmem:[%s8686_s0 + $0x10] sm:$0xf]   ;;  %s6802_s14 = smov 0  }
  0x15   :  { %8803 = vst [vmem:[#allocation17_spill] sm:$0xff] %v6724_v46  ;;  %v6774_v56 = vld [vmem:[%s8679_s15] ss:$0 sm:$0xff] }
  0x16   :  { %8804 = vst [vmem:[#allocation18_spill] sm:$0xff] %v6729_v47  ;;  %v168_v57 = vld [vmem:[%s8686_s0] sm:$0xff]  }
  0x17   :  { %8805 = vst [vmem:[#allocation19_spill] sm:$0xff] %v6734_v48 }
  0x18   :  { %8806 = vst [vmem:[#allocation20_spill] sm:$0xff] %v6739_v49 }
  0x19   :  { %8807 = vst [vmem:[#allocation21_spill] sm:$0xff] %v6744_v50 }
  0x1a   :  { %8808 = vst [vmem:[#allocation22_spill] sm:$0xff] %v6749_v51  ;;  %v6794_v51 = vmov 0.0  }
  0x1b   :  { %8809 = vst [vmem:[#allocation23_spill] sm:$0xff] %v6754_v52 }
  0x1c   :  { %8810 = vst [vmem:[#allocation24_spill] sm:$0xff] %v6759_v53 }
  0x1d   :  { %8811 = vst [vmem:[#allocation25_spill] sm:$0xff] %v6764_v54 }
  0x1e   :  { %8812 = vst [vmem:[#allocation26_spill] sm:$0xff] %v6769_v55 }
  0x1f   :  { %8813 = vst [vmem:[#allocation27_spill] sm:$0xff] %v6774_v56  ;;  %v6792_v56 = vmov 0.0  }
  0x7b   :  { %v151_v60 = vpop.permute.xlu0 %150  ;;  %v155_v61 = vpop.permute.xlu1 %154 }
  0x7c   :  { %v160_v62 = vsel %vm159_vm0, 0.0, %v151_v60  ;;  %v162_v63 = vsel %vm159_vm0, 0.0, %v155_v61 }
  0x7d   :  { %164 = vst.msk [vmem:[#allocation2] sm:$0xff] %vm163_vm1, %v160_v62 }
  0x7e   :  { %167 = vst.msk [vmem:[#allocation2 + $0x10] sm:$0xf] %vm166_vm2, %v162_v63 }
  0x83   :  { %v153_v0 = vpop.permute.xlu0 %152 }
  0x84   :  { %v161_v1 = vsel %vm159_vm0, 0.0, %v153_v0 }
  0x85   :  { %165 = vst.msk [vmem:[#allocation2 + $0x8] sm:$0xff] %vm163_vm1, %v161_v1 }
  0x86 LB: > { %v8814_v55 = vld [vmem:[#allocation26_spill] sm:$0xff]  ;;  %v8815_v54 = vld [vmem:[#allocation25_spill] sm:$0xff]  ;;  %v8816_v53 = vld [vmem:[#allocation24_spill] sm:$0xff]  ;;  %8821 = vst [vmem:[#allocation28_spill] sm:$0xff] %v6359_v59  ;;  %vm184_vm3 = vcmask 64512   ;;  %295 = vmatpush.msra.mxu0 %v6529_v7  ;;  %561 = vmatpush.msra.mxu1 %v6564_v14  ;;  %vm191_vm4 = vcmask 60416   ;;  %s6371_s14 = sphi %s6802_s14, %s176_s14   ;;  %v6367_v57 = vphi %v168_v57, %v8914_v57   ;;  %v6363_v58 = vphi %v169_v58, %v2843_v58   ;;  %v6359_v59 = vphi %v170_v59, %v2844_v59   ;;  %v6355_v51 = vphi %v6794_v51, %v8913_v51   ;;  %v6351_v56 = vphi %v6792_v56, %v8912_v56   ;;  %v6347_v2 = vphi %v6790_v2, %v8911_v2  }
  0x87   : > { %v8817_v52 = vld [vmem:[#allocation23_spill] sm:$0xff]  ;;  %v8820_v11 = vld [vmem:[#allocation6_spill] sm:$0xff]  ;;  %8822 = vst [vmem:[#allocation29_spill] sm:$0xff] %v6363_v58  ;;  %599 = vmatpush.msra.mxu2 %v6584_v18  ;;  %647 = vmatpush.msra.mxu3 %v6624_v26  ;;  %v185_v60 = vsel %vm184_vm3, %v6367_v57, 0.0  ;;  %v192_v61 = vsel %vm191_vm4, %v6359_v59, 0.0  ;;  %v188_v62 = vsel %vm184_vm3, %v6363_v58, 0.0 }
  0x88   : > { %v8818_v8 = vld [vmem:[#allocation3_spill] sm:$0xff]  ;;  %8823 = vst [vmem:[#allocation30_spill] sm:$0xff] %v6367_v57  ;;  %296 = vmatpush.msra.mxu0 %v6524_v6  ;;  %562 = vmatpush.msra.mxu1 %v6559_v13  ;;  %v8824_v45 = vld [vmem:[#allocation16_spill] sm:$0xff]  ;;  %v8829_v43 = vld [vmem:[#allocation14_spill] sm:$0xff]  ;;  %v6402_v63 = vmov 8.0   ;;  %s6403_s15 = smov 104  }
  0x89   : > { %v8819_v12 = vld [vmem:[#allocation7_spill] sm:$0xff]  ;;  %186 = vadd.xlane.f32.xlu0 %v185_v60  ;;  %193 = vadd.xlane.f32.xlu1 %v192_v61  ;;  %v8825_v38 = vld [vmem:[#allocation12_spill] sm:$0xff]  ;;  %v8831_v36 = vld [vmem:[#allocation10_spill] sm:$0xff]  ;;  %6045 = vrcp.f32 %v6402_v63  ;;  %vm274_vm9 = vcmask 326656   ;;  %s6404_s18 = smov 32   ;;  %s6405_s4 = smov 64  }
  0x8a   : > { %297 = vmatpush.msra.mxu0 %v6519_v5  ;;  %563 = vmatpush.msra.mxu1 %v8819_v12  ;;  %v8826_v44 = vld [vmem:[#allocation15_spill] sm:$0xff]  ;;  %v8827_v49 = vld [vmem:[#allocation20_spill] sm:$0xff]  ;;  %v8832_v42 = vld [vmem:[#allocation13_spill] sm:$0xff]  ;;  %s6406_s19 = smov 96   ;;  %s5662_s7 = smul.u32 96, %s6371_s14 }
  0x8b   : > { %600 = vmatpush.msra.mxu2 %v6579_v17  ;;  %648 = vmatpush.msra.mxu3 %v6619_v25  ;;  %v8828_v37 = vld [vmem:[#allocation11_spill] sm:$0xff]  ;;  %v8833_v47 = vld [vmem:[#allocation18_spill] sm:$0xff]  ;;  %v8834_v35 = vld [vmem:[#allocation9_spill] sm:$0xff]  ;;  %s176_s14 = sadd.s32 1, %s6371_s14  }
  0x8c   : > { %298 = vmatpush.msra.mxu0 %v6514_v4  ;;  %564 = vmatpush.msra.mxu1 %v8820_v11  ;;  %v8830_v48 = vld [vmem:[#allocation19_spill] sm:$0xff]  ;;  %v8835_v46 = vld [vmem:[#allocation17_spill] sm:$0xff]  ;;  %v8839_v9 = vld [vmem:[#allocation4_spill] sm:$0xff]  ;;  %s7081_s8 = scalar_lea.vmem %s8675_s16, %s5662_s7  ;;  %p173_p0 = scmp.ge.s32.totalorder %s176_s14, 5  }
  0x8d   : > { %601 = vmatpush.msra.mxu2 %v6574_v16  ;;  %649 = vmatpush.msra.mxu3 %v6614_v24  ;;  %v8838_v10 = vld [vmem:[#allocation5_spill] sm:$0xff]  ;;  %s7750_s26 = smov (%p173_p0), 0  }
  0x8e   : > { %299 = vmatpush.msra.mxu0 %v6509_v3  ;;  %685 = vmatpush.msrb.mxu1 %v6654_v32 }
  0x8f   : > { %602 = vmatpush.msra.mxu2 %v6569_v15  ;;  %650 = vmatpush.msra.mxu3 %v6609_v23  ;;  %v6046_v0 = vpop.eup %6045 }
  0x90   : > { %686 = vmatpush.msrb.mxu1 %v6649_v31  ;;  %766 = vmatpush.msrb.mxu0 %v8824_v45  ;;  %v196_v1 = vmul.f32 8.0, %v6046_v0  ;;  %vm200_vm5 = vweird.f32 %v6046_v0 }
  0x91   : > { %726 = vmatpush.msrb.mxu2 %v6694_v40  ;;  %189 = vadd.xlane.f32.xlu0 %v188_v62 }
  0x92   : > { %651 = vmatpush.msra.mxu3 %v6604_v22  ;;  %687 = vmatpush.msrb.mxu1 %v6644_v30  ;;  %v197_v60 = vsub.f32 1.0, %v196_v1 }
  0x93   : > { %727 = vmatpush.msrb.mxu2 %v6689_v39  ;;  %767 = vmatpush.msrb.mxu0 %v8826_v44 }
  0x94   : > { %652 = vmatpush.msra.mxu3 %v6599_v21  ;;  %688 = vmatpush.msrb.mxu1 %v6639_v29  ;;  %v198_v61 = vmul.f32 %v6046_v0, %v197_v60 }
  0x95   : > { %728 = vmatpush.msrb.mxu2 %v8825_v38  ;;  %768 = vmatpush.msrb.mxu0 %v8829_v43 }
  0x96   : > { %804 = vmatpush.msrb.mxu3 %v8827_v49  ;;  %689 = vmatpush.msrb.mxu1 %v6634_v28  ;;  %v199_v62 = vadd.f32 %v6046_v0, %v198_v61 }
  0x97   : > { %729 = vmatpush.msrb.mxu2 %v8828_v37  ;;  %769 = vmatpush.msrb.mxu0 %v8832_v42 }
  0x98   : > { %805 = vmatpush.msrb.mxu3 %v8830_v48  ;;  %690 = vmatpush.msrb.mxu1 %v6629_v27  ;;  %v6872_v48 = vsel %vm200_vm5, %v6046_v0, %v199_v62 }
  0x99   : > { %730 = vmatpush.msrb.mxu2 %v8831_v36  ;;  %8836 = vst [vmem:[#allocation31_spill] sm:$0xff] %v6872_v48 }
  0x9a   : > { %806 = vmatpush.msrb.mxu3 %v8833_v47 }
  0x9b   : > { %731 = vmatpush.msrb.mxu2 %v8834_v35 }
  0x9c   : > { %807 = vmatpush.msrb.mxu3 %v8835_v46 }
  0xa5   : > { %262 = vrot.lane.b32.xlu0 %v6355_v51, %s6403_s15 }
  0xfc   : > { %v187_v49 = vpop.xlane.xlu0 %186  ;;  %v194_v43 = vpop.xlane.xlu1 %193 }
  0xfd   : > { %v202_v47 = vmul.f32 %v6872_v48, %v187_v49  ;;  %v204_v60 = vmul.f32 %v6872_v48, %v194_v43 }
  0xff   : > { %v205_v42 = vsub.f32 %v6367_v57, %v202_v47  ;;  %v6881_v0 = vsub.f32 %v6359_v59, %v204_v60 }
 0x101   : > { %v208_v46 = vmul.f32 %v205_v42, %v205_v42  ;;  %v210_v47 = vmul.f32 %v6881_v0, %v6881_v0 }
 0x103   : > { %v211_v63 = vsel %vm184_vm3, %v208_v46, 0.0  ;;  %v217_v46 = vsel %vm191_vm4, %v210_v47, 0.0 }
 0x104   : > { %v190_v44 = vpop.xlane.xlu0 %189  ;;  %212 = vadd.xlane.f32.xlu1 %v211_v63 }
 0x105   : > { %v203_v1 = vmul.f32 %v6872_v48, %v190_v44 }
 0x107   : > { %v206_v61 = vsub.f32 %v6363_v58, %v203_v1 }
 0x109   : > { %v209_v45 = vmul.f32 %v206_v61, %v206_v61 }
 0x10b   : > { %v214_v49 = vsel %vm184_vm3, %v209_v45, 0.0 }
 0x10c   : > { %215 = vadd.xlane.f32.xlu2 %v214_v49 }
 0x114   : > { %218 = vadd.xlane.f32.xlu2 %v217_v46 }
 0x11d   : > { %264 = vrot.lane.b32.xlu1 %v6351_v56, %s6403_s15 }
 0x12c   : > { %266 = vrot.lane.b32.xlu2 %v6347_v2, %s6403_s15 }
 0x177   : > { %v213_v43 = vpop.xlane.xlu1 %212 }
 0x178   : > { %v220_v44 = vmul.f32 %v213_v43, %v6872_v48 }
 0x17a   : > { %v223_v62 = vadd.f32 1e-05, %v220_v44 }
 0x17c   : > { %6047 = vrsqrt.f32 %v223_v62  ;;  %vm232_vm7 = vweird.f32 %v223_v62 }
 0x17f   : > { %v216_v63 = vpop.xlane.xlu2 %215 }
 0x180   : > { %v221_v45 = vmul.f32 %v216_v63, %v6872_v48  ;;  %v263_v63 = vpop.permute.xlu0 %262 }
 0x182   : > { %v6048_v1 = vpop.eup %6047  ;;  %v224_v60 = vadd.f32 1e-05, %v221_v45 }
 0x183   : > { %v227_v49 = vmul.f32 %v6048_v1, %v223_v62  ;;  %vm233_vm6 = vweird.f32 %v6048_v1 }
 0x184   : > { %6049 = vrsqrt.f32 %v224_v60  ;;  %vm234_vm8 = vmor %vm232_vm7, %vm233_vm6  ;;  %vm242_vm11 = vweird.f32 %v224_v60 }
 0x185   : > { %v228_v47 = vmul.f32 %v6048_v1, %v227_v49 }
 0x187   : > { %v229_v46 = vmul.f32 0.5, %v228_v47  ;;  %v219_v59 = vpop.xlane.xlu2 %218 }
 0x188   : > { %v222_v58 = vmul.f32 %v219_v59, %v6872_v48 }
 0x189   : > { %v230_v57 = vsub.f32 1.5, %v229_v46 }
 0x18a   : > { %v6050_v50 = vpop.eup %6049  ;;  %v225_v35 = vadd.f32 1e-05, %v222_v58 }
 0x18b   : > { %v231_v36 = vmul.f32 %v6048_v1, %v230_v57  ;;  %v237_v43 = vmul.f32 %v6050_v50, %v224_v60  ;;  %vm243_vm10 = vweird.f32 %v6050_v50 }
 0x18c   : > { %6051 = vrsqrt.f32 %v225_v35  ;;  %vm244_vm12 = vmor %vm242_vm11, %vm243_vm10  ;;  %vm252_vm14 = vweird.f32 %v225_v35 }
 0x18d   : > { %v238_v44 = vmul.f32 %v6050_v50, %v237_v43  ;;  %v235_v37 = vsel %vm234_vm8, %v6048_v1, %v231_v36 }
 0x18e   : > { %v256_v45 = vmul.f32 %v235_v37, %v205_v42 }
 0x18f   : > { %v239_v38 = vmul.f32 0.5, %v238_v44  ;;  %v265_v36 = vpop.permute.xlu1 %264  ;;  %v267_v43 = vpop.permute.xlu2 %266 }
 0x190   : > { %v271_v49 = vsel %vm184_vm3, %v256_v45, %v263_v63 }
 0x191   : > { %v240_v47 = vsub.f32 1.5, %v239_v38  ;;  %5632 = vmatmul.msk.f32.vlgmr.msra.gmra.mxu0 %vm274_vm9, %v271_v49 }
 0x192   : > { %v6052_v59 = vpop.eup %6051  ;;  %1221 = vmatpush.msra.mxu0 %v6564_v14 }
 0x193   : > { %v241_v57 = vmul.f32 %v6050_v50, %v240_v47  ;;  %v247_v58 = vmul.f32 %v6052_v59, %v225_v35  ;;  %vm253_vm13 = vweird.f32 %v6052_v59 }
 0x194   : > { %1222 = vmatpush.msra.mxu0 %v6559_v13  ;;  %vm254_vm15 = vmor %vm252_vm14, %vm253_vm13 }
 0x195   : > { %v248_v62 = vmul.f32 %v6052_v59, %v247_v58  ;;  %v245_v37 = vsel %vm244_vm12, %v6050_v50, %v241_v57 }
 0x196   : > { %v257_v42 = vmul.f32 %v245_v37, %v206_v61  ;;  %1223 = vmatpush.msra.mxu0 %v8819_v12 }
 0x197   : > { %v249_v1 = vmul.f32 0.5, %v248_v62 }
 0x198   : > { %v272_v38 = vsel %vm184_vm3, %v257_v42, %v265_v36  ;;  %1224 = vmatpush.msra.mxu0 %v8820_v11 }
 0x199   : > { %v250_v46 = vsub.f32 1.5, %v249_v1  ;;  %5633 = vmatmul.msk.f32.gmra.mxu0 %vm274_vm9, %v272_v38 }
 0x19b   : > { %v251_v60 = vmul.f32 %v6052_v59, %v250_v46 }
 0x19d   : > { %v255_v44 = vsel %vm254_vm15, %v6052_v59, %v251_v60 }
 0x19e   : > { %v258_v63 = vmul.f32 %v255_v44, %v6881_v0 }
 0x1a0   : > { %v273_v50 = vsel %vm184_vm3, %v258_v63, %v267_v43 }
 0x1a1   : > { %5634 = vmatmul.msk.f32.gmra.mxu0 %vm274_vm9, %v273_v50 }
 0x20e   : > { %v301_v61 = vpop.f32.mrf.mxu0 }
 0x20f   : > { %v6906_v45 = vadd.f32 %v8818_v8, %v301_v61 }
 0x211   : > { %370 = vrot.lane.b32.xlu0 %v6906_v45, %s6404_s18  ;;  %v5635_v62 = vmul.f32 -1.442695, %v6906_v45 }
 0x216   : > { %v304_v49 = vpop.f32.mrf.mxu0 }
 0x217   : > { %v6911_v35 = vadd.f32 %v8818_v8, %v304_v49 }
 0x219   : > { %372 = vrot.lane.b32.xlu2 %v6911_v35, %s6404_s18  ;;  %v5636_v59 = vmul.f32 -1.442695, %v6911_v35 }
 0x21b   : > { %6053 = vpow2.f32 %v5636_v59 }
 0x21e   : > { %v307_v0 = vpop.f32.mrf.mxu0 }
 0x21f   : > { %v6916_v47 = vadd.f32 %v8818_v8, %v307_v0 }
 0x221   : > { %374 = vrot.lane.b32.xlu1 %v6916_v47, %s6404_s18  ;;  %v6054_v57 = vpop.eup %6053  ;;  %v5637_v46 = vmul.f32 -1.442695, %v6916_v47 }
 0x222   : > { %v320_v58 = vadd.f32 1.0, %v6054_v57 }
 0x224   : > { %6055 = vrcp.f32 %v320_v58  ;;  %v348_v63 = vand.u32 2147483648, %v320_v58  ;;  %vm342_vm5 = vweird.f32 %v320_v58  ;;  %v346_v50 = vand.u32 2147483647, %v320_v58 }
 0x225   : > { %6057 = vpow2.f32 %v5635_v62 }
 0x226   : > { %v349_v59 = vor.u32 1.1754944e-38, %v348_v63  ;;  %vm347_vm7 = vcmp.eq.f32.partialorder %v346_v50, 8.507059e+37 }
 0x22a   : > { %v6056_v36 = vpop.eup %6055 }
 0x22b   : > { %v6058_v37 = vpop.eup %6057  ;;  %v338_v42 = vmul.f32 %v6056_v36, %v320_v58  ;;  %vm343_vm2 = vweird.f32 %v6056_v36 }
 0x22c   : > { %v319_v1 = vadd.f32 1.0, %v6058_v37  ;;  %vm344_vm6 = vmor %vm342_vm5, %vm343_vm2  ;;  %vm442_vm5 = vcmask 257024  }
 0x22d   : > { %v339_v38 = vsub.f32 1.0, %v338_v42 }
 0x22e   : > { %6059 = vrcp.f32 %v319_v1  ;;  %v333_v58 = vand.u32 2147483648, %v319_v1  ;;  %vm327_vm10 = vweird.f32 %v319_v1  ;;  %v331_v12 = vand.u32 2147483647, %v319_v1 }
 0x22f   : > { %v340_v60 = vmul.f32 %v6056_v36, %v339_v38  ;;  %6061 = vpow2.f32 %v5637_v46 }
 0x230   : > { %v334_v63 = vor.u32 1.1754944e-38, %v333_v58  ;;  %vm332_vm12 = vcmp.eq.f32.partialorder %v331_v12, 8.507059e+37 }
 0x231   : > { %v341_v43 = vadd.f32 %v6056_v36, %v340_v60 }
 0x233   : > { %v345_v49 = vsel %vm344_vm6, %v6056_v36, %v341_v43 }
 0x234   : > { %v6060_v44 = vpop.eup %6059  ;;  %v350_v62 = vsel %vm347_vm7, %v349_v59, %v345_v49 }
 0x235   : > { %v6062_v61 = vpop.eup %6061  ;;  %v323_v0 = vmul.f32 %v6060_v44, %v319_v1  ;;  %vm328_vm8 = vweird.f32 %v6060_v44 }
 0x236   : > { %v321_v57 = vadd.f32 1.0, %v6062_v61  ;;  %vm329_vm11 = vmor %vm327_vm10, %vm328_vm8 }
 0x237   : > { %v324_v11 = vsub.f32 1.0, %v323_v0 }
 0x238   : > { %6063 = vrcp.f32 %v321_v57  ;;  %vm357_vm14 = vweird.f32 %v321_v57 }
 0x239   : > { %v325_v38 = vmul.f32 %v6060_v44, %v324_v11  ;;  %v363_v11 = vand.u32 2147483648, %v321_v57 }
 0x23b   : > { %v326_v46 = vadd.f32 %v6060_v44, %v325_v38  ;;  %v364_v1 = vor.u32 1.1754944e-38, %v363_v11 }
 0x23d   : > { %v330_v36 = vsel %vm329_vm11, %v6060_v44, %v326_v46 }
 0x23e   : > { %v6064_v60 = vpop.eup %6063  ;;  %v335_v61 = vsel %vm332_vm12, %v334_v63, %v330_v36 }
 0x23f   : > { %v353_v43 = vmul.f32 %v6064_v60, %v321_v57  ;;  %vm358_vm13 = vweird.f32 %v6064_v60 }
 0x240   : > { %vm359_vm15 = vmor %vm357_vm14, %vm358_vm13 }
 0x241   : > { %v354_v0 = vsub.f32 1.0, %v353_v43 }
 0x243   : > { %v355_v59 = vmul.f32 %v6064_v60, %v354_v0 }
 0x273   : > { %v373_v37 = vpop.permute.xlu2 %372 }
 0x274   : > { %v380_v42 = vmul.f32 %v373_v37, %v350_v62  ;;  %v356_v37 = vadd.f32 %v6064_v60, %v355_v59 }
 0x276   : > { %387 = vrot.lane.b32.xlu2 %v380_v42, %s6405_s4  ;;  %v361_v42 = vand.u32 2147483647, %v321_v57  ;;  %v360_v38 = vsel %vm359_vm15, %v6064_v60, %v356_v37  ;;  %v419_v37 = vmul.f32 %v6351_v56, %v350_v62 }
 0x278   : > { %vm362_vm2 = vcmp.eq.f32.partialorder %v361_v42, 8.507059e+37 }
 0x279   : > { %v365_v46 = vsel %vm362_vm2, %v364_v1, %v360_v38  ;;  %v418_v1 = vmul.f32 %v6355_v51, %v335_v61 }
 0x27a   : > { %v420_v56 = vmul.f32 %v6347_v2, %v365_v46 }
 0x283   : > { %v371_v50 = vpop.permute.xlu0 %370 }
 0x284   : > { %v379_v49 = vmul.f32 %v371_v50, %v335_v61 }
 0x286   : > { %385 = vrot.lane.b32.xlu0 %v379_v49, %s6405_s4 }
 0x293   : > { %v375_v44 = vpop.permute.xlu1 %374 }
 0x294   : > { %v381_v58 = vmul.f32 %v375_v44, %v365_v46 }
 0x296   : > { %389 = vrot.lane.b32.xlu1 %v381_v58, %s6405_s4  ;;  %v402_v58 = vsub.f32 1.0, %v365_v46 }
 0x2d0   : > { %v388_v12 = vpop.permute.xlu2 %387 }
 0x2d1   : > { %v395_v36 = vadd.f32 %v388_v12, %v6911_v35  ;;  %v401_v35 = vsub.f32 1.0, %v350_v62 }
 0x2d3   : > { %6065 = vtanh.f32 %v395_v36 }
 0x2d9   : > { %v6066_v43 = vpop.eup %6065 }
 0x2da   : > { %408 = vrot.lane.b32.xlu2 %v6066_v43, %s6406_s19 }
 0x2f8   : > { %v386_v63 = vpop.permute.xlu0 %385 }
 0x2f9   : > { %v394_v57 = vadd.f32 %v386_v63, %v6906_v45  ;;  %v400_v45 = vsub.f32 1.0, %v335_v61 }
 0x2fb   : > { %6067 = vtanh.f32 %v394_v57  ;;  %v6407_v57 = vmov 32.0  }
 0x301   : > { %v6068_v60 = vpop.eup %6067 }
 0x302   : > { %406 = vrot.lane.b32.xlu0 %v6068_v60, %s6406_s19 }
 0x308   : > { %v390_v50 = vpop.permute.xlu1 %389 }
 0x309   : > { %v396_v49 = vadd.f32 %v390_v50, %v6916_v47 }
 0x30b   : > { %6069 = vtanh.f32 %v396_v49 }
 0x30c   : > { %6071 = vrcp.f32 %v6407_v57 }
 0x311   : > { %v6070_v0 = vpop.eup %6069 }
 0x312   : > { %410 = vrot.lane.b32.xlu1 %v6070_v0, %s6406_s19  ;;  %v6072_v60 = vpop.eup %6071 }
 0x313   : > { %v447_v50 = vmul.f32 32.0, %v6072_v60  ;;  %vm451_vm6 = vweird.f32 %v6072_v60 }
 0x315   : > { %v448_v2 = vsub.f32 1.0, %v447_v50 }
 0x317   : > { %v449_v0 = vmul.f32 %v6072_v60, %v448_v2 }
 0x334   : > { %v409_v59 = vpop.permute.xlu2 %408 }
 0x335   : > { %v416_v11 = vmul.f32 %v409_v59, %v401_v35  ;;  %v450_v35 = vadd.f32 %v6072_v60, %v449_v0 }
 0x337   : > { %v6933_v42 = vadd.f32 %v419_v37, %v416_v11  ;;  %v6950_v59 = vsel %vm451_vm6, %v6072_v60, %v450_v35 }
 0x338   : > { %v8837_v37 = vmov %v6950_v59 }
 0x339   : > { %429 = vrot.lane.b32.xlu2 %v6933_v42, %s6406_s19 }
 0x374   : > { %v407_v38 = vpop.permute.xlu0 %406 }
 0x375   : > { %v415_v44 = vmul.f32 %v407_v38, %v400_v45 }
 0x377   : > { %v6938_v47 = vadd.f32 %v418_v1, %v415_v44 }
 0x379   : > { %427 = vrot.lane.b32.xlu0 %v6938_v47, %s6406_s19 }
 0x384   : > { %v411_v12 = vpop.permute.xlu1 %410 }
 0x385   : > { %v417_v62 = vmul.f32 %v411_v12, %v402_v58 }
 0x387   : > { %v6943_v36 = vadd.f32 %v420_v56, %v417_v62 }
 0x389   : > { %431 = vrot.lane.b32.xlu1 %v6943_v36, %s6406_s19 }
 0x393   : > { %v430_v43 = vpop.permute.xlu2 %429 }
 0x394   : > { %v439_v63 = vsel %vm159_vm0, %v430_v43, 0.0 }
 0x395   : > { %440 = vadd.xlane.f32.xlu2 %v439_v63 }
 0x3eb   : > { %v428_v51 = vpop.permute.xlu0 %427 }
 0x3ec   : > { %v436_v61 = vsel %vm159_vm0, %v428_v51, 0.0 }
 0x3ed   : > { %437 = vadd.xlane.f32.xlu0 %v436_v61 }
 0x3fb   : > { %v432_v46 = vpop.permute.xlu1 %431 }
 0x3fc   : > { %v443_v49 = vsel %vm442_vm5, %v432_v46, 0.0 }
 0x3fd   : > { %444 = vadd.xlane.f32.xlu1 %v443_v49 }
 0x408   : > { %v441_v11 = vpop.xlane.xlu2 %440 }
 0x409   : > { %v454_v45 = vmul.f32 %v8837_v37, %v441_v11 }
 0x40b   : > { %v457_v38 = vsub.f32 %v6933_v42, %v454_v45 }
 0x40d   : > { %v460_v1 = vmul.f32 %v457_v38, %v457_v38 }
 0x40f   : > { %467 = vrot.lane.b32.xlu2 %v460_v1, %s6406_s19 }
 0x460   : > { %v438_v44 = vpop.xlane.xlu0 %437 }
 0x461   : > { %v453_v58 = vmul.f32 %v8837_v37, %v438_v44 }
 0x463   : > { %v456_v12 = vsub.f32 %v6938_v47, %v453_v58 }
 0x465   : > { %v459_v56 = vmul.f32 %v456_v12, %v456_v12 }
 0x467   : > { %465 = vrot.lane.b32.xlu0 %v459_v56, %s6406_s19 }
 0x469   : > { %v468_v62 = vpop.permute.xlu2 %467 }
 0x46a   : > { %v477_v43 = vsel %vm159_vm0, %v468_v62, 0.0 }
 0x46b   : > { %478 = vadd.xlane.f32.xlu2 %v477_v43 }
 0x470   : > { %v445_v63 = vpop.xlane.xlu1 %444 }
 0x471   : > { %v455_v51 = vmul.f32 %v8837_v37, %v445_v63 }
 0x473   : > { %v6961_v61 = vsub.f32 %v6943_v36, %v455_v51 }
 0x475   : > { %v461_v57 = vmul.f32 %v6961_v61, %v6961_v61 }
 0x477   : > { %469 = vrot.lane.b32.xlu1 %v461_v57, %s6406_s19 }
 0x483   : > { %528 = vrot.lane.b32.xlu2 %v8838_v10, %s6404_s18 }
 0x4d9   : > { %v466_v60 = vpop.permute.xlu0 %465 }
 0x4da   : > { %v474_v50 = vsel %vm159_vm0, %v466_v60, 0.0 }
 0x4db   : > { %475 = vadd.xlane.f32.xlu0 %v474_v50 }
 0x4de   : > { %v479_v49 = vpop.xlane.xlu2 %478 }
 0x4df   : > { %v484_v0 = vmul.f32 %v479_v49, %v8837_v37 }
 0x4e1   : > { %v487_v35 = vadd.f32 1e-05, %v484_v0 }
 0x4e3   : > { %6073 = vrsqrt.f32 %v487_v35  ;;  %vm505_vm8 = vweird.f32 %v487_v35 }
 0x4e9   : > { %v470_v2 = vpop.permute.xlu1 %469  ;;  %v6074_v59 = vpop.eup %6073 }
 0x4ea   : > { %v480_v46 = vsel %vm442_vm5, %v470_v2, 0.0  ;;  %v500_v11 = vmul.f32 %v6074_v59, %v487_v35  ;;  %vm506_vm7 = vweird.f32 %v6074_v59 }
 0x4eb   : > { %481 = vadd.xlane.f32.xlu1 %v480_v46  ;;  %vm507_vm10 = vmor %vm505_vm8, %vm506_vm7 }
 0x4ec   : > { %v501_v45 = vmul.f32 %v6074_v59, %v500_v11 }
 0x4ee   : > { %v502_v58 = vmul.f32 0.5, %v501_v45 }
 0x4ef   : > { %522 = vrot.lane.b32.xlu0 %v8839_v9, %s6404_s18 }
 0x4f0   : > { %v503_v62 = vsub.f32 1.5, %v502_v58 }
 0x4f2   : > { %v504_v63 = vmul.f32 %v6074_v59, %v503_v62 }
 0x4f4   : > { %v508_v60 = vsel %vm507_vm10, %v6074_v59, %v504_v63 }
 0x4f5   : > { %v520_v0 = vmul.f32 %v508_v60, %v457_v38 }
 0x54e   : > { %v476_v1 = vpop.xlane.xlu0 %475 }
 0x54f   : > { %v483_v44 = vmul.f32 %v476_v1, %v8837_v37  ;;  %v6977_v1 = vpop.permute.xlu2 %528 }
 0x551   : > { %v486_v56 = vadd.f32 1e-05, %v483_v44 }
 0x553   : > { %6075 = vrsqrt.f32 %v486_v56  ;;  %vm495_vm12 = vweird.f32 %v486_v56 }
 0x559   : > { %v6076_v43 = vpop.eup %6075 }
 0x55a   : > { %v490_v51 = vmul.f32 %v6076_v43, %v486_v56  ;;  %vm496_vm11 = vweird.f32 %v6076_v43 }
 0x55b   : > { %vm497_vm13 = vmor %vm495_vm12, %vm496_vm11 }
 0x55c   : > { %v491_v57 = vmul.f32 %v6076_v43, %v490_v51 }
 0x55e   : > { %v492_v50 = vmul.f32 0.5, %v491_v57  ;;  %v482_v2 = vpop.xlane.xlu1 %481 }
 0x55f   : > { %v485_v46 = vmul.f32 %v482_v2, %v8837_v37 }
 0x560   : > { %v493_v49 = vsub.f32 1.5, %v492_v50 }
 0x561   : > { %v488_v11 = vadd.f32 1e-05, %v485_v46  ;;  %v6975_v45 = vpop.permute.xlu0 %522 }
 0x562   : > { %v494_v44 = vmul.f32 %v6076_v43, %v493_v49  ;;  %v526_v58 = vmul.f32 %v6975_v45, %v520_v0 }
 0x563   : > { %6077 = vrsqrt.f32 %v488_v11  ;;  %vm515_vm15 = vweird.f32 %v488_v11 }
 0x564   : > { %v498_v35 = vsel %vm497_vm13, %v6076_v43, %v494_v44  ;;  %v532_v59 = vadd.f32 %v6977_v1, %v526_v58 }
 0x565   : > { %v519_v62 = vmul.f32 %v498_v35, %v456_v12 }
 0x566   : > { %539 = vrot.lane.b32.xlu0 %v532_v59, %s6406_s19 }
 0x567   : > { %v525_v63 = vmul.f32 %v6975_v45, %v519_v62 }
 0x569   : > { %v6078_v38 = vpop.eup %6077  ;;  %v531_v51 = vadd.f32 %v6977_v1, %v525_v63 }
 0x56a   : > { %v510_v57 = vmul.f32 %v6078_v38, %v488_v11  ;;  %vm516_vm14 = vweird.f32 %v6078_v38 }
 0x56b   : > { %537 = vrot.lane.b32.xlu1 %v531_v51, %s6406_s19  ;;  %vm517_vm2 = vmor %vm515_vm15, %vm516_vm14 }
 0x56c   : > { %v511_v60 = vmul.f32 %v6078_v38, %v510_v57 }
 0x56e   : > { %v512_v56 = vmul.f32 0.5, %v511_v60 }
 0x570   : > { %v513_v50 = vsub.f32 1.5, %v512_v56 }
 0x572   : > { %v514_v2 = vmul.f32 %v6078_v38, %v513_v50 }
 0x574   : > { %v518_v43 = vsel %vm517_vm2, %v6078_v38, %v514_v2 }
 0x575   : > { %v521_v12 = vmul.f32 %v518_v43, %v6961_v61 }
 0x577   : > { %v527_v46 = vmul.f32 %v6975_v45, %v521_v12 }
 0x579   : > { %v533_v49 = vadd.f32 %v6977_v1, %v527_v46 }
 0x57b   : > { %541 = vrot.lane.b32.xlu0 %v533_v49, %s6406_s19 }
 0x5d8   : > { %v540_v11 = vpop.permute.xlu0 %539 }
 0x5dd   : > { %v538_v0 = vpop.permute.xlu1 %537 }
 0x5de   : > { %5638 = vmatmul.msk.f32.vlgmr.msra.gmra.mxu1 %vm159_vm0, %v538_v0 }
 0x5df   : > { %845 = vmatpush.msra.mxu1 %v8814_v55 }
 0x5e1   : > { %846 = vmatpush.msra.mxu1 %v8815_v54 }
 0x5e3   : > { %847 = vmatpush.msra.mxu1 %v8816_v53 }
 0x5e5   : > { %848 = vmatpush.msra.mxu1 %v8817_v52 }
 0x5e6   : > { %5639 = vmatmul.msk.f32.gmra.mxu1 %vm159_vm0, %v540_v11 }
 0x5ed   : > { %v542_v61 = vpop.permute.xlu0 %541 }
 0x5ee   : > { %5640 = vmatmul.msk.f32.gmra.mxu1 %vm159_vm0, %v542_v61 }
 0x65b   : > { %v566_v44 = vpop.f32.mrf.mxu1 }
 0x65c   : > { %v567_v58 = vadd.f32 %v6589_v19, %v566_v44 }
 0x65e   : > { %v575_v35 = vmax.f32 %v567_v58, 0.0 }
 0x660   : > { %5641 = vmatmul.msk.f32.vlgmr.msra.gmra.mxu2 %vm159_vm0, %v575_v35 }
 0x661   : > { %969 = vmatpush.msra.mxu2 %v6529_v7 }
 0x663   : > { %v569_v59 = vpop.f32.mrf.mxu1  ;;  %970 = vmatpush.msra.mxu2 %v6524_v6 }
 0x664   : > { %v570_v62 = vadd.f32 %v6589_v19, %v569_v59 }
 0x665   : > { %971 = vmatpush.msra.mxu2 %v6519_v5 }
 0x666   : > { %v576_v63 = vmax.f32 %v570_v62, 0.0 }
 0x667   : > { %972 = vmatpush.msra.mxu2 %v6514_v4 }
 0x668   : > { %5642 = vmatmul.msk.f32.gmra.mxu2 %vm159_vm0, %v576_v63 }
 0x669   : > { %973 = vmatpush.msra.mxu2 %v6509_v3 }
 0x66b   : > { %v572_v38 = vpop.f32.mrf.mxu1 }
 0x66c   : > { %v573_v51 = vadd.f32 %v6589_v19, %v572_v38 }
 0x66e   : > { %v577_v57 = vmax.f32 %v573_v51, 0.0 }
 0x670   : > { %5643 = vmatmul.msk.f32.gmra.mxu2 %vm159_vm0, %v577_v57 }
 0x6e3   : > { %v604_v60 = vpop.f32.mrf.mxu2 }
 0x6e4   : > { %v605_v56 = vadd.f32 %v6594_v20, %v604_v60 }
 0x6e6   : > { %v613_v50 = vmax.f32 %v605_v56, 0.0 }
 0x6e8   : > { %v619_v2 = vadd.f32 %v613_v50, %v538_v0 }
 0x6ea   : > { %622 = vst.msk [vmem:[#allocation2] sm:$0xff] %vm159_vm0, %v619_v2 }
 0x6eb   : > { %v607_v43 = vpop.f32.mrf.mxu2 }
 0x6ec   : > { %v608_v12 = vadd.f32 %v6594_v20, %v607_v43 }
 0x6ee   : > { %v614_v46 = vmax.f32 %v608_v12, 0.0 }
 0x6f0   : > { %v620_v49 = vadd.f32 %v614_v46, %v540_v11 }
 0x6f1   : > { %v625_v44 = vld [vmem:[#allocation2] sm:$0xff] }
 0x6f2   : > { %623 = vst.msk [vmem:[#allocation2 + $0x8] sm:$0xff] %vm159_vm0, %v620_v49  ;;  %5644 = vmatmul.msk.f32.vlgmr.msra.gmra.mxu3 %vm163_vm1, %v625_v44 }
 0x6f3   : > { %v610_v58 = vpop.f32.mrf.mxu2  ;;  %1259 = vmatpush.msra.mxu3 %v6584_v18 }
 0x6f4   : > { %v611_v35 = vadd.f32 %v6594_v20, %v610_v58 }
 0x6f5   : > { %1260 = vmatpush.msra.mxu3 %v6579_v17 }
 0x6f6   : > { %v615_v0 = vmax.f32 %v611_v35, 0.0 }
 0x6f7   : > { %1261 = vmatpush.msra.mxu3 %v6574_v16 }
 0x6f8   : > { %v621_v59 = vadd.f32 %v615_v0, %v542_v61 }
 0x6f9   : > { %v626_v62 = vld [vmem:[#allocation2 + $0x8] sm:$0xff]  ;;  %1262 = vmatpush.msra.mxu3 %v6569_v15 }
 0x6fa   : > { %624 = vst.msk [vmem:[#allocation2 + $0x10] sm:$0xf] %vm442_vm5, %v621_v59  ;;  %5645 = vmatmul.msk.f32.gmra.mxu3 %vm163_vm1, %v626_v62 }
 0x701   : > { %v627_v11 = vld [vmem:[#allocation2 + $0x10] sm:$0xf] }
 0x702   : > { %5646 = vmatmul.msk.f32.gmra.mxu3 %vm163_vm1, %v627_v11 }
 0x775   : > { %v654_v63 = vpop.f32.mrf.mxu3 }
 0x776   : > { %v655_v38 = vadd.f32 %v6659_v33, %v654_v63 }
 0x778   : > { %v663_v51 = vmax.f32 %v655_v38, 0.0 }
 0x77a   : > { %5647 = vmatmul.msk.f32.vlgmr.msrb.gmra.mxu1 %vm163_vm1, %v663_v51 }
 0x77b   : > { %1307 = vmatpush.msrb.mxu1 %v6624_v26 }
 0x77d   : > { %v657_v57 = vpop.f32.mrf.mxu3  ;;  %1308 = vmatpush.msrb.mxu1 %v6619_v25 }
 0x77e   : > { %v658_v61 = vadd.f32 %v6659_v33, %v657_v57 }
 0x77f   : > { %1309 = vmatpush.msrb.mxu1 %v6614_v24 }
 0x780   : > { %v664_v60 = vmax.f32 %v658_v61, 0.0 }
 0x781   : > { %1310 = vmatpush.msrb.mxu1 %v6609_v23 }
 0x782   : > { %5648 = vmatmul.msk.f32.gmra.mxu1 %vm163_vm1, %v664_v60 }
 0x783   : > { %1311 = vmatpush.msrb.mxu1 %v6604_v22 }
 0x785   : > { %v660_v56 = vpop.f32.mrf.mxu3  ;;  %1312 = vmatpush.msrb.mxu1 %v6599_v21 }
 0x786   : > { %v661_v50 = vadd.f32 %v6659_v33, %v660_v56 }
 0x788   : > { %v665_v2 = vmax.f32 %v661_v50, 0.0  ;;  %v8840_v50 = vld [vmem:[#allocation12_spill] sm:$0xff] }
 0x78a   : > { %5649 = vmatmul.msk.f32.gmra.mxu1 %vm163_vm1, %v665_v2 }
 0x7f7   : > { %v692_v43 = vpop.f32.mrf.mxu1 }
 0x7f8   : > { %v693_v12 = vadd.f32 %v6664_v34, %v692_v43  ;;  %v8841_v43 = vld [vmem:[#allocation11_spill] sm:$0xff] }
 0x7fa   : > { %v701_v46 = vmax.f32 %v693_v12, 0.0 }
 0x7fc   : > { %v704_v49 = vadd.f32 %v701_v46, %v625_v44  ;;  %v8843_v46 = vld [vmem:[#allocation9_spill] sm:$0xff] }
 0x7fe   : > { %5650 = vmatmul.msk.f32.vlgmr.msrb.gmra.mxu2 %vm163_vm1, %v704_v49 }
 0x7ff   : > { %v695_v58 = vpop.f32.mrf.mxu1  ;;  %1345 = vmatpush.msrb.mxu2 %v6654_v32 }
 0x800   : > { %v696_v35 = vadd.f32 %v6664_v34, %v695_v58 }
 0x801   : > { %1346 = vmatpush.msrb.mxu2 %v6649_v31 }
 0x802   : > { %v702_v0 = vmax.f32 %v696_v35, 0.0 }
 0x803   : > { %1347 = vmatpush.msrb.mxu2 %v6644_v30 }
 0x804   : > { %v705_v59 = vadd.f32 %v702_v0, %v626_v62  ;;  %v8844_v0 = vld [vmem:[#allocation21_spill] sm:$0xff] }
 0x805   : > { %1348 = vmatpush.msrb.mxu2 %v6639_v29 }
 0x806   : > { %5651 = vmatmul.msk.f32.gmra.mxu2 %vm163_vm1, %v705_v59 }
 0x807   : > { %v698_v63 = vpop.f32.mrf.mxu1  ;;  %1349 = vmatpush.msrb.mxu2 %v6634_v28 }
 0x808   : > { %v699_v44 = vadd.f32 %v6664_v34, %v698_v63 }
 0x809   : > { %1350 = vmatpush.msrb.mxu2 %v6629_v27 }
 0x80a   : > { %v703_v38 = vmax.f32 %v699_v44, 0.0  ;;  %v8845_v44 = vld [vmem:[#allocation16_spill] sm:$0xff] }
 0x80c   : > { %v706_v51 = vadd.f32 %v703_v38, %v627_v11  ;;  %v8842_v11 = vld [vmem:[#allocation10_spill] sm:$0xff] }
 0x80e   : > { %5652 = vmatmul.msk.f32.gmra.mxu2 %vm163_vm1, %v706_v51  ;;  %v8846_v51 = vld [vmem:[#allocation15_spill] sm:$0xff] }
 0x881   : > { %v733_v57 = vpop.f32.mrf.mxu2 }
 0x882   : > { %v734_v61 = vadd.f32 %v6699_v41, %v733_v57 }
 0x884   : > { %v742_v60 = vmax.f32 %v734_v61, 0.0  ;;  %v8847_v61 = vld [vmem:[#allocation14_spill] sm:$0xff] }
 0x886   : > { %5653 = vmatmul.msk.f32.vlgmr.msrb.gmra.mxu0 %vm159_vm0, %v742_v60 }
 0x887   : > { %1386 = vmatpush.msrb.mxu0 %v6694_v40 }
 0x889   : > { %v736_v62 = vpop.f32.mrf.mxu2  ;;  %1387 = vmatpush.msrb.mxu0 %v6689_v39 }
 0x88a   : > { %v737_v56 = vadd.f32 %v6699_v41, %v736_v62 }
 0x88b   : > { %1388 = vmatpush.msrb.mxu0 %v8840_v50 }
 0x88c   : > { %v743_v2 = vmax.f32 %v737_v56, 0.0  ;;  %v8848_v56 = vld [vmem:[#allocation13_spill] sm:$0xff] }
 0x88d   : > { %1389 = vmatpush.msrb.mxu0 %v8841_v43 }
 0x88e   : > { %5654 = vmatmul.msk.f32.gmra.mxu0 %vm159_vm0, %v743_v2 }
 0x88f   : > { %1390 = vmatpush.msrb.mxu0 %v8842_v11 }
 0x891   : > { %v739_v12 = vpop.f32.mrf.mxu2  ;;  %1391 = vmatpush.msrb.mxu0 %v8843_v46 }
 0x892   : > { %v740_v49 = vadd.f32 %v6699_v41, %v739_v12 }
 0x894   : > { %v744_v58 = vmax.f32 %v740_v49, 0.0 }
 0x896   : > { %5655 = vmatmul.msk.f32.gmra.mxu0 %vm159_vm0, %v744_v58 }
 0x903   : > { %v771_v35 = vpop.f32.mrf.mxu0 }
 0x904   : > { %v772_v59 = vadd.f32 %v8844_v0, %v771_v35 }
 0x906   : > { %v780_v63 = vmax.f32 %v772_v59, 0.0 }
 0x908   : > { %5656 = vmatmul.msk.f32.vlgmr.msrb.gmra.mxu3 %vm159_vm0, %v780_v63  ;;  %v8849_v63 = vld [vmem:[#allocation22_spill] sm:$0xff] }
 0x909   : > { %1426 = vmatpush.msrb.mxu3 %v8845_v44 }
 0x90b   : > { %v774_v38 = vpop.f32.mrf.mxu0  ;;  %1427 = vmatpush.msrb.mxu3 %v8846_v51 }
 0x90c   : > { %v775_v57 = vadd.f32 %v8844_v0, %v774_v38 }
 0x90d   : > { %1428 = vmatpush.msrb.mxu3 %v8847_v61 }
 0x90e   : > { %v781_v62 = vmax.f32 %v775_v57, 0.0  ;;  %v8850_v57 = vld [vmem:[#allocation20_spill] sm:$0xff] }
 0x90f   : > { %1429 = vmatpush.msrb.mxu3 %v8848_v56 }
 0x910   : > { %5657 = vmatmul.msk.f32.gmra.mxu3 %vm159_vm0, %v781_v62  ;;  %v8851_v62 = vld [vmem:[#allocation19_spill] sm:$0xff] }
 0x913   : > { %v777_v12 = vpop.f32.mrf.mxu0 }
 0x914   : > { %v778_v49 = vadd.f32 %v8844_v0, %v777_v12  ;;  %v8852_v12 = vld [vmem:[#allocation18_spill] sm:$0xff] }
 0x916   : > { %v782_v35 = vmax.f32 %v778_v49, 0.0 }
 0x918   : > { %5658 = vmatmul.msk.f32.gmra.mxu3 %vm159_vm0, %v782_v35  ;;  %v8853_v35 = vld [vmem:[#allocation17_spill] sm:$0xff] }
 0x98b   : > { %v809_v59 = vpop.f32.mrf.mxu3 }
 0x98c   : > { %v810_v9 = vadd.f32 %v8849_v63, %v809_v59 }
 0x98e   : > { %v818_v10 = vmax.f32 %v810_v9, 0.0 }
 0x990   : > { %v821_v51 = vadd.f32 %v818_v10, %v742_v60 }
 0x992   : > { %5659 = vmatmul.msk.f32.vlgmr.msra.gmra.mxu1 %vm159_vm0, %v821_v51 }
 0x993   : > { %v812_v38 = vpop.f32.mrf.mxu3  ;;  %1464 = vmatpush.msra.mxu1 %v8850_v57 }
 0x994   : > { %v813_v56 = vadd.f32 %v8849_v63, %v812_v38  ;;  %v8854_v38 = vld [vmem:[#allocation27_spill] sm:$0xff] }
 0x995   : > { %1465 = vmatpush.msra.mxu1 %v8851_v62 }
 0x996   : > { %v819_v61 = vmax.f32 %v813_v56, 0.0 }
 0x997   : > { %1466 = vmatpush.msra.mxu1 %v8852_v12 }
 0x998   : > { %v822_v49 = vadd.f32 %v819_v61, %v743_v2  ;;  %v8855_v2 = vld [vmem:[#allocation30_spill] sm:$0xff] }
 0x999   : > { %1467 = vmatpush.msra.mxu1 %v8853_v35 }
 0x99a   : > { %5660 = vmatmul.msk.f32.gmra.mxu1 %vm159_vm0, %v822_v49 }
 0x99b   : > { %v815_v9 = vpop.f32.mrf.mxu3 }
 0x99c   : > { %v816_v10 = vadd.f32 %v8849_v63, %v815_v9  ;;  %v8857_v9 = vld [vmem:[#allocation29_spill] sm:$0xff] }
 0x99e   : > { %v820_v60 = vmax.f32 %v816_v10, 0.0 }
 0x9a0   : > { %v823_v51 = vadd.f32 %v820_v60, %v744_v58 }
 0x9a2   : > { %5661 = vmatmul.msk.f32.gmra.mxu1 %vm159_vm0, %v823_v51 }
 0xa0f   : > { %v850_v59 = vpop.f32.mrf.mxu1 }
 0xa10   : > { %v851_v57 = vadd.f32 %v8854_v38, %v850_v59 }
 0xa12   : > { %v859_v62 = vmax.f32 %v851_v57, 0.0 }
 0xa14   : > { %v7084_v61 = vadd.f32 %v8855_v2, %v859_v62  ;;  %v8859_v2 = vld [vmem:[#allocation28_spill] sm:$0xff] }
 0xa16   : > { %8856 = vst [vmem:[#allocation30_spill] sm:$0xff] %v7084_v61  ;;  %v871_v58 = vsel %vm184_vm3, %v7084_v61, 0.0 }
 0xa17   : > { %867 = vst.msk [vmem:[%s7081_s8] sm:$0xff] %vm184_vm3, %v7084_v61  ;;  %v853_v56 = vpop.f32.mrf.mxu1  ;;  %872 = vadd.xlane.f32.xlu2 %v871_v58 }
 0xa18   : > { %v854_v57 = vadd.f32 %v8854_v38, %v853_v56 }
 0xa1a   : > { %v860_v49 = vmax.f32 %v854_v57, 0.0 }
 0xa1c   : > { %v7093_v10 = vadd.f32 %v8857_v9, %v860_v49 }
 0xa1e   : > { %8858 = vst [vmem:[#allocation29_spill] sm:$0xff] %v7093_v10  ;;  %v874_v62 = vsel %vm184_vm3, %v7093_v10, 0.0 }
 0xa1f   : > { %868 = vst.msk [vmem:[%s7081_s8 + $0x8] sm:$0xff] %vm184_vm3, %v7093_v10  ;;  %v856_v60 = vpop.f32.mrf.mxu1  ;;  %875 = vadd.xlane.f32.xlu1 %v874_v62 }
 0xa20   : > { %v857_v51 = vadd.f32 %v8854_v38, %v856_v60 }
 0xa22   : > { %v861_v59 = vmax.f32 %v857_v51, 0.0 }
 0xa24   : > { %v7102_v35 = vadd.f32 %v8859_v2, %v861_v59 }
 0xa26   : > { %8860 = vst [vmem:[#allocation28_spill] sm:$0xff] %v7102_v35  ;;  %v877_v58 = vsel %vm191_vm4, %v7102_v35, 0.0 }
 0xa27   : > { %869 = vst.msk [vmem:[%s7081_s8 + $0x10] sm:$0xf] %vm191_vm4, %v7102_v35  ;;  %878 = vadd.xlane.f32.xlu0 %v877_v58 }
 0xa8a   : > { %v873_v56 = vpop.xlane.xlu2 %872 }
 0xa8b   : > { %v880_v57 = vmul.f32 %v873_v56, %v6872_v48 }
 0xa8d   : > { %v883_v49 = vsub.f32 %v7084_v61, %v880_v57 }
 0xa8f   : > { %v886_v9 = vmul.f32 %v883_v49, %v883_v49 }
 0xa91   : > { %v889_v62 = vsel %vm184_vm3, %v886_v9, 0.0 }
 0xa92   : > { %v876_v60 = vpop.xlane.xlu1 %875  ;;  %890 = vadd.xlane.f32.xlu2 %v889_v62 }
 0xa93   : > { %v881_v51 = vmul.f32 %v876_v60, %v6872_v48 }
 0xa95   : > { %v884_v59 = vsub.f32 %v7093_v10, %v881_v51 }
 0xa97   : > { %v887_v2 = vmul.f32 %v884_v59, %v884_v59 }
 0xa99   : > { %v892_v38 = vsel %vm184_vm3, %v887_v2, 0.0 }
 0xa9a   : > { %v879_v12 = vpop.xlane.xlu0 %878  ;;  %893 = vadd.xlane.f32.xlu1 %v892_v38 }
 0xa9b   : > { %v882_v58 = vmul.f32 %v879_v12, %v6872_v48 }
 0xa9d   : > { %v885_v56 = vsub.f32 %v7102_v35, %v882_v58 }
 0xa9f   : > { %v888_v63 = vmul.f32 %v885_v56, %v885_v56 }
 0xaa1   : > { %v895_v57 = vsel %vm191_vm4, %v888_v63, 0.0 }
 0xaa2   : > { %896 = vadd.xlane.f32.xlu0 %v895_v57 }
 0xaaa   : > { %937 = vrot.lane.b32.xlu2 %v6938_v47, %s6403_s15 }
 0xab3   : > { %939 = vrot.lane.b32.xlu1 %v6933_v42, %s6403_s15 }
 0xab6   : > { %941 = vrot.lane.b32.xlu0 %v6943_v36, %s6403_s15 }
 0xb05   : > { %v891_v9 = vpop.xlane.xlu2 %890 }
 0xb06   : > { %v898_v38 = vmul.f32 %v891_v9, %v6872_v48 }
 0xb08   : > { %v901_v62 = vadd.f32 1e-05, %v898_v38 }
 0xb0a   : > { %6079 = vrsqrt.f32 %v901_v62  ;;  %vm910_vm7 = vweird.f32 %v901_v62 }
 0xb0d   : > { %v894_v12 = vpop.xlane.xlu1 %893  ;;  %v938_v43 = vpop.permute.xlu2 %937 }
 0xb0e   : > { %v899_v60 = vmul.f32 %v894_v12, %v6872_v48 }
 0xb10   : > { %v6080_v51 = vpop.eup %6079  ;;  %v902_v63 = vadd.f32 1e-05, %v899_v60 }
 0xb11   : > { %v905_v2 = vmul.f32 %v6080_v51, %v901_v62  ;;  %vm911_vm6 = vweird.f32 %v6080_v51 }
 0xb12   : > { %6081 = vrsqrt.f32 %v902_v63  ;;  %vm912_vm8 = vmor %vm910_vm7, %vm911_vm6  ;;  %vm920_vm11 = vweird.f32 %v902_v63 }
 0xb13   : > { %v906_v58 = vmul.f32 %v6080_v51, %v905_v2 }
 0xb15   : > { %v907_v57 = vmul.f32 0.5, %v906_v58  ;;  %v897_v35 = vpop.xlane.xlu0 %896 }
 0xb16   : > { %v900_v10 = vmul.f32 %v897_v35, %v6872_v48 }
 0xb17   : > { %v908_v61 = vsub.f32 1.5, %v907_v57 }
 0xb18   : > { %v6082_v44 = vpop.eup %6081  ;;  %v903_v0 = vadd.f32 1e-05, %v900_v10 }
 0xb19   : > { %v909_v46 = vmul.f32 %v6080_v51, %v908_v61  ;;  %v915_v9 = vmul.f32 %v6082_v44, %v902_v63  ;;  %vm921_vm10 = vweird.f32 %v6082_v44 }
 0xb1a   : > { %6083 = vrsqrt.f32 %v903_v0  ;;  %vm922_vm12 = vmor %vm920_vm11, %vm921_vm10  ;;  %vm930_vm14 = vweird.f32 %v903_v0 }
 0xb1b   : > { %v916_v38 = vmul.f32 %v6082_v44, %v915_v9  ;;  %v913_v12 = vsel %vm912_vm8, %v6080_v51, %v909_v46 }
 0xb1c   : > { %v934_v11 = vmul.f32 %v913_v12, %v883_v49 }
 0xb1d   : > { %v917_v60 = vmul.f32 0.5, %v916_v38 }
 0xb1e   : > { %v946_v2 = vsel %vm184_vm3, %v934_v11, %v938_v43 }
 0xb1f   : > { %v918_v58 = vsub.f32 1.5, %v917_v60  ;;  %5663 = vmatmul.msk.f32.vlgmr.msra.gmra.mxu2 %vm274_vm9, %v946_v2 }
 0xb20   : > { %v6084_v35 = vpop.eup %6083  ;;  %1505 = vmatpush.msra.mxu2 %v8814_v55 }
 0xb21   : > { %v919_v10 = vmul.f32 %v6082_v44, %v918_v58  ;;  %v925_v61 = vmul.f32 %v6084_v35, %v903_v0  ;;  %vm931_vm13 = vweird.f32 %v6084_v35 }
 0xb22   : > { %1506 = vmatpush.msra.mxu2 %v8815_v54  ;;  %vm932_vm15 = vmor %vm930_vm14, %vm931_vm13 }
 0xb23   : > { %v926_v62 = vmul.f32 %v6084_v35, %v925_v61  ;;  %v923_v46 = vsel %vm922_vm12, %v6082_v44, %v919_v10 }
 0xb24   : > { %v935_v49 = vmul.f32 %v923_v46, %v884_v59  ;;  %1507 = vmatpush.msra.mxu2 %v8816_v53 }
 0xb25   : > { %v927_v51 = vmul.f32 0.5, %v926_v62  ;;  %v940_v43 = vpop.permute.xlu1 %939 }
 0xb26   : > { %v947_v11 = vsel %vm184_vm3, %v935_v49, %v940_v43  ;;  %1508 = vmatpush.msra.mxu2 %v8817_v52 }
 0xb27   : > { %v928_v57 = vsub.f32 1.5, %v927_v51  ;;  %5664 = vmatmul.msk.f32.gmra.mxu2 %vm274_vm9, %v947_v11 }
 0xb28   : > { %v942_v12 = vpop.permute.xlu0 %941 }
 0xb29   : > { %v929_v63 = vmul.f32 %v6084_v35, %v928_v57 }
 0xb2b   : > { %v933_v9 = vsel %vm932_vm15, %v6084_v35, %v929_v63 }
 0xb2c   : > { %v936_v38 = vmul.f32 %v933_v9, %v885_v56 }
 0xb2e   : > { %v948_v44 = vsel %vm184_vm3, %v936_v38, %v942_v12 }
 0xb2f   : > { %5665 = vmatmul.msk.f32.gmra.mxu2 %vm274_vm9, %v948_v44 }
 0xba2   : > { %v975_v59 = vpop.f32.mrf.mxu2 }
 0xba3   : > { %v7138_v60 = vadd.f32 %v8818_v8, %v975_v59 }
 0xba5   : > { %1044 = vrot.lane.b32.xlu2 %v7138_v60, %s6404_s18  ;;  %v5666_v35 = vmul.f32 -1.442695, %v7138_v60 }
 0xba7   : > { %6085 = vpow2.f32 %v5666_v35 }
 0xbaa   : > { %v978_v2 = vpop.f32.mrf.mxu2 }
 0xbab   : > { %v7143_v58 = vadd.f32 %v8818_v8, %v978_v2 }
 0xbad   : > { %1046 = vrot.lane.b32.xlu0 %v7143_v58, %s6404_s18  ;;  %v6086_v10 = vpop.eup %6085  ;;  %v5667_v51 = vmul.f32 -1.442695, %v7143_v58 }
 0xbae   : > { %v993_v61 = vadd.f32 1.0, %v6086_v10 }
 0xbb0   : > { %6087 = vrcp.f32 %v993_v61  ;;  %v1007_v57 = vand.u32 2147483648, %v993_v61  ;;  %vm1001_vm6 = vweird.f32 %v993_v61  ;;  %v1005_v9 = vand.u32 2147483647, %v993_v61 }
 0xbb1   : > { %6089 = vpow2.f32 %v5667_v51 }
 0xbb2   : > { %v981_v0 = vpop.f32.mrf.mxu2  ;;  %v1008_v44 = vor.u32 1.1754944e-38, %v1007_v57  ;;  %vm1006_vm8 = vcmp.eq.f32.partialorder %v1005_v9, 8.507059e+37 }
 0xbb3   : > { %v7148_v56 = vadd.f32 %v8818_v8, %v981_v0 }
 0xbb5   : > { %1048 = vrot.lane.b32.xlu1 %v7148_v56, %s6404_s18  ;;  %v5668_v63 = vmul.f32 -1.442695, %v7148_v56 }
 0xbb6   : > { %v6088_v62 = vpop.eup %6087 }
 0xbb7   : > { %v997_v46 = vmul.f32 %v6088_v62, %v993_v61  ;;  %vm1002_vm2 = vweird.f32 %v6088_v62  ;;  %v6090_v38 = vpop.eup %6089  ;;  %6091 = vpow2.f32 %v5668_v63 }
 0xbb8   : > { %vm1003_vm7 = vmor %vm1001_vm6, %vm1002_vm2  ;;  %v994_v59 = vadd.f32 1.0, %v6090_v38 }
 0xbb9   : > { %v998_v49 = vsub.f32 1.0, %v997_v46 }
 0xbba   : > { %6093 = vrcp.f32 %v994_v59  ;;  %v1022_v57 = vand.u32 2147483648, %v994_v59  ;;  %vm1016_vm11 = vweird.f32 %v994_v59  ;;  %v1020_v63 = vand.u32 2147483647, %v994_v59 }
 0xbbb   : > { %v999_v43 = vmul.f32 %v6088_v62, %v998_v49 }
 0xbbc   : > { %vm1021_vm13 = vcmp.eq.f32.partialorder %v1020_v63, 8.507059e+37 }
 0xbbd   : > { %v1000_v11 = vadd.f32 %v6088_v62, %v999_v43  ;;  %v6092_v10 = vpop.eup %6091 }
 0xbbe   : > { %v995_v46 = vadd.f32 1.0, %v6092_v10 }
 0xbbf   : > { %v1004_v12 = vsel %vm1003_vm7, %v6088_v62, %v1000_v11 }
 0xbc0   : > { %v1009_v0 = vsel %vm1006_vm8, %v1008_v44, %v1004_v12  ;;  %v6094_v49 = vpop.eup %6093  ;;  %6095 = vrcp.f32 %v995_v46  ;;  %v1023_v12 = vor.u32 1.1754944e-38, %v1022_v57  ;;  %vm1031_vm15 = vweird.f32 %v995_v46 }
 0xbc1   : > { %v1012_v51 = vmul.f32 %v6094_v49, %v994_v59  ;;  %vm1017_vm10 = vweird.f32 %v6094_v49 }
 0xbc2   : > { %vm1018_vm12 = vmor %vm1016_vm11, %vm1017_vm10 }
 0xbc3   : > { %v1013_v43 = vsub.f32 1.0, %v1012_v51  ;;  %v1037_v51 = vand.u32 2147483648, %v995_v46 }
 0xbc5   : > { %v1014_v8 = vmul.f32 %v6094_v49, %v1013_v43  ;;  %v1038_v43 = vor.u32 1.1754944e-38, %v1037_v51 }
 0xbc6   : > { %v6096_v61 = vpop.eup %6095 }
 0xbc7   : > { %v1027_v52 = vmul.f32 %v6096_v61, %v995_v46  ;;  %v1015_v62 = vadd.f32 %v6094_v49, %v1014_v8  ;;  %vm1032_vm14 = vweird.f32 %v6096_v61  ;;  %v1035_v8 = vand.u32 2147483647, %v995_v46 }
 0xbc8   : > { %vm1033_vm2 = vmor %vm1031_vm15, %vm1032_vm14 }
 0xbc9   : > { %v1028_v11 = vsub.f32 1.0, %v1027_v52  ;;  %v1019_v9 = vsel %vm1018_vm12, %v6094_v49, %v1015_v62  ;;  %vm1036_vm6 = vcmp.eq.f32.partialorder %v1035_v8, 8.507059e+37 }
 0xbcb   : > { %v1029_v38 = vmul.f32 %v6096_v61, %v1028_v11 }
 0xbcd   : > { %v1030_v10 = vadd.f32 %v6096_v61, %v1029_v38 }
 0xbcf   : > { %v1034_v52 = vsel %vm1033_vm2, %v6096_v61, %v1030_v10 }
 0xbd0   : > { %v1039_v53 = vsel %vm1036_vm6, %v1038_v43, %v1034_v52 }
 0xbff   : > { %v1045_v2 = vpop.permute.xlu2 %1044 }
 0xc00   : > { %v1053_v35 = vmul.f32 %v1045_v2, %v1009_v0  ;;  %v1024_v2 = vsel %vm1021_vm13, %v1023_v12, %v1019_v9 }
 0xc02   : > { %1059 = vrot.lane.b32.xlu2 %v1053_v35, %s6405_s4 }
 0xc1f   : > { %v1047_v44 = vpop.permute.xlu0 %1046 }
 0xc20   : > { %v1054_v35 = vmul.f32 %v1047_v44, %v1024_v2  ;;  %v1074_v44 = vsub.f32 1.0, %v1009_v0 }
 0xc22   : > { %1061 = vrot.lane.b32.xlu0 %v1054_v35, %s6405_s4  ;;  %v1092_v35 = vmul.f32 %v1009_v0, %v6938_v47  ;;  %v1094_v47 = vmul.f32 %v1039_v53, %v6943_v36 }
 0xc27   : > { %v1049_v59 = vpop.permute.xlu1 %1048 }
 0xc28   : > { %v1055_v49 = vmul.f32 %v1049_v59, %v1039_v53  ;;  %v1076_v59 = vsub.f32 1.0, %v1039_v53 }
 0xc2a   : > { %1063 = vrot.lane.b32.xlu1 %v1055_v49, %s6405_s4 }
 0xc5c   : > { %v1060_v62 = vpop.permute.xlu2 %1059 }
 0xc5d   : > { %v1068_v11 = vadd.f32 %v1060_v62, %v7138_v60 }
 0xc5f   : > { %6097 = vtanh.f32 %v1068_v11 }
 0xc65   : > { %v6098_v57 = vpop.eup %6097 }
 0xc66   : > { %1080 = vrot.lane.b32.xlu2 %v6098_v57, %s6406_s19 }
 0xc94   : > { %v1062_v63 = vpop.permute.xlu0 %1061 }
 0xc95   : > { %v1069_v9 = vadd.f32 %v1062_v63, %v7143_v58  ;;  %v1075_v58 = vsub.f32 1.0, %v1024_v2 }
 0xc97   : > { %6099 = vtanh.f32 %v1069_v9 }
 0xc9c   : > { %v1064_v46 = vpop.permute.xlu1 %1063 }
 0xc9d   : > { %v6100_v61 = vpop.eup %6099  ;;  %v1070_v38 = vadd.f32 %v1064_v46, %v7148_v56  ;;  %v1093_v56 = vmul.f32 %v1024_v2, %v6933_v42 }
 0xc9e   : > { %1082 = vrot.lane.b32.xlu0 %v6100_v61, %s6406_s19 }
 0xc9f   : > { %6101 = vtanh.f32 %v1070_v38 }
 0xca5   : > { %v6102_v12 = vpop.eup %6101 }
 0xca6   : > { %1084 = vrot.lane.b32.xlu1 %v6102_v12, %s6406_s19 }
 0xcc0   : > { %v1081_v60 = vpop.permute.xlu2 %1080 }
 0xcc1   : > { %v1089_v10 = vmul.f32 %v1081_v60, %v1074_v44 }
 0xcc3   : > { %v7165_v51 = vadd.f32 %v1092_v35, %v1089_v10 }
 0xcc5   : > { %1101 = vrot.lane.b32.xlu2 %v7165_v51, %s6406_s19 }
 0xd10   : > { %v1083_v8 = vpop.permute.xlu0 %1082 }
 0xd11   : > { %v1090_v52 = vmul.f32 %v1083_v8, %v1075_v58 }
 0xd13   : > { %v7170_v43 = vadd.f32 %v1093_v56, %v1090_v52 }
 0xd15   : > { %1103 = vrot.lane.b32.xlu0 %v7170_v43, %s6406_s19 }
 0xd18   : > { %v1085_v49 = vpop.permute.xlu1 %1084 }
 0xd19   : > { %v1091_v0 = vmul.f32 %v1085_v49, %v1076_v59 }
 0xd1b   : > { %v7175_v62 = vadd.f32 %v1094_v47, %v1091_v0 }
 0xd1d   : > { %1105 = vrot.lane.b32.xlu1 %v7175_v62, %s6406_s19 }
 0xd1f   : > { %v1102_v11 = vpop.permute.xlu2 %1101 }
 0xd20   : > { %v1110_v57 = vsel %vm159_vm0, %v1102_v11, 0.0 }
 0xd21   : > { %1111 = vadd.xlane.f32.xlu2 %v1110_v57 }
 0xd87   : > { %v1104_v42 = vpop.permute.xlu0 %1103 }
 0xd88   : > { %v1113_v2 = vsel %vm159_vm0, %v1104_v42, 0.0 }
 0xd89   : > { %1114 = vadd.xlane.f32.xlu0 %v1113_v2 }
 0xd8f   : > { %v1106_v63 = vpop.permute.xlu1 %1105 }
 0xd90   : > { %v1116_v9 = vsel %vm442_vm5, %v1106_v63, 0.0 }
 0xd91   : > { %1117 = vadd.xlane.f32.xlu1 %v1116_v9 }
 0xd94   : > { %v1112_v46 = vpop.xlane.xlu2 %1111 }
 0xd95   : > { %v1119_v53 = vmul.f32 %v1112_v46, %v8837_v37 }
 0xd97   : > { %v1122_v36 = vsub.f32 %v7165_v51, %v1119_v53 }
 0xd99   : > { %v1125_v61 = vmul.f32 %v1122_v36, %v1122_v36 }
 0xd9b   : > { %1131 = vrot.lane.b32.xlu2 %v1125_v61, %s6406_s19 }
 0xdf5   : > { %v1132_v56 = vpop.permute.xlu2 %1131 }
 0xdf6   : > { %v1140_v52 = vsel %vm159_vm0, %v1132_v56, 0.0 }
 0xdfc   : > { %v1115_v38 = vpop.xlane.xlu0 %1114 }
 0xdfd   : > { %v1120_v12 = vmul.f32 %v1115_v38, %v8837_v37 }
 0xdff   : > { %v1123_v44 = vsub.f32 %v7170_v43, %v1120_v12 }
 0xe01   : > { %v1126_v60 = vmul.f32 %v1123_v44, %v1123_v44 }
 0xe03   : > { %1133 = vrot.lane.b32.xlu0 %v1126_v60, %s6406_s19 }
 0xe04   : > { %v1118_v35 = vpop.xlane.xlu1 %1117 }
 0xe05   : > { %v1121_v10 = vmul.f32 %v1118_v35, %v8837_v37 }
 0xe07   : > { %v7190_v58 = vsub.f32 %v7175_v62, %v1121_v10 }
 0xe09   : > { %v1127_v8 = vmul.f32 %v7190_v58, %v7190_v58 }
 0xe0b   : > { %1135 = vrot.lane.b32.xlu1 %v1127_v8, %s6406_s19 }
 0xe2d   : > { %1141 = vadd.xlane.f32.xlu0 %v1140_v52 }
 0xe75   : > { %v1134_v59 = vpop.permute.xlu0 %1133 }
 0xe76   : > { %v1143_v49 = vsel %vm159_vm0, %v1134_v59, 0.0 }
 0xe77   : > { %1144 = vadd.xlane.f32.xlu2 %v1143_v49 }
 0xe7d   : > { %v1136_v47 = vpop.permute.xlu1 %1135 }
 0xe7e   : > { %v1146_v0 = vsel %vm442_vm5, %v1136_v47, 0.0 }
 0xe7f   : > { %1147 = vadd.xlane.f32.xlu1 %v1146_v0 }
 0xea0   : > { %v1142_v11 = vpop.xlane.xlu0 %1141 }
 0xea1   : > { %v1149_v57 = vmul.f32 %v1142_v11, %v8837_v37 }
 0xea3   : > { %v1152_v42 = vadd.f32 1e-05, %v1149_v57 }
 0xea5   : > { %6103 = vrsqrt.f32 %v1152_v42  ;;  %vm1161_vm8 = vweird.f32 %v1152_v42 }
 0xeab   : > { %v6104_v2 = vpop.eup %6103 }
 0xeac   : > { %v1156_v63 = vmul.f32 %v6104_v2, %v1152_v42  ;;  %vm1162_vm7 = vweird.f32 %v6104_v2 }
 0xead   : > { %vm1163_vm10 = vmor %vm1161_vm8, %vm1162_vm7 }
 0xeae   : > { %v1157_v9 = vmul.f32 %v6104_v2, %v1156_v63 }
 0xeb0   : > { %v1158_v46 = vmul.f32 0.5, %v1157_v9 }
 0xeb2   : > { %v1159_v53 = vsub.f32 1.5, %v1158_v46 }
 0xeb4   : > { %v1160_v61 = vmul.f32 %v6104_v2, %v1159_v53 }
 0xeb6   : > { %v1164_v38 = vsel %vm1163_vm10, %v6104_v2, %v1160_v61 }
 0xeb7   : > { %v1185_v12 = vmul.f32 %v1164_v38, %v1122_v36 }
 0xeb9   : > { %v1188_v60 = vmul.f32 %v1185_v12, %v6975_v45 }
 0xebb   : > { %v1191_v35 = vadd.f32 %v1188_v60, %v6977_v1 }
 0xebd   : > { %1197 = vrot.lane.b32.xlu2 %v1191_v35, %s6406_s19 }
 0xeea   : > { %v1145_v10 = vpop.xlane.xlu2 %1144 }
 0xeeb   : > { %v1150_v8 = vmul.f32 %v1145_v10, %v8837_v37 }
 0xeed   : > { %v1153_v56 = vadd.f32 1e-05, %v1150_v8 }
 0xeef   : > { %6105 = vrsqrt.f32 %v1153_v56  ;;  %vm1171_vm12 = vweird.f32 %v1153_v56 }
 0xef2   : > { %v1148_v52 = vpop.xlane.xlu1 %1147 }
 0xef3   : > { %v1151_v59 = vmul.f32 %v1148_v52, %v8837_v37 }
 0xef5   : > { %v6106_v49 = vpop.eup %6105  ;;  %v1154_v47 = vadd.f32 1e-05, %v1151_v59 }
 0xef6   : > { %v1166_v0 = vmul.f32 %v6106_v49, %v1153_v56  ;;  %vm1172_vm11 = vweird.f32 %v6106_v49 }
 0xef7   : > { %6107 = vrsqrt.f32 %v1154_v47  ;;  %vm1173_vm13 = vmor %vm1171_vm12, %vm1172_vm11  ;;  %vm1181_vm15 = vweird.f32 %v1154_v47 }
 0xef8   : > { %v1167_v11 = vmul.f32 %v6106_v49, %v1166_v0 }
 0xefa   : > { %v1168_v36 = vmul.f32 0.5, %v1167_v11  ;;  %v8861_v11 = vld [vmem:[#allocation7_spill] sm:$0xff] }
 0xefc   : > { %v1169_v57 = vsub.f32 1.5, %v1168_v36  ;;  %v8862_v36 = vld [vmem:[#allocation6_spill] sm:$0xff] }
 0xefd   : > { %v6108_v42 = vpop.eup %6107 }
 0xefe   : > { %v1170_v2 = vmul.f32 %v6106_v49, %v1169_v57  ;;  %v1176_v63 = vmul.f32 %v6108_v42, %v1154_v47  ;;  %vm1182_vm14 = vweird.f32 %v6108_v42 }
 0xeff   : > { %vm1183_vm2 = vmor %vm1181_vm15, %vm1182_vm14 }
 0xf00   : > { %v1174_v9 = vsel %vm1173_vm13, %v6106_v49, %v1170_v2  ;;  %v1177_v46 = vmul.f32 %v6108_v42, %v1176_v63 }
 0xf01   : > { %v1186_v53 = vmul.f32 %v1174_v9, %v1123_v44 }
 0xf02   : > { %v1178_v61 = vmul.f32 0.5, %v1177_v46 }
 0xf03   : > { %v1189_v38 = vmul.f32 %v1186_v53, %v6975_v45 }
 0xf04   : > { %v1179_v12 = vsub.f32 1.5, %v1178_v61 }
 0xf05   : > { %v1192_v60 = vadd.f32 %v1189_v38, %v6977_v1 }
 0xf06   : > { %v1180_v35 = vmul.f32 %v6108_v42, %v1179_v12 }
 0xf07   : > { %1199 = vrot.lane.b32.xlu0 %v1192_v60, %s6406_s19 }
 0xf08   : > { %v1184_v10 = vsel %vm1183_vm2, %v6108_v42, %v1180_v35 }
 0xf09   : > { %v1187_v8 = vmul.f32 %v1184_v10, %v7190_v58 }
 0xf0b   : > { %v1190_v56 = vmul.f32 %v1187_v8, %v6975_v45 }
 0xf0d   : > { %v1193_v52 = vadd.f32 %v1190_v56, %v6977_v1 }
 0xf0f   : > { %1201 = vrot.lane.b32.xlu1 %v1193_v52, %s6406_s19 }
 0xf17   : > { %v1198_v44 = vpop.permute.xlu2 %1197 }
 0xf18   : > { %5669 = vmatmul.msk.f32.vlgmr.msra.gmra.mxu0 %vm159_vm0, %v1198_v44 }
 0xf19   : > { %1629 = vmatpush.msra.mxu0 %v6529_v7 }
 0xf1b   : > { %1630 = vmatpush.msra.mxu0 %v6524_v6 }
 0xf1d   : > { %1631 = vmatpush.msra.mxu0 %v6519_v5 }
 0xf1f   : > { %1632 = vmatpush.msra.mxu0 %v6514_v4 }
 0xf21   : > { %1633 = vmatpush.msra.mxu0 %v6509_v3 }
 0xf79   : > { %v1200_v58 = vpop.permute.xlu0 %1199 }
 0xf7a   : > { %5670 = vmatmul.msk.f32.gmra.mxu0 %vm159_vm0, %v1200_v58 }
 0xf81   : > { %v1202_v59 = vpop.permute.xlu1 %1201 }
 0xf82   : > { %5671 = vmatmul.msk.f32.gmra.mxu0 %vm159_vm0, %v1202_v59 }
 0xf95   : > { %v1226_v49 = vpop.f32.mrf.mxu0 }
 0xf96   : > { %v1227_v47 = vadd.f32 %v6589_v19, %v1226_v49 }
 0xf98   : > { %v1235_v0 = vmax.f32 %v1227_v47, 0.0 }
 0xf9a   : > { %5672 = vmatmul.msk.f32.vlgmr.msra.gmra.mxu3 %vm159_vm0, %v1235_v0 }
 0xf9b   : > { %1881 = vmatpush.msra.mxu3 %v6564_v14 }
 0xf9d   : > { %1882 = vmatpush.msra.mxu3 %v6559_v13 }
 0xf9f   : > { %1883 = vmatpush.msra.mxu3 %v8861_v11 }
 0xfa1   : > { %1884 = vmatpush.msra.mxu3 %v8862_v36 }
 0xff7   : > { %v1229_v57 = vpop.f32.mrf.mxu0 }
 0xff8   : > { %v1230_v42 = vadd.f32 %v6589_v19, %v1229_v57 }
 0xffa   : > { %v1236_v2 = vmax.f32 %v1230_v42, 0.0 }
 0xffc   : > { %5673 = vmatmul.msk.f32.gmra.mxu3 %vm159_vm0, %v1236_v2 }
 0xfff   : > { %v1232_v63 = vpop.f32.mrf.mxu0 }
0x1000   : > { %v1233_v9 = vadd.f32 %v6589_v19, %v1232_v63 }
0x1002   : > { %v1237_v46 = vmax.f32 %v1233_v9, 0.0 }
0x1004   : > { %5674 = vmatmul.msk.f32.gmra.mxu3 %vm159_vm0, %v1237_v46 }
0x101d   : > { %v1264_v53 = vpop.f32.mrf.mxu3 }
0x101e   : > { %v1265_v61 = vadd.f32 %v6594_v20, %v1264_v53 }
0x1020   : > { %v1273_v38 = vmax.f32 %v1265_v61, 0.0 }
0x1022   : > { %v1279_v12 = vadd.f32 %v1273_v38, %v1198_v44 }
0x1024   : > { %1282 = vst.msk [vmem:[#allocation2] sm:$0xff] %vm159_vm0, %v1279_v12 }
0x102b   : > { %v1285_v60 = vld [vmem:[#allocation2] sm:$0xff] }
0x102c   : > { %5675 = vmatmul.msk.f32.vlgmr.msrb.gmra.mxu1 %vm163_vm1, %v1285_v60 }
0x102d   : > { %1919 = vmatpush.msrb.mxu1 %v6584_v18 }
0x102f   : > { %1920 = vmatpush.msrb.mxu1 %v6579_v17 }
0x1031   : > { %1921 = vmatpush.msrb.mxu1 %v6574_v16 }
0x1033   : > { %1922 = vmatpush.msrb.mxu1 %v6569_v15 }
0x107f   : > { %v1267_v35 = vpop.f32.mrf.mxu3 }
0x1080   : > { %v1268_v10 = vadd.f32 %v6594_v20, %v1267_v35 }
0x1082   : > { %v1274_v8 = vmax.f32 %v1268_v10, 0.0 }
0x1084   : > { %v1280_v56 = vadd.f32 %v1274_v8, %v1200_v58 }
0x1086   : > { %1283 = vst.msk [vmem:[#allocation2 + $0x8] sm:$0xff] %vm159_vm0, %v1280_v56 }
0x1087   : > { %v1270_v52 = vpop.f32.mrf.mxu3 }
0x1088   : > { %v1271_v44 = vadd.f32 %v6594_v20, %v1270_v52 }
0x108a   : > { %v1275_v49 = vmax.f32 %v1271_v44, 0.0 }
0x108c   : > { %v1281_v47 = vadd.f32 %v1275_v49, %v1202_v59 }
0x108d   : > { %v1286_v0 = vld [vmem:[#allocation2 + $0x8] sm:$0xff] }
0x108e   : > { %1284 = vst.msk [vmem:[#allocation2 + $0x10] sm:$0xf] %vm442_vm5, %v1281_v47  ;;  %5676 = vmatmul.msk.f32.gmra.mxu1 %vm163_vm1, %v1286_v0 }
0x1095   : > { %v1287_v57 = vld [vmem:[#allocation2 + $0x10] sm:$0xf] }
0x1096   : > { %5677 = vmatmul.msk.f32.gmra.mxu1 %vm163_vm1, %v1287_v57 }
0x10a9   : > { %v1314_v42 = vpop.f32.mrf.mxu1 }
0x10aa   : > { %v1315_v2 = vadd.f32 %v6659_v33, %v1314_v42 }
0x10ac   : > { %v1323_v63 = vmax.f32 %v1315_v2, 0.0 }
0x10ae   : > { %5678 = vmatmul.msk.f32.vlgmr.msrb.gmra.mxu2 %vm163_vm1, %v1323_v63 }
0x10af   : > { %1967 = vmatpush.msrb.mxu2 %v6624_v26 }
0x10b1   : > { %1968 = vmatpush.msrb.mxu2 %v6619_v25 }
0x10b3   : > { %1969 = vmatpush.msrb.mxu2 %v6614_v24 }
0x10b5   : > { %1970 = vmatpush.msrb.mxu2 %v6609_v23 }
0x10b7   : > { %1971 = vmatpush.msrb.mxu2 %v6604_v22 }
0x10b9   : > { %1972 = vmatpush.msrb.mxu2 %v6599_v21 }
0x110b   : > { %v1317_v58 = vpop.f32.mrf.mxu1 }
0x110c   : > { %v1318_v59 = vadd.f32 %v6659_v33, %v1317_v58 }
0x110e   : > { %v1324_v9 = vmax.f32 %v1318_v59, 0.0  ;;  %v8864_v59 = vld [vmem:[#allocation10_spill] sm:$0xff] }
0x1110   : > { %5679 = vmatmul.msk.f32.gmra.mxu2 %vm163_vm1, %v1324_v9  ;;  %v8865_v9 = vld [vmem:[#allocation9_spill] sm:$0xff] }
0x1113   : > { %v1320_v46 = vpop.f32.mrf.mxu1 }
0x1114   : > { %v1321_v53 = vadd.f32 %v6659_v33, %v1320_v46 }
0x1116   : > { %v1325_v61 = vmax.f32 %v1321_v53, 0.0 }
0x1118   : > { %5680 = vmatmul.msk.f32.gmra.mxu2 %vm163_vm1, %v1325_v61 }
0x1131   : > { %v1352_v38 = vpop.f32.mrf.mxu2 }
0x1132   : > { %v1353_v12 = vadd.f32 %v6664_v34, %v1352_v38 }
0x1134   : > { %v1361_v35 = vmax.f32 %v1353_v12, 0.0 }
0x1136   : > { %v1364_v10 = vadd.f32 %v1361_v35, %v1285_v60 }
0x1138   : > { %5681 = vmatmul.msk.f32.vlgmr.msrb.gmra.mxu0 %vm163_vm1, %v1364_v10  ;;  %v8866_v10 = vld [vmem:[#allocation21_spill] sm:$0xff] }
0x1139   : > { %2005 = vmatpush.msrb.mxu0 %v6654_v32 }
0x113b   : > { %2006 = vmatpush.msrb.mxu0 %v6649_v31 }
0x113d   : > { %2007 = vmatpush.msrb.mxu0 %v6644_v30 }
0x113f   : > { %2008 = vmatpush.msrb.mxu0 %v6639_v29 }
0x1141   : > { %2009 = vmatpush.msrb.mxu0 %v6634_v28 }
0x1143   : > { %2010 = vmatpush.msrb.mxu0 %v6629_v27 }
0x1193   : > { %v1355_v8 = vpop.f32.mrf.mxu2 }
0x1194   : > { %v1356_v56 = vadd.f32 %v6664_v34, %v1355_v8 }
0x1196   : > { %v1362_v52 = vmax.f32 %v1356_v56, 0.0 }
0x1198   : > { %v1365_v44 = vadd.f32 %v1362_v52, %v1286_v0  ;;  %v8863_v0 = vld [vmem:[#allocation11_spill] sm:$0xff]  ;;  %v8867_v52 = vld [vmem:[#allocation16_spill] sm:$0xff] }
0x119a   : > { %5682 = vmatmul.msk.f32.gmra.mxu0 %vm163_vm1, %v1365_v44  ;;  %v8868_v44 = vld [vmem:[#allocation15_spill] sm:$0xff] }
0x119b   : > { %v1358_v60 = vpop.f32.mrf.mxu2 }
0x119c   : > { %v1359_v49 = vadd.f32 %v6664_v34, %v1358_v60  ;;  %v8869_v60 = vld [vmem:[#allocation14_spill] sm:$0xff] }
0x119e   : > { %v1363_v47 = vmax.f32 %v1359_v49, 0.0  ;;  %v8870_v49 = vld [vmem:[#allocation13_spill] sm:$0xff] }
0x11a0   : > { %v1366_v42 = vadd.f32 %v1363_v47, %v1287_v57 }
0x11a2   : > { %5683 = vmatmul.msk.f32.gmra.mxu0 %vm163_vm1, %v1366_v42 }
0x11b5   : > { %v1393_v2 = vpop.f32.mrf.mxu0 }
0x11b6   : > { %v1394_v63 = vadd.f32 %v6699_v41, %v1393_v2 }
0x11b8   : > { %v1402_v58 = vmax.f32 %v1394_v63, 0.0 }
0x11ba   : > { %5684 = vmatmul.msk.f32.vlgmr.msrb.gmra.mxu3 %vm159_vm0, %v1402_v58 }
0x11bb   : > { %2046 = vmatpush.msrb.mxu3 %v6694_v40 }
0x11bd   : > { %2047 = vmatpush.msrb.mxu3 %v6689_v39 }
0x11bf   : > { %2048 = vmatpush.msrb.mxu3 %v8840_v50 }
0x11c1   : > { %2049 = vmatpush.msrb.mxu3 %v8863_v0 }
0x11c3   : > { %2050 = vmatpush.msrb.mxu3 %v8864_v59 }
0x11c5   : > { %2051 = vmatpush.msrb.mxu3 %v8865_v9 }
0x1217   : > { %v1396_v57 = vpop.f32.mrf.mxu0 }
0x1218   : > { %v1397_v46 = vadd.f32 %v6699_v41, %v1396_v57 }
0x121a   : > { %v1403_v53 = vmax.f32 %v1397_v46, 0.0 }
0x121c   : > { %5685 = vmatmul.msk.f32.gmra.mxu3 %vm159_vm0, %v1403_v53 }
0x121f   : > { %v1399_v61 = vpop.f32.mrf.mxu0 }
0x1220   : > { %v1400_v38 = vadd.f32 %v6699_v41, %v1399_v61 }
0x1222   : > { %v1404_v12 = vmax.f32 %v1400_v38, 0.0  ;;  %v8871_v38 = vld [vmem:[#allocation22_spill] sm:$0xff] }
0x1224   : > { %5686 = vmatmul.msk.f32.gmra.mxu3 %vm159_vm0, %v1404_v12 }
0x123d   : > { %v1431_v35 = vpop.f32.mrf.mxu3 }
0x123e   : > { %v1432_v8 = vadd.f32 %v8866_v10, %v1431_v35 }
0x1240   : > { %v1440_v56 = vmax.f32 %v1432_v8, 0.0 }
0x1242   : > { %5687 = vmatmul.msk.f32.vlgmr.msra.gmra.mxu1 %vm159_vm0, %v1440_v56 }
0x1243   : > { %2086 = vmatpush.msra.mxu1 %v8867_v52 }
0x1245   : > { %2087 = vmatpush.msra.mxu1 %v8868_v44 }
0x1247   : > { %2088 = vmatpush.msra.mxu1 %v8869_v60  ;;  %v8873_v60 = vld [vmem:[#allocation19_spill] sm:$0xff] }
0x1249   : > { %2089 = vmatpush.msra.mxu1 %v8870_v49  ;;  %v8872_v49 = vld [vmem:[#allocation20_spill] sm:$0xff] }
0x129f   : > { %v1434_v47 = vpop.f32.mrf.mxu3 }
0x12a0   : > { %v1435_v42 = vadd.f32 %v8866_v10, %v1434_v47  ;;  %v8874_v47 = vld [vmem:[#allocation18_spill] sm:$0xff] }
0x12a2   : > { %v1441_v2 = vmax.f32 %v1435_v42, 0.0  ;;  %v8875_v42 = vld [vmem:[#allocation17_spill] sm:$0xff] }
0x12a4   : > { %5688 = vmatmul.msk.f32.gmra.mxu1 %vm159_vm0, %v1441_v2 }
0x12a7   : > { %v1437_v63 = vpop.f32.mrf.mxu3 }
0x12a8   : > { %v1438_v57 = vadd.f32 %v8866_v10, %v1437_v63 }
0x12aa   : > { %v1442_v46 = vmax.f32 %v1438_v57, 0.0 }
0x12ac   : > { %5689 = vmatmul.msk.f32.gmra.mxu1 %vm159_vm0, %v1442_v46 }
0x12bf   : > { %v1469_v61 = vpop.f32.mrf.mxu1 }
0x12c0   : > { %v1470_v35 = vadd.f32 %v8871_v38, %v1469_v61 }
0x12c2   : > { %v1478_v8 = vmax.f32 %v1470_v35, 0.0 }
0x12c4   : > { %v1481_v56 = vadd.f32 %v1478_v8, %v1402_v58 }
0x12c6   : > { %5690 = vmatmul.msk.f32.vlgmr.msra.gmra.mxu2 %vm159_vm0, %v1481_v56 }
0x12c7   : > { %2124 = vmatpush.msra.mxu2 %v8872_v49 }
0x12c9   : > { %2125 = vmatpush.msra.mxu2 %v8873_v60 }
0x12cb   : > { %2126 = vmatpush.msra.mxu2 %v8874_v47  ;;  %v8876_v47 = vld [vmem:[#allocation27_spill] sm:$0xff] }
0x12cd   : > { %2127 = vmatpush.msra.mxu2 %v8875_v42  ;;  %v8877_v42 = vld [vmem:[#allocation30_spill] sm:$0xff] }
0x1321   : > { %v1472_v2 = vpop.f32.mrf.mxu1 }
0x1322   : > { %v1473_v63 = vadd.f32 %v8871_v38, %v1472_v2 }
0x1324   : > { %v1479_v57 = vmax.f32 %v1473_v63, 0.0 }
0x1326   : > { %v1482_v46 = vadd.f32 %v1479_v57, %v1403_v53  ;;  %v8879_v57 = vld [vmem:[#allocation29_spill] sm:$0xff] }
0x1328   : > { %5691 = vmatmul.msk.f32.gmra.mxu2 %vm159_vm0, %v1482_v46 }
0x1329   : > { %v1475_v61 = vpop.f32.mrf.mxu1 }
0x132a   : > { %v1476_v58 = vadd.f32 %v8871_v38, %v1475_v61 }
0x132c   : > { %v1480_v35 = vmax.f32 %v1476_v58, 0.0  ;;  %v8881_v58 = vld [vmem:[#allocation28_spill] sm:$0xff] }
0x132e   : > { %v1483_v8 = vadd.f32 %v1480_v35, %v1404_v12 }
0x1330   : > { %5692 = vmatmul.msk.f32.gmra.mxu2 %vm159_vm0, %v1483_v8 }
0x1349   : > { %v1510_v56 = vpop.f32.mrf.mxu2 }
0x134a   : > { %v1511_v60 = vadd.f32 %v8876_v47, %v1510_v56 }
0x134c   : > { %v1519_v49 = vmax.f32 %v1511_v60, 0.0 }
0x134e   : > { %v7300_v44 = vadd.f32 %v1519_v49, %v8877_v42 }
0x1350   : > { %8878 = vst [vmem:[#allocation30_spill] sm:$0xff] %v7300_v44  ;;  %v1531_v53 = vsel %vm184_vm3, %v7300_v44, 0.0 }
0x1351   : > { %5695 = vst.msk [vmem:[%s7081_s8 + $0x18] sm:$0xff] %vm184_vm3, %v7300_v44  ;;  %1532 = vadd.xlane.f32.xlu0 %v1531_v53 }
0x13ab   : > { %v1513_v2 = vpop.f32.mrf.mxu2 }
0x13ac   : > { %v1514_v12 = vadd.f32 %v8876_v47, %v1513_v2 }
0x13ae   : > { %v1520_v63 = vmax.f32 %v1514_v12, 0.0 }
0x13b0   : > { %v7309_v46 = vadd.f32 %v1520_v63, %v8879_v57 }
0x13b2   : > { %8880 = vst [vmem:[#allocation29_spill] sm:$0xff] %v7309_v46  ;;  %v1534_v60 = vsel %vm184_vm3, %v7309_v46, 0.0 }
0x13b3   : > { %5696 = vst.msk [vmem:[%s7081_s8 + $0x20] sm:$0xff] %vm184_vm3, %v7309_v46  ;;  %v1516_v49 = vpop.f32.mrf.mxu2  ;;  %1535 = vadd.xlane.f32.xlu2 %v1534_v60 }
0x13b4   : > { %v1517_v42 = vadd.f32 %v8876_v47, %v1516_v49 }
0x13b6   : > { %v1521_v61 = vmax.f32 %v1517_v42, 0.0 }
0x13b8   : > { %v7318_v35 = vadd.f32 %v1521_v61, %v8881_v58 }
0x13ba   : > { %8882 = vst [vmem:[#allocation28_spill] sm:$0xff] %v7318_v35  ;;  %v1537_v8 = vsel %vm191_vm4, %v7318_v35, 0.0 }
0x13bb   : > { %5697 = vst.msk [vmem:[%s7081_s8 + $0x28] sm:$0xf] %vm191_vm4, %v7318_v35  ;;  %1538 = vadd.xlane.f32.xlu1 %v1537_v8 }
0x13c4   : > { %v1533_v56 = vpop.xlane.xlu0 %1532 }
0x13c5   : > { %v1540_v53 = vmul.f32 %v1533_v56, %v6872_v48 }
0x13c7   : > { %v1543_v2 = vsub.f32 %v7300_v44, %v1540_v53 }
0x13c9   : > { %v1546_v12 = vmul.f32 %v1543_v2, %v1543_v2 }
0x13cb   : > { %v1549_v63 = vsel %vm184_vm3, %v1546_v12, 0.0 }
0x13cc   : > { %1550 = vadd.xlane.f32.xlu0 %v1549_v63 }
0x13d4   : > { %1599 = vrot.lane.b32.xlu1 %v7170_v43, %s6403_s15 }
0x1426   : > { %v1536_v57 = vpop.xlane.xlu2 %1535 }
0x1427   : > { %v1541_v60 = vmul.f32 %v1536_v57, %v6872_v48 }
0x1429   : > { %v1544_v49 = vsub.f32 %v7309_v46, %v1541_v60 }
0x142b   : > { %v1547_v42 = vmul.f32 %v1544_v49, %v1544_v49 }
0x142d   : > { %v1552_v61 = vsel %vm184_vm3, %v1547_v42, 0.0 }
0x142e   : > { %v1539_v58 = vpop.xlane.xlu1 %1538  ;;  %1553 = vadd.xlane.f32.xlu2 %v1552_v61 }
0x142f   : > { %v1542_v8 = vmul.f32 %v1539_v58, %v6872_v48 }
0x1431   : > { %v1545_v56 = vsub.f32 %v7318_v35, %v1542_v8 }
0x1433   : > { %v1548_v53 = vmul.f32 %v1545_v56, %v1545_v56 }
0x1435   : > { %v1555_v12 = vsel %vm191_vm4, %v1548_v53, 0.0 }
0x1436   : > { %1556 = vadd.xlane.f32.xlu0 %v1555_v12 }
0x143f   : > { %v1551_v63 = vpop.xlane.xlu0 %1550 }
0x1440   : > { %v1558_v57 = vmul.f32 %v1551_v63, %v6872_v48 }
0x1442   : > { %v1561_v60 = vadd.f32 1e-05, %v1558_v57 }
0x1444   : > { %6109 = vrsqrt.f32 %v1561_v60  ;;  %vm1570_vm7 = vweird.f32 %v1561_v60 }
0x1446   : > { %1597 = vrot.lane.b32.xlu2 %v7165_v51, %s6403_s15 }
0x144a   : > { %1601 = vrot.lane.b32.xlu0 %v7175_v62, %s6403_s15  ;;  %v6110_v42 = vpop.eup %6109 }
0x144b   : > { %v1565_v61 = vmul.f32 %v6110_v42, %v1561_v60  ;;  %vm1571_vm6 = vweird.f32 %v6110_v42 }
0x144c   : > { %vm1572_vm8 = vmor %vm1570_vm7, %vm1571_vm6 }
0x144d   : > { %v1566_v58 = vmul.f32 %v6110_v42, %v1565_v61 }
0x144f   : > { %v1567_v46 = vmul.f32 0.5, %v1566_v58 }
0x1451   : > { %v1568_v8 = vsub.f32 1.5, %v1567_v46 }
0x1453   : > { %v1569_v35 = vmul.f32 %v6110_v42, %v1568_v8 }
0x1455   : > { %v1573_v47 = vsel %vm1572_vm8, %v6110_v42, %v1569_v35  ;;  %v8883_v35 = vld [vmem:[#allocation24_spill] sm:$0xff] }
0x1456   : > { %v1594_v38 = vmul.f32 %v1573_v47, %v1543_v2  ;;  %v8884_v2 = vld [vmem:[#allocation23_spill] sm:$0xff] }
0x14a1   : > { %v1554_v53 = vpop.xlane.xlu2 %1553 }
0x14a2   : > { %v1559_v12 = vmul.f32 %v1554_v53, %v6872_v48 }
0x14a4   : > { %v1562_v44 = vadd.f32 1e-05, %v1559_v12 }
0x14a6   : > { %6111 = vrsqrt.f32 %v1562_v44  ;;  %vm1580_vm11 = vweird.f32 %v1562_v44 }
0x14a9   : > { %v1598_v52 = vpop.permute.xlu2 %1597  ;;  %v1557_v63 = vpop.xlane.xlu0 %1556 }
0x14aa   : > { %v1606_v57 = vsel %vm184_vm3, %v1594_v38, %v1598_v52  ;;  %v1560_v10 = vmul.f32 %v1557_v63, %v6872_v48  ;;  %v1600_v63 = vpop.permute.xlu1 %1599 }
0x14ab   : > { %5698 = vmatmul.msk.f32.vlgmr.msra.gmra.mxu0 %vm274_vm9, %v1606_v57 }
0x14ac   : > { %v6112_v46 = vpop.eup %6111  ;;  %v1563_v61 = vadd.f32 1e-05, %v1560_v10  ;;  %2165 = vmatpush.msra.mxu0 %v8814_v55 }
0x14ad   : > { %v1575_v58 = vmul.f32 %v6112_v46, %v1562_v44  ;;  %vm1581_vm10 = vweird.f32 %v6112_v46 }
0x14ae   : > { %6113 = vrsqrt.f32 %v1563_v61  ;;  %2166 = vmatpush.msra.mxu0 %v8815_v54  ;;  %vm1582_vm12 = vmor %vm1580_vm11, %vm1581_vm10  ;;  %vm1590_vm14 = vweird.f32 %v1563_v61 }
0x14af   : > { %v1576_v60 = vmul.f32 %v6112_v46, %v1575_v58 }
0x14b0   : > { %2167 = vmatpush.msra.mxu0 %v8883_v35 }
0x14b1   : > { %v1577_v47 = vmul.f32 0.5, %v1576_v60 }
0x14b2   : > { %2168 = vmatpush.msra.mxu0 %v8884_v2 }
0x14b3   : > { %v1578_v42 = vsub.f32 1.5, %v1577_v47 }
0x14b4   : > { %v6114_v52 = vpop.eup %6113 }
0x14b5   : > { %v1579_v38 = vmul.f32 %v6112_v46, %v1578_v42  ;;  %v1585_v8 = vmul.f32 %v6114_v52, %v1563_v61  ;;  %vm1591_vm13 = vweird.f32 %v6114_v52 }
0x14b6   : > { %vm1592_vm15 = vmor %vm1590_vm14, %vm1591_vm13 }
0x14b7   : > { %v1586_v10 = vmul.f32 %v6114_v52, %v1585_v8  ;;  %v1583_v53 = vsel %vm1582_vm12, %v6112_v46, %v1579_v38 }
0x14b8   : > { %v1595_v12 = vmul.f32 %v1583_v53, %v1544_v49  ;;  %v8885_v49 = vld [vmem:[#allocation3_spill] sm:$0xff] }
0x14b9   : > { %v1587_v57 = vmul.f32 0.5, %v1586_v10 }
0x14ba   : > { %v1607_v54 = vsel %vm184_vm3, %v1595_v12, %v1600_v63 }
0x14bb   : > { %v1588_v58 = vsub.f32 1.5, %v1587_v57  ;;  %5699 = vmatmul.msk.f32.gmra.mxu0 %vm274_vm9, %v1607_v54 }
0x14bc   : > { %v1602_v42 = vpop.permute.xlu0 %1601 }
0x14bd   : > { %v1589_v60 = vmul.f32 %v6114_v52, %v1588_v58 }
0x14bf   : > { %v1593_v47 = vsel %vm1592_vm15, %v6114_v52, %v1589_v60 }
0x14c0   : > { %v1596_v2 = vmul.f32 %v1593_v47, %v1545_v56 }
0x14c2   : > { %v1608_v44 = vsel %vm184_vm3, %v1596_v2, %v1602_v42 }
0x14c3   : > { %5700 = vmatmul.msk.f32.gmra.mxu0 %vm274_vm9, %v1608_v44 }
0x1528   : > { %v1635_v46 = vpop.f32.mrf.mxu0 }
0x1529   : > { %v7354_v38 = vadd.f32 %v8885_v49, %v1635_v46 }
0x152b   : > { %1704 = vrot.lane.b32.xlu2 %v7354_v38, %s6404_s18  ;;  %v5701_v2 = vmul.f32 -1.442695, %v7354_v38 }
0x152d   : > { %6115 = vpow2.f32 %v5701_v2 }
0x1533   : > { %v6116_v52 = vpop.eup %6115 }
0x1534   : > { %v1653_v10 = vadd.f32 1.0, %v6116_v52 }
0x1536   : > { %6117 = vrcp.f32 %v1653_v10  ;;  %v1667_v60 = vand.u32 2147483648, %v1653_v10  ;;  %vm1661_vm6 = vweird.f32 %v1653_v10  ;;  %v1665_v42 = vand.u32 2147483647, %v1653_v10 }
0x1538   : > { %v1638_v8 = vpop.f32.mrf.mxu0  ;;  %v1668_v46 = vor.u32 1.1754944e-38, %v1667_v60  ;;  %vm1666_vm8 = vcmp.eq.f32.partialorder %v1665_v42, 8.507059e+37 }
0x1539   : > { %v7359_v54 = vadd.f32 %v8885_v49, %v1638_v8 }
0x153b   : > { %1706 = vrot.lane.b32.xlu0 %v7359_v54, %s6404_s18  ;;  %v5702_v47 = vmul.f32 -1.442695, %v7359_v54 }
0x153c   : > { %v6118_v53 = vpop.eup %6117 }
0x153d   : > { %v1657_v12 = vmul.f32 %v6118_v53, %v1653_v10  ;;  %vm1662_vm2 = vweird.f32 %v6118_v53  ;;  %6119 = vpow2.f32 %v5702_v47 }
0x153e   : > { %vm1663_vm7 = vmor %vm1661_vm6, %vm1662_vm2 }
0x153f   : > { %v1658_v63 = vsub.f32 1.0, %v1657_v12 }
0x1540   : > { %v1641_v56 = vpop.f32.mrf.mxu0 }
0x1541   : > { %v7364_v61 = vadd.f32 %v8885_v49, %v1641_v56  ;;  %v1659_v57 = vmul.f32 %v6118_v53, %v1658_v63 }
0x1543   : > { %1708 = vrot.lane.b32.xlu1 %v7364_v61, %s6404_s18  ;;  %v1660_v58 = vadd.f32 %v6118_v53, %v1659_v57  ;;  %v5703_v52 = vmul.f32 -1.442695, %v7364_v61  ;;  %v6120_v12 = vpop.eup %6119 }
0x1544   : > { %v1654_v63 = vadd.f32 1.0, %v6120_v12 }
0x1545   : > { %v1664_v44 = vsel %vm1663_vm7, %v6118_v53, %v1660_v58  ;;  %6121 = vpow2.f32 %v5703_v52 }
0x1546   : > { %v7370_v56 = vsel %vm1666_vm8, %v1668_v46, %v1664_v44  ;;  %6123 = vrcp.f32 %v1654_v63  ;;  %vm1676_vm11 = vweird.f32 %v1654_v63  ;;  %v1680_v35 = vand.u32 2147483647, %v1654_v63 }
0x1548   : > { %vm1681_vm13 = vcmp.eq.f32.partialorder %v1680_v35, 8.507059e+37 }
0x154b   : > { %v6122_v57 = vpop.eup %6121 }
0x154c   : > { %v1655_v10 = vadd.f32 1.0, %v6122_v57  ;;  %v6124_v49 = vpop.eup %6123 }
0x154d   : > { %v1672_v53 = vmul.f32 %v6124_v49, %v1654_v63  ;;  %vm1677_vm10 = vweird.f32 %v6124_v49 }
0x154e   : > { %6125 = vrcp.f32 %v1655_v10  ;;  %vm1678_vm12 = vmor %vm1676_vm11, %vm1677_vm10  ;;  %vm1691_vm15 = vweird.f32 %v1655_v10 }
0x154f   : > { %v1673_v58 = vsub.f32 1.0, %v1672_v53  ;;  %v1697_v53 = vand.u32 2147483648, %v1655_v10 }
0x1551   : > { %v1674_v47 = vmul.f32 %v6124_v49, %v1673_v58  ;;  %v1695_v58 = vand.u32 2147483647, %v1655_v10 }
0x1553   : > { %v1675_v44 = vadd.f32 %v6124_v49, %v1674_v47  ;;  %vm1696_vm6 = vcmp.eq.f32.partialorder %v1695_v58, 8.507059e+37 }
0x1554   : > { %v6126_v60 = vpop.eup %6125 }
0x1555   : > { %v1687_v42 = vmul.f32 %v6126_v60, %v1655_v10  ;;  %vm1692_vm14 = vweird.f32 %v6126_v60 }
0x1556   : > { %vm1693_vm2 = vmor %vm1691_vm15, %vm1692_vm14 }
0x1557   : > { %v1688_v46 = vsub.f32 1.0, %v1687_v42  ;;  %v1698_v42 = vor.u32 1.1754944e-38, %v1697_v53 }
0x1559   : > { %v1689_v52 = vmul.f32 %v6126_v60, %v1688_v46 }
0x155b   : > { %v1690_v9 = vadd.f32 %v6126_v60, %v1689_v52 }
0x155d   : > { %v1694_v47 = vsel %vm1693_vm2, %v6126_v60, %v1690_v9 }
0x155e   : > { %v1699_v59 = vsel %vm1696_vm6, %v1698_v42, %v1694_v47 }
0x1585   : > { %v1705_v8 = vpop.permute.xlu2 %1704 }
0x1586   : > { %v1713_v2 = vmul.f32 %v1705_v8, %v7370_v56  ;;  %v1682_v8 = vand.u32 2147483648, %v1654_v63 }
0x1588   : > { %1719 = vrot.lane.b32.xlu2 %v1713_v2, %s6405_s4  ;;  %v1679_v2 = vsel %vm1678_vm12, %v6124_v49, %v1675_v44  ;;  %v1683_v12 = vor.u32 1.1754944e-38, %v1682_v8 }
0x158a   : > { %v1684_v55 = vsel %vm1681_vm13, %v1683_v12, %v1679_v2  ;;  %v1752_v12 = vmul.f32 %v7370_v56, %v7165_v51 }
0x158b   : > { %v1753_v58 = vmul.f32 %v1684_v55, %v7170_v43 }
0x15ad   : > { %v1707_v57 = vpop.permute.xlu0 %1706 }
0x15ae   : > { %v1714_v48 = vmul.f32 %v1707_v57, %v1684_v55 }
0x15b0   : > { %1721 = vrot.lane.b32.xlu0 %v1714_v48, %s6405_s4 }
0x15b5   : > { %v1709_v63 = vpop.permute.xlu1 %1708 }
0x15b6   : > { %v1715_v49 = vmul.f32 %v1709_v63, %v1699_v59 }
0x15b8   : > { %1723 = vrot.lane.b32.xlu1 %v1715_v49, %s6405_s4  ;;  %v1736_v49 = vsub.f32 1.0, %v1699_v59 }
0x15e2   : > { %v1720_v35 = vpop.permute.xlu2 %1719 }
0x15e3   : > { %v1728_v44 = vadd.f32 %v1720_v35, %v7354_v38  ;;  %v1734_v38 = vsub.f32 1.0, %v7370_v56  ;;  %v1754_v56 = vmul.f32 %v1699_v59, %v7175_v62 }
0x15e5   : > { %6127 = vtanh.f32 %v1728_v44 }
0x15eb   : > { %v6128_v46 = vpop.eup %6127 }
0x15ec   : > { %1740 = vrot.lane.b32.xlu2 %v6128_v46, %s6406_s19 }
0x1622   : > { %v1722_v8 = vpop.permute.xlu0 %1721 }
0x1623   : > { %v1729_v48 = vadd.f32 %v1722_v8, %v7359_v54  ;;  %v1735_v54 = vsub.f32 1.0, %v1684_v55 }
0x1625   : > { %6129 = vtanh.f32 %v1729_v48 }
0x162a   : > { %v1724_v10 = vpop.permute.xlu1 %1723 }
0x162b   : > { %v6130_v9 = vpop.eup %6129  ;;  %v1730_v60 = vadd.f32 %v1724_v10, %v7364_v61 }
0x162c   : > { %1742 = vrot.lane.b32.xlu0 %v6130_v9, %s6406_s19 }
0x162d   : > { %6131 = vtanh.f32 %v1730_v60 }
0x1633   : > { %v6132_v2 = vpop.eup %6131 }
0x1634   : > { %1744 = vrot.lane.b32.xlu1 %v6132_v2, %s6406_s19 }
0x1646   : > { %v1741_v52 = vpop.permute.xlu2 %1740 }
0x1647   : > { %v1749_v57 = vmul.f32 %v1741_v52, %v1734_v38 }
0x1649   : > { %v7386_v53 = vadd.f32 %v1752_v12, %v1749_v57 }
0x164b   : > { %1761 = vrot.lane.b32.xlu2 %v7386_v53, %s6406_s19 }
0x169e   : > { %v1743_v61 = vpop.permute.xlu0 %1742 }
0x169f   : > { %v1750_v47 = vmul.f32 %v1743_v61, %v1735_v54 }
0x16a1   : > { %v7391_v42 = vadd.f32 %v1753_v58, %v1750_v47 }
0x16a3   : > { %1763 = vrot.lane.b32.xlu0 %v7391_v42, %s6406_s19 }
0x16a5   : > { %v1762_v63 = vpop.permute.xlu2 %1761 }
0x16a6   : > { %v1745_v35 = vpop.permute.xlu1 %1744  ;;  %v1770_v51 = vsel %vm159_vm0, %v1762_v63, 0.0 }
0x16a7   : > { %v1751_v44 = vmul.f32 %v1745_v35, %v1736_v49  ;;  %1771 = vadd.xlane.f32.xlu2 %v1770_v51 }
0x16a9   : > { %v7397_v46 = vadd.f32 %v1754_v56, %v1751_v44 }
0x16ab   : > { %1765 = vrot.lane.b32.xlu1 %v7397_v46, %s6406_s19 }
0x1715   : > { %v1764_v55 = vpop.permute.xlu0 %1763 }
0x1716   : > { %v1773_v43 = vsel %vm159_vm0, %v1764_v55, 0.0 }
0x1717   : > { %1774 = vadd.xlane.f32.xlu0 %v1773_v43 }
0x171a   : > { %v1772_v8 = vpop.xlane.xlu2 %1771 }
0x171b   : > { %v1779_v48 = vmul.f32 %v1772_v8, %v8837_v37 }
0x171d   : > { %v1782_v10 = vsub.f32 %v7386_v53, %v1779_v48  ;;  %v1766_v9 = vpop.permute.xlu1 %1765 }
0x171e   : > { %v1776_v60 = vsel %vm442_vm5, %v1766_v9, 0.0 }
0x171f   : > { %1777 = vadd.xlane.f32.xlu1 %v1776_v60  ;;  %v1785_v62 = vmul.f32 %v1782_v10, %v1782_v10 }
0x1721   : > { %1791 = vrot.lane.b32.xlu2 %v1785_v62, %s6406_s19 }
0x177b   : > { %v1792_v58 = vpop.permute.xlu2 %1791 }
0x177c   : > { %v1800_v47 = vsel %vm159_vm0, %v1792_v58, 0.0 }
0x178a   : > { %v1775_v59 = vpop.xlane.xlu0 %1774 }
0x178b   : > { %v1780_v2 = vmul.f32 %v1775_v59, %v8837_v37 }
0x178d   : > { %v1783_v38 = vsub.f32 %v7391_v42, %v1780_v2 }
0x178f   : > { %v1786_v52 = vmul.f32 %v1783_v38, %v1783_v38 }
0x1791   : > { %1793 = vrot.lane.b32.xlu0 %v1786_v52, %s6406_s19 }
0x1792   : > { %v1778_v12 = vpop.xlane.xlu1 %1777 }
0x1793   : > { %v1781_v57 = vmul.f32 %v1778_v12, %v8837_v37 }
0x1795   : > { %v7411_v54 = vsub.f32 %v7397_v46, %v1781_v57 }
0x1797   : > { %v1787_v61 = vmul.f32 %v7411_v54, %v7411_v54 }
0x1799   : > { %1795 = vrot.lane.b32.xlu1 %v1787_v61, %s6406_s19 }
0x17bb   : > { %1801 = vadd.xlane.f32.xlu0 %v1800_v47 }
0x1803   : > { %v1794_v63 = vpop.permute.xlu0 %1793 }
0x1804   : > { %v1803_v49 = vsel %vm159_vm0, %v1794_v63, 0.0 }
0x1805   : > { %1804 = vadd.xlane.f32.xlu2 %v1803_v49 }
0x180b   : > { %v1796_v35 = vpop.permute.xlu1 %1795 }
0x180c   : > { %v1806_v51 = vsel %vm442_vm5, %v1796_v35, 0.0 }
0x180d   : > { %1807 = vadd.xlane.f32.xlu1 %v1806_v51 }
0x182e   : > { %v1802_v56 = vpop.xlane.xlu0 %1801 }
0x182f   : > { %v1809_v44 = vmul.f32 %v1802_v56, %v8837_v37 }
0x1831   : > { %v1812_v55 = vadd.f32 1e-05, %v1809_v44 }
0x1833   : > { %6133 = vrsqrt.f32 %v1812_v55  ;;  %vm1821_vm8 = vweird.f32 %v1812_v55 }
0x1839   : > { %v6134_v43 = vpop.eup %6133 }
0x183a   : > { %v1816_v8 = vmul.f32 %v6134_v43, %v1812_v55  ;;  %vm1822_vm7 = vweird.f32 %v6134_v43 }
0x183b   : > { %vm1823_vm10 = vmor %vm1821_vm8, %vm1822_vm7 }
0x183c   : > { %v1817_v48 = vmul.f32 %v6134_v43, %v1816_v8 }
0x183e   : > { %v1818_v9 = vmul.f32 0.5, %v1817_v48 }
0x1840   : > { %v1819_v60 = vsub.f32 1.5, %v1818_v9 }
0x1842   : > { %v1820_v62 = vmul.f32 %v6134_v43, %v1819_v60 }
0x1844   : > { %v1824_v59 = vsel %vm1823_vm10, %v6134_v43, %v1820_v62 }
0x1845   : > { %v1845_v2 = vmul.f32 %v1824_v59, %v1782_v10 }
0x1847   : > { %v1848_v52 = vmul.f32 %v1845_v2, %v6975_v45 }
0x1849   : > { %v1851_v12 = vadd.f32 %v1848_v52, %v6977_v1 }
0x184b   : > { %1857 = vrot.lane.b32.xlu0 %v1851_v12, %s6406_s19 }
0x1878   : > { %v1805_v57 = vpop.xlane.xlu2 %1804 }
0x1879   : > { %v1810_v61 = vmul.f32 %v1805_v57, %v8837_v37 }
0x187b   : > { %v1813_v58 = vadd.f32 1e-05, %v1810_v61 }
0x187d   : > { %6135 = vrsqrt.f32 %v1813_v58  ;;  %vm1831_vm12 = vweird.f32 %v1813_v58 }
0x1880   : > { %v1808_v47 = vpop.xlane.xlu1 %1807 }
0x1881   : > { %v1811_v63 = vmul.f32 %v1808_v47, %v8837_v37 }
0x1883   : > { %v6136_v49 = vpop.eup %6135  ;;  %v1814_v35 = vadd.f32 1e-05, %v1811_v63 }
0x1884   : > { %v1826_v51 = vmul.f32 %v6136_v49, %v1813_v58  ;;  %vm1832_vm11 = vweird.f32 %v6136_v49 }
0x1885   : > { %6137 = vrsqrt.f32 %v1814_v35  ;;  %vm1833_vm13 = vmor %vm1831_vm12, %vm1832_vm11  ;;  %vm1841_vm15 = vweird.f32 %v1814_v35 }
0x1886   : > { %v1827_v56 = vmul.f32 %v6136_v49, %v1826_v51 }
0x1888   : > { %v1828_v10 = vmul.f32 0.5, %v1827_v56 }
0x188a   : > { %v1829_v44 = vsub.f32 1.5, %v1828_v10 }
0x188b   : > { %v6138_v55 = vpop.eup %6137 }
0x188c   : > { %v1830_v43 = vmul.f32 %v6136_v49, %v1829_v44  ;;  %v1836_v8 = vmul.f32 %v6138_v55, %v1814_v35  ;;  %vm1842_vm14 = vweird.f32 %v6138_v55 }
0x188d   : > { %vm1843_vm2 = vmor %vm1841_vm15, %vm1842_vm14 }
0x188e   : > { %v1834_v48 = vsel %vm1833_vm13, %v6136_v49, %v1830_v43  ;;  %v1837_v9 = vmul.f32 %v6138_v55, %v1836_v8 }
0x188f   : > { %v1846_v60 = vmul.f32 %v1834_v48, %v1783_v38 }
0x1890   : > { %v1838_v62 = vmul.f32 0.5, %v1837_v9 }
0x1891   : > { %v1849_v59 = vmul.f32 %v1846_v60, %v6975_v45 }
0x1892   : > { %v1839_v2 = vsub.f32 1.5, %v1838_v62 }
0x1893   : > { %v1852_v52 = vadd.f32 %v1849_v59, %v6977_v1 }
0x1894   : > { %v1840_v12 = vmul.f32 %v6138_v55, %v1839_v2 }
0x1895   : > { %1859 = vrot.lane.b32.xlu2 %v1852_v52, %s6406_s19 }
0x1896   : > { %v1844_v57 = vsel %vm1843_vm2, %v6138_v55, %v1840_v12 }
0x1897   : > { %v1847_v61 = vmul.f32 %v1844_v57, %v7411_v54 }
0x1899   : > { %v1850_v58 = vmul.f32 %v1847_v61, %v6975_v45 }
0x189b   : > { %v1853_v47 = vadd.f32 %v1850_v58, %v6977_v1 }
0x189d   : > { %1861 = vrot.lane.b32.xlu1 %v1853_v47, %s6406_s19 }
0x18bd   : > { %v1858_v38 = vpop.permute.xlu0 %1857 }
0x18be   : > { %5704 = vmatmul.msk.f32.vlgmr.msra.gmra.mxu3 %vm159_vm0, %v1858_v38 }
0x18bf   : > { %2289 = vmatpush.msra.mxu3 %v6529_v7 }
0x18c1   : > { %2290 = vmatpush.msra.mxu3 %v6524_v6 }
0x18c3   : > { %2291 = vmatpush.msra.mxu3 %v6519_v5 }
0x18c5   : > { %2292 = vmatpush.msra.mxu3 %v6514_v4 }
0x18c7   : > { %2293 = vmatpush.msra.mxu3 %v6509_v3 }
0x18ef   : > { %v1860_v54 = vpop.permute.xlu2 %1859 }
0x18f0   : > { %5705 = vmatmul.msk.f32.gmra.mxu3 %vm159_vm0, %v1860_v54 }
0x190f   : > { %v1862_v63 = vpop.permute.xlu1 %1861 }
0x1910   : > { %5706 = vmatmul.msk.f32.gmra.mxu3 %vm159_vm0, %v1862_v63 }
0x1941   : > { %v1886_v49 = vpop.f32.mrf.mxu3 }
0x1942   : > { %v1887_v35 = vadd.f32 %v6589_v19, %v1886_v49 }
0x1944   : > { %v1895_v51 = vmax.f32 %v1887_v35, 0.0 }
0x1946   : > { %5707 = vmatmul.msk.f32.vlgmr.msrb.gmra.mxu1 %vm159_vm0, %v1895_v51 }
0x1947   : > { %2541 = vmatpush.msrb.mxu1 %v6564_v14 }
0x1949   : > { %2542 = vmatpush.msrb.mxu1 %v6559_v13 }
0x194b   : > { %2543 = vmatpush.msrb.mxu1 %v8861_v11 }
0x194d   : > { %2544 = vmatpush.msrb.mxu1 %v8862_v36 }
0x1973   : > { %v1889_v56 = vpop.f32.mrf.mxu3 }
0x1974   : > { %v1890_v10 = vadd.f32 %v6589_v19, %v1889_v56 }
0x1976   : > { %v1896_v44 = vmax.f32 %v1890_v10, 0.0 }
0x1978   : > { %5708 = vmatmul.msk.f32.gmra.mxu1 %vm159_vm0, %v1896_v44 }
0x1993   : > { %v1892_v55 = vpop.f32.mrf.mxu3 }
0x1994   : > { %v1893_v43 = vadd.f32 %v6589_v19, %v1892_v55 }
0x1996   : > { %v1897_v8 = vmax.f32 %v1893_v43, 0.0 }
0x1998   : > { %5709 = vmatmul.msk.f32.gmra.mxu1 %vm159_vm0, %v1897_v8 }
0x19c3   : > { %v1924_v48 = vpop.f32.mrf.mxu1 }
0x19c4   : > { %v1925_v9 = vadd.f32 %v6594_v20, %v1924_v48 }
0x19c6   : > { %v1933_v60 = vmax.f32 %v1925_v9, 0.0 }
0x19c8   : > { %v1939_v62 = vadd.f32 %v1933_v60, %v1858_v38 }
0x19ca   : > { %1942 = vst.msk [vmem:[#allocation2] sm:$0xff] %vm159_vm0, %v1939_v62 }
0x19d1   : > { %v1945_v11 = vld [vmem:[#allocation2] sm:$0xff] }
0x19d2   : > { %5710 = vmatmul.msk.f32.vlgmr.msrb.gmra.mxu2 %vm163_vm1, %v1945_v11 }
0x19d3   : > { %2579 = vmatpush.msrb.mxu2 %v6584_v18 }
0x19d5   : > { %2580 = vmatpush.msrb.mxu2 %v6579_v17 }
0x19d7   : > { %2581 = vmatpush.msrb.mxu2 %v6574_v16 }
0x19d9   : > { %2582 = vmatpush.msrb.mxu2 %v6569_v15 }
0x19f5   : > { %v1927_v36 = vpop.f32.mrf.mxu1 }
0x19f6   : > { %v1928_v59 = vadd.f32 %v6594_v20, %v1927_v36 }
0x19f8   : > { %v1934_v2 = vmax.f32 %v1928_v59, 0.0 }
0x19fa   : > { %v1940_v52 = vadd.f32 %v1934_v2, %v1860_v54 }
0x19fc   : > { %1943 = vst.msk [vmem:[#allocation2 + $0x8] sm:$0xff] %vm159_vm0, %v1940_v52 }
0x1a03   : > { %v1946_v12 = vld [vmem:[#allocation2 + $0x8] sm:$0xff] }
0x1a04   : > { %5711 = vmatmul.msk.f32.gmra.mxu2 %vm163_vm1, %v1946_v12 }
0x1a15   : > { %v1930_v57 = vpop.f32.mrf.mxu1 }
0x1a16   : > { %v1931_v61 = vadd.f32 %v6594_v20, %v1930_v57 }
0x1a18   : > { %v1935_v58 = vmax.f32 %v1931_v61, 0.0 }
0x1a1a   : > { %v1941_v47 = vadd.f32 %v1935_v58, %v1862_v63 }
0x1a1c   : > { %1944 = vst.msk [vmem:[#allocation2 + $0x10] sm:$0xf] %vm442_vm5, %v1941_v47 }
0x1a23   : > { %v1947_v38 = vld [vmem:[#allocation2 + $0x10] sm:$0xf] }
0x1a24   : > { %5712 = vmatmul.msk.f32.gmra.mxu2 %vm163_vm1, %v1947_v38 }
0x1a55   : > { %v1974_v49 = vpop.f32.mrf.mxu2 }
0x1a56   : > { %v1975_v35 = vadd.f32 %v6659_v33, %v1974_v49  ;;  %v8887_v49 = vld [vmem:[#allocation9_spill] sm:$0xff] }
0x1a58   : > { %v1983_v51 = vmax.f32 %v1975_v35, 0.0 }
0x1a5a   : > { %5713 = vmatmul.msk.f32.vlgmr.msrb.gmra.mxu0 %vm163_vm1, %v1983_v51 }
0x1a5b   : > { %2627 = vmatpush.msrb.mxu0 %v6624_v26 }
0x1a5d   : > { %2628 = vmatpush.msrb.mxu0 %v6619_v25 }
0x1a5f   : > { %2629 = vmatpush.msrb.mxu0 %v6614_v24 }
0x1a61   : > { %2630 = vmatpush.msrb.mxu0 %v6609_v23 }
0x1a63   : > { %2631 = vmatpush.msrb.mxu0 %v6604_v22 }
0x1a65   : > { %2632 = vmatpush.msrb.mxu0 %v6599_v21 }
0x1a87   : > { %v1977_v54 = vpop.f32.mrf.mxu2 }
0x1a88   : > { %v1978_v63 = vadd.f32 %v6659_v33, %v1977_v54 }
0x1a8a   : > { %v1984_v56 = vmax.f32 %v1978_v63, 0.0 }
0x1a8c   : > { %5714 = vmatmul.msk.f32.gmra.mxu0 %vm163_vm1, %v1984_v56 }
0x1aa7   : > { %v1980_v10 = vpop.f32.mrf.mxu2 }
0x1aa8   : > { %v1981_v44 = vadd.f32 %v6659_v33, %v1980_v10 }
0x1aaa   : > { %v1985_v55 = vmax.f32 %v1981_v44, 0.0 }
0x1aac   : > { %5715 = vmatmul.msk.f32.gmra.mxu0 %vm163_vm1, %v1985_v55  ;;  %v8889_v55 = vld [vmem:[#allocation16_spill] sm:$0xff] }
0x1ad7   : > { %v2012_v43 = vpop.f32.mrf.mxu0 }
0x1ad8   : > { %v2013_v8 = vadd.f32 %v6664_v34, %v2012_v43  ;;  %v8890_v43 = vld [vmem:[#allocation15_spill] sm:$0xff] }
0x1ada   : > { %v2021_v48 = vmax.f32 %v2013_v8, 0.0  ;;  %v8891_v8 = vld [vmem:[#allocation14_spill] sm:$0xff] }
0x1adc   : > { %v2024_v9 = vadd.f32 %v2021_v48, %v1945_v11  ;;  %v8892_v48 = vld [vmem:[#allocation13_spill] sm:$0xff] }
0x1ade   : > { %5716 = vmatmul.msk.f32.vlgmr.msrb.gmra.mxu3 %vm163_vm1, %v2024_v9 }
0x1adf   : > { %2665 = vmatpush.msrb.mxu3 %v6654_v32 }
0x1ae1   : > { %2666 = vmatpush.msrb.mxu3 %v6649_v31 }
0x1ae3   : > { %2667 = vmatpush.msrb.mxu3 %v6644_v30 }
0x1ae5   : > { %2668 = vmatpush.msrb.mxu3 %v6639_v29 }
0x1ae7   : > { %2669 = vmatpush.msrb.mxu3 %v6634_v28 }
0x1ae9   : > { %2670 = vmatpush.msrb.mxu3 %v6629_v27 }
0x1b09   : > { %v2015_v60 = vpop.f32.mrf.mxu0 }
0x1b0a   : > { %v2016_v62 = vadd.f32 %v6664_v34, %v2015_v60 }
0x1b0c   : > { %v2022_v36 = vmax.f32 %v2016_v62, 0.0 }
0x1b0e   : > { %v2025_v59 = vadd.f32 %v2022_v36, %v1946_v12  ;;  %v8886_v12 = vld [vmem:[#allocation10_spill] sm:$0xff] }
0x1b10   : > { %5717 = vmatmul.msk.f32.gmra.mxu3 %vm163_vm1, %v2025_v59 }
0x1b29   : > { %v2018_v11 = vpop.f32.mrf.mxu0 }
0x1b2a   : > { %v2019_v2 = vadd.f32 %v6664_v34, %v2018_v11 }
0x1b2c   : > { %v2023_v52 = vmax.f32 %v2019_v2, 0.0 }
0x1b2e   : > { %v2026_v57 = vadd.f32 %v2023_v52, %v1947_v38  ;;  %v8893_v52 = vld [vmem:[#allocation22_spill] sm:$0xff] }
0x1b30   : > { %5718 = vmatmul.msk.f32.gmra.mxu3 %vm163_vm1, %v2026_v57 }
0x1b61   : > { %v2053_v61 = vpop.f32.mrf.mxu3 }
0x1b62   : > { %v2054_v58 = vadd.f32 %v6699_v41, %v2053_v61 }
0x1b64   : > { %v2062_v47 = vmax.f32 %v2054_v58, 0.0 }
0x1b66   : > { %5719 = vmatmul.msk.f32.vlgmr.msra.gmra.mxu1 %vm159_vm0, %v2062_v47 }
0x1b67   : > { %2706 = vmatpush.msra.mxu1 %v6694_v40 }
0x1b69   : > { %2707 = vmatpush.msra.mxu1 %v6689_v39 }
0x1b6b   : > { %2708 = vmatpush.msra.mxu1 %v8840_v50  ;;  %v8888_v50 = vld [vmem:[#allocation21_spill] sm:$0xff] }
0x1b6d   : > { %2709 = vmatpush.msra.mxu1 %v8863_v0 }
0x1b6f   : > { %2710 = vmatpush.msra.mxu1 %v8886_v12  ;;  %v8894_v12 = vld [vmem:[#allocation20_spill] sm:$0xff] }
0x1b71   : > { %2711 = vmatpush.msra.mxu1 %v8887_v49  ;;  %v8895_v49 = vld [vmem:[#allocation19_spill] sm:$0xff] }
0x1b93   : > { %v2056_v38 = vpop.f32.mrf.mxu3 }
0x1b94   : > { %v2057_v35 = vadd.f32 %v6699_v41, %v2056_v38  ;;  %v8896_v38 = vld [vmem:[#allocation18_spill] sm:$0xff] }
0x1b96   : > { %v2063_v51 = vmax.f32 %v2057_v35, 0.0  ;;  %v8897_v35 = vld [vmem:[#allocation17_spill] sm:$0xff] }
0x1b98   : > { %5720 = vmatmul.msk.f32.gmra.mxu1 %vm159_vm0, %v2063_v51 }
0x1bb3   : > { %v2059_v54 = vpop.f32.mrf.mxu3 }
0x1bb4   : > { %v2060_v63 = vadd.f32 %v6699_v41, %v2059_v54 }
0x1bb6   : > { %v2064_v56 = vmax.f32 %v2060_v63, 0.0 }
0x1bb8   : > { %5721 = vmatmul.msk.f32.gmra.mxu1 %vm159_vm0, %v2064_v56 }
0x1be3   : > { %v2091_v10 = vpop.f32.mrf.mxu1 }
0x1be4   : > { %v2092_v44 = vadd.f32 %v8888_v50, %v2091_v10 }
0x1be6   : > { %v2100_v0 = vmax.f32 %v2092_v44, 0.0 }
0x1be8   : > { %5722 = vmatmul.msk.f32.vlgmr.msra.gmra.mxu2 %vm159_vm0, %v2100_v0 }
0x1be9   : > { %2746 = vmatpush.msra.mxu2 %v8889_v55 }
0x1beb   : > { %2747 = vmatpush.msra.mxu2 %v8890_v43 }
0x1bed   : > { %2748 = vmatpush.msra.mxu2 %v8891_v8 }
0x1bef   : > { %2749 = vmatpush.msra.mxu2 %v8892_v48  ;;  %v8898_v48 = vld [vmem:[#allocation27_spill] sm:$0xff] }
0x1c15   : > { %v2094_v9 = vpop.f32.mrf.mxu1 }
0x1c16   : > { %v2095_v60 = vadd.f32 %v8888_v50, %v2094_v9 }
0x1c18   : > { %v2101_v62 = vmax.f32 %v2095_v60, 0.0 }
0x1c1a   : > { %5723 = vmatmul.msk.f32.gmra.mxu2 %vm159_vm0, %v2101_v62  ;;  %v8899_v62 = vld [vmem:[#allocation30_spill] sm:$0xff] }
0x1c35   : > { %v2097_v36 = vpop.f32.mrf.mxu1 }
0x1c36   : > { %v2098_v59 = vadd.f32 %v8888_v50, %v2097_v36 }
0x1c38   : > { %v2102_v11 = vmax.f32 %v2098_v59, 0.0 }
0x1c3a   : > { %5724 = vmatmul.msk.f32.gmra.mxu2 %vm159_vm0, %v2102_v11 }
0x1c6b   : > { %v2129_v2 = vpop.f32.mrf.mxu2 }
0x1c6c   : > { %v2130_v57 = vadd.f32 %v8893_v52, %v2129_v2  ;;  %v8900_v2 = vld [vmem:[#allocation29_spill] sm:$0xff] }
0x1c6e   : > { %v2138_v61 = vmax.f32 %v2130_v57, 0.0 }
0x1c70   : > { %v2141_v58 = vadd.f32 %v2138_v61, %v2062_v47 }
0x1c72   : > { %5725 = vmatmul.msk.f32.vlgmr.msra.gmra.mxu0 %vm159_vm0, %v2141_v58 }
0x1c73   : > { %2784 = vmatpush.msra.mxu0 %v8894_v12 }
0x1c75   : > { %2785 = vmatpush.msra.mxu0 %v8895_v49 }
0x1c77   : > { %2786 = vmatpush.msra.mxu0 %v8896_v38  ;;  %v8901_v38 = vld [vmem:[#allocation28_spill] sm:$0xff] }
0x1c79   : > { %2787 = vmatpush.msra.mxu0 %v8897_v35 }
0x1c9d   : > { %v2132_v54 = vpop.f32.mrf.mxu2 }
0x1c9e   : > { %v2133_v63 = vadd.f32 %v8893_v52, %v2132_v54 }
0x1ca0   : > { %v2139_v10 = vmax.f32 %v2133_v63, 0.0 }
0x1ca2   : > { %v2142_v44 = vadd.f32 %v2139_v10, %v2063_v51  ;;  %v8902_v10 = vld [vmem:[#allocation31_spill] sm:$0xff] }
0x1ca4   : > { %5726 = vmatmul.msk.f32.gmra.mxu0 %vm159_vm0, %v2142_v44 }
0x1cbd   : > { %v2135_v0 = vpop.f32.mrf.mxu2 }
0x1cbe   : > { %v2136_v47 = vadd.f32 %v8893_v52, %v2135_v0 }
0x1cc0   : > { %v2140_v55 = vmax.f32 %v2136_v47, 0.0 }
0x1cc2   : > { %v2143_v43 = vadd.f32 %v2140_v55, %v2064_v56 }
0x1cc4   : > { %5727 = vmatmul.msk.f32.gmra.mxu0 %vm159_vm0, %v2143_v43 }
0x1cef   : > { %v2170_v8 = vpop.f32.mrf.mxu0 }
0x1cf0   : > { %v2171_v9 = vadd.f32 %v8898_v48, %v2170_v8 }
0x1cf2   : > { %v2179_v60 = vmax.f32 %v2171_v9, 0.0 }
0x1cf4   : > { %v7521_v36 = vadd.f32 %v2179_v60, %v8899_v62 }
0x1cf6   : > { %5730 = vst.msk [vmem:[%s7081_s8 + $0x30] sm:$0xff] %vm184_vm3, %v7521_v36  ;;  %v2191_v51 = vsel %vm184_vm3, %v7521_v36, 0.0 }
0x1cf7   : > { %2192 = vadd.xlane.f32.xlu0 %v2191_v51 }
0x1d21   : > { %v2173_v59 = vpop.f32.mrf.mxu0 }
0x1d22   : > { %v2174_v56 = vadd.f32 %v8898_v48, %v2173_v59 }
0x1d24   : > { %v2180_v11 = vmax.f32 %v2174_v56, 0.0 }
0x1d26   : > { %v7530_v57 = vadd.f32 %v2180_v11, %v8900_v2 }
0x1d28   : > { %5731 = vst.msk [vmem:[%s7081_s8 + $0x38] sm:$0xff] %vm184_vm3, %v7530_v57  ;;  %v2194_v61 = vsel %vm184_vm3, %v7530_v57, 0.0 }
0x1d29   : > { %2195 = vadd.xlane.f32.xlu2 %v2194_v61 }
0x1d41   : > { %v2176_v58 = vpop.f32.mrf.mxu0 }
0x1d42   : > { %v2177_v12 = vadd.f32 %v8898_v48, %v2176_v58 }
0x1d44   : > { %v2181_v49 = vmax.f32 %v2177_v12, 0.0 }
0x1d46   : > { %v7539_v35 = vadd.f32 %v2181_v49, %v8901_v38 }
0x1d48   : > { %5732 = vst.msk [vmem:[%s7081_s8 + $0x40] sm:$0xf] %vm191_vm4, %v7539_v35  ;;  %v2197_v54 = vsel %vm191_vm4, %v7539_v35, 0.0 }
0x1d49   : > { %2198 = vadd.xlane.f32.xlu1 %v2197_v54 }
0x1d62   : > { %2259 = vrot.lane.b32.xlu1 %v7391_v42, %s6403_s15 }
0x1d6a   : > { %v2193_v63 = vpop.xlane.xlu0 %2192 }
0x1d6b   : > { %v2200_v44 = vmul.f32 %v2193_v63, %v8902_v10 }
0x1d6d   : > { %v2203_v0 = vsub.f32 %v7521_v36, %v2200_v44 }
0x1d6f   : > { %v2206_v47 = vmul.f32 %v2203_v0, %v2203_v0 }
0x1d71   : > { %v2209_v55 = vsel %vm184_vm3, %v2206_v47, 0.0 }
0x1d72   : > { %2210 = vadd.xlane.f32.xlu0 %v2209_v55 }
0x1d9c   : > { %v2196_v43 = vpop.xlane.xlu2 %2195 }
0x1d9d   : > { %v2201_v8 = vmul.f32 %v2196_v43, %v8902_v10 }
0x1d9f   : > { %v2204_v9 = vsub.f32 %v7530_v57, %v2201_v8 }
0x1da1   : > { %v2207_v60 = vmul.f32 %v2204_v9, %v2204_v9 }
0x1da3   : > { %v2212_v62 = vsel %vm184_vm3, %v2207_v60, 0.0 }
0x1da4   : > { %2213 = vadd.xlane.f32.xlu2 %v2212_v62 }
0x1dbc   : > { %v2199_v51 = vpop.xlane.xlu1 %2198  ;;  %2257 = vrot.lane.b32.xlu2 %v7386_v53, %s6403_s15 }
0x1dbd   : > { %v2202_v59 = vmul.f32 %v2199_v51, %v8902_v10 }
0x1dbf   : > { %v2205_v56 = vsub.f32 %v7539_v35, %v2202_v59 }
0x1dc1   : > { %v2208_v11 = vmul.f32 %v2205_v56, %v2205_v56 }
0x1dc3   : > { %v2215_v2 = vsel %vm191_vm4, %v2208_v11, 0.0 }
0x1dc4   : > { %2216 = vadd.xlane.f32.xlu0 %v2215_v2  ;;  %v8903_v2 = vld [vmem:[#allocation26_spill] sm:$0xff] }
0x1dd8   : > { %2261 = vrot.lane.b32.xlu0 %v7397_v46, %s6403_s15 }
0x1de5   : > { %v2211_v61 = vpop.xlane.xlu0 %2210 }
0x1de6   : > { %v2218_v58 = vmul.f32 %v2211_v61, %v8902_v10 }
0x1de8   : > { %v2221_v12 = vadd.f32 1e-05, %v2218_v58  ;;  %v8904_v58 = vld [vmem:[#allocation25_spill] sm:$0xff] }
0x1dea   : > { %6139 = vrsqrt.f32 %v2221_v12  ;;  %vm2230_vm7 = vweird.f32 %v2221_v12 }
0x1df0   : > { %v6140_v49 = vpop.eup %6139 }
0x1df1   : > { %v2225_v38 = vmul.f32 %v6140_v49, %v2221_v12  ;;  %vm2231_vm6 = vweird.f32 %v6140_v49 }
0x1df2   : > { %vm2232_vm8 = vmor %vm2230_vm7, %vm2231_vm6 }
0x1df3   : > { %v2226_v54 = vmul.f32 %v6140_v49, %v2225_v38 }
0x1df5   : > { %v2227_v63 = vmul.f32 0.5, %v2226_v54  ;;  %v8905_v54 = vld [vmem:[#allocation24_spill] sm:$0xff] }
0x1df7   : > { %v2228_v44 = vsub.f32 1.5, %v2227_v63  ;;  %v8906_v63 = vld [vmem:[#allocation23_spill] sm:$0xff] }
0x1df9   : > { %v2229_v47 = vmul.f32 %v6140_v49, %v2228_v44 }
0x1dfb   : > { %v2233_v60 = vsel %vm2232_vm8, %v6140_v49, %v2229_v47 }
0x1dfc   : > { %v2254_v62 = vmul.f32 %v2233_v60, %v2203_v0 }
0x1e17   : > { %v2214_v55 = vpop.xlane.xlu2 %2213 }
0x1e18   : > { %v2219_v43 = vmul.f32 %v2214_v55, %v8902_v10  ;;  %v2260_v55 = vpop.permute.xlu1 %2259 }
0x1e1a   : > { %v2222_v8 = vadd.f32 1e-05, %v2219_v43 }
0x1e1c   : > { %6141 = vrsqrt.f32 %v2222_v8  ;;  %vm2240_vm11 = vweird.f32 %v2222_v8 }
0x1e1f   : > { %v2258_v51 = vpop.permute.xlu2 %2257 }
0x1e20   : > { %v2266_v59 = vsel %vm184_vm3, %v2254_v62, %v2258_v51 }
0x1e21   : > { %5733 = vmatmul.msk.f32.vlgmr.msra.gmra.mxu3 %vm274_vm9, %v2266_v59 }
0x1e22   : > { %v6142_v11 = vpop.eup %6141  ;;  %2825 = vmatpush.msra.mxu3 %v8903_v2 }
0x1e23   : > { %v2235_v61 = vmul.f32 %v6142_v11, %v2222_v8  ;;  %vm2241_vm10 = vweird.f32 %v6142_v11 }
0x1e24   : > { %2826 = vmatpush.msra.mxu3 %v8904_v58  ;;  %vm2242_vm12 = vmor %vm2240_vm11, %vm2241_vm10 }
0x1e25   : > { %v2236_v38 = vmul.f32 %v6142_v11, %v2235_v61 }
0x1e26   : > { %2827 = vmatpush.msra.mxu3 %v8905_v54 }
0x1e27   : > { %v2237_v12 = vmul.f32 0.5, %v2236_v38 }
0x1e28   : > { %2828 = vmatpush.msra.mxu3 %v8906_v63 }
0x1e29   : > { %v2238_v49 = vsub.f32 1.5, %v2237_v12 }
0x1e2b   : > { %v2239_v0 = vmul.f32 %v6142_v11, %v2238_v49 }
0x1e2d   : > { %v2243_v44 = vsel %vm2242_vm12, %v6142_v11, %v2239_v0 }
0x1e2e   : > { %v2255_v47 = vmul.f32 %v2243_v44, %v2204_v9 }
0x1e30   : > { %v2267_v43 = vsel %vm184_vm3, %v2255_v47, %v2260_v55 }
0x1e31   : > { %5734 = vmatmul.msk.f32.gmra.mxu3 %vm274_vm9, %v2267_v43 }
0x1e37   : > { %v2217_v60 = vpop.xlane.xlu0 %2216 }
0x1e38   : > { %v2220_v62 = vmul.f32 %v2217_v60, %v8902_v10  ;;  %v8907_v10 = vld [vmem:[#allocation3_spill] sm:$0xff] }
0x1e3a   : > { %v2223_v51 = vadd.f32 1e-05, %v2220_v62 }
0x1e3c   : > { %6143 = vrsqrt.f32 %v2223_v51  ;;  %vm2250_vm14 = vweird.f32 %v2223_v51 }
0x1e42   : > { %v6144_v59 = vpop.eup %6143 }
0x1e43   : > { %v2245_v2 = vmul.f32 %v6144_v59, %v2223_v51  ;;  %vm2251_vm13 = vweird.f32 %v6144_v59 }
0x1e44   : > { %vm2252_vm15 = vmor %vm2250_vm14, %vm2251_vm13 }
0x1e45   : > { %v2246_v61 = vmul.f32 %v6144_v59, %v2245_v2 }
0x1e47   : > { %v2247_v58 = vmul.f32 0.5, %v2246_v61 }
0x1e49   : > { %v2248_v38 = vsub.f32 1.5, %v2247_v58 }
0x1e4a   : > { %v2262_v54 = vpop.permute.xlu0 %2261 }
0x1e4b   : > { %v2249_v8 = vmul.f32 %v6144_v59, %v2248_v38 }
0x1e4d   : > { %v2253_v9 = vsel %vm2252_vm15, %v6144_v59, %v2249_v8 }
0x1e4e   : > { %v2256_v11 = vmul.f32 %v2253_v9, %v2205_v56 }
0x1e50   : > { %v2268_v12 = vsel %vm184_vm3, %v2256_v11, %v2262_v54 }
0x1e51   : > { %5735 = vmatmul.msk.f32.gmra.mxu3 %vm274_vm9, %v2268_v12 }
0x1ea4   : > { %v2295_v63 = vpop.f32.mrf.mxu3 }
0x1ea5   : > { %v7575_v49 = vadd.f32 %v8907_v10, %v2295_v63 }
0x1ea7   : > { %2364 = vrot.lane.b32.xlu2 %v7575_v49, %s6404_s18  ;;  %v5736_v56 = vmul.f32 -1.442695, %v7575_v49 }
0x1ea9   : > { %6145 = vpow2.f32 %v5736_v56 }
0x1eaf   : > { %v6146_v43 = vpop.eup %6145 }
0x1eb0   : > { %v2313_v60 = vadd.f32 1.0, %v6146_v43 }
0x1eb2   : > { %6147 = vrcp.f32 %v2313_v60  ;;  %v2327_v58 = vand.u32 2147483648, %v2313_v60  ;;  %vm2321_vm6 = vweird.f32 %v2313_v60  ;;  %v2325_v8 = vand.u32 2147483647, %v2313_v60 }
0x1eb4   : > { %v2298_v0 = vpop.f32.mrf.mxu3  ;;  %v2328_v11 = vor.u32 1.1754944e-38, %v2327_v58  ;;  %vm2326_vm8 = vcmp.eq.f32.partialorder %v2325_v8, 8.507059e+37 }
0x1eb5   : > { %v7580_v44 = vadd.f32 %v8907_v10, %v2298_v0 }
0x1eb7   : > { %2366 = vrot.lane.b32.xlu0 %v7580_v44, %s6404_s18  ;;  %v5737_v38 = vmul.f32 -1.442695, %v7580_v44 }
0x1eb8   : > { %v6148_v62 = vpop.eup %6147 }
0x1eb9   : > { %v2317_v51 = vmul.f32 %v6148_v62, %v2313_v60  ;;  %vm2322_vm2 = vweird.f32 %v6148_v62  ;;  %6149 = vpow2.f32 %v5737_v38 }
0x1eba   : > { %vm2323_vm7 = vmor %vm2321_vm6, %vm2322_vm2 }
0x1ebb   : > { %v2318_v59 = vsub.f32 1.0, %v2317_v51 }
0x1ebd   : > { %v2319_v2 = vmul.f32 %v6148_v62, %v2318_v59 }
0x1ebf   : > { %v2320_v61 = vadd.f32 %v6148_v62, %v2319_v2 }
0x1ec1   : > { %v2324_v9 = vsel %vm2323_vm7, %v6148_v62, %v2320_v61 }
0x1ec2   : > { %v2329_v12 = vsel %vm2326_vm8, %v2328_v11, %v2324_v9 }
0x1ed4   : > { %v2301_v47 = vpop.f32.mrf.mxu3 }
0x1ed5   : > { %v7586_v55 = vadd.f32 %v8907_v10, %v2301_v47  ;;  %v6150_v10 = vpop.eup %6149 }
0x1ed6   : > { %v2314_v0 = vadd.f32 1.0, %v6150_v10 }
0x1ed7   : > { %2368 = vrot.lane.b32.xlu1 %v7586_v55, %s6404_s18  ;;  %v5738_v51 = vmul.f32 -1.442695, %v7586_v55 }
0x1ed8   : > { %6151 = vrcp.f32 %v2314_v0  ;;  %v2342_v62 = vand.u32 2147483648, %v2314_v0  ;;  %vm2336_vm11 = vweird.f32 %v2314_v0  ;;  %v2340_v2 = vand.u32 2147483647, %v2314_v0 }
0x1ed9   : > { %6153 = vpow2.f32 %v5738_v51 }
0x1eda   : > { %v2343_v38 = vor.u32 1.1754944e-38, %v2342_v62  ;;  %vm2341_vm13 = vcmp.eq.f32.partialorder %v2340_v2, 8.507059e+37 }
0x1ede   : > { %v6152_v56 = vpop.eup %6151 }
0x1edf   : > { %v2332_v47 = vmul.f32 %v6152_v56, %v2314_v0  ;;  %vm2337_vm10 = vweird.f32 %v6152_v56  ;;  %v6154_v61 = vpop.eup %6153 }
0x1ee0   : > { %vm2338_vm12 = vmor %vm2336_vm11, %vm2337_vm10  ;;  %v2315_v8 = vadd.f32 1.0, %v6154_v61 }
0x1ee1   : > { %v2333_v43 = vsub.f32 1.0, %v2332_v47 }
0x1ee2   : > { %6155 = vrcp.f32 %v2315_v8  ;;  %vm2351_vm15 = vweird.f32 %v2315_v8  ;;  %v2355_v0 = vand.u32 2147483647, %v2315_v8 }
0x1ee3   : > { %v2334_v59 = vmul.f32 %v6152_v56, %v2333_v43 }
0x1ee4   : > { %vm2356_vm6 = vcmp.eq.f32.partialorder %v2355_v0, 8.507059e+37 }
0x1ee5   : > { %v2335_v60 = vadd.f32 %v6152_v56, %v2334_v59  ;;  %v2357_v59 = vand.u32 2147483648, %v2315_v8 }
0x1ee7   : > { %v2339_v58 = vsel %vm2338_vm12, %v6152_v56, %v2335_v60  ;;  %v2358_v60 = vor.u32 1.1754944e-38, %v2357_v59  ;;  %v2412_v59 = vmul.f32 %v2329_v12, %v7386_v53 }
0x1ee8   : > { %v2344_v9 = vsel %vm2341_vm13, %v2343_v38, %v2339_v58 }
0x1f01   : > { %v2365_v54 = vpop.permute.xlu2 %2364 }
0x1f02   : > { %v2373_v63 = vmul.f32 %v2365_v54, %v2329_v12 }
0x1f04   : > { %2379 = vrot.lane.b32.xlu2 %v2373_v63, %s6405_s4  ;;  %v6156_v63 = vpop.eup %6155 }
0x1f05   : > { %v2347_v10 = vmul.f32 %v6156_v63, %v2315_v8  ;;  %vm2352_vm14 = vweird.f32 %v6156_v63 }
0x1f06   : > { %vm2353_vm2 = vmor %vm2351_vm15, %vm2352_vm14 }
0x1f07   : > { %v2348_v47 = vsub.f32 1.0, %v2347_v10 }
0x1f09   : > { %v2349_v43 = vmul.f32 %v6156_v63, %v2348_v47 }
0x1f0b   : > { %v2350_v51 = vadd.f32 %v6156_v63, %v2349_v43  ;;  %v2394_v43 = vsub.f32 1.0, %v2329_v12 }
0x1f0d   : > { %v2354_v56 = vsel %vm2353_vm2, %v6156_v63, %v2350_v51 }
0x1f0e   : > { %v2359_v2 = vsel %vm2356_vm6, %v2358_v60, %v2354_v56 }
0x1f29   : > { %v2367_v11 = vpop.permute.xlu0 %2366 }
0x1f2a   : > { %v2374_v54 = vmul.f32 %v2367_v11, %v2344_v9 }
0x1f2c   : > { %2381 = vrot.lane.b32.xlu0 %v2374_v54, %s6405_s4 }
0x1f49   : > { %v2369_v62 = vpop.permute.xlu1 %2368 }
0x1f4a   : > { %v2375_v61 = vmul.f32 %v2369_v62, %v2359_v2  ;;  %v2413_v62 = vmul.f32 %v2344_v9, %v7391_v42 }
0x1f4c   : > { %2383 = vrot.lane.b32.xlu1 %v2375_v61, %s6405_s4 }
0x1f5e   : > { %v2380_v58 = vpop.permute.xlu2 %2379 }
0x1f5f   : > { %v2388_v38 = vadd.f32 %v2380_v58, %v7575_v49  ;;  %v2396_v58 = vsub.f32 1.0, %v2359_v2 }
0x1f61   : > { %6157 = vtanh.f32 %v2388_v38 }
0x1f67   : > { %v6158_v11 = vpop.eup %6157 }
0x1f68   : > { %2400 = vrot.lane.b32.xlu2 %v6158_v11, %s6406_s19  ;;  %v2414_v11 = vmul.f32 %v2359_v2, %v7397_v46 }
0x1f9e   : > { %v2382_v54 = vpop.permute.xlu0 %2381 }
0x1f9f   : > { %v2389_v10 = vadd.f32 %v2382_v54, %v7580_v44  ;;  %v2395_v44 = vsub.f32 1.0, %v2344_v9 }
0x1fa1   : > { %6159 = vtanh.f32 %v2389_v10 }
0x1fa7   : > { %v6160_v8 = vpop.eup %6159 }
0x1fa8   : > { %2402 = vrot.lane.b32.xlu0 %v6160_v8, %s6406_s19 }
0x1fbe   : > { %v2384_v63 = vpop.permute.xlu1 %2383 }
0x1fbf   : > { %v2390_v47 = vadd.f32 %v2384_v63, %v7586_v55 }
0x1fc1   : > { %6161 = vtanh.f32 %v2390_v47 }
0x1fc2   : > { %v2401_v51 = vpop.permute.xlu2 %2400 }
0x1fc3   : > { %v2409_v49 = vmul.f32 %v2401_v51, %v2394_v43 }
0x1fc5   : > { %v7601_v51 = vadd.f32 %v2412_v59, %v2409_v49  }
0x1fc7   : > { %v8908_v0 = vmov %v7601_v51  ;;  %v6162_v56 = vpop.eup %6161 }
0x1fc8   : > { %2421 = vrot.lane.b32.xlu2 %v8908_v0, %s6406_s19  ;;  %2404 = vrot.lane.b32.xlu1 %v6162_v56, %s6406_s19 }
0x201a   : > { %v2403_v60 = vpop.permute.xlu0 %2402 }
0x201b   : > { %v2410_v61 = vmul.f32 %v2403_v60, %v2395_v44 }
0x201d   : > { %v7607_v56 = vadd.f32 %v2413_v62, %v2410_v61  }
0x201f   : > { %v8909_v55 = vmov %v7607_v56 }
0x2020   : > { %2423 = vrot.lane.b32.xlu0 %v8909_v55, %s6406_s19 }
0x2022   : > { %v2422_v53 = vpop.permute.xlu2 %2421 }
0x2023   : > { %v2430_v12 = vsel %vm159_vm0, %v2422_v53, 0.0 }
0x2024   : > { %2431 = vadd.xlane.f32.xlu2 %v2430_v12 }
0x203a   : > { %v2405_v38 = vpop.permute.xlu1 %2404 }
0x203b   : > { %v2411_v54 = vmul.f32 %v2405_v38, %v2396_v58 }
0x203d   : > { %v7613_v2 = vadd.f32 %v2414_v11, %v2411_v54  }
0x203f   : > { %v8910_v10 = vmov %v7613_v2 }
0x2040   : > { %2425 = vrot.lane.b32.xlu1 %v8910_v10, %s6406_s19 }
0x2092   : > { %v2424_v42 = vpop.permute.xlu0 %2423 }
0x2093   : > { %v2433_v9 = vsel %vm159_vm0, %v2424_v42, 0.0 }
0x2094   : > { %2434 = vadd.xlane.f32.xlu0 %v2433_v9 }
0x2097   : > { %v2432_v8 = vpop.xlane.xlu2 %2431 }
0x2098   : > { %v2439_v63 = vmul.f32 %v2432_v8, %v8837_v37 }
0x209a   : > { %v2442_v47 = vsub.f32 %v8908_v0, %v2439_v63 }
0x209c   : > { %v2445_v43 = vmul.f32 %v2442_v47, %v2442_v47 }
0x209e   : > { %2451 = vrot.lane.b32.xlu2 %v2445_v43, %s6406_s19 }
0x20b2   : > { %v2426_v51 = vpop.permute.xlu1 %2425 }
0x20b3   : > { %v2436_v46 = vsel %vm442_vm5, %v2426_v51, 0.0 }
0x20b4   : > { %2437 = vadd.xlane.f32.xlu1 %v2436_v46 }
0x20f8   : > { %v2452_v53 = vpop.permute.xlu2 %2451 }
0x20f9   : > { %v2460_v12 = vsel %vm159_vm0, %v2452_v53, 0.0 }
0x2107   : > { %v2435_v2 = vpop.xlane.xlu0 %2434 }
0x2108   : > { %v2440_v59 = vmul.f32 %v2435_v2, %v8837_v37 }
0x210a   : > { %v2443_v49 = vsub.f32 %v8909_v55, %v2440_v59 }
0x210c   : > { %v2446_v56 = vmul.f32 %v2443_v49, %v2443_v49 }
0x210e   : > { %2453 = vrot.lane.b32.xlu0 %v2446_v56, %s6406_s19 }
0x2127   : > { %v2438_v44 = vpop.xlane.xlu1 %2437 }
0x2128   : > { %v2441_v60 = vmul.f32 %v2438_v44, %v8837_v37 }
0x212a   : > { %v7627_v62 = vsub.f32 %v8910_v10, %v2441_v60 }
0x212c   : > { %v2447_v61 = vmul.f32 %v7627_v62, %v7627_v62 }
0x212e   : > { %2455 = vrot.lane.b32.xlu1 %v2447_v61, %s6406_s19 }
0x2138   : > { %2461 = vadd.xlane.f32.xlu0 %v2460_v12 }
0x2180   : > { %v2454_v58 = vpop.permute.xlu0 %2453 }
0x2181   : > { %v2463_v38 = vsel %vm159_vm0, %v2454_v58, 0.0 }
0x2182   : > { %2464 = vadd.xlane.f32.xlu2 %v2463_v38 }
0x21a0   : > { %v2456_v11 = vpop.permute.xlu1 %2455 }
0x21a1   : > { %v2466_v54 = vsel %vm442_vm5, %v2456_v11, 0.0 }
0x21a2   : > { %2467 = vadd.xlane.f32.xlu1 %v2466_v54 }
0x21ab   : > { %v2462_v42 = vpop.xlane.xlu0 %2461 }
0x21ac   : > { %v2469_v9 = vmul.f32 %v2462_v42, %v8837_v37 }
0x21ae   : > { %v2472_v8 = vadd.f32 1e-05, %v2469_v9 }
0x21b0   : > { %6163 = vrsqrt.f32 %v2472_v8  ;;  %vm2481_vm8 = vweird.f32 %v2472_v8 }
0x21b6   : > { %v6164_v63 = vpop.eup %6163 }
0x21b7   : > { %v2476_v43 = vmul.f32 %v6164_v63, %v2472_v8  ;;  %vm2482_vm7 = vweird.f32 %v6164_v63 }
0x21b8   : > { %vm2483_vm10 = vmor %vm2481_vm8, %vm2482_vm7 }
0x21b9   : > { %v2477_v51 = vmul.f32 %v6164_v63, %v2476_v43 }
0x21bb   : > { %v2478_v46 = vmul.f32 0.5, %v2477_v51 }
0x21bd   : > { %v2479_v2 = vsub.f32 1.5, %v2478_v46 }
0x21bf   : > { %v2480_v59 = vmul.f32 %v6164_v63, %v2479_v2 }
0x21c1   : > { %v2484_v56 = vsel %vm2483_vm10, %v6164_v63, %v2480_v59 }
0x21c2   : > { %v2505_v44 = vmul.f32 %v2484_v56, %v2442_v47 }
0x21c4   : > { %v2508_v60 = vmul.f32 %v2505_v44, %v6975_v45 }
0x21c6   : > { %v2511_v61 = vadd.f32 %v2508_v60, %v6977_v1 }
0x21c8   : > { %2517 = vrot.lane.b32.xlu0 %v2511_v61, %s6406_s19 }
0x21f5   : > { %v2465_v53 = vpop.xlane.xlu2 %2464 }
0x21f6   : > { %v2470_v12 = vmul.f32 %v2465_v53, %v8837_v37 }
0x21f8   : > { %v2473_v58 = vadd.f32 1e-05, %v2470_v12 }
0x21fa   : > { %6165 = vrsqrt.f32 %v2473_v58  ;;  %vm2491_vm12 = vweird.f32 %v2473_v58 }
0x2200   : > { %v6166_v38 = vpop.eup %6165 }
0x2201   : > { %v2486_v11 = vmul.f32 %v6166_v38, %v2473_v58  ;;  %vm2492_vm11 = vweird.f32 %v6166_v38 }
0x2202   : > { %vm2493_vm13 = vmor %vm2491_vm12, %vm2492_vm11 }
0x2203   : > { %v2487_v54 = vmul.f32 %v6166_v38, %v2486_v11 }
0x2205   : > { %v2488_v42 = vmul.f32 0.5, %v2487_v54 }
0x2207   : > { %v2489_v9 = vsub.f32 1.5, %v2488_v42 }
0x2209   : > { %v2490_v8 = vmul.f32 %v6166_v38, %v2489_v9 }
0x220b   : > { %v2494_v47 = vsel %vm2493_vm13, %v6166_v38, %v2490_v8 }
0x220c   : > { %v2506_v63 = vmul.f32 %v2494_v47, %v2443_v49 }
0x220e   : > { %v2509_v43 = vmul.f32 %v2506_v63, %v6975_v45 }
0x2210   : > { %v2512_v51 = vadd.f32 %v2509_v43, %v6977_v1 }
0x2212   : > { %2519 = vrot.lane.b32.xlu2 %v2512_v51, %s6406_s19 }
0x2215   : > { %v2468_v46 = vpop.xlane.xlu1 %2467 }
0x2216   : > { %v2471_v2 = vmul.f32 %v2468_v46, %v8837_v37 }
0x2218   : > { %v2474_v59 = vadd.f32 1e-05, %v2471_v2 }
0x221a   : > { %6167 = vrsqrt.f32 %v2474_v59  ;;  %vm2501_vm15 = vweird.f32 %v2474_v59 }
0x2220   : > { %v6168_v56 = vpop.eup %6167 }
0x2221   : > { %v2496_v44 = vmul.f32 %v6168_v56, %v2474_v59  ;;  %vm2502_vm14 = vweird.f32 %v6168_v56 }
0x2222   : > { %vm2503_vm2 = vmor %vm2501_vm15, %vm2502_vm14 }
0x2223   : > { %v2497_v60 = vmul.f32 %v6168_v56, %v2496_v44 }
0x2225   : > { %v2498_v61 = vmul.f32 0.5, %v2497_v60 }
0x2227   : > { %v2499_v53 = vsub.f32 1.5, %v2498_v61 }
0x2229   : > { %v2500_v12 = vmul.f32 %v6168_v56, %v2499_v53 }
0x222b   : > { %v2504_v49 = vsel %vm2503_vm2, %v6168_v56, %v2500_v12 }
0x222c   : > { %v2507_v58 = vmul.f32 %v2504_v49, %v7627_v62 }
0x222e   : > { %v2510_v38 = vmul.f32 %v2507_v58, %v6975_v45 }
0x2230   : > { %v2513_v11 = vadd.f32 %v2510_v38, %v6977_v1 }
0x2232   : > { %2521 = vrot.lane.b32.xlu1 %v2513_v11, %s6406_s19 }
0x223a   : > { %v2518_v54 = vpop.permute.xlu0 %2517 }
0x223b   : > { %5739 = vmatmul.msk.f32.vlgmr.msrb.gmra.mxu1 %vm159_vm0, %v2518_v54 }
0x226c   : > { %v2520_v42 = vpop.permute.xlu2 %2519 }
0x226d   : > { %5740 = vmatmul.msk.f32.gmra.mxu1 %vm159_vm0, %v2520_v42 }
0x22a4   : > { %v2522_v9 = vpop.permute.xlu1 %2521 }
0x22a5   : > { %5741 = vmatmul.msk.f32.gmra.mxu1 %vm159_vm0, %v2522_v9 }
0x22b8   : > { %v2546_v8 = vpop.f32.mrf.mxu1 }
0x22b9   : > { %v2547_v47 = vadd.f32 %v6589_v19, %v2546_v8 }
0x22bb   : > { %v2555_v63 = vmax.f32 %v2547_v47, 0.0 }
0x22bd   : > { %5742 = vmatmul.msk.f32.vlgmr.msrb.gmra.mxu2 %vm159_vm0, %v2555_v63 }
0x22ea   : > { %v2549_v45 = vpop.f32.mrf.mxu1 }
0x22eb   : > { %v2550_v1 = vadd.f32 %v6589_v19, %v2549_v45 }
0x22ed   : > { %v2556_v62 = vmax.f32 %v2550_v1, 0.0 }
0x22ef   : > { %5743 = vmatmul.msk.f32.gmra.mxu2 %vm159_vm0, %v2556_v62 }
0x2322   : > { %v2552_v43 = vpop.f32.mrf.mxu1 }
0x2323   : > { %v2553_v51 = vadd.f32 %v6589_v19, %v2552_v43 }
0x2325   : > { %v2557_v46 = vmax.f32 %v2553_v51, 0.0 }
0x2327   : > { %5744 = vmatmul.msk.f32.gmra.mxu2 %vm159_vm0, %v2557_v46 }
0x2340   : > { %v2584_v2 = vpop.f32.mrf.mxu2 }
0x2341   : > { %v2585_v59 = vadd.f32 %v6594_v20, %v2584_v2 }
0x2343   : > { %v2593_v56 = vmax.f32 %v2585_v59, 0.0 }
0x2345   : > { %v2599_v44 = vadd.f32 %v2593_v56, %v2518_v54 }
0x2347   : > { %2602 = vst.msk [vmem:[#allocation2] sm:$0xff] %vm159_vm0, %v2599_v44 }
0x234e   : > { %v2605_v60 = vld [vmem:[#allocation2] sm:$0xff] }
0x234f   : > { %5745 = vmatmul.msk.f32.vlgmr.msrb.gmra.mxu0 %vm163_vm1, %v2605_v60 }
0x2372   : > { %v2587_v61 = vpop.f32.mrf.mxu2 }
0x2373   : > { %v2588_v53 = vadd.f32 %v6594_v20, %v2587_v61 }
0x2375   : > { %v2594_v12 = vmax.f32 %v2588_v53, 0.0 }
0x2377   : > { %v2600_v49 = vadd.f32 %v2594_v12, %v2520_v42 }
0x2379   : > { %2603 = vst.msk [vmem:[#allocation2 + $0x8] sm:$0xff] %vm159_vm0, %v2600_v49 }
0x2380   : > { %v2606_v58 = vld [vmem:[#allocation2 + $0x8] sm:$0xff] }
0x2381   : > { %5746 = vmatmul.msk.f32.gmra.mxu0 %vm163_vm1, %v2606_v58 }
0x23aa   : > { %v2590_v38 = vpop.f32.mrf.mxu2 }
0x23ab   : > { %v2591_v11 = vadd.f32 %v6594_v20, %v2590_v38 }
0x23ad   : > { %v2595_v8 = vmax.f32 %v2591_v11, 0.0 }
0x23af   : > { %v2601_v54 = vadd.f32 %v2595_v8, %v2522_v9 }
0x23b1   : > { %2604 = vst.msk [vmem:[#allocation2 + $0x10] sm:$0xf] %vm442_vm5, %v2601_v54 }
0x23b8   : > { %v2607_v47 = vld [vmem:[#allocation2 + $0x10] sm:$0xf] }
0x23b9   : > { %5747 = vmatmul.msk.f32.gmra.mxu0 %vm163_vm1, %v2607_v47 }
0x23cc   : > { %v2634_v63 = vpop.f32.mrf.mxu0 }
0x23cd   : > { %v2635_v45 = vadd.f32 %v6659_v33, %v2634_v63 }
0x23cf   : > { %v2643_v1 = vmax.f32 %v2635_v45, 0.0 }
0x23d1   : > { %5748 = vmatmul.msk.f32.vlgmr.msrb.gmra.mxu3 %vm163_vm1, %v2643_v1 }
0x23fe   : > { %v2637_v42 = vpop.f32.mrf.mxu0 }
0x23ff   : > { %v2638_v62 = vadd.f32 %v6659_v33, %v2637_v42 }
0x2401   : > { %v2644_v43 = vmax.f32 %v2638_v62, 0.0 }
0x2403   : > { %5749 = vmatmul.msk.f32.gmra.mxu3 %vm163_vm1, %v2644_v43 }
0x2436   : > { %v2640_v51 = vpop.f32.mrf.mxu0 }
0x2437   : > { %v2641_v9 = vadd.f32 %v6659_v33, %v2640_v51 }
0x2439   : > { %v2645_v46 = vmax.f32 %v2641_v9, 0.0 }
0x243b   : > { %5750 = vmatmul.msk.f32.gmra.mxu3 %vm163_vm1, %v2645_v46 }
0x2454   : > { %v2672_v2 = vpop.f32.mrf.mxu3 }
0x2455   : > { %v2673_v59 = vadd.f32 %v6664_v34, %v2672_v2 }
0x2457   : > { %v2681_v56 = vmax.f32 %v2673_v59, 0.0 }
0x2459   : > { %v2684_v44 = vadd.f32 %v2681_v56, %v2605_v60 }
0x245b   : > { %5751 = vmatmul.msk.f32.vlgmr.msra.gmra.mxu1 %vm163_vm1, %v2684_v44 }
0x2486   : > { %v2675_v61 = vpop.f32.mrf.mxu3 }
0x2487   : > { %v2676_v53 = vadd.f32 %v6664_v34, %v2675_v61 }
0x2489   : > { %v2682_v12 = vmax.f32 %v2676_v53, 0.0 }
0x248b   : > { %v2685_v49 = vadd.f32 %v2682_v12, %v2606_v58 }
0x248d   : > { %5752 = vmatmul.msk.f32.gmra.mxu1 %vm163_vm1, %v2685_v49 }
0x24be   : > { %v2678_v38 = vpop.f32.mrf.mxu3 }
0x24bf   : > { %v2679_v11 = vadd.f32 %v6664_v34, %v2678_v38 }
0x24c1   : > { %v2683_v8 = vmax.f32 %v2679_v11, 0.0 }
0x24c3   : > { %v2686_v54 = vadd.f32 %v2683_v8, %v2607_v47 }
0x24c5   : > { %5753 = vmatmul.msk.f32.gmra.mxu1 %vm163_vm1, %v2686_v54 }
0x24d8   : > { %v2713_v63 = vpop.f32.mrf.mxu1 }
0x24d9   : > { %v2714_v45 = vadd.f32 %v6699_v41, %v2713_v63 }
0x24db   : > { %v2722_v60 = vmax.f32 %v2714_v45, 0.0 }
0x24dd   : > { %5754 = vmatmul.msk.f32.vlgmr.msra.gmra.mxu2 %vm159_vm0, %v2722_v60 }
0x250a   : > { %v2716_v1 = vpop.f32.mrf.mxu1 }
0x250b   : > { %v2717_v42 = vadd.f32 %v6699_v41, %v2716_v1 }
0x250d   : > { %v2723_v62 = vmax.f32 %v2717_v42, 0.0 }
0x250f   : > { %5755 = vmatmul.msk.f32.gmra.mxu2 %vm159_vm0, %v2723_v62 }
0x2542   : > { %v2719_v58 = vpop.f32.mrf.mxu1 }
0x2543   : > { %v2720_v43 = vadd.f32 %v6699_v41, %v2719_v58 }
0x2545   : > { %v2724_v51 = vmax.f32 %v2720_v43, 0.0 }
0x2547   : > { %5756 = vmatmul.msk.f32.gmra.mxu2 %vm159_vm0, %v2724_v51 }
0x2560   : > { %v2751_v47 = vpop.f32.mrf.mxu2 }
0x2561   : > { %v2752_v9 = vadd.f32 %v8888_v50, %v2751_v47 }
0x2563   : > { %v2760_v46 = vmax.f32 %v2752_v9, 0.0 }
0x2565   : > { %5757 = vmatmul.msk.f32.vlgmr.msra.gmra.mxu0 %vm159_vm0, %v2760_v46 }
0x2592   : > { %v2754_v2 = vpop.f32.mrf.mxu2 }
0x2593   : > { %v2755_v59 = vadd.f32 %v8888_v50, %v2754_v2 }
0x2595   : > { %v2761_v56 = vmax.f32 %v2755_v59, 0.0 }
0x2597   : > { %5758 = vmatmul.msk.f32.gmra.mxu0 %vm159_vm0, %v2761_v56  ;;  %v8912_v56 = vmov %v8909_v55 }
0x25ca   : > { %v2757_v44 = vpop.f32.mrf.mxu2 }
0x25cb   : > { %v2758_v61 = vadd.f32 %v8888_v50, %v2757_v44 }
0x25cd   : > { %v2762_v53 = vmax.f32 %v2758_v61, 0.0 }
0x25cf   : > { %5759 = vmatmul.msk.f32.gmra.mxu0 %vm159_vm0, %v2762_v53 }
0x25e2   : > { %v2789_v12 = vpop.f32.mrf.mxu0 }
0x25e3   : > { %v2790_v49 = vadd.f32 %v8893_v52, %v2789_v12 }
0x25e5   : > { %v2798_v38 = vmax.f32 %v2790_v49, 0.0 }
0x25e7   : > { %v2801_v11 = vadd.f32 %v2798_v38, %v2722_v60 }
0x25e9   : > { %5760 = vmatmul.msk.f32.vlgmr.msra.gmra.mxu3 %vm159_vm0, %v2801_v11 }
0x2614   : > { %v2792_v8 = vpop.f32.mrf.mxu0 }
0x2615   : > { %v2793_v54 = vadd.f32 %v8893_v52, %v2792_v8 }
0x2617   : > { %v2799_v63 = vmax.f32 %v2793_v54, 0.0 }
0x2619   : > { %v2802_v45 = vadd.f32 %v2799_v63, %v2723_v62 }
0x261b   : > { %5761 = vmatmul.msk.f32.gmra.mxu3 %vm159_vm0, %v2802_v45 }
0x264c   : > { %v2795_v50 = vpop.f32.mrf.mxu0 }
0x264d   : > { %v2796_v1 = vadd.f32 %v8893_v52, %v2795_v50 }
0x264f   : > { %v2800_v42 = vmax.f32 %v2796_v1, 0.0 }
0x2651   : > { %v2803_v58 = vadd.f32 %v2800_v42, %v2724_v51 }
0x2653   : > { %5762 = vmatmul.msk.f32.gmra.mxu3 %vm159_vm0, %v2803_v58 }
0x266c   : > { %v2830_v60 = vpop.f32.mrf.mxu3 }
0x266d   : > { %v2831_v43 = vadd.f32 %v8898_v48, %v2830_v60 }
0x266f   : > { %v2839_v47 = vmax.f32 %v2831_v43, 0.0 }
0x2671   : > { %v2842_v9 = vadd.f32 %v2839_v47, %v7521_v36   ;;  %v5769_v36 = vld [vmem:[%s8686_s0 + $0x20] sm:$0xff] (%p173_p0)  }
0x2673   : > { %5765 = vst.msk [vmem:[%s7081_s8 + $0x48] sm:$0xff] %vm184_vm3, %v2842_v9 }
0x269e   : > { %v2833_v62 = vpop.f32.mrf.mxu3 }
0x269f   : > { %v2834_v46 = vadd.f32 %v8898_v48, %v2833_v62 }
0x26a1   : > { %v2840_v2 = vmax.f32 %v2834_v46, 0.0 }
0x26a3   : > { %v2843_v58 = vadd.f32 %v2840_v2, %v7530_v57   ;;  %v8911_v2 = vmov %v8910_v10  ;;  %v8914_v57 = vmov %v2842_v9 }
0x26a4   :  { %v5770_v57 = vld [vmem:[%s8686_s0 + $0x28] sm:$0xf] (%p173_p0)  }
0x26a5   : > { %5766 = vst.msk [vmem:[%s7081_s8 + $0x50] sm:$0xff] %vm184_vm3, %v2843_v58 }
0x26d6   : > { %v2836_v52 = vpop.f32.mrf.mxu3 }
0x26d7   : > { %v2837_v51 = vadd.f32 %v8898_v48, %v2836_v52  ;;  %v5768_v48 = vld [vmem:[%s8686_s0 + $0x18] sm:$0xff] (%p173_p0)  }
0x26d9   : > { %v2841_v59 = vmax.f32 %v2837_v51, 0.0  ;;  %v8913_v51 = vmov %v8908_v0  ;;  %175 = sbr.rel (!%p173_p0) target bundleno = 134 (0x86), region = 113 }
0x26db   : > { %v2844_v59 = vadd.f32 %v2841_v59, %v7539_v35  }
0x26dd   : > { %5767 = vst.msk [vmem:[%s7081_s8 + $0x58] sm:$0xf] %vm191_vm4, %v2844_v59 }
0x26de LB: > { %v8915_v13 = vld [vmem:[#allocation8_spill] sm:$0xff]  ;;  %8916 = vst [vmem:[#allocation32_spill] sm:$0xff] %v6387_v57  ;;  %2979 = vmatpush.msra.mxu0 %v6529_v7  ;;  %3245 = vmatpush.msra.mxu1 %v6564_v14  ;;  %v2869_v35 = vsel %vm184_vm3, %v6395_v48, 0.0  ;;  %v2876_v56 = vsel %vm191_vm4, %v6387_v57, 0.0  ;;  %v8919_v44 = vld [vmem:[#allocation7_spill] sm:$0xff]  ;;  %v8920_v61 = vld [vmem:[#allocation6_spill] sm:$0xff]  ;;  %v6375_v10 = vphi %v8910_v10, %v9003_v10   ;;  %s6399_s26 = sphi %s7750_s26, %s2859_s26   ;;  %v6395_v48 = vphi %v5768_v48, %v5526_v48   ;;  %v6391_v36 = vphi %v5769_v36, %v5527_v36   ;;  %v6387_v57 = vphi %v5770_v57, %v5528_v57   ;;  %v6383_v0 = vphi %v8908_v0, %v8545_v0   ;;  %v6379_v55 = vphi %v8909_v55, %v8551_v55  }
0x26df   : > { %8917 = vst [vmem:[#allocation33_spill] sm:$0xff] %v6391_v36  ;;  %3283 = vmatpush.msra.mxu2 %v6584_v18  ;;  %3331 = vmatpush.msra.mxu3 %v6624_v26  ;;  %v2872_v53 = vsel %vm184_vm3, %v6391_v36, 0.0  ;;  %v8921_v12 = vld [vmem:[#allocation16_spill] sm:$0xff]  ;;  %v8923_v38 = vld [vmem:[#allocation15_spill] sm:$0xff]  ;;  %v8926_v54 = vld [vmem:[#allocation14_spill] sm:$0xff]  ;;  %s6408_s0 = smov 104  }
0x26e0   : > { %8918 = vst [vmem:[#allocation34_spill] sm:$0xff] %v6395_v48  ;;  %2980 = vmatpush.msra.mxu0 %v6524_v6  ;;  %3246 = vmatpush.msra.mxu1 %v8915_v13  ;;  %v8922_v49 = vld [vmem:[#allocation12_spill] sm:$0xff]  ;;  %v8925_v8 = vld [vmem:[#allocation11_spill] sm:$0xff]  ;;  %v8928_v45 = vld [vmem:[#allocation10_spill] sm:$0xff]  ;;  %s6409_s27 = smov 32   ;;  %s6410_s12 = smov 64  }
0x26e1   : > { %2870 = vadd.xlane.f32.xlu0 %v2869_v35  ;;  %2877 = vadd.xlane.f32.xlu1 %v2876_v56  ;;  %v8924_v11 = vld [vmem:[#allocation20_spill] sm:$0xff]  ;;  %v8927_v63 = vld [vmem:[#allocation19_spill] sm:$0xff]  ;;  %v8929_v50 = vld [vmem:[#allocation13_spill] sm:$0xff]  ;;  %s6411_s28 = smov 96   ;;  %s5802_s29 = smul.u32 96, %s6399_s26 }
0x26e2   : > { %2981 = vmatpush.msra.mxu0 %v6519_v5  ;;  %3247 = vmatpush.msra.mxu1 %v8919_v44  ;;  %v8930_v1 = vld [vmem:[#allocation18_spill] sm:$0xff]  ;;  %v8931_v42 = vld [vmem:[#allocation9_spill] sm:$0xff]  ;;  %v8933_v43 = vld [vmem:[#allocation31_spill] sm:$0xff]  ;;  %s2859_s26 = sadd.s32 1, %s6399_s26  }
0x26e3   : > { %3284 = vmatpush.msra.mxu2 %v6579_v17  ;;  %3332 = vmatpush.msra.mxu3 %v6619_v25  ;;  %v8932_v58 = vld [vmem:[#allocation17_spill] sm:$0xff]  ;;  %s8025_s1 = scalar_lea.vmem %s8675_s16, %s5802_s29  ;;  %p2856_p1 = scmp.ge.s32.totalorder %s2859_s26, 5  }
0x26e4   : > { %2982 = vmatpush.msra.mxu0 %v6514_v4  ;;  %3248 = vmatpush.msra.mxu1 %v8920_v61 }
0x26e5   : > { %3285 = vmatpush.msra.mxu2 %v6574_v16  ;;  %3333 = vmatpush.msra.mxu3 %v6614_v24 }
0x26e6   : > { %2983 = vmatpush.msra.mxu0 %v6509_v3  ;;  %3369 = vmatpush.msrb.mxu1 %v6654_v32 }
0x26e7   : > { %3286 = vmatpush.msra.mxu2 %v6569_v15  ;;  %3334 = vmatpush.msra.mxu3 %v6609_v23 }
0x26e8   : > { %3370 = vmatpush.msrb.mxu1 %v6649_v31  ;;  %3450 = vmatpush.msrb.mxu0 %v8921_v12 }
0x26e9   : > { %3410 = vmatpush.msrb.mxu2 %v6694_v40  ;;  %2873 = vadd.xlane.f32.xlu0 %v2872_v53 }
0x26ea   : > { %3335 = vmatpush.msra.mxu3 %v6604_v22  ;;  %3371 = vmatpush.msrb.mxu1 %v6644_v30 }
0x26eb   : > { %3411 = vmatpush.msrb.mxu2 %v6689_v39  ;;  %3451 = vmatpush.msrb.mxu0 %v8923_v38 }
0x26ec   : > { %3336 = vmatpush.msra.mxu3 %v6599_v21  ;;  %3372 = vmatpush.msrb.mxu1 %v6639_v29 }
0x26ed   : > { %3412 = vmatpush.msrb.mxu2 %v8922_v49  ;;  %3452 = vmatpush.msrb.mxu0 %v8926_v54 }
0x26ee   : > { %3488 = vmatpush.msrb.mxu3 %v8924_v11  ;;  %3373 = vmatpush.msrb.mxu1 %v6634_v28 }
0x26ef   : > { %3413 = vmatpush.msrb.mxu2 %v8925_v8  ;;  %3453 = vmatpush.msrb.mxu0 %v8929_v50 }
0x26f0   : > { %3489 = vmatpush.msrb.mxu3 %v8927_v63  ;;  %3374 = vmatpush.msrb.mxu1 %v6629_v27 }
0x26f1   : > { %3414 = vmatpush.msrb.mxu2 %v8928_v45 }
0x26f2   : > { %3490 = vmatpush.msrb.mxu3 %v8930_v1 }
0x26f3   : > { %3415 = vmatpush.msrb.mxu2 %v8931_v42 }
0x26f4   : > { %3491 = vmatpush.msrb.mxu3 %v8932_v58 }
0x26fd   : > { %2946 = vrot.lane.b32.xlu0 %v6383_v0, %s6408_s0 }
0x2754   : > { %v2871_v60 = vpop.xlane.xlu0 %2870  ;;  %v2878_v46 = vpop.xlane.xlu1 %2877 }
0x2755   : > { %v2886_v47 = vmul.f32 %v2871_v60, %v8933_v43  ;;  %v2888_v59 = vmul.f32 %v2878_v46, %v8933_v43 }
0x2757   : > { %v2889_v9 = vsub.f32 %v6395_v48, %v2886_v47  ;;  %v7827_v53 = vsub.f32 %v6387_v57, %v2888_v59 }
0x2759   : > { %v2892_v62 = vmul.f32 %v2889_v9, %v2889_v9  ;;  %v2894_v47 = vmul.f32 %v7827_v53, %v7827_v53 }
0x275b   : > { %v2895_v2 = vsel %vm184_vm3, %v2892_v62, 0.0  ;;  %v2901_v62 = vsel %vm191_vm4, %v2894_v47, 0.0 }
0x275c   : > { %v2874_v52 = vpop.xlane.xlu0 %2873  ;;  %2896 = vadd.xlane.f32.xlu1 %v2895_v2 }
0x275d   : > { %v2887_v51 = vmul.f32 %v2874_v52, %v8933_v43 }
0x275f   : > { %v2890_v35 = vsub.f32 %v6391_v36, %v2887_v51 }
0x2761   : > { %v2893_v56 = vmul.f32 %v2890_v35, %v2890_v35 }
0x2763   : > { %v2898_v60 = vsel %vm184_vm3, %v2893_v56, 0.0 }
0x2764   : > { %2899 = vadd.xlane.f32.xlu2 %v2898_v60 }
0x276c   : > { %2902 = vadd.xlane.f32.xlu2 %v2901_v62 }
0x2775   : > { %2948 = vrot.lane.b32.xlu1 %v6379_v55, %s6408_s0 }
0x2784   : > { %2950 = vrot.lane.b32.xlu2 %v6375_v10, %s6408_s0 }
0x27cf   : > { %v2897_v46 = vpop.xlane.xlu1 %2896 }
0x27d0   : > { %v2904_v2 = vmul.f32 %v2897_v46, %v8933_v43 }
0x27d2   : > { %v2907_v52 = vadd.f32 1e-05, %v2904_v2 }
0x27d4   : > { %6169 = vrsqrt.f32 %v2907_v52  ;;  %vm2916_vm7 = vweird.f32 %v2907_v52 }
0x27d7   : > { %v2900_v51 = vpop.xlane.xlu2 %2899 }
0x27d8   : > { %v2905_v59 = vmul.f32 %v2900_v51, %v8933_v43  ;;  %v2947_v51 = vpop.permute.xlu0 %2946 }
0x27da   : > { %v6170_v56 = vpop.eup %6169  ;;  %v2908_v60 = vadd.f32 1e-05, %v2905_v59 }
0x27db   : > { %v2911_v57 = vmul.f32 %v6170_v56, %v2907_v52  ;;  %vm2917_vm6 = vweird.f32 %v6170_v56 }
0x27dc   : > { %6171 = vrsqrt.f32 %v2908_v60  ;;  %vm2918_vm8 = vmor %vm2916_vm7, %vm2917_vm6  ;;  %vm2926_vm11 = vweird.f32 %v2908_v60 }
0x27dd   : > { %v2912_v47 = vmul.f32 %v6170_v56, %v2911_v57 }
0x27df   : > { %v2913_v62 = vmul.f32 0.5, %v2912_v47  ;;  %v2903_v36 = vpop.xlane.xlu2 %2902 }
0x27e0   : > { %v2906_v48 = vmul.f32 %v2903_v36, %v8933_v43 }
0x27e1   : > { %v2914_v58 = vsub.f32 1.5, %v2913_v62 }
0x27e2   : > { %v6172_v1 = vpop.eup %6171  ;;  %v2909_v63 = vadd.f32 1e-05, %v2906_v48 }
0x27e3   : > { %v2921_v46 = vmul.f32 %v6172_v1, %v2908_v60  ;;  %v2915_v2 = vmul.f32 %v6170_v56, %v2914_v58  ;;  %vm2927_vm10 = vweird.f32 %v6172_v1 }
0x27e4   : > { %6173 = vrsqrt.f32 %v2909_v63  ;;  %vm2928_vm12 = vmor %vm2926_vm11, %vm2927_vm10  ;;  %vm2936_vm14 = vweird.f32 %v2909_v63 }
0x27e5   : > { %v2922_v11 = vmul.f32 %v6172_v1, %v2921_v46  ;;  %v2919_v50 = vsel %vm2918_vm8, %v6170_v56, %v2915_v2 }
0x27e6   : > { %v2940_v59 = vmul.f32 %v2919_v50, %v2889_v9 }
0x27e7   : > { %v2923_v54 = vmul.f32 0.5, %v2922_v11  ;;  %v2949_v62 = vpop.permute.xlu1 %2948  ;;  %v2951_v46 = vpop.permute.xlu2 %2950 }
0x27e8   : > { %v2955_v57 = vsel %vm184_vm3, %v2940_v59, %v2947_v51  ;;  %v8934_v59 = vld [vmem:[#allocation3_spill] sm:$0xff] }
0x27e9   : > { %v2924_v47 = vsub.f32 1.5, %v2923_v54  ;;  %5771 = vmatmul.msk.f32.vlgmr.msra.gmra.mxu0 %vm274_vm9, %v2955_v57 }
0x27ea   : > { %v6174_v36 = vpop.eup %6173  ;;  %3905 = vmatpush.msra.mxu0 %v6564_v14 }
0x27eb   : > { %v2931_v48 = vmul.f32 %v6174_v36, %v2909_v63  ;;  %v2925_v52 = vmul.f32 %v6172_v1, %v2924_v47  ;;  %vm2937_vm13 = vweird.f32 %v6174_v36 }
0x27ec   : > { %3906 = vmatpush.msra.mxu0 %v8915_v13  ;;  %vm2938_vm15 = vmor %vm2936_vm14, %vm2937_vm13 }
0x27ed   : > { %v2932_v58 = vmul.f32 %v6174_v36, %v2931_v48  ;;  %v2929_v56 = vsel %vm2928_vm12, %v6172_v1, %v2925_v52 }
0x27ee   : > { %v2941_v50 = vmul.f32 %v2929_v56, %v2890_v35  ;;  %3907 = vmatpush.msra.mxu0 %v8919_v44 }
0x27ef   : > { %v2933_v11 = vmul.f32 0.5, %v2932_v58 }
0x27f0   : > { %v2956_v54 = vsel %vm184_vm3, %v2941_v50, %v2949_v62  ;;  %3908 = vmatpush.msra.mxu0 %v8920_v61 }
0x27f1   : > { %v2934_v9 = vsub.f32 1.5, %v2933_v11  ;;  %5772 = vmatmul.msk.f32.gmra.mxu0 %vm274_vm9, %v2956_v54 }
0x27f3   : > { %v2935_v60 = vmul.f32 %v6174_v36, %v2934_v9 }
0x27f5   : > { %v2939_v2 = vsel %vm2938_vm15, %v6174_v36, %v2935_v60 }
0x27f6   : > { %v2942_v51 = vmul.f32 %v2939_v2, %v7827_v53 }
0x27f8   : > { %v2957_v1 = vsel %vm184_vm3, %v2942_v51, %v2951_v46 }
0x27f9   : > { %5773 = vmatmul.msk.f32.gmra.mxu0 %vm274_vm9, %v2957_v1 }
0x2866   : > { %v2985_v35 = vpop.f32.mrf.mxu0 }
0x2867   : > { %v7852_v57 = vadd.f32 %v8934_v59, %v2985_v35 }
0x2869   : > { %3054 = vrot.lane.b32.xlu0 %v7852_v57, %s6409_s27  ;;  %v5774_v62 = vmul.f32 -1.442695, %v7852_v57 }
0x286e   : > { %v2988_v47 = vpop.f32.mrf.mxu0 }
0x286f   : > { %v7857_v63 = vadd.f32 %v8934_v59, %v2988_v47 }
0x2871   : > { %3056 = vrot.lane.b32.xlu2 %v7857_v63, %s6409_s27  ;;  %v5775_v48 = vmul.f32 -1.442695, %v7857_v63 }
0x2873   : > { %6175 = vpow2.f32 %v5775_v48 }
0x2876   : > { %v2991_v53 = vpop.f32.mrf.mxu0 }
0x2877   : > { %v7862_v36 = vadd.f32 %v8934_v59, %v2991_v53 }
0x2879   : > { %3058 = vrot.lane.b32.xlu1 %v7862_v36, %s6409_s27  ;;  %v6176_v52 = vpop.eup %6175  ;;  %v5776_v60 = vmul.f32 -1.442695, %v7862_v36 }
0x287a   : > { %v3004_v58 = vadd.f32 1.0, %v6176_v52 }
0x287c   : > { %6177 = vrcp.f32 %v3004_v58  ;;  %v3032_v1 = vand.u32 2147483648, %v3004_v58  ;;  %vm3026_vm6 = vweird.f32 %v3004_v58  ;;  %v3030_v35 = vand.u32 2147483647, %v3004_v58 }
0x287d   : > { %6179 = vpow2.f32 %v5774_v62 }
0x287e   : > { %v3033_v52 = vor.u32 1.1754944e-38, %v3032_v1  ;;  %vm3031_vm8 = vcmp.eq.f32.partialorder %v3030_v35, 8.507059e+37 }
0x2882   : > { %v6178_v56 = vpop.eup %6177 }
0x2883   : > { %v6180_v50 = vpop.eup %6179  ;;  %v3022_v11 = vmul.f32 %v6178_v56, %v3004_v58  ;;  %vm3027_vm2 = vweird.f32 %v6178_v56 }
0x2884   : > { %v3003_v54 = vadd.f32 1.0, %v6180_v50  ;;  %vm3028_vm7 = vmor %vm3026_vm6, %vm3027_vm2 }
0x2885   : > { %v3023_v9 = vsub.f32 1.0, %v3022_v11 }
0x2886   : > { %6181 = vrcp.f32 %v3003_v54  ;;  %v3017_v58 = vand.u32 2147483648, %v3003_v54  ;;  %vm3011_vm11 = vweird.f32 %v3003_v54  ;;  %v3015_v13 = vand.u32 2147483647, %v3003_v54 }
0x2887   : > { %v3024_v46 = vmul.f32 %v6178_v56, %v3023_v9  ;;  %6183 = vpow2.f32 %v5776_v60 }
0x2888   : > { %v3018_v1 = vor.u32 1.1754944e-38, %v3017_v58  ;;  %vm3016_vm13 = vcmp.eq.f32.partialorder %v3015_v13, 8.507059e+37 }
0x2889   : > { %v3025_v2 = vadd.f32 %v6178_v56, %v3024_v46 }
0x288b   : > { %v3029_v53 = vsel %vm3028_vm7, %v6178_v56, %v3025_v2 }
0x288c   : > { %v6182_v51 = vpop.eup %6181  ;;  %v3034_v50 = vsel %vm3031_vm8, %v3033_v52, %v3029_v53 }
0x288d   : > { %v6184_v47 = vpop.eup %6183  ;;  %v3007_v48 = vmul.f32 %v6182_v51, %v3003_v54  ;;  %vm3012_vm10 = vweird.f32 %v6182_v51 }
0x288e   : > { %v3005_v62 = vadd.f32 1.0, %v6184_v47  ;;  %vm3013_vm12 = vmor %vm3011_vm11, %vm3012_vm10 }
0x288f   : > { %v3008_v44 = vsub.f32 1.0, %v3007_v48 }
0x2890   : > { %6185 = vrcp.f32 %v3005_v62  ;;  %vm3041_vm15 = vweird.f32 %v3005_v62 }
0x2891   : > { %v3009_v9 = vmul.f32 %v6182_v51, %v3008_v44  ;;  %v3047_v44 = vand.u32 2147483648, %v3005_v62 }
0x2893   : > { %v3010_v60 = vadd.f32 %v6182_v51, %v3009_v9  ;;  %v3048_v54 = vor.u32 1.1754944e-38, %v3047_v44 }
0x2895   : > { %v3014_v56 = vsel %vm3013_vm12, %v6182_v51, %v3010_v60 }
0x2896   : > { %v6186_v46 = vpop.eup %6185  ;;  %v3019_v47 = vsel %vm3016_vm13, %v3018_v1, %v3014_v56 }
0x2897   : > { %v3037_v2 = vmul.f32 %v6186_v46, %v3005_v62  ;;  %vm3042_vm14 = vweird.f32 %v6186_v46 }
0x2898   : > { %vm3043_vm2 = vmor %vm3041_vm15, %vm3042_vm14 }
0x2899   : > { %v3038_v48 = vsub.f32 1.0, %v3037_v2 }
0x28cb   : > { %v3057_v11 = vpop.permute.xlu2 %3056 }
0x28cc   : > { %v3064_v61 = vmul.f32 %v3057_v11, %v3034_v50  ;;  %v3045_v11 = vand.u32 2147483647, %v3005_v62 }
0x28ce   : > { %3071 = vrot.lane.b32.xlu2 %v3064_v61, %s6410_s12  ;;  %v3039_v61 = vmul.f32 %v6186_v46, %v3038_v48  ;;  %vm3046_vm6 = vcmp.eq.f32.partialorder %v3045_v11, 8.507059e+37 }
0x28d0   : > { %v3040_v52 = vadd.f32 %v6186_v46, %v3039_v61 }
0x28d2   : > { %v3044_v9 = vsel %vm3043_vm2, %v6186_v46, %v3040_v52  ;;  %v3103_v52 = vmul.f32 %v6379_v55, %v3034_v50 }
0x28d3   : > { %v3049_v60 = vsel %vm3046_vm6, %v3048_v54, %v3044_v9  ;;  %v3102_v54 = vmul.f32 %v6383_v0, %v3019_v47 }
0x28d4   : > { %v3104_v55 = vmul.f32 %v6375_v10, %v3049_v60 }
0x28db   : > { %v3055_v35 = vpop.permute.xlu0 %3054 }
0x28dc   : > { %v3063_v53 = vmul.f32 %v3055_v35, %v3019_v47 }
0x28de   : > { %3069 = vrot.lane.b32.xlu0 %v3063_v53, %s6410_s12 }
0x28eb   : > { %v3059_v51 = vpop.permute.xlu1 %3058 }
0x28ec   : > { %v3065_v58 = vmul.f32 %v3059_v51, %v3049_v60 }
0x28ee   : > { %3073 = vrot.lane.b32.xlu1 %v3065_v58, %s6410_s12  ;;  %v3086_v58 = vsub.f32 1.0, %v3049_v60 }
0x2928   : > { %v3072_v13 = vpop.permute.xlu2 %3071 }
0x2929   : > { %v3079_v56 = vadd.f32 %v3072_v13, %v7857_v63  ;;  %v3085_v63 = vsub.f32 1.0, %v3034_v50 }
0x292b   : > { %6187 = vtanh.f32 %v3079_v56 }
0x2931   : > { %v6188_v2 = vpop.eup %6187 }
0x2932   : > { %3092 = vrot.lane.b32.xlu2 %v6188_v2, %s6411_s28 }
0x2950   : > { %v3070_v1 = vpop.permute.xlu0 %3069 }
0x2951   : > { %v3078_v62 = vadd.f32 %v3070_v1, %v7852_v57  ;;  %v3084_v57 = vsub.f32 1.0, %v3019_v47 }
0x2953   : > { %6189 = vtanh.f32 %v3078_v62 }
0x2959   : > { %v6190_v46 = vpop.eup %6189 }
0x295a   : > { %3090 = vrot.lane.b32.xlu0 %v6190_v46, %s6411_s28 }
0x2960   : > { %v3074_v35 = vpop.permute.xlu1 %3073 }
0x2961   : > { %v3080_v53 = vadd.f32 %v3074_v35, %v7862_v36 }
0x2963   : > { %6191 = vtanh.f32 %v3080_v53 }
0x2969   : > { %v6192_v48 = vpop.eup %6191 }
0x296a   : > { %3094 = vrot.lane.b32.xlu1 %v6192_v48, %s6411_s28 }
0x298c   : > { %v3093_v61 = vpop.permute.xlu2 %3092 }
0x298d   : > { %v3100_v44 = vmul.f32 %v3093_v61, %v3085_v63 }
0x298f   : > { %v7879_v11 = vadd.f32 %v3103_v52, %v3100_v44 }
0x2991   : > { %3113 = vrot.lane.b32.xlu2 %v7879_v11, %s6411_s28 }
0x29cc   : > { %v3091_v9 = vpop.permute.xlu0 %3090 }
0x29cd   : > { %v3099_v51 = vmul.f32 %v3091_v9, %v3084_v57 }
0x29cf   : > { %v7884_v36 = vadd.f32 %v3102_v54, %v3099_v51 }
0x29d1   : > { %3111 = vrot.lane.b32.xlu0 %v7884_v36, %s6411_s28 }
0x29dc   : > { %v3095_v13 = vpop.permute.xlu1 %3094 }
0x29dd   : > { %v3101_v50 = vmul.f32 %v3095_v13, %v3086_v58  ;;  %v8935_v13 = vld [vmem:[#allocation5_spill] sm:$0xff] }
0x29df   : > { %v7889_v56 = vadd.f32 %v3104_v55, %v3101_v50 }
0x29e1   : > { %3115 = vrot.lane.b32.xlu1 %v7889_v56, %s6411_s28 }
0x29eb   : > { %v3114_v2 = vpop.permute.xlu2 %3113 }
0x29ec   : > { %v3123_v1 = vsel %vm159_vm0, %v3114_v2, 0.0 }
0x29ed   : > { %3124 = vadd.xlane.f32.xlu2 %v3123_v1 }
0x2a43   : > { %v3112_v0 = vpop.permute.xlu0 %3111 }
0x2a44   : > { %v3120_v47 = vsel %vm159_vm0, %v3112_v0, 0.0  ;;  %v8936_v0 = vld [vmem:[#allocation4_spill] sm:$0xff] }
0x2a45   : > { %3121 = vadd.xlane.f32.xlu0 %v3120_v47 }
0x2a53   : > { %v3116_v62 = vpop.permute.xlu1 %3115 }
0x2a54   : > { %v3127_v46 = vsel %vm442_vm5, %v3116_v62, 0.0 }
0x2a55   : > { %3128 = vadd.xlane.f32.xlu1 %v3127_v46 }
0x2a60   : > { %v3125_v35 = vpop.xlane.xlu2 %3124 }
0x2a61   : > { %v3138_v10 = vmul.f32 %v3125_v35, %v8837_v37 }
0x2a63   : > { %v3141_v60 = vsub.f32 %v7879_v11, %v3138_v10 }
0x2a65   : > { %v3144_v53 = vmul.f32 %v3141_v60, %v3141_v60 }
0x2a67   : > { %3151 = vrot.lane.b32.xlu2 %v3144_v53, %s6411_s28 }
0x2ab8   : > { %v3122_v48 = vpop.xlane.xlu0 %3121 }
0x2ab9   : > { %v3137_v63 = vmul.f32 %v3122_v48, %v8837_v37 }
0x2abb   : > { %v3140_v61 = vsub.f32 %v7884_v36, %v3137_v63 }
0x2abd   : > { %v3143_v52 = vmul.f32 %v3140_v61, %v3140_v61 }
0x2abf   : > { %3149 = vrot.lane.b32.xlu0 %v3143_v52, %s6411_s28 }
0x2ac1   : > { %v3152_v44 = vpop.permute.xlu2 %3151 }
0x2ac2   : > { %v3161_v57 = vsel %vm159_vm0, %v3152_v44, 0.0 }
0x2ac3   : > { %3162 = vadd.xlane.f32.xlu2 %v3161_v57 }
0x2ac8   : > { %v3129_v9 = vpop.xlane.xlu1 %3128 }
0x2ac9   : > { %v3139_v54 = vmul.f32 %v3129_v9, %v8837_v37 }
0x2acb   : > { %v7905_v51 = vsub.f32 %v7889_v56, %v3139_v54 }
0x2acd   : > { %v3145_v58 = vmul.f32 %v7905_v51, %v7905_v51 }
0x2acf   : > { %3153 = vrot.lane.b32.xlu1 %v3145_v58, %s6411_s28 }
0x2adb   : > { %3212 = vrot.lane.b32.xlu2 %v8935_v13, %s6409_s27 }
0x2b31   : > { %v3150_v55 = vpop.permute.xlu0 %3149 }
0x2b32   : > { %v3158_v50 = vsel %vm159_vm0, %v3150_v55, 0.0 }
0x2b33   : > { %3159 = vadd.xlane.f32.xlu0 %v3158_v50 }
0x2b36   : > { %v3163_v47 = vpop.xlane.xlu2 %3162 }
0x2b37   : > { %v3168_v62 = vmul.f32 %v3163_v47, %v8837_v37 }
0x2b39   : > { %v3171_v46 = vadd.f32 1e-05, %v3168_v62 }
0x2b3b   : > { %6193 = vrsqrt.f32 %v3171_v46  ;;  %vm3189_vm8 = vweird.f32 %v3171_v46 }
0x2b41   : > { %v3154_v2 = vpop.permute.xlu1 %3153  ;;  %v6194_v35 = vpop.eup %6193 }
0x2b42   : > { %v3164_v1 = vsel %vm442_vm5, %v3154_v2, 0.0  ;;  %v3184_v10 = vmul.f32 %v6194_v35, %v3171_v46  ;;  %vm3190_vm7 = vweird.f32 %v6194_v35 }
0x2b43   : > { %3165 = vadd.xlane.f32.xlu1 %v3164_v1  ;;  %vm3191_vm10 = vmor %vm3189_vm8, %vm3190_vm7 }
0x2b44   : > { %v3185_v53 = vmul.f32 %v6194_v35, %v3184_v10 }
0x2b46   : > { %v3186_v52 = vmul.f32 0.5, %v3185_v53  ;;  %v7921_v53 = vpop.permute.xlu2 %3212 }
0x2b47   : > { %3206 = vrot.lane.b32.xlu0 %v8936_v0, %s6409_s27 }
0x2b48   : > { %v3187_v57 = vsub.f32 1.5, %v3186_v52 }
0x2b4a   : > { %v3188_v54 = vmul.f32 %v6194_v35, %v3187_v57 }
0x2b4c   : > { %v3192_v55 = vsel %vm3191_vm10, %v6194_v35, %v3188_v54 }
0x2b4d   : > { %v3204_v47 = vmul.f32 %v3192_v55, %v3141_v60 }
0x2ba6   : > { %v3160_v48 = vpop.xlane.xlu0 %3159 }
0x2ba7   : > { %v3167_v63 = vmul.f32 %v3160_v48, %v8837_v37 }
0x2ba9   : > { %v3170_v44 = vadd.f32 1e-05, %v3167_v63 }
0x2bab   : > { %6195 = vrsqrt.f32 %v3170_v44  ;;  %vm3179_vm12 = vweird.f32 %v3170_v44 }
0x2bb1   : > { %v6196_v9 = vpop.eup %6195 }
0x2bb2   : > { %v3174_v58 = vmul.f32 %v6196_v9, %v3170_v44  ;;  %vm3180_vm11 = vweird.f32 %v6196_v9 }
0x2bb3   : > { %vm3181_vm13 = vmor %vm3179_vm12, %vm3180_vm11 }
0x2bb4   : > { %v3175_v13 = vmul.f32 %v6196_v9, %v3174_v58 }
0x2bb6   : > { %v3176_v50 = vmul.f32 0.5, %v3175_v13  ;;  %v3166_v2 = vpop.xlane.xlu1 %3165 }
0x2bb7   : > { %v3169_v1 = vmul.f32 %v3166_v2, %v8837_v37 }
0x2bb8   : > { %v3177_v0 = vsub.f32 1.5, %v3176_v50 }
0x2bb9   : > { %v3172_v62 = vadd.f32 1e-05, %v3169_v1  ;;  %v7919_v10 = vpop.permute.xlu0 %3206 }
0x2bba   : > { %v3178_v48 = vmul.f32 %v6196_v9, %v3177_v0  ;;  %v3210_v63 = vmul.f32 %v7919_v10, %v3204_v47  ;;  %v8937_v47 = vld [vmem:[#allocation26_spill] sm:$0xff] }
0x2bbb   : > { %6197 = vrsqrt.f32 %v3172_v62  ;;  %vm3199_vm15 = vweird.f32 %v3172_v62 }
0x2bbc   : > { %v3182_v46 = vsel %vm3181_vm13, %v6196_v9, %v3178_v48  ;;  %v3216_v35 = vadd.f32 %v7921_v53, %v3210_v63  ;;  %v8938_v48 = vld [vmem:[#allocation25_spill] sm:$0xff]  ;;  %v8939_v63 = vld [vmem:[#allocation24_spill] sm:$0xff] }
0x2bbd   : > { %v3203_v52 = vmul.f32 %v3182_v46, %v3140_v61  ;;  %v8940_v46 = vld [vmem:[#allocation23_spill] sm:$0xff] }
0x2bbe   : > { %3223 = vrot.lane.b32.xlu0 %v3216_v35, %s6411_s28 }
0x2bbf   : > { %v3209_v57 = vmul.f32 %v7919_v10, %v3203_v52 }
0x2bc1   : > { %v6198_v60 = vpop.eup %6197  ;;  %v3215_v54 = vadd.f32 %v7921_v53, %v3209_v57 }
0x2bc2   : > { %v3194_v58 = vmul.f32 %v6198_v60, %v3172_v62  ;;  %vm3200_vm14 = vweird.f32 %v6198_v60 }
0x2bc3   : > { %3221 = vrot.lane.b32.xlu1 %v3215_v54, %s6411_s28  ;;  %vm3201_vm2 = vmor %vm3199_vm15, %vm3200_vm14 }
0x2bc4   : > { %v3195_v13 = vmul.f32 %v6198_v60, %v3194_v58 }
0x2bc6   : > { %v3196_v44 = vmul.f32 0.5, %v3195_v13 }
0x2bc8   : > { %v3197_v55 = vsub.f32 1.5, %v3196_v44 }
0x2bca   : > { %v3198_v50 = vmul.f32 %v6198_v60, %v3197_v55 }
0x2bcc   : > { %v3202_v9 = vsel %vm3201_vm2, %v6198_v60, %v3198_v50 }
0x2bcd   : > { %v3205_v61 = vmul.f32 %v3202_v9, %v7905_v51 }
0x2bcf   : > { %v3211_v2 = vmul.f32 %v7919_v10, %v3205_v61 }
0x2bd1   : > { %v3217_v1 = vadd.f32 %v7921_v53, %v3211_v2 }
0x2bd3   : > { %3225 = vrot.lane.b32.xlu0 %v3217_v1, %s6411_s28 }
0x2c30   : > { %v3224_v62 = vpop.permute.xlu0 %3223 }
0x2c35   : > { %v3222_v0 = vpop.permute.xlu1 %3221 }
0x2c36   : > { %5777 = vmatmul.msk.f32.vlgmr.msra.gmra.mxu1 %vm159_vm0, %v3222_v0 }
0x2c37   : > { %3529 = vmatpush.msra.mxu1 %v8937_v47 }
0x2c39   : > { %3530 = vmatpush.msra.mxu1 %v8938_v48 }
0x2c3b   : > { %3531 = vmatpush.msra.mxu1 %v8939_v63 }
0x2c3d   : > { %3532 = vmatpush.msra.mxu1 %v8940_v46 }
0x2c3e   : > { %5778 = vmatmul.msk.f32.gmra.mxu1 %vm159_vm0, %v3224_v62 }
0x2c45   : > { %v3226_v51 = vpop.permute.xlu0 %3225 }
0x2c46   : > { %5779 = vmatmul.msk.f32.gmra.mxu1 %vm159_vm0, %v3226_v51 }
0x2cb3   : > { %v3250_v35 = vpop.f32.mrf.mxu1 }
0x2cb4   : > { %v3251_v52 = vadd.f32 %v6589_v19, %v3250_v35 }
0x2cb6   : > { %v3259_v57 = vmax.f32 %v3251_v52, 0.0 }
0x2cb8   : > { %5780 = vmatmul.msk.f32.vlgmr.msra.gmra.mxu2 %vm159_vm0, %v3259_v57 }
0x2cb9   : > { %3653 = vmatpush.msra.mxu2 %v6529_v7 }
0x2cbb   : > { %v3253_v60 = vpop.f32.mrf.mxu1  ;;  %3654 = vmatpush.msra.mxu2 %v6524_v6 }
0x2cbc   : > { %v3254_v54 = vadd.f32 %v6589_v19, %v3253_v60 }
0x2cbd   : > { %3655 = vmatpush.msra.mxu2 %v6519_v5 }
0x2cbe   : > { %v3260_v58 = vmax.f32 %v3254_v54, 0.0 }
0x2cbf   : > { %3656 = vmatpush.msra.mxu2 %v6514_v4 }
0x2cc0   : > { %5781 = vmatmul.msk.f32.gmra.mxu2 %vm159_vm0, %v3260_v58 }
0x2cc1   : > { %3657 = vmatpush.msra.mxu2 %v6509_v3 }
0x2cc3   : > { %v3256_v13 = vpop.f32.mrf.mxu1 }
0x2cc4   : > { %v3257_v44 = vadd.f32 %v6589_v19, %v3256_v13 }
0x2cc6   : > { %v3261_v55 = vmax.f32 %v3257_v44, 0.0 }
0x2cc8   : > { %5782 = vmatmul.msk.f32.gmra.mxu2 %vm159_vm0, %v3261_v55 }
0x2d3b   : > { %v3288_v50 = vpop.f32.mrf.mxu2 }
0x2d3c   : > { %v3289_v9 = vadd.f32 %v6594_v20, %v3288_v50 }
0x2d3e   : > { %v3297_v61 = vmax.f32 %v3289_v9, 0.0 }
0x2d40   : > { %v3303_v2 = vadd.f32 %v3297_v61, %v3222_v0 }
0x2d42   : > { %3306 = vst.msk [vmem:[#allocation2] sm:$0xff] %vm159_vm0, %v3303_v2 }
0x2d43   : > { %v3291_v1 = vpop.f32.mrf.mxu2 }
0x2d44   : > { %v3292_v35 = vadd.f32 %v6594_v20, %v3291_v1 }
0x2d46   : > { %v3298_v52 = vmax.f32 %v3292_v35, 0.0 }
0x2d48   : > { %v3304_v57 = vadd.f32 %v3298_v52, %v3224_v62 }
0x2d49   : > { %v3309_v60 = vld [vmem:[#allocation2] sm:$0xff] }
0x2d4a   : > { %3307 = vst.msk [vmem:[#allocation2 + $0x8] sm:$0xff] %vm159_vm0, %v3304_v57  ;;  %5783 = vmatmul.msk.f32.vlgmr.msra.gmra.mxu3 %vm163_vm1, %v3309_v60 }
0x2d4b   : > { %v3294_v54 = vpop.f32.mrf.mxu2  ;;  %3943 = vmatpush.msra.mxu3 %v6584_v18 }
0x2d4c   : > { %v3295_v58 = vadd.f32 %v6594_v20, %v3294_v54 }
0x2d4d   : > { %3944 = vmatpush.msra.mxu3 %v6579_v17 }
0x2d4e   : > { %v3299_v0 = vmax.f32 %v3295_v58, 0.0 }
0x2d4f   : > { %3945 = vmatpush.msra.mxu3 %v6574_v16 }
0x2d50   : > { %v3305_v13 = vadd.f32 %v3299_v0, %v3226_v51 }
0x2d51   : > { %v3310_v44 = vld [vmem:[#allocation2 + $0x8] sm:$0xff]  ;;  %3946 = vmatpush.msra.mxu3 %v6569_v15 }
0x2d52   : > { %3308 = vst.msk [vmem:[#allocation2 + $0x10] sm:$0xf] %vm442_vm5, %v3305_v13  ;;  %5784 = vmatmul.msk.f32.gmra.mxu3 %vm163_vm1, %v3310_v44 }
0x2d59   : > { %v3311_v62 = vld [vmem:[#allocation2 + $0x10] sm:$0xf] }
0x2d5a   : > { %5785 = vmatmul.msk.f32.gmra.mxu3 %vm163_vm1, %v3311_v62 }
0x2dcd   : > { %v3338_v55 = vpop.f32.mrf.mxu3 }
0x2dce   : > { %v3339_v50 = vadd.f32 %v6659_v33, %v3338_v55 }
0x2dd0   : > { %v3347_v9 = vmax.f32 %v3339_v50, 0.0 }
0x2dd2   : > { %5786 = vmatmul.msk.f32.vlgmr.msrb.gmra.mxu1 %vm163_vm1, %v3347_v9 }
0x2dd3   : > { %3991 = vmatpush.msrb.mxu1 %v6624_v26 }
0x2dd5   : > { %v3341_v61 = vpop.f32.mrf.mxu3  ;;  %3992 = vmatpush.msrb.mxu1 %v6619_v25 }
0x2dd6   : > { %v3342_v51 = vadd.f32 %v6659_v33, %v3341_v61 }
0x2dd7   : > { %3993 = vmatpush.msrb.mxu1 %v6614_v24 }
0x2dd8   : > { %v3348_v2 = vmax.f32 %v3342_v51, 0.0 }
0x2dd9   : > { %3994 = vmatpush.msrb.mxu1 %v6609_v23 }
0x2dda   : > { %5787 = vmatmul.msk.f32.gmra.mxu1 %vm163_vm1, %v3348_v2 }
0x2ddb   : > { %3995 = vmatpush.msrb.mxu1 %v6604_v22 }
0x2ddd   : > { %v3344_v1 = vpop.f32.mrf.mxu3  ;;  %3996 = vmatpush.msrb.mxu1 %v6599_v21 }
0x2dde   : > { %v3345_v35 = vadd.f32 %v6659_v33, %v3344_v1 }
0x2de0   : > { %v3349_v52 = vmax.f32 %v3345_v35, 0.0 }
0x2de2   : > { %5788 = vmatmul.msk.f32.gmra.mxu1 %vm163_vm1, %v3349_v52 }
0x2e4f   : > { %v3376_v57 = vpop.f32.mrf.mxu1 }
0x2e50   : > { %v3377_v54 = vadd.f32 %v6664_v34, %v3376_v57 }
0x2e52   : > { %v3385_v58 = vmax.f32 %v3377_v54, 0.0 }
0x2e54   : > { %v3388_v0 = vadd.f32 %v3385_v58, %v3309_v60 }
0x2e56   : > { %5789 = vmatmul.msk.f32.vlgmr.msrb.gmra.mxu2 %vm163_vm1, %v3388_v0 }
0x2e57   : > { %v3379_v13 = vpop.f32.mrf.mxu1  ;;  %4029 = vmatpush.msrb.mxu2 %v6654_v32 }
0x2e58   : > { %v3380_v55 = vadd.f32 %v6664_v34, %v3379_v13 }
0x2e59   : > { %4030 = vmatpush.msrb.mxu2 %v6649_v31 }
0x2e5a   : > { %v3386_v50 = vmax.f32 %v3380_v55, 0.0  ;;  %v8941_v55 = vld [vmem:[#allocation21_spill] sm:$0xff] }
0x2e5b   : > { %4031 = vmatpush.msrb.mxu2 %v6644_v30 }
0x2e5c   : > { %v3389_v9 = vadd.f32 %v3386_v50, %v3310_v44 }
0x2e5d   : > { %4032 = vmatpush.msrb.mxu2 %v6639_v29 }
0x2e5e   : > { %5790 = vmatmul.msk.f32.gmra.mxu2 %vm163_vm1, %v3389_v9 }
0x2e5f   : > { %v3382_v61 = vpop.f32.mrf.mxu1  ;;  %4033 = vmatpush.msrb.mxu2 %v6634_v28 }
0x2e60   : > { %v3383_v60 = vadd.f32 %v6664_v34, %v3382_v61 }
0x2e61   : > { %4034 = vmatpush.msrb.mxu2 %v6629_v27 }
0x2e62   : > { %v3387_v51 = vmax.f32 %v3383_v60, 0.0 }
0x2e64   : > { %v3390_v2 = vadd.f32 %v3387_v51, %v3311_v62  ;;  %v8942_v51 = vld [vmem:[#allocation14_spill] sm:$0xff] }
0x2e66   : > { %5791 = vmatmul.msk.f32.gmra.mxu2 %vm163_vm1, %v3390_v2 }
0x2ed9   : > { %v3417_v1 = vpop.f32.mrf.mxu2 }
0x2eda   : > { %v3418_v35 = vadd.f32 %v6699_v41, %v3417_v1  ;;  %v8943_v1 = vld [vmem:[#allocation13_spill] sm:$0xff] }
0x2edc   : > { %v3426_v52 = vmax.f32 %v3418_v35, 0.0 }
0x2ede   : > { %5792 = vmatmul.msk.f32.vlgmr.msrb.gmra.mxu0 %vm159_vm0, %v3426_v52 }
0x2edf   : > { %4070 = vmatpush.msrb.mxu0 %v6694_v40 }
0x2ee1   : > { %v3420_v44 = vpop.f32.mrf.mxu2  ;;  %4071 = vmatpush.msrb.mxu0 %v6689_v39 }
0x2ee2   : > { %v3421_v57 = vadd.f32 %v6699_v41, %v3420_v44 }
0x2ee3   : > { %4072 = vmatpush.msrb.mxu0 %v8922_v49 }
0x2ee4   : > { %v3427_v54 = vmax.f32 %v3421_v57, 0.0 }
0x2ee5   : > { %4073 = vmatpush.msrb.mxu0 %v8925_v8 }
0x2ee6   : > { %5793 = vmatmul.msk.f32.gmra.mxu0 %vm159_vm0, %v3427_v54 }
0x2ee7   : > { %4074 = vmatpush.msrb.mxu0 %v8928_v45 }
0x2ee9   : > { %v3423_v62 = vpop.f32.mrf.mxu2  ;;  %4075 = vmatpush.msrb.mxu0 %v8931_v42 }
0x2eea   : > { %v3424_v58 = vadd.f32 %v6699_v41, %v3423_v62 }
0x2eec   : > { %v3428_v0 = vmax.f32 %v3424_v58, 0.0  ;;  %v8944_v58 = vld [vmem:[#allocation22_spill] sm:$0xff] }
0x2eee   : > { %5794 = vmatmul.msk.f32.gmra.mxu0 %vm159_vm0, %v3428_v0 }
0x2f5b   : > { %v3455_v13 = vpop.f32.mrf.mxu0 }
0x2f5c   : > { %v3456_v50 = vadd.f32 %v8941_v55, %v3455_v13 }
0x2f5e   : > { %v3464_v9 = vmax.f32 %v3456_v50, 0.0 }
0x2f60   : > { %5795 = vmatmul.msk.f32.vlgmr.msrb.gmra.mxu3 %vm159_vm0, %v3464_v9 }
0x2f61   : > { %4110 = vmatpush.msrb.mxu3 %v8921_v12 }
0x2f63   : > { %v3458_v61 = vpop.f32.mrf.mxu0  ;;  %4111 = vmatpush.msrb.mxu3 %v8923_v38 }
0x2f64   : > { %v3459_v60 = vadd.f32 %v8941_v55, %v3458_v61 }
0x2f65   : > { %4112 = vmatpush.msrb.mxu3 %v8942_v51 }
0x2f66   : > { %v3465_v2 = vmax.f32 %v3459_v60, 0.0  ;;  %v8945_v60 = vld [vmem:[#allocation20_spill] sm:$0xff] }
0x2f67   : > { %4113 = vmatpush.msrb.mxu3 %v8943_v1 }
0x2f68   : > { %5796 = vmatmul.msk.f32.gmra.mxu3 %vm159_vm0, %v3465_v2  ;;  %v8946_v2 = vld [vmem:[#allocation19_spill] sm:$0xff] }
0x2f6b   : > { %v3461_v35 = vpop.f32.mrf.mxu0 }
0x2f6c   : > { %v3462_v44 = vadd.f32 %v8941_v55, %v3461_v35  ;;  %v8947_v35 = vld [vmem:[#allocation18_spill] sm:$0xff] }
0x2f6e   : > { %v3466_v57 = vmax.f32 %v3462_v44, 0.0 }
0x2f70   : > { %5797 = vmatmul.msk.f32.gmra.mxu3 %vm159_vm0, %v3466_v57  ;;  %v8948_v57 = vld [vmem:[#allocation17_spill] sm:$0xff] }
0x2fe3   : > { %v3493_v62 = vpop.f32.mrf.mxu3 }
0x2fe4   : > { %v3494_v13 = vadd.f32 %v8944_v58, %v3493_v62 }
0x2fe6   : > { %v3502_v50 = vmax.f32 %v3494_v13, 0.0 }
0x2fe8   : > { %v3505_v9 = vadd.f32 %v3502_v50, %v3426_v52 }
0x2fea   : > { %5798 = vmatmul.msk.f32.vlgmr.msra.gmra.mxu1 %vm159_vm0, %v3505_v9 }
0x2feb   : > { %v3496_v61 = vpop.f32.mrf.mxu3  ;;  %4148 = vmatpush.msra.mxu1 %v8945_v60 }
0x2fec   : > { %v3497_v1 = vadd.f32 %v8944_v58, %v3496_v61  ;;  %v8949_v61 = vld [vmem:[#allocation27_spill] sm:$0xff] }
0x2fed   : > { %4149 = vmatpush.msra.mxu1 %v8946_v2 }
0x2fee   : > { %v3503_v51 = vmax.f32 %v3497_v1, 0.0 }
0x2fef   : > { %4150 = vmatpush.msra.mxu1 %v8947_v35 }
0x2ff0   : > { %v3506_v44 = vadd.f32 %v3503_v51, %v3427_v54  ;;  %v8950_v54 = vld [vmem:[#allocation34_spill] sm:$0xff] }
0x2ff1   : > { %4151 = vmatpush.msra.mxu1 %v8948_v57 }
0x2ff2   : > { %5799 = vmatmul.msk.f32.gmra.mxu1 %vm159_vm0, %v3506_v44 }
0x2ff3   : > { %v3499_v62 = vpop.f32.mrf.mxu3 }
0x2ff4   : > { %v3500_v52 = vadd.f32 %v8944_v58, %v3499_v62  ;;  %v8952_v62 = vld [vmem:[#allocation33_spill] sm:$0xff] }
0x2ff6   : > { %v3504_v13 = vmax.f32 %v3500_v52, 0.0 }
0x2ff8   : > { %v3507_v50 = vadd.f32 %v3504_v13, %v3428_v0 }
0x2ffa   : > { %5800 = vmatmul.msk.f32.gmra.mxu1 %vm159_vm0, %v3507_v50 }
0x3067   : > { %v3534_v9 = vpop.f32.mrf.mxu1 }
0x3068   : > { %v3535_v60 = vadd.f32 %v8949_v61, %v3534_v9 }
0x306a   : > { %v3543_v2 = vmax.f32 %v3535_v60, 0.0 }
0x306c   : > { %v8028_v51 = vadd.f32 %v8950_v54, %v3543_v2  ;;  %v8954_v54 = vld [vmem:[#allocation32_spill] sm:$0xff] }
0x306e   : > { %8951 = vst [vmem:[#allocation34_spill] sm:$0xff] %v8028_v51  ;;  %v3555_v0 = vsel %vm184_vm3, %v8028_v51, 0.0 }
0x306f   : > { %5803 = vst.msk [vmem:[%s8025_s1 + $0x1e0] sm:$0xff] %vm184_vm3, %v8028_v51  ;;  %v3537_v1 = vpop.f32.mrf.mxu1  ;;  %3556 = vadd.xlane.f32.xlu2 %v3555_v0 }
0x3070   : > { %v3538_v60 = vadd.f32 %v8949_v61, %v3537_v1 }
0x3072   : > { %v3544_v44 = vmax.f32 %v3538_v60, 0.0 }
0x3074   : > { %v8037_v52 = vadd.f32 %v8952_v62, %v3544_v44 }
0x3076   : > { %8953 = vst [vmem:[#allocation33_spill] sm:$0xff] %v8037_v52  ;;  %v3558_v2 = vsel %vm184_vm3, %v8037_v52, 0.0 }
0x3077   : > { %5804 = vst.msk [vmem:[%s8025_s1 + $0x1e8] sm:$0xff] %vm184_vm3, %v8037_v52  ;;  %v3540_v13 = vpop.f32.mrf.mxu1  ;;  %3559 = vadd.xlane.f32.xlu1 %v3558_v2 }
0x3078   : > { %v3541_v50 = vadd.f32 %v8949_v61, %v3540_v13 }
0x307a   : > { %v3545_v9 = vmax.f32 %v3541_v50, 0.0 }
0x307c   : > { %v8046_v57 = vadd.f32 %v8954_v54, %v3545_v9 }
0x307e   : > { %8955 = vst [vmem:[#allocation32_spill] sm:$0xff] %v8046_v57  ;;  %v3561_v0 = vsel %vm191_vm4, %v8046_v57, 0.0 }
0x307f   : > { %5805 = vst.msk [vmem:[%s8025_s1 + $0x1f0] sm:$0xf] %vm191_vm4, %v8046_v57  ;;  %3562 = vadd.xlane.f32.xlu0 %v3561_v0 }
0x30e2   : > { %v3557_v1 = vpop.xlane.xlu2 %3556 }
0x30e3   : > { %v3564_v60 = vmul.f32 %v3557_v1, %v8933_v43 }
0x30e5   : > { %v3567_v44 = vsub.f32 %v8028_v51, %v3564_v60 }
0x30e7   : > { %v3570_v62 = vmul.f32 %v3567_v44, %v3567_v44 }
0x30e9   : > { %v3573_v2 = vsel %vm184_vm3, %v3570_v62, 0.0 }
0x30ea   : > { %v3560_v13 = vpop.xlane.xlu1 %3559  ;;  %3574 = vadd.xlane.f32.xlu2 %v3573_v2 }
0x30eb   : > { %v3565_v50 = vmul.f32 %v3560_v13, %v8933_v43 }
0x30ed   : > { %v3568_v9 = vsub.f32 %v8037_v52, %v3565_v50 }
0x30ef   : > { %v3571_v54 = vmul.f32 %v3568_v9, %v3568_v9 }
0x30f1   : > { %v3576_v61 = vsel %vm184_vm3, %v3571_v54, 0.0 }
0x30f2   : > { %v3563_v35 = vpop.xlane.xlu0 %3562  ;;  %3577 = vadd.xlane.f32.xlu1 %v3576_v61 }
0x30f3   : > { %v3566_v0 = vmul.f32 %v3563_v35, %v8933_v43 }
0x30f5   : > { %v3569_v1 = vsub.f32 %v8046_v57, %v3566_v0 }
0x30f7   : > { %v3572_v58 = vmul.f32 %v3569_v1, %v3569_v1 }
0x30f9   : > { %v3579_v60 = vsel %vm191_vm4, %v3572_v58, 0.0 }
0x30fa   : > { %3580 = vadd.xlane.f32.xlu0 %v3579_v60 }
0x3102   : > { %3621 = vrot.lane.b32.xlu2 %v7884_v36, %s6408_s0 }
0x310b   : > { %3623 = vrot.lane.b32.xlu1 %v7879_v11, %s6408_s0 }
0x310e   : > { %3625 = vrot.lane.b32.xlu0 %v7889_v56, %s6408_s0 }
0x315d   : > { %v3575_v62 = vpop.xlane.xlu2 %3574 }
0x315e   : > { %v3582_v61 = vmul.f32 %v3575_v62, %v8933_v43 }
0x3160   : > { %v3585_v2 = vadd.f32 1e-05, %v3582_v61 }
0x3162   : > { %6199 = vrsqrt.f32 %v3585_v2  ;;  %vm3594_vm7 = vweird.f32 %v3585_v2 }
0x3165   : > { %v3578_v35 = vpop.xlane.xlu1 %3577  ;;  %v3622_v45 = vpop.permute.xlu2 %3621 }
0x3166   : > { %v3583_v13 = vmul.f32 %v3578_v35, %v8933_v43 }
0x3168   : > { %v6200_v50 = vpop.eup %6199  ;;  %v3586_v58 = vadd.f32 1e-05, %v3583_v13 }
0x3169   : > { %v3589_v54 = vmul.f32 %v6200_v50, %v3585_v2  ;;  %vm3595_vm6 = vweird.f32 %v6200_v50 }
0x316a   : > { %6201 = vrsqrt.f32 %v3586_v58  ;;  %vm3596_vm8 = vmor %vm3594_vm7, %vm3595_vm6  ;;  %vm3604_vm11 = vweird.f32 %v3586_v58 }
0x316b   : > { %v3590_v0 = vmul.f32 %v6200_v50, %v3589_v54 }
0x316d   : > { %v3591_v60 = vmul.f32 0.5, %v3590_v0  ;;  %v3581_v57 = vpop.xlane.xlu0 %3580 }
0x316e   : > { %v3584_v52 = vmul.f32 %v3581_v57, %v8933_v43 }
0x316f   : > { %v3592_v51 = vsub.f32 1.5, %v3591_v60 }
0x3170   : > { %v6202_v38 = vpop.eup %6201  ;;  %v3587_v12 = vadd.f32 1e-05, %v3584_v52 }
0x3171   : > { %v3599_v62 = vmul.f32 %v6202_v38, %v3586_v58  ;;  %v3593_v61 = vmul.f32 %v6200_v50, %v3592_v51  ;;  %vm3605_vm10 = vweird.f32 %v6202_v38 }
0x3172   : > { %6203 = vrsqrt.f32 %v3587_v12  ;;  %vm3606_vm12 = vmor %vm3604_vm11, %vm3605_vm10  ;;  %vm3614_vm14 = vweird.f32 %v3587_v12 }
0x3173   : > { %v3600_v55 = vmul.f32 %v6202_v38, %v3599_v62  ;;  %v3597_v35 = vsel %vm3596_vm8, %v6200_v50, %v3593_v61 }
0x3174   : > { %v3618_v42 = vmul.f32 %v3597_v35, %v3567_v44 }
0x3175   : > { %v3601_v13 = vmul.f32 0.5, %v3600_v55 }
0x3176   : > { %v3630_v54 = vsel %vm184_vm3, %v3618_v42, %v3622_v45 }
0x3177   : > { %v3602_v0 = vsub.f32 1.5, %v3601_v13  ;;  %5806 = vmatmul.msk.f32.vlgmr.msra.gmra.mxu2 %vm274_vm9, %v3630_v54 }
0x3178   : > { %v6204_v57 = vpop.eup %6203  ;;  %4189 = vmatpush.msra.mxu2 %v8937_v47 }
0x3179   : > { %v3609_v52 = vmul.f32 %v6204_v57, %v3587_v12  ;;  %v3603_v2 = vmul.f32 %v6202_v38, %v3602_v0  ;;  %vm3615_vm13 = vweird.f32 %v6204_v57 }
0x317a   : > { %4190 = vmatpush.msra.mxu2 %v8938_v48  ;;  %vm3616_vm15 = vmor %vm3614_vm14, %vm3615_vm13 }
0x317b   : > { %v3610_v51 = vmul.f32 %v6204_v57, %v3609_v52  ;;  %v3607_v50 = vsel %vm3606_vm12, %v6202_v38, %v3603_v2 }
0x317c   : > { %v3619_v44 = vmul.f32 %v3607_v50, %v3568_v9  ;;  %4191 = vmatpush.msra.mxu2 %v8939_v63 }
0x317d   : > { %v3611_v55 = vmul.f32 0.5, %v3610_v51  ;;  %v3624_v45 = vpop.permute.xlu1 %3623 }
0x317e   : > { %v3631_v42 = vsel %vm184_vm3, %v3619_v44, %v3624_v45  ;;  %4192 = vmatpush.msra.mxu2 %v8940_v46 }
0x317f   : > { %v3612_v60 = vsub.f32 1.5, %v3611_v55  ;;  %5807 = vmatmul.msk.f32.gmra.mxu2 %vm274_vm9, %v3631_v42 }
0x3180   : > { %v3626_v35 = vpop.permute.xlu0 %3625 }
0x3181   : > { %v3613_v58 = vmul.f32 %v6204_v57, %v3612_v60 }
0x3183   : > { %v3617_v62 = vsel %vm3616_vm15, %v6204_v57, %v3613_v58 }
0x3184   : > { %v3620_v61 = vmul.f32 %v3617_v62, %v3569_v1 }
0x3186   : > { %v3632_v38 = vsel %vm184_vm3, %v3620_v61, %v3626_v35 }
0x3187   : > { %5808 = vmatmul.msk.f32.gmra.mxu2 %vm274_vm9, %v3632_v38 }
0x31fa   : > { %v3659_v9 = vpop.f32.mrf.mxu2 }
0x31fb   : > { %v8082_v13 = vadd.f32 %v8934_v59, %v3659_v9 }
0x31fd   : > { %3728 = vrot.lane.b32.xlu2 %v8082_v13, %s6409_s27  ;;  %v5809_v57 = vmul.f32 -1.442695, %v8082_v13 }
0x31ff   : > { %6205 = vpow2.f32 %v5809_v57 }
0x3202   : > { %v3662_v54 = vpop.f32.mrf.mxu2 }
0x3203   : > { %v8087_v0 = vadd.f32 %v8934_v59, %v3662_v54 }
0x3205   : > { %3730 = vrot.lane.b32.xlu0 %v8087_v0, %s6409_s27  ;;  %v6206_v52 = vpop.eup %6205  ;;  %v5810_v55 = vmul.f32 -1.442695, %v8087_v0 }
0x3206   : > { %v3677_v2 = vadd.f32 1.0, %v6206_v52 }
0x3208   : > { %6207 = vrcp.f32 %v3677_v2  ;;  %v3691_v60 = vand.u32 2147483648, %v3677_v2  ;;  %vm3685_vm6 = vweird.f32 %v3677_v2  ;;  %v3689_v62 = vand.u32 2147483647, %v3677_v2 }
0x3209   : > { %6209 = vpow2.f32 %v5810_v55 }
0x320a   : > { %v3665_v12 = vpop.f32.mrf.mxu2  ;;  %v3692_v38 = vor.u32 1.1754944e-38, %v3691_v60  ;;  %vm3690_vm8 = vcmp.eq.f32.partialorder %v3689_v62, 8.507059e+37 }
0x320b   : > { %v8092_v1 = vadd.f32 %v8934_v59, %v3665_v12 }
0x320d   : > { %3732 = vrot.lane.b32.xlu1 %v8092_v1, %s6409_s27  ;;  %v5811_v58 = vmul.f32 -1.442695, %v8092_v1 }
0x320e   : > { %v6208_v51 = vpop.eup %6207 }
0x320f   : > { %v3681_v50 = vmul.f32 %v6208_v51, %v3677_v2  ;;  %vm3686_vm2 = vweird.f32 %v6208_v51  ;;  %v6210_v61 = vpop.eup %6209  ;;  %6211 = vpow2.f32 %v5811_v58 }
0x3210   : > { %vm3687_vm7 = vmor %vm3685_vm6, %vm3686_vm2  ;;  %v3678_v9 = vadd.f32 1.0, %v6210_v61 }
0x3211   : > { %v3682_v44 = vsub.f32 1.0, %v3681_v50 }
0x3212   : > { %6213 = vrcp.f32 %v3678_v9  ;;  %v3706_v60 = vand.u32 2147483648, %v3678_v9  ;;  %vm3700_vm11 = vweird.f32 %v3678_v9  ;;  %v3704_v58 = vand.u32 2147483647, %v3678_v9 }
0x3213   : > { %v3683_v45 = vmul.f32 %v6208_v51, %v3682_v44 }
0x3214   : > { %vm3705_vm13 = vcmp.eq.f32.partialorder %v3704_v58, 8.507059e+37 }
0x3215   : > { %v3684_v42 = vadd.f32 %v6208_v51, %v3683_v45  ;;  %v6212_v52 = vpop.eup %6211 }
0x3216   : > { %v3679_v50 = vadd.f32 1.0, %v6212_v52 }
0x3217   : > { %v3688_v35 = vsel %vm3687_vm7, %v6208_v51, %v3684_v42 }
0x3218   : > { %v3693_v12 = vsel %vm3690_vm8, %v3692_v38, %v3688_v35  ;;  %v6214_v44 = vpop.eup %6213  ;;  %6215 = vrcp.f32 %v3679_v50  ;;  %v3707_v35 = vor.u32 1.1754944e-38, %v3706_v60  ;;  %vm3715_vm15 = vweird.f32 %v3679_v50 }
0x3219   : > { %v3696_v55 = vmul.f32 %v6214_v44, %v3678_v9  ;;  %vm3701_vm10 = vweird.f32 %v6214_v44 }
0x321a   : > { %vm3702_vm12 = vmor %vm3700_vm11, %vm3701_vm10 }
0x321b   : > { %v3697_v45 = vsub.f32 1.0, %v3696_v55  ;;  %v3721_v55 = vand.u32 2147483648, %v3679_v50 }
0x321d   : > { %v3698_v59 = vmul.f32 %v6214_v44, %v3697_v45  ;;  %v3722_v45 = vor.u32 1.1754944e-38, %v3721_v55 }
0x321e   : > { %v6216_v2 = vpop.eup %6215 }
0x321f   : > { %v3711_v46 = vmul.f32 %v6216_v2, %v3679_v50  ;;  %v3699_v51 = vadd.f32 %v6214_v44, %v3698_v59  ;;  %vm3716_vm14 = vweird.f32 %v6216_v2  ;;  %v3719_v59 = vand.u32 2147483647, %v3679_v50 }
0x3220   : > { %vm3717_vm2 = vmor %vm3715_vm15, %vm3716_vm14 }
0x3221   : > { %v3712_v42 = vsub.f32 1.0, %v3711_v46  ;;  %v3703_v62 = vsel %vm3702_vm12, %v6214_v44, %v3699_v51  ;;  %vm3720_vm6 = vcmp.eq.f32.partialorder %v3719_v59, 8.507059e+37 }
0x3223   : > { %v3713_v61 = vmul.f32 %v6216_v2, %v3712_v42 }
0x3225   : > { %v3714_v52 = vadd.f32 %v6216_v2, %v3713_v61 }
0x3227   : > { %v3718_v46 = vsel %vm3717_vm2, %v6216_v2, %v3714_v52 }
0x3228   : > { %v3723_v63 = vsel %vm3720_vm6, %v3722_v45, %v3718_v46 }
0x3257   : > { %v3729_v54 = vpop.permute.xlu2 %3728 }
0x3258   : > { %v3737_v57 = vmul.f32 %v3729_v54, %v3693_v12  ;;  %v3708_v54 = vsel %vm3705_vm13, %v3707_v35, %v3703_v62 }
0x325a   : > { %3743 = vrot.lane.b32.xlu2 %v3737_v57, %s6410_s12 }
0x3277   : > { %v3731_v38 = vpop.permute.xlu0 %3730 }
0x3278   : > { %v3738_v57 = vmul.f32 %v3731_v38, %v3708_v54  ;;  %v3758_v38 = vsub.f32 1.0, %v3693_v12 }
0x327a   : > { %3745 = vrot.lane.b32.xlu0 %v3738_v57, %s6410_s12  ;;  %v3776_v57 = vmul.f32 %v3693_v12, %v7884_v36  ;;  %v3778_v36 = vmul.f32 %v3723_v63, %v7889_v56 }
0x327f   : > { %v3733_v9 = vpop.permute.xlu1 %3732 }
0x3280   : > { %v3739_v44 = vmul.f32 %v3733_v9, %v3723_v63  ;;  %v3760_v9 = vsub.f32 1.0, %v3723_v63 }
0x3282   : > { %3747 = vrot.lane.b32.xlu1 %v3739_v44, %s6410_s12 }
0x32b4   : > { %v3744_v51 = vpop.permute.xlu2 %3743 }
0x32b5   : > { %v3752_v42 = vadd.f32 %v3744_v51, %v8082_v13 }
0x32b7   : > { %6217 = vtanh.f32 %v3752_v42 }
0x32bd   : > { %v6218_v60 = vpop.eup %6217 }
0x32be   : > { %3764 = vrot.lane.b32.xlu2 %v6218_v60, %s6411_s28 }
0x32ec   : > { %v3746_v58 = vpop.permute.xlu0 %3745 }
0x32ed   : > { %v3753_v62 = vadd.f32 %v3746_v58, %v8087_v0  ;;  %v3759_v0 = vsub.f32 1.0, %v3708_v54 }
0x32ef   : > { %6219 = vtanh.f32 %v3753_v62 }
0x32f4   : > { %v3748_v50 = vpop.permute.xlu1 %3747 }
0x32f5   : > { %v6220_v2 = vpop.eup %6219  ;;  %v3754_v61 = vadd.f32 %v3748_v50, %v8092_v1  ;;  %v3777_v1 = vmul.f32 %v3708_v54, %v7879_v11 }
0x32f6   : > { %3766 = vrot.lane.b32.xlu0 %v6220_v2, %s6411_s28 }
0x32f7   : > { %6221 = vtanh.f32 %v3754_v61 }
0x32fd   : > { %v6222_v35 = vpop.eup %6221 }
0x32fe   : > { %3768 = vrot.lane.b32.xlu1 %v6222_v35, %s6411_s28 }
0x3318   : > { %v3765_v13 = vpop.permute.xlu2 %3764 }
0x3319   : > { %v3773_v52 = vmul.f32 %v3765_v13, %v3758_v38 }
0x331b   : > { %v8109_v55 = vadd.f32 %v3776_v57, %v3773_v52 }
0x331d   : > { %3785 = vrot.lane.b32.xlu2 %v8109_v55, %s6411_s28 }
0x3368   : > { %v3767_v59 = vpop.permute.xlu0 %3766 }
0x3369   : > { %v3774_v46 = vmul.f32 %v3767_v59, %v3759_v0 }
0x336b   : > { %v8114_v45 = vadd.f32 %v3777_v1, %v3774_v46 }
0x336d   : > { %3787 = vrot.lane.b32.xlu0 %v8114_v45, %s6411_s28 }
0x3370   : > { %v3769_v44 = vpop.permute.xlu1 %3768 }
0x3371   : > { %v3775_v12 = vmul.f32 %v3769_v44, %v3760_v9 }
0x3373   : > { %v8119_v51 = vadd.f32 %v3778_v36, %v3775_v12 }
0x3375   : > { %3789 = vrot.lane.b32.xlu1 %v8119_v51, %s6411_s28 }
0x3377   : > { %v3786_v42 = vpop.permute.xlu2 %3785 }
0x3378   : > { %v3794_v60 = vsel %vm159_vm0, %v3786_v42, 0.0 }
0x3379   : > { %3795 = vadd.xlane.f32.xlu2 %v3794_v60 }
0x33df   : > { %v3788_v11 = vpop.permute.xlu0 %3787 }
0x33e0   : > { %v3797_v54 = vsel %vm159_vm0, %v3788_v11, 0.0 }
0x33e1   : > { %3798 = vadd.xlane.f32.xlu0 %v3797_v54 }
0x33e7   : > { %v3790_v58 = vpop.permute.xlu1 %3789 }
0x33e8   : > { %v3800_v62 = vsel %vm442_vm5, %v3790_v58, 0.0 }
0x33e9   : > { %3801 = vadd.xlane.f32.xlu1 %v3800_v62 }
0x33ec   : > { %v3796_v50 = vpop.xlane.xlu2 %3795 }
0x33ed   : > { %v3803_v56 = vmul.f32 %v3796_v50, %v8837_v37 }
0x33ef   : > { %v3806_v63 = vsub.f32 %v8109_v55, %v3803_v56 }
0x33f1   : > { %v3809_v2 = vmul.f32 %v3806_v63, %v3806_v63 }
0x33f3   : > { %3815 = vrot.lane.b32.xlu2 %v3809_v2, %s6411_s28 }
0x344d   : > { %v3816_v1 = vpop.permute.xlu2 %3815 }
0x344e   : > { %v3824_v46 = vsel %vm159_vm0, %v3816_v1, 0.0 }
0x3454   : > { %v3799_v61 = vpop.xlane.xlu0 %3798 }
0x3455   : > { %v3804_v35 = vmul.f32 %v3799_v61, %v8837_v37 }
0x3457   : > { %v3807_v38 = vsub.f32 %v8114_v45, %v3804_v35 }
0x3459   : > { %v3810_v13 = vmul.f32 %v3807_v38, %v3807_v38 }
0x345b   : > { %3817 = vrot.lane.b32.xlu0 %v3810_v13, %s6411_s28 }
0x345c   : > { %v3802_v57 = vpop.xlane.xlu1 %3801 }
0x345d   : > { %v3805_v52 = vmul.f32 %v3802_v57, %v8837_v37 }
0x345f   : > { %v8134_v0 = vsub.f32 %v8119_v51, %v3805_v52 }
0x3461   : > { %v3811_v59 = vmul.f32 %v8134_v0, %v8134_v0 }
0x3463   : > { %3819 = vrot.lane.b32.xlu1 %v3811_v59, %s6411_s28 }
0x3485   : > { %3825 = vadd.xlane.f32.xlu0 %v3824_v46 }
0x34cd   : > { %v3818_v9 = vpop.permute.xlu0 %3817 }
0x34ce   : > { %v3827_v44 = vsel %vm159_vm0, %v3818_v9, 0.0 }
0x34cf   : > { %3828 = vadd.xlane.f32.xlu2 %v3827_v44 }
0x34d5   : > { %v3820_v36 = vpop.permute.xlu1 %3819 }
0x34d6   : > { %v3830_v12 = vsel %vm442_vm5, %v3820_v36, 0.0 }
0x34d7   : > { %3831 = vadd.xlane.f32.xlu1 %v3830_v12 }
0x34f8   : > { %v3826_v42 = vpop.xlane.xlu0 %3825 }
0x34f9   : > { %v3833_v60 = vmul.f32 %v3826_v42, %v8837_v37 }
0x34fb   : > { %v3836_v11 = vadd.f32 1e-05, %v3833_v60 }
0x34fd   : > { %6223 = vrsqrt.f32 %v3836_v11  ;;  %vm3845_vm8 = vweird.f32 %v3836_v11 }
0x3503   : > { %v6224_v54 = vpop.eup %6223 }
0x3504   : > { %v3840_v58 = vmul.f32 %v6224_v54, %v3836_v11  ;;  %vm3846_vm7 = vweird.f32 %v6224_v54 }
0x3505   : > { %vm3847_vm10 = vmor %vm3845_vm8, %vm3846_vm7 }
0x3506   : > { %v3841_v62 = vmul.f32 %v6224_v54, %v3840_v58 }
0x3508   : > { %v3842_v50 = vmul.f32 0.5, %v3841_v62 }
0x350a   : > { %v3843_v56 = vsub.f32 1.5, %v3842_v50 }
0x350c   : > { %v3844_v2 = vmul.f32 %v6224_v54, %v3843_v56 }
0x350e   : > { %v3848_v61 = vsel %vm3847_vm10, %v6224_v54, %v3844_v2 }
0x350f   : > { %v3869_v35 = vmul.f32 %v3848_v61, %v3806_v63 }
0x3511   : > { %v3872_v13 = vmul.f32 %v3869_v35, %v7919_v10 }
0x3513   : > { %v3875_v57 = vadd.f32 %v3872_v13, %v7921_v53 }
0x3515   : > { %3881 = vrot.lane.b32.xlu2 %v3875_v57, %s6411_s28 }
0x3542   : > { %v3829_v52 = vpop.xlane.xlu2 %3828 }
0x3543   : > { %v3834_v59 = vmul.f32 %v3829_v52, %v8837_v37 }
0x3545   : > { %v3837_v1 = vadd.f32 1e-05, %v3834_v59 }
0x3547   : > { %6225 = vrsqrt.f32 %v3837_v1  ;;  %vm3855_vm12 = vweird.f32 %v3837_v1 }
0x354a   : > { %v3832_v46 = vpop.xlane.xlu1 %3831 }
0x354b   : > { %v3835_v9 = vmul.f32 %v3832_v46, %v8837_v37 }
0x354d   : > { %v6226_v44 = vpop.eup %6225  ;;  %v3838_v36 = vadd.f32 1e-05, %v3835_v9 }
0x354e   : > { %v3850_v12 = vmul.f32 %v6226_v44, %v3837_v1  ;;  %vm3856_vm11 = vweird.f32 %v6226_v44 }
0x354f   : > { %6227 = vrsqrt.f32 %v3838_v36  ;;  %vm3857_vm13 = vmor %vm3855_vm12, %vm3856_vm11  ;;  %vm3865_vm15 = vweird.f32 %v3838_v36 }
0x3550   : > { %v3851_v42 = vmul.f32 %v6226_v44, %v3850_v12 }
0x3552   : > { %v3852_v63 = vmul.f32 0.5, %v3851_v42  ;;  %v8956_v42 = vld [vmem:[#allocation8_spill] sm:$0xff] }
0x3554   : > { %v3853_v60 = vsub.f32 1.5, %v3852_v63  ;;  %v8957_v63 = vld [vmem:[#allocation7_spill] sm:$0xff] }
0x3555   : > { %v6228_v11 = vpop.eup %6227 }
0x3556   : > { %v3854_v54 = vmul.f32 %v6226_v44, %v3853_v60  ;;  %v3860_v58 = vmul.f32 %v6228_v11, %v3838_v36  ;;  %vm3866_vm14 = vweird.f32 %v6228_v11  ;;  %v8958_v60 = vld [vmem:[#allocation6_spill] sm:$0xff] }
0x3557   : > { %vm3867_vm2 = vmor %vm3865_vm15, %vm3866_vm14 }
0x3558   : > { %v3858_v62 = vsel %vm3857_vm13, %v6226_v44, %v3854_v54  ;;  %v3861_v50 = vmul.f32 %v6228_v11, %v3860_v58 }
0x3559   : > { %v3870_v56 = vmul.f32 %v3858_v62, %v3807_v38 }
0x355a   : > { %v3862_v2 = vmul.f32 0.5, %v3861_v50 }
0x355b   : > { %v3873_v61 = vmul.f32 %v3870_v56, %v7919_v10 }
0x355c   : > { %v3863_v35 = vsub.f32 1.5, %v3862_v2 }
0x355d   : > { %v3876_v13 = vadd.f32 %v3873_v61, %v7921_v53 }
0x355e   : > { %v3864_v57 = vmul.f32 %v6228_v11, %v3863_v35 }
0x355f   : > { %3883 = vrot.lane.b32.xlu0 %v3876_v13, %s6411_s28 }
0x3560   : > { %v3868_v52 = vsel %vm3867_vm2, %v6228_v11, %v3864_v57 }
0x3561   : > { %v3871_v59 = vmul.f32 %v3868_v52, %v8134_v0 }
0x3563   : > { %v3874_v1 = vmul.f32 %v3871_v59, %v7919_v10 }
0x3565   : > { %v3877_v46 = vadd.f32 %v3874_v1, %v7921_v53 }
0x3567   : > { %3885 = vrot.lane.b32.xlu1 %v3877_v46, %s6411_s28 }
0x356f   : > { %v3882_v38 = vpop.permute.xlu2 %3881 }
0x3570   : > { %5812 = vmatmul.msk.f32.vlgmr.msra.gmra.mxu0 %vm159_vm0, %v3882_v38 }
0x3571   : > { %4313 = vmatpush.msra.mxu0 %v6529_v7 }
0x3573   : > { %4314 = vmatpush.msra.mxu0 %v6524_v6 }
0x3575   : > { %4315 = vmatpush.msra.mxu0 %v6519_v5 }
0x3577   : > { %4316 = vmatpush.msra.mxu0 %v6514_v4 }
0x3579   : > { %4317 = vmatpush.msra.mxu0 %v6509_v3 }
0x35d1   : > { %v3884_v0 = vpop.permute.xlu0 %3883 }
0x35d2   : > { %5813 = vmatmul.msk.f32.gmra.mxu0 %vm159_vm0, %v3884_v0 }
0x35d9   : > { %v3886_v9 = vpop.permute.xlu1 %3885 }
0x35da   : > { %5814 = vmatmul.msk.f32.gmra.mxu0 %vm159_vm0, %v3886_v9 }
0x35ed   : > { %v3910_v44 = vpop.f32.mrf.mxu0 }
0x35ee   : > { %v3911_v36 = vadd.f32 %v6589_v19, %v3910_v44 }
0x35f0   : > { %v3919_v12 = vmax.f32 %v3911_v36, 0.0 }
0x35f2   : > { %5815 = vmatmul.msk.f32.vlgmr.msra.gmra.mxu3 %vm159_vm0, %v3919_v12 }
0x35f3   : > { %4565 = vmatpush.msra.mxu3 %v6564_v14 }
0x35f5   : > { %4566 = vmatpush.msra.mxu3 %v8956_v42 }
0x35f7   : > { %4567 = vmatpush.msra.mxu3 %v8957_v63 }
0x35f9   : > { %4568 = vmatpush.msra.mxu3 %v8958_v60 }
0x364f   : > { %v3913_v11 = vpop.f32.mrf.mxu0 }
0x3650   : > { %v3914_v54 = vadd.f32 %v6589_v19, %v3913_v11 }
0x3652   : > { %v3920_v58 = vmax.f32 %v3914_v54, 0.0 }
0x3654   : > { %5816 = vmatmul.msk.f32.gmra.mxu3 %vm159_vm0, %v3920_v58 }
0x3657   : > { %v3916_v62 = vpop.f32.mrf.mxu0 }
0x3658   : > { %v3917_v50 = vadd.f32 %v6589_v19, %v3916_v62 }
0x365a   : > { %v3921_v56 = vmax.f32 %v3917_v50, 0.0 }
0x365c   : > { %5817 = vmatmul.msk.f32.gmra.mxu3 %vm159_vm0, %v3921_v56 }
0x3675   : > { %v3948_v2 = vpop.f32.mrf.mxu3 }
0x3676   : > { %v3949_v61 = vadd.f32 %v6594_v20, %v3948_v2 }
0x3678   : > { %v3957_v35 = vmax.f32 %v3949_v61, 0.0 }
0x367a   : > { %v3963_v13 = vadd.f32 %v3957_v35, %v3882_v38 }
0x367c   : > { %3966 = vst.msk [vmem:[#allocation2] sm:$0xff] %vm159_vm0, %v3963_v13 }
0x3683   : > { %v3969_v57 = vld [vmem:[#allocation2] sm:$0xff] }
0x3684   : > { %5818 = vmatmul.msk.f32.vlgmr.msrb.gmra.mxu1 %vm163_vm1, %v3969_v57 }
0x3685   : > { %4603 = vmatpush.msrb.mxu1 %v6584_v18 }
0x3687   : > { %4604 = vmatpush.msrb.mxu1 %v6579_v17 }
0x3689   : > { %4605 = vmatpush.msrb.mxu1 %v6574_v16 }
0x368b   : > { %4606 = vmatpush.msrb.mxu1 %v6569_v15 }
0x36d7   : > { %v3951_v52 = vpop.f32.mrf.mxu3 }
0x36d8   : > { %v3952_v59 = vadd.f32 %v6594_v20, %v3951_v52 }
0x36da   : > { %v3958_v1 = vmax.f32 %v3952_v59, 0.0 }
0x36dc   : > { %v3964_v46 = vadd.f32 %v3958_v1, %v3884_v0 }
0x36de   : > { %3967 = vst.msk [vmem:[#allocation2 + $0x8] sm:$0xff] %vm159_vm0, %v3964_v46 }
0x36df   : > { %v3954_v38 = vpop.f32.mrf.mxu3 }
0x36e0   : > { %v3955_v44 = vadd.f32 %v6594_v20, %v3954_v38 }
0x36e2   : > { %v3959_v36 = vmax.f32 %v3955_v44, 0.0 }
0x36e4   : > { %v3965_v12 = vadd.f32 %v3959_v36, %v3886_v9 }
0x36e5   : > { %v3970_v11 = vld [vmem:[#allocation2 + $0x8] sm:$0xff] }
0x36e6   : > { %3968 = vst.msk [vmem:[#allocation2 + $0x10] sm:$0xf] %vm442_vm5, %v3965_v12  ;;  %5819 = vmatmul.msk.f32.gmra.mxu1 %vm163_vm1, %v3970_v11 }
0x36ed   : > { %v3971_v54 = vld [vmem:[#allocation2 + $0x10] sm:$0xf] }
0x36ee   : > { %5820 = vmatmul.msk.f32.gmra.mxu1 %vm163_vm1, %v3971_v54 }
0x3701   : > { %v3998_v58 = vpop.f32.mrf.mxu1 }
0x3702   : > { %v3999_v62 = vadd.f32 %v6659_v33, %v3998_v58 }
0x3704   : > { %v4007_v50 = vmax.f32 %v3999_v62, 0.0 }
0x3706   : > { %5821 = vmatmul.msk.f32.vlgmr.msrb.gmra.mxu2 %vm163_vm1, %v4007_v50 }
0x3707   : > { %4651 = vmatpush.msrb.mxu2 %v6624_v26 }
0x3709   : > { %4652 = vmatpush.msrb.mxu2 %v6619_v25 }
0x370b   : > { %4653 = vmatpush.msrb.mxu2 %v6614_v24 }
0x370d   : > { %4654 = vmatpush.msrb.mxu2 %v6609_v23 }
0x370f   : > { %4655 = vmatpush.msrb.mxu2 %v6604_v22 }
0x3711   : > { %4656 = vmatpush.msrb.mxu2 %v6599_v21 }
0x3763   : > { %v4001_v0 = vpop.f32.mrf.mxu1 }
0x3764   : > { %v4002_v9 = vadd.f32 %v6659_v33, %v4001_v0 }
0x3766   : > { %v4008_v56 = vmax.f32 %v4002_v9, 0.0 }
0x3768   : > { %5822 = vmatmul.msk.f32.gmra.mxu2 %vm163_vm1, %v4008_v56  ;;  %v8960_v56 = vld [vmem:[#allocation9_spill] sm:$0xff] }
0x376b   : > { %v4004_v2 = vpop.f32.mrf.mxu1 }
0x376c   : > { %v4005_v61 = vadd.f32 %v6659_v33, %v4004_v2 }
0x376e   : > { %v4009_v35 = vmax.f32 %v4005_v61, 0.0 }
0x3770   : > { %5823 = vmatmul.msk.f32.gmra.mxu2 %vm163_vm1, %v4009_v35 }
0x3789   : > { %v4036_v13 = vpop.f32.mrf.mxu2 }
0x378a   : > { %v4037_v52 = vadd.f32 %v6664_v34, %v4036_v13 }
0x378c   : > { %v4045_v59 = vmax.f32 %v4037_v52, 0.0 }
0x378e   : > { %v4048_v1 = vadd.f32 %v4045_v59, %v3969_v57 }
0x3790   : > { %5824 = vmatmul.msk.f32.vlgmr.msrb.gmra.mxu0 %vm163_vm1, %v4048_v1  ;;  %v8961_v1 = vld [vmem:[#allocation21_spill] sm:$0xff] }
0x3791   : > { %4689 = vmatpush.msrb.mxu0 %v6654_v32 }
0x3793   : > { %4690 = vmatpush.msrb.mxu0 %v6649_v31 }
0x3795   : > { %4691 = vmatpush.msrb.mxu0 %v6644_v30 }
0x3797   : > { %4692 = vmatpush.msrb.mxu0 %v6639_v29 }
0x3799   : > { %4693 = vmatpush.msrb.mxu0 %v6634_v28 }
0x379b   : > { %4694 = vmatpush.msrb.mxu0 %v6629_v27 }
0x37eb   : > { %v4039_v46 = vpop.f32.mrf.mxu2 }
0x37ec   : > { %v4040_v38 = vadd.f32 %v6664_v34, %v4039_v46 }
0x37ee   : > { %v4046_v44 = vmax.f32 %v4040_v38, 0.0 }
0x37f0   : > { %v4049_v36 = vadd.f32 %v4046_v44, %v3970_v11  ;;  %v8959_v11 = vld [vmem:[#allocation10_spill] sm:$0xff]  ;;  %v8962_v44 = vld [vmem:[#allocation16_spill] sm:$0xff] }
0x37f2   : > { %5825 = vmatmul.msk.f32.gmra.mxu0 %vm163_vm1, %v4049_v36  ;;  %v8963_v36 = vld [vmem:[#allocation15_spill] sm:$0xff] }
0x37f3   : > { %v4042_v57 = vpop.f32.mrf.mxu2 }
0x37f4   : > { %v4043_v12 = vadd.f32 %v6664_v34, %v4042_v57  ;;  %v8964_v57 = vld [vmem:[#allocation14_spill] sm:$0xff] }
0x37f6   : > { %v4047_v58 = vmax.f32 %v4043_v12, 0.0  ;;  %v8965_v12 = vld [vmem:[#allocation13_spill] sm:$0xff] }
0x37f8   : > { %v4050_v62 = vadd.f32 %v4047_v58, %v3971_v54 }
0x37fa   : > { %5826 = vmatmul.msk.f32.gmra.mxu0 %vm163_vm1, %v4050_v62 }
0x380d   : > { %v4077_v50 = vpop.f32.mrf.mxu0 }
0x380e   : > { %v4078_v0 = vadd.f32 %v6699_v41, %v4077_v50 }
0x3810   : > { %v4086_v9 = vmax.f32 %v4078_v0, 0.0 }
0x3812   : > { %5827 = vmatmul.msk.f32.vlgmr.msrb.gmra.mxu3 %vm159_vm0, %v4086_v9 }
0x3813   : > { %4730 = vmatpush.msrb.mxu3 %v6694_v40 }
0x3815   : > { %4731 = vmatpush.msrb.mxu3 %v6689_v39 }
0x3817   : > { %4732 = vmatpush.msrb.mxu3 %v8922_v49 }
0x3819   : > { %4733 = vmatpush.msrb.mxu3 %v8925_v8 }
0x381b   : > { %4734 = vmatpush.msrb.mxu3 %v8959_v11 }
0x381d   : > { %4735 = vmatpush.msrb.mxu3 %v8960_v56 }
0x386f   : > { %v4080_v54 = vpop.f32.mrf.mxu0 }
0x3870   : > { %v4081_v2 = vadd.f32 %v6699_v41, %v4080_v54 }
0x3872   : > { %v4087_v61 = vmax.f32 %v4081_v2, 0.0 }
0x3874   : > { %5828 = vmatmul.msk.f32.gmra.mxu3 %vm159_vm0, %v4087_v61 }
0x3877   : > { %v4083_v35 = vpop.f32.mrf.mxu0 }
0x3878   : > { %v4084_v13 = vadd.f32 %v6699_v41, %v4083_v35 }
0x387a   : > { %v4088_v52 = vmax.f32 %v4084_v13, 0.0  ;;  %v8966_v13 = vld [vmem:[#allocation22_spill] sm:$0xff] }
0x387c   : > { %5829 = vmatmul.msk.f32.gmra.mxu3 %vm159_vm0, %v4088_v52 }
0x3895   : > { %v4115_v59 = vpop.f32.mrf.mxu3 }
0x3896   : > { %v4116_v46 = vadd.f32 %v8961_v1, %v4115_v59 }
0x3898   : > { %v4124_v38 = vmax.f32 %v4116_v46, 0.0 }
0x389a   : > { %5830 = vmatmul.msk.f32.vlgmr.msra.gmra.mxu1 %vm159_vm0, %v4124_v38 }
0x389b   : > { %4770 = vmatpush.msra.mxu1 %v8962_v44 }
0x389d   : > { %4771 = vmatpush.msra.mxu1 %v8963_v36 }
0x389f   : > { %4772 = vmatpush.msra.mxu1 %v8964_v57  ;;  %v8968_v57 = vld [vmem:[#allocation19_spill] sm:$0xff] }
0x38a1   : > { %4773 = vmatpush.msra.mxu1 %v8965_v12  ;;  %v8967_v12 = vld [vmem:[#allocation20_spill] sm:$0xff] }
0x38f7   : > { %v4118_v58 = vpop.f32.mrf.mxu3 }
0x38f8   : > { %v4119_v62 = vadd.f32 %v8961_v1, %v4118_v58  ;;  %v8969_v58 = vld [vmem:[#allocation18_spill] sm:$0xff] }
0x38fa   : > { %v4125_v50 = vmax.f32 %v4119_v62, 0.0  ;;  %v8970_v62 = vld [vmem:[#allocation17_spill] sm:$0xff] }
0x38fc   : > { %5831 = vmatmul.msk.f32.gmra.mxu1 %vm159_vm0, %v4125_v50 }
0x38ff   : > { %v4121_v0 = vpop.f32.mrf.mxu3 }
0x3900   : > { %v4122_v54 = vadd.f32 %v8961_v1, %v4121_v0 }
0x3902   : > { %v4126_v2 = vmax.f32 %v4122_v54, 0.0 }
0x3904   : > { %5832 = vmatmul.msk.f32.gmra.mxu1 %vm159_vm0, %v4126_v2 }
0x3917   : > { %v4153_v35 = vpop.f32.mrf.mxu1 }
0x3918   : > { %v4154_v59 = vadd.f32 %v8966_v13, %v4153_v35 }
0x391a   : > { %v4162_v46 = vmax.f32 %v4154_v59, 0.0 }
0x391c   : > { %v4165_v38 = vadd.f32 %v4162_v46, %v4086_v9 }
0x391e   : > { %5833 = vmatmul.msk.f32.vlgmr.msra.gmra.mxu2 %vm159_vm0, %v4165_v38 }
0x391f   : > { %4808 = vmatpush.msra.mxu2 %v8967_v12 }
0x3921   : > { %4809 = vmatpush.msra.mxu2 %v8968_v57 }
0x3923   : > { %4810 = vmatpush.msra.mxu2 %v8969_v58  ;;  %v8971_v58 = vld [vmem:[#allocation27_spill] sm:$0xff] }
0x3925   : > { %4811 = vmatpush.msra.mxu2 %v8970_v62  ;;  %v8972_v62 = vld [vmem:[#allocation34_spill] sm:$0xff] }
0x3979   : > { %v4156_v50 = vpop.f32.mrf.mxu1 }
0x397a   : > { %v4157_v0 = vadd.f32 %v8966_v13, %v4156_v50 }
0x397c   : > { %v4163_v54 = vmax.f32 %v4157_v0, 0.0 }
0x397e   : > { %v4166_v2 = vadd.f32 %v4163_v54, %v4087_v61  ;;  %v8974_v54 = vld [vmem:[#allocation33_spill] sm:$0xff] }
0x3980   : > { %5834 = vmatmul.msk.f32.gmra.mxu2 %vm159_vm0, %v4166_v2 }
0x3981   : > { %v4159_v35 = vpop.f32.mrf.mxu1 }
0x3982   : > { %v4160_v9 = vadd.f32 %v8966_v13, %v4159_v35 }
0x3984   : > { %v4164_v59 = vmax.f32 %v4160_v9, 0.0  ;;  %v8976_v9 = vld [vmem:[#allocation32_spill] sm:$0xff] }
0x3986   : > { %v4167_v46 = vadd.f32 %v4164_v59, %v4088_v52 }
0x3988   : > { %5835 = vmatmul.msk.f32.gmra.mxu2 %vm159_vm0, %v4167_v46 }
0x39a1   : > { %v4194_v38 = vpop.f32.mrf.mxu2 }
0x39a2   : > { %v4195_v57 = vadd.f32 %v8971_v58, %v4194_v38 }
0x39a4   : > { %v4203_v12 = vmax.f32 %v4195_v57, 0.0 }
0x39a6   : > { %v8244_v36 = vadd.f32 %v4203_v12, %v8972_v62 }
0x39a8   : > { %8973 = vst [vmem:[#allocation34_spill] sm:$0xff] %v8244_v36  ;;  %v4215_v61 = vsel %vm184_vm3, %v8244_v36, 0.0 }
0x39a9   : > { %5838 = vst.msk [vmem:[%s8025_s1 + $0x1f8] sm:$0xff] %vm184_vm3, %v8244_v36  ;;  %4216 = vadd.xlane.f32.xlu0 %v4215_v61 }
0x3a03   : > { %v4197_v50 = vpop.f32.mrf.mxu2 }
0x3a04   : > { %v4198_v52 = vadd.f32 %v8971_v58, %v4197_v50 }
0x3a06   : > { %v4204_v0 = vmax.f32 %v4198_v52, 0.0 }
0x3a08   : > { %v8253_v2 = vadd.f32 %v4204_v0, %v8974_v54 }
0x3a0a   : > { %8975 = vst [vmem:[#allocation33_spill] sm:$0xff] %v8253_v2  ;;  %v4218_v57 = vsel %vm184_vm3, %v8253_v2, 0.0 }
0x3a0b   : > { %5839 = vst.msk [vmem:[%s8025_s1 + $0x200] sm:$0xff] %vm184_vm3, %v8253_v2  ;;  %v4200_v12 = vpop.f32.mrf.mxu2  ;;  %4219 = vadd.xlane.f32.xlu2 %v4218_v57 }
0x3a0c   : > { %v4201_v62 = vadd.f32 %v8971_v58, %v4200_v12 }
0x3a0e   : > { %v4205_v35 = vmax.f32 %v4201_v62, 0.0 }
0x3a10   : > { %v8262_v59 = vadd.f32 %v4205_v35, %v8976_v9 }
0x3a12   : > { %8977 = vst [vmem:[#allocation32_spill] sm:$0xff] %v8262_v59  ;;  %v4221_v46 = vsel %vm191_vm4, %v8262_v59, 0.0 }
0x3a13   : > { %5840 = vst.msk [vmem:[%s8025_s1 + $0x208] sm:$0xf] %vm191_vm4, %v8262_v59  ;;  %4222 = vadd.xlane.f32.xlu1 %v4221_v46 }
0x3a1c   : > { %v4217_v38 = vpop.xlane.xlu0 %4216 }
0x3a1d   : > { %v4224_v61 = vmul.f32 %v4217_v38, %v8933_v43 }
0x3a1f   : > { %v4227_v50 = vsub.f32 %v8244_v36, %v4224_v61 }
0x3a21   : > { %v4230_v52 = vmul.f32 %v4227_v50, %v4227_v50 }
0x3a23   : > { %v4233_v0 = vsel %vm184_vm3, %v4230_v52, 0.0 }
0x3a24   : > { %4234 = vadd.xlane.f32.xlu0 %v4233_v0 }
0x3a2c   : > { %4283 = vrot.lane.b32.xlu1 %v8114_v45, %s6408_s0 }
0x3a7e   : > { %v4220_v54 = vpop.xlane.xlu2 %4219 }
0x3a7f   : > { %v4225_v57 = vmul.f32 %v4220_v54, %v8933_v43 }
0x3a81   : > { %v4228_v12 = vsub.f32 %v8253_v2, %v4225_v57 }
0x3a83   : > { %v4231_v62 = vmul.f32 %v4228_v12, %v4228_v12 }
0x3a85   : > { %v4236_v35 = vsel %vm184_vm3, %v4231_v62, 0.0 }
0x3a86   : > { %v4223_v9 = vpop.xlane.xlu1 %4222  ;;  %4237 = vadd.xlane.f32.xlu2 %v4236_v35 }
0x3a87   : > { %v4226_v46 = vmul.f32 %v4223_v9, %v8933_v43 }
0x3a89   : > { %v4229_v38 = vsub.f32 %v8262_v59, %v4226_v46 }
0x3a8b   : > { %v4232_v61 = vmul.f32 %v4229_v38, %v4229_v38 }
0x3a8d   : > { %v4239_v52 = vsel %vm191_vm4, %v4232_v61, 0.0 }
0x3a8e   : > { %4240 = vadd.xlane.f32.xlu0 %v4239_v52 }
0x3a97   : > { %v4235_v0 = vpop.xlane.xlu0 %4234 }
0x3a98   : > { %v4242_v54 = vmul.f32 %v4235_v0, %v8933_v43 }
0x3a9a   : > { %v4245_v57 = vadd.f32 1e-05, %v4242_v54 }
0x3a9c   : > { %6229 = vrsqrt.f32 %v4245_v57  ;;  %vm4254_vm7 = vweird.f32 %v4245_v57 }
0x3a9e   : > { %4281 = vrot.lane.b32.xlu2 %v8109_v55, %s6408_s0 }
0x3aa2   : > { %4285 = vrot.lane.b32.xlu0 %v8119_v51, %s6408_s0  ;;  %v6230_v62 = vpop.eup %6229 }
0x3aa3   : > { %v4249_v35 = vmul.f32 %v6230_v62, %v4245_v57  ;;  %vm4255_vm6 = vweird.f32 %v6230_v62 }
0x3aa4   : > { %vm4256_vm8 = vmor %vm4254_vm7, %vm4255_vm6 }
0x3aa5   : > { %v4250_v9 = vmul.f32 %v6230_v62, %v4249_v35 }
0x3aa7   : > { %v4251_v2 = vmul.f32 0.5, %v4250_v9 }
0x3aa9   : > { %v4252_v46 = vsub.f32 1.5, %v4251_v2 }
0x3aab   : > { %v4253_v36 = vmul.f32 %v6230_v62, %v4252_v46 }
0x3aad   : > { %v4257_v58 = vsel %vm4256_vm8, %v6230_v62, %v4253_v36  ;;  %v8978_v36 = vld [vmem:[#allocation24_spill] sm:$0xff] }
0x3aae   : > { %v4278_v13 = vmul.f32 %v4257_v58, %v4227_v50  ;;  %v8979_v50 = vld [vmem:[#allocation23_spill] sm:$0xff] }
0x3af9   : > { %v4238_v59 = vpop.xlane.xlu2 %4237 }
0x3afa   : > { %v4243_v61 = vmul.f32 %v4238_v59, %v8933_v43 }
0x3afc   : > { %v4246_v52 = vadd.f32 1e-05, %v4243_v61 }
0x3afe   : > { %6231 = vrsqrt.f32 %v4246_v52  ;;  %vm4264_vm11 = vweird.f32 %v4246_v52 }
0x3b01   : > { %v4282_v44 = vpop.permute.xlu2 %4281  ;;  %v4241_v0 = vpop.xlane.xlu0 %4240 }
0x3b02   : > { %v4290_v54 = vsel %vm184_vm3, %v4278_v13, %v4282_v44  ;;  %v4244_v1 = vmul.f32 %v4241_v0, %v8933_v43  ;;  %v4284_v0 = vpop.permute.xlu1 %4283 }
0x3b03   : > { %5841 = vmatmul.msk.f32.vlgmr.msra.gmra.mxu0 %vm274_vm9, %v4290_v54 }
0x3b04   : > { %v6232_v2 = vpop.eup %6231  ;;  %v4247_v35 = vadd.f32 1e-05, %v4244_v1  ;;  %4849 = vmatpush.msra.mxu0 %v8937_v47 }
0x3b05   : > { %v4259_v9 = vmul.f32 %v6232_v2, %v4246_v52  ;;  %vm4265_vm10 = vweird.f32 %v6232_v2 }
0x3b06   : > { %6233 = vrsqrt.f32 %v4247_v35  ;;  %4850 = vmatpush.msra.mxu0 %v8938_v48  ;;  %vm4266_vm12 = vmor %vm4264_vm11, %vm4265_vm10  ;;  %vm4274_vm14 = vweird.f32 %v4247_v35 }
0x3b07   : > { %v4260_v59 = vmul.f32 %v6232_v2, %v4259_v9 }
0x3b08   : > { %4851 = vmatpush.msra.mxu0 %v8978_v36 }
0x3b09   : > { %v4261_v58 = vmul.f32 0.5, %v4260_v59 }
0x3b0a   : > { %4852 = vmatpush.msra.mxu0 %v8979_v50 }
0x3b0b   : > { %v4262_v57 = vsub.f32 1.5, %v4261_v58 }
0x3b0c   : > { %v6234_v44 = vpop.eup %6233 }
0x3b0d   : > { %v4269_v13 = vmul.f32 %v6234_v44, %v4247_v35  ;;  %v4263_v62 = vmul.f32 %v6232_v2, %v4262_v57  ;;  %vm4275_vm13 = vweird.f32 %v6234_v44 }
0x3b0e   : > { %vm4276_vm15 = vmor %vm4274_vm14, %vm4275_vm13 }
0x3b0f   : > { %v4270_v1 = vmul.f32 %v6234_v44, %v4269_v13  ;;  %v4267_v46 = vsel %vm4266_vm12, %v6232_v2, %v4263_v62 }
0x3b10   : > { %v4279_v61 = vmul.f32 %v4267_v46, %v4228_v12  ;;  %v8980_v12 = vld [vmem:[#allocation3_spill] sm:$0xff] }
0x3b11   : > { %v4271_v54 = vmul.f32 0.5, %v4270_v1 }
0x3b12   : > { %v4291_v48 = vsel %vm184_vm3, %v4279_v61, %v4284_v0 }
0x3b13   : > { %v4272_v9 = vsub.f32 1.5, %v4271_v54  ;;  %5842 = vmatmul.msk.f32.gmra.mxu0 %vm274_vm9, %v4291_v48 }
0x3b14   : > { %v4286_v52 = vpop.permute.xlu0 %4285 }
0x3b15   : > { %v4273_v59 = vmul.f32 %v6234_v44, %v4272_v9 }
0x3b17   : > { %v4277_v58 = vsel %vm4276_vm15, %v6234_v44, %v4273_v59 }
0x3b18   : > { %v4280_v50 = vmul.f32 %v4277_v58, %v4229_v38 }
0x3b1a   : > { %v4292_v57 = vsel %vm184_vm3, %v4280_v50, %v4286_v52 }
0x3b1b   : > { %5843 = vmatmul.msk.f32.gmra.mxu0 %vm274_vm9, %v4292_v57 }
0x3b80   : > { %v4319_v2 = vpop.f32.mrf.mxu0 }
0x3b81   : > { %v8298_v13 = vadd.f32 %v8980_v12, %v4319_v2 }
0x3b83   : > { %4388 = vrot.lane.b32.xlu2 %v8298_v13, %s6409_s27  ;;  %v5844_v50 = vmul.f32 -1.442695, %v8298_v13 }
0x3b85   : > { %6235 = vpow2.f32 %v5844_v50 }
0x3b8b   : > { %v6236_v44 = vpop.eup %6235 }
0x3b8c   : > { %v4337_v1 = vadd.f32 1.0, %v6236_v44 }
0x3b8e   : > { %6237 = vrcp.f32 %v4337_v1  ;;  %v4351_v59 = vand.u32 2147483648, %v4337_v1  ;;  %vm4345_vm6 = vweird.f32 %v4337_v1  ;;  %v4349_v52 = vand.u32 2147483647, %v4337_v1 }
0x3b90   : > { %v4322_v62 = vpop.f32.mrf.mxu0  ;;  %v4352_v2 = vor.u32 1.1754944e-38, %v4351_v59  ;;  %vm4350_vm8 = vcmp.eq.f32.partialorder %v4349_v52, 8.507059e+37 }
0x3b91   : > { %v8303_v48 = vadd.f32 %v8980_v12, %v4322_v62 }
0x3b93   : > { %4390 = vrot.lane.b32.xlu0 %v8303_v48, %s6409_s27  ;;  %v5845_v58 = vmul.f32 -1.442695, %v8303_v48 }
0x3b94   : > { %v6238_v46 = vpop.eup %6237 }
0x3b95   : > { %v4341_v61 = vmul.f32 %v6238_v46, %v4337_v1  ;;  %vm4346_vm2 = vweird.f32 %v6238_v46  ;;  %6239 = vpow2.f32 %v5845_v58 }
0x3b96   : > { %vm4347_vm7 = vmor %vm4345_vm6, %vm4346_vm2 }
0x3b97   : > { %v4342_v0 = vsub.f32 1.0, %v4341_v61 }
0x3b98   : > { %v4325_v38 = vpop.f32.mrf.mxu0 }
0x3b99   : > { %v8308_v35 = vadd.f32 %v8980_v12, %v4325_v38  ;;  %v4343_v54 = vmul.f32 %v6238_v46, %v4342_v0 }
0x3b9b   : > { %4392 = vrot.lane.b32.xlu1 %v8308_v35, %s6409_s27  ;;  %v4344_v9 = vadd.f32 %v6238_v46, %v4343_v54  ;;  %v5846_v44 = vmul.f32 -1.442695, %v8308_v35  ;;  %v6240_v61 = vpop.eup %6239 }
0x3b9c   : > { %v4338_v0 = vadd.f32 1.0, %v6240_v61 }
0x3b9d   : > { %v4348_v57 = vsel %vm4347_vm7, %v6238_v46, %v4344_v9  ;;  %6241 = vpow2.f32 %v5846_v44 }
0x3b9e   : > { %v8314_v38 = vsel %vm4350_vm8, %v4352_v2, %v4348_v57  ;;  %6243 = vrcp.f32 %v4338_v0  ;;  %vm4360_vm11 = vweird.f32 %v4338_v0  ;;  %v4364_v36 = vand.u32 2147483647, %v4338_v0 }
0x3ba0   : > { %vm4365_vm13 = vcmp.eq.f32.partialorder %v4364_v36, 8.507059e+37 }
0x3ba3   : > { %v6242_v54 = vpop.eup %6241 }
0x3ba4   : > { %v4339_v1 = vadd.f32 1.0, %v6242_v54  ;;  %v6244_v12 = vpop.eup %6243 }
0x3ba5   : > { %v4356_v46 = vmul.f32 %v6244_v12, %v4338_v0  ;;  %vm4361_vm10 = vweird.f32 %v6244_v12 }
0x3ba6   : > { %6245 = vrcp.f32 %v4339_v1  ;;  %vm4362_vm12 = vmor %vm4360_vm11, %vm4361_vm10  ;;  %vm4375_vm15 = vweird.f32 %v4339_v1 }
0x3ba7   : > { %v4357_v9 = vsub.f32 1.0, %v4356_v46  ;;  %v4381_v46 = vand.u32 2147483648, %v4339_v1 }
0x3ba9   : > { %v4358_v58 = vmul.f32 %v6244_v12, %v4357_v9  ;;  %v4379_v9 = vand.u32 2147483647, %v4339_v1 }
0x3bab   : > { %v4359_v57 = vadd.f32 %v6244_v12, %v4358_v58  ;;  %vm4380_vm6 = vcmp.eq.f32.partialorder %v4379_v9, 8.507059e+37 }
0x3bac   : > { %v6246_v59 = vpop.eup %6245 }
0x3bad   : > { %v4371_v52 = vmul.f32 %v6246_v59, %v4339_v1  ;;  %vm4376_vm14 = vweird.f32 %v6246_v59 }
0x3bae   : > { %vm4377_vm2 = vmor %vm4375_vm15, %vm4376_vm14 }
0x3baf   : > { %v4372_v2 = vsub.f32 1.0, %v4371_v52  ;;  %v4382_v52 = vor.u32 1.1754944e-38, %v4381_v46 }
0x3bb1   : > { %v4373_v44 = vmul.f32 %v6246_v59, %v4372_v2 }
0x3bb3   : > { %v4374_v56 = vadd.f32 %v6246_v59, %v4373_v44 }
0x3bb5   : > { %v4378_v58 = vsel %vm4377_vm2, %v6246_v59, %v4374_v56 }
0x3bb6   : > { %v4383_v11 = vsel %vm4380_vm6, %v4382_v52, %v4378_v58 }
0x3bdd   : > { %v4389_v62 = vpop.permute.xlu2 %4388 }
0x3bde   : > { %v4397_v50 = vmul.f32 %v4389_v62, %v8314_v38  ;;  %v4366_v62 = vand.u32 2147483648, %v4338_v0 }
0x3be0   : > { %4403 = vrot.lane.b32.xlu2 %v4397_v50, %s6410_s12  ;;  %v4363_v50 = vsel %vm4362_vm12, %v6244_v12, %v4359_v57  ;;  %v4367_v61 = vor.u32 1.1754944e-38, %v4366_v62 }
0x3be2   : > { %v4368_v47 = vsel %vm4365_vm13, %v4367_v61, %v4363_v50  ;;  %v4436_v61 = vmul.f32 %v8314_v38, %v8109_v55 }
0x3be3   : > { %v4437_v9 = vmul.f32 %v4368_v47, %v8114_v45 }
0x3c05   : > { %v4391_v54 = vpop.permute.xlu0 %4390 }
0x3c06   : > { %v4398_v43 = vmul.f32 %v4391_v54, %v4368_v47 }
0x3c08   : > { %4405 = vrot.lane.b32.xlu0 %v4398_v43, %s6410_s12 }
0x3c0d   : > { %v4393_v0 = vpop.permute.xlu1 %4392 }
0x3c0e   : > { %v4399_v12 = vmul.f32 %v4393_v0, %v4383_v11 }
0x3c10   : > { %4407 = vrot.lane.b32.xlu1 %v4399_v12, %s6410_s12  ;;  %v4420_v12 = vsub.f32 1.0, %v4383_v11 }
0x3c3a   : > { %v4404_v36 = vpop.permute.xlu2 %4403 }
0x3c3b   : > { %v4412_v57 = vadd.f32 %v4404_v36, %v8298_v13  ;;  %v4418_v13 = vsub.f32 1.0, %v8314_v38  ;;  %v4438_v38 = vmul.f32 %v4383_v11, %v8119_v51 }
0x3c3d   : > { %6247 = vtanh.f32 %v4412_v57 }
0x3c43   : > { %v6248_v2 = vpop.eup %6247 }
0x3c44   : > { %4424 = vrot.lane.b32.xlu2 %v6248_v2, %s6411_s28 }
0x3c7a   : > { %v4406_v62 = vpop.permute.xlu0 %4405 }
0x3c7b   : > { %v4413_v43 = vadd.f32 %v4406_v62, %v8303_v48  ;;  %v4419_v48 = vsub.f32 1.0, %v4368_v47 }
0x3c7d   : > { %6249 = vtanh.f32 %v4413_v43 }
0x3c82   : > { %v4408_v1 = vpop.permute.xlu1 %4407 }
0x3c83   : > { %v6250_v56 = vpop.eup %6249  ;;  %v4414_v59 = vadd.f32 %v4408_v1, %v8308_v35 }
0x3c84   : > { %4426 = vrot.lane.b32.xlu0 %v6250_v56, %s6411_s28 }
0x3c85   : > { %6251 = vtanh.f32 %v4414_v59 }
0x3c8b   : > { %v6252_v50 = vpop.eup %6251 }
0x3c8c   : > { %4428 = vrot.lane.b32.xlu1 %v6252_v50, %s6411_s28 }
0x3c9e   : > { %v4425_v44 = vpop.permute.xlu2 %4424 }
0x3c9f   : > { %v4433_v54 = vmul.f32 %v4425_v44, %v4418_v13 }
0x3ca1   : > { %v8330_v46 = vadd.f32 %v4436_v61, %v4433_v54 }
0x3ca3   : > { %4445 = vrot.lane.b32.xlu2 %v8330_v46, %s6411_s28 }
0x3cf6   : > { %v4427_v35 = vpop.permute.xlu0 %4426 }
0x3cf7   : > { %v4434_v58 = vmul.f32 %v4427_v35, %v4419_v48 }
0x3cf9   : > { %v8335_v52 = vadd.f32 %v4437_v9, %v4434_v58 }
0x3cfb   : > { %4447 = vrot.lane.b32.xlu0 %v8335_v52, %s6411_s28 }
0x3cfd   : > { %v4446_v0 = vpop.permute.xlu2 %4445 }
0x3cfe   : > { %v4429_v36 = vpop.permute.xlu1 %4428  ;;  %v4454_v55 = vsel %vm159_vm0, %v4446_v0, 0.0 }
0x3cff   : > { %v4435_v57 = vmul.f32 %v4429_v36, %v4420_v12  ;;  %4455 = vadd.xlane.f32.xlu2 %v4454_v55 }
0x3d01   : > { %v8341_v2 = vadd.f32 %v4438_v38, %v4435_v57 }
0x3d03   : > { %4449 = vrot.lane.b32.xlu1 %v8341_v2, %s6411_s28 }
0x3d6d   : > { %v4448_v47 = vpop.permute.xlu0 %4447 }
0x3d6e   : > { %v4457_v45 = vsel %vm159_vm0, %v4448_v47, 0.0 }
0x3d6f   : > { %4458 = vadd.xlane.f32.xlu0 %v4457_v45 }
0x3d72   : > { %v4456_v62 = vpop.xlane.xlu2 %4455 }
0x3d73   : > { %v4463_v43 = vmul.f32 %v4456_v62, %v8837_v37 }
0x3d75   : > { %v4466_v1 = vsub.f32 %v8330_v46, %v4463_v43  ;;  %v4450_v56 = vpop.permute.xlu1 %4449 }
0x3d76   : > { %v4460_v59 = vsel %vm442_vm5, %v4450_v56, 0.0 }
0x3d77   : > { %4461 = vadd.xlane.f32.xlu1 %v4460_v59  ;;  %v4469_v51 = vmul.f32 %v4466_v1, %v4466_v1 }
0x3d79   : > { %4475 = vrot.lane.b32.xlu2 %v4469_v51, %s6411_s28 }
0x3dd3   : > { %v4476_v9 = vpop.permute.xlu2 %4475 }
0x3dd4   : > { %v4484_v58 = vsel %vm159_vm0, %v4476_v9, 0.0 }
0x3de2   : > { %v4459_v11 = vpop.xlane.xlu0 %4458 }
0x3de3   : > { %v4464_v50 = vmul.f32 %v4459_v11, %v8837_v37 }
0x3de5   : > { %v4467_v13 = vsub.f32 %v8335_v52, %v4464_v50 }
0x3de7   : > { %v4470_v44 = vmul.f32 %v4467_v13, %v4467_v13 }
0x3de9   : > { %4477 = vrot.lane.b32.xlu0 %v4470_v44, %s6411_s28 }
0x3dea   : > { %v4462_v61 = vpop.xlane.xlu1 %4461 }
0x3deb   : > { %v4465_v54 = vmul.f32 %v4462_v61, %v8837_v37 }
0x3ded   : > { %v8355_v48 = vsub.f32 %v8341_v2, %v4465_v54 }
0x3def   : > { %v4471_v35 = vmul.f32 %v8355_v48, %v8355_v48 }
0x3df1   : > { %4479 = vrot.lane.b32.xlu1 %v4471_v35, %s6411_s28 }
0x3e13   : > { %4485 = vadd.xlane.f32.xlu0 %v4484_v58 }
0x3e5b   : > { %v4478_v0 = vpop.permute.xlu0 %4477 }
0x3e5c   : > { %v4487_v12 = vsel %vm159_vm0, %v4478_v0, 0.0 }
0x3e5d   : > { %4488 = vadd.xlane.f32.xlu2 %v4487_v12 }
0x3e63   : > { %v4480_v36 = vpop.permute.xlu1 %4479 }
0x3e64   : > { %v4490_v55 = vsel %vm442_vm5, %v4480_v36, 0.0 }
0x3e65   : > { %4491 = vadd.xlane.f32.xlu1 %v4490_v55 }
0x3e86   : > { %v4486_v38 = vpop.xlane.xlu0 %4485 }
0x3e87   : > { %v4493_v57 = vmul.f32 %v4486_v38, %v8837_v37 }
0x3e89   : > { %v4496_v47 = vadd.f32 1e-05, %v4493_v57 }
0x3e8b   : > { %6253 = vrsqrt.f32 %v4496_v47  ;;  %vm4505_vm8 = vweird.f32 %v4496_v47 }
0x3e91   : > { %v6254_v45 = vpop.eup %6253 }
0x3e92   : > { %v4500_v62 = vmul.f32 %v6254_v45, %v4496_v47  ;;  %vm4506_vm7 = vweird.f32 %v6254_v45 }
0x3e93   : > { %vm4507_vm10 = vmor %vm4505_vm8, %vm4506_vm7 }
0x3e94   : > { %v4501_v43 = vmul.f32 %v6254_v45, %v4500_v62 }
0x3e96   : > { %v4502_v56 = vmul.f32 0.5, %v4501_v43 }
0x3e98   : > { %v4503_v59 = vsub.f32 1.5, %v4502_v56 }
0x3e9a   : > { %v4504_v51 = vmul.f32 %v6254_v45, %v4503_v59 }
0x3e9c   : > { %v4508_v11 = vsel %vm4507_vm10, %v6254_v45, %v4504_v51 }
0x3e9d   : > { %v4529_v50 = vmul.f32 %v4508_v11, %v4466_v1 }
0x3e9f   : > { %v4532_v44 = vmul.f32 %v4529_v50, %v7919_v10 }
0x3ea1   : > { %v4535_v61 = vadd.f32 %v4532_v44, %v7921_v53 }
0x3ea3   : > { %4541 = vrot.lane.b32.xlu0 %v4535_v61, %s6411_s28 }
0x3ed0   : > { %v4489_v54 = vpop.xlane.xlu2 %4488 }
0x3ed1   : > { %v4494_v35 = vmul.f32 %v4489_v54, %v8837_v37 }
0x3ed3   : > { %v4497_v9 = vadd.f32 1e-05, %v4494_v35 }
0x3ed5   : > { %6255 = vrsqrt.f32 %v4497_v9  ;;  %vm4515_vm12 = vweird.f32 %v4497_v9 }
0x3ed8   : > { %v4492_v58 = vpop.xlane.xlu1 %4491 }
0x3ed9   : > { %v4495_v0 = vmul.f32 %v4492_v58, %v8837_v37 }
0x3edb   : > { %v6256_v12 = vpop.eup %6255  ;;  %v4498_v36 = vadd.f32 1e-05, %v4495_v0 }
0x3edc   : > { %v4510_v55 = vmul.f32 %v6256_v12, %v4497_v9  ;;  %vm4516_vm11 = vweird.f32 %v6256_v12 }
0x3edd   : > { %6257 = vrsqrt.f32 %v4498_v36  ;;  %vm4517_vm13 = vmor %vm4515_vm12, %vm4516_vm11  ;;  %vm4525_vm15 = vweird.f32 %v4498_v36 }
0x3ede   : > { %v4511_v38 = vmul.f32 %v6256_v12, %v4510_v55 }
0x3ee0   : > { %v4512_v1 = vmul.f32 0.5, %v4511_v38 }
0x3ee2   : > { %v4513_v57 = vsub.f32 1.5, %v4512_v1 }
0x3ee3   : > { %v6258_v47 = vpop.eup %6257 }
0x3ee4   : > { %v4514_v45 = vmul.f32 %v6256_v12, %v4513_v57  ;;  %v4520_v62 = vmul.f32 %v6258_v47, %v4498_v36  ;;  %vm4526_vm14 = vweird.f32 %v6258_v47 }
0x3ee5   : > { %vm4527_vm2 = vmor %vm4525_vm15, %vm4526_vm14 }
0x3ee6   : > { %v4518_v43 = vsel %vm4517_vm13, %v6256_v12, %v4514_v45  ;;  %v4521_v56 = vmul.f32 %v6258_v47, %v4520_v62 }
0x3ee7   : > { %v4530_v59 = vmul.f32 %v4518_v43, %v4467_v13 }
0x3ee8   : > { %v4522_v51 = vmul.f32 0.5, %v4521_v56 }
0x3ee9   : > { %v4533_v11 = vmul.f32 %v4530_v59, %v7919_v10 }
0x3eea   : > { %v4523_v50 = vsub.f32 1.5, %v4522_v51 }
0x3eeb   : > { %v4536_v44 = vadd.f32 %v4533_v11, %v7921_v53 }
0x3eec   : > { %v4524_v61 = vmul.f32 %v6258_v47, %v4523_v50 }
0x3eed   : > { %4543 = vrot.lane.b32.xlu2 %v4536_v44, %s6411_s28 }
0x3eee   : > { %v4528_v54 = vsel %vm4527_vm2, %v6258_v47, %v4524_v61 }
0x3eef   : > { %v4531_v35 = vmul.f32 %v4528_v54, %v8355_v48 }
0x3ef1   : > { %v4534_v9 = vmul.f32 %v4531_v35, %v7919_v10 }
0x3ef3   : > { %v4537_v58 = vadd.f32 %v4534_v9, %v7921_v53 }
0x3ef5   : > { %4545 = vrot.lane.b32.xlu1 %v4537_v58, %s6411_s28 }
0x3f15   : > { %v4542_v13 = vpop.permute.xlu0 %4541 }
0x3f16   : > { %5847 = vmatmul.msk.f32.vlgmr.msra.gmra.mxu3 %vm159_vm0, %v4542_v13 }
0x3f17   : > { %4973 = vmatpush.msra.mxu3 %v6529_v7 }
0x3f19   : > { %4974 = vmatpush.msra.mxu3 %v6524_v6 }
0x3f1b   : > { %4975 = vmatpush.msra.mxu3 %v6519_v5 }
0x3f1d   : > { %4976 = vmatpush.msra.mxu3 %v6514_v4 }
0x3f1f   : > { %4977 = vmatpush.msra.mxu3 %v6509_v3 }
0x3f47   : > { %v4544_v48 = vpop.permute.xlu2 %4543 }
0x3f48   : > { %5848 = vmatmul.msk.f32.gmra.mxu3 %vm159_vm0, %v4544_v48 }
0x3f67   : > { %v4546_v0 = vpop.permute.xlu1 %4545 }
0x3f68   : > { %5849 = vmatmul.msk.f32.gmra.mxu3 %vm159_vm0, %v4546_v0 }
0x3f99   : > { %v4570_v12 = vpop.f32.mrf.mxu3 }
0x3f9a   : > { %v4571_v36 = vadd.f32 %v6589_v19, %v4570_v12 }
0x3f9c   : > { %v4579_v55 = vmax.f32 %v4571_v36, 0.0 }
0x3f9e   : > { %5850 = vmatmul.msk.f32.vlgmr.msrb.gmra.mxu1 %vm159_vm0, %v4579_v55 }
0x3f9f   : > { %5225 = vmatpush.msrb.mxu1 %v6564_v14 }
0x3fa1   : > { %5226 = vmatpush.msrb.mxu1 %v8956_v42 }
0x3fa3   : > { %5227 = vmatpush.msrb.mxu1 %v8957_v63 }
0x3fa5   : > { %5228 = vmatpush.msrb.mxu1 %v8958_v60 }
0x3fcb   : > { %v4573_v38 = vpop.f32.mrf.mxu3 }
0x3fcc   : > { %v4574_v1 = vadd.f32 %v6589_v19, %v4573_v38 }
0x3fce   : > { %v4580_v57 = vmax.f32 %v4574_v1, 0.0 }
0x3fd0   : > { %5851 = vmatmul.msk.f32.gmra.mxu1 %vm159_vm0, %v4580_v57 }
0x3feb   : > { %v4576_v47 = vpop.f32.mrf.mxu3 }
0x3fec   : > { %v4577_v45 = vadd.f32 %v6589_v19, %v4576_v47 }
0x3fee   : > { %v4581_v62 = vmax.f32 %v4577_v45, 0.0 }
0x3ff0   : > { %5852 = vmatmul.msk.f32.gmra.mxu1 %vm159_vm0, %v4581_v62 }
0x401b   : > { %v4608_v43 = vpop.f32.mrf.mxu1 }
0x401c   : > { %v4609_v56 = vadd.f32 %v6594_v20, %v4608_v43 }
0x401e   : > { %v4617_v42 = vmax.f32 %v4609_v56, 0.0 }
0x4020   : > { %v4623_v59 = vadd.f32 %v4617_v42, %v4542_v13 }
0x4022   : > { %4626 = vst.msk [vmem:[#allocation2] sm:$0xff] %vm159_vm0, %v4623_v59 }
0x4029   : > { %v4629_v63 = vld [vmem:[#allocation2] sm:$0xff] }
0x402a   : > { %5853 = vmatmul.msk.f32.vlgmr.msrb.gmra.mxu2 %vm163_vm1, %v4629_v63 }
0x402b   : > { %5263 = vmatpush.msrb.mxu2 %v6584_v18 }
0x402d   : > { %5264 = vmatpush.msrb.mxu2 %v6579_v17 }
0x402f   : > { %5265 = vmatpush.msrb.mxu2 %v6574_v16 }
0x4031   : > { %5266 = vmatpush.msrb.mxu2 %v6569_v15 }
0x404d   : > { %v4611_v60 = vpop.f32.mrf.mxu1 }
0x404e   : > { %v4612_v51 = vadd.f32 %v6594_v20, %v4611_v60 }
0x4050   : > { %v4618_v11 = vmax.f32 %v4612_v51, 0.0 }
0x4052   : > { %v4624_v50 = vadd.f32 %v4618_v11, %v4544_v48 }
0x4054   : > { %4627 = vst.msk [vmem:[#allocation2 + $0x8] sm:$0xff] %vm159_vm0, %v4624_v50 }
0x405b   : > { %v4630_v44 = vld [vmem:[#allocation2 + $0x8] sm:$0xff] }
0x405c   : > { %5854 = vmatmul.msk.f32.gmra.mxu2 %vm163_vm1, %v4630_v44 }
0x406d   : > { %v4614_v61 = vpop.f32.mrf.mxu1 }
0x406e   : > { %v4615_v54 = vadd.f32 %v6594_v20, %v4614_v61 }
0x4070   : > { %v4619_v35 = vmax.f32 %v4615_v54, 0.0 }
0x4072   : > { %v4625_v9 = vadd.f32 %v4619_v35, %v4546_v0 }
0x4074   : > { %4628 = vst.msk [vmem:[#allocation2 + $0x10] sm:$0xf] %vm442_vm5, %v4625_v9  ;;  %v8982_v9 = vld [vmem:[#allocation9_spill] sm:$0xff] }
0x407b   : > { %v4631_v58 = vld [vmem:[#allocation2 + $0x10] sm:$0xf] }
0x407c   : > { %5855 = vmatmul.msk.f32.gmra.mxu2 %vm163_vm1, %v4631_v58 }
0x40ad   : > { %v4658_v13 = vpop.f32.mrf.mxu2 }
0x40ae   : > { %v4659_v12 = vadd.f32 %v6659_v33, %v4658_v13 }
0x40b0   : > { %v4667_v36 = vmax.f32 %v4659_v12, 0.0 }
0x40b2   : > { %5856 = vmatmul.msk.f32.vlgmr.msrb.gmra.mxu0 %vm163_vm1, %v4667_v36 }
0x40b3   : > { %5311 = vmatpush.msrb.mxu0 %v6624_v26 }
0x40b5   : > { %5312 = vmatpush.msrb.mxu0 %v6619_v25 }
0x40b7   : > { %5313 = vmatpush.msrb.mxu0 %v6614_v24 }
0x40b9   : > { %5314 = vmatpush.msrb.mxu0 %v6609_v23 }
0x40bb   : > { %5315 = vmatpush.msrb.mxu0 %v6604_v22 }
0x40bd   : > { %5316 = vmatpush.msrb.mxu0 %v6599_v21 }
0x40df   : > { %v4661_v48 = vpop.f32.mrf.mxu2 }
0x40e0   : > { %v4662_v0 = vadd.f32 %v6659_v33, %v4661_v48 }
0x40e2   : > { %v4668_v55 = vmax.f32 %v4662_v0, 0.0 }
0x40e4   : > { %5857 = vmatmul.msk.f32.gmra.mxu0 %vm163_vm1, %v4668_v55 }
0x40ff   : > { %v4664_v38 = vpop.f32.mrf.mxu2 }
0x4100   : > { %v4665_v1 = vadd.f32 %v6659_v33, %v4664_v38 }
0x4102   : > { %v4669_v57 = vmax.f32 %v4665_v1, 0.0  ;;  %v8984_v1 = vld [vmem:[#allocation16_spill] sm:$0xff] }
0x4104   : > { %5858 = vmatmul.msk.f32.gmra.mxu0 %vm163_vm1, %v4669_v57  ;;  %v8985_v57 = vld [vmem:[#allocation15_spill] sm:$0xff] }
0x412f   : > { %v4696_v47 = vpop.f32.mrf.mxu0 }
0x4130   : > { %v4697_v45 = vadd.f32 %v6664_v34, %v4696_v47  ;;  %v8986_v47 = vld [vmem:[#allocation14_spill] sm:$0xff] }
0x4132   : > { %v4705_v62 = vmax.f32 %v4697_v45, 0.0  ;;  %v8987_v45 = vld [vmem:[#allocation13_spill] sm:$0xff] }
0x4134   : > { %v4708_v43 = vadd.f32 %v4705_v62, %v4629_v63 }
0x4136   : > { %5859 = vmatmul.msk.f32.vlgmr.msrb.gmra.mxu3 %vm163_vm1, %v4708_v43 }
0x4137   : > { %5349 = vmatpush.msrb.mxu3 %v6654_v32 }
0x4139   : > { %5350 = vmatpush.msrb.mxu3 %v6649_v31 }
0x413b   : > { %5351 = vmatpush.msrb.mxu3 %v6644_v30 }
0x413d   : > { %5352 = vmatpush.msrb.mxu3 %v6639_v29 }
0x413f   : > { %5353 = vmatpush.msrb.mxu3 %v6634_v28 }
0x4141   : > { %5354 = vmatpush.msrb.mxu3 %v6629_v27 }
0x4161   : > { %v4699_v56 = vpop.f32.mrf.mxu0 }
0x4162   : > { %v4700_v42 = vadd.f32 %v6664_v34, %v4699_v56 }
0x4164   : > { %v4706_v59 = vmax.f32 %v4700_v42, 0.0 }
0x4166   : > { %v4709_v60 = vadd.f32 %v4706_v59, %v4630_v44  ;;  %v8981_v44 = vld [vmem:[#allocation10_spill] sm:$0xff] }
0x4168   : > { %5860 = vmatmul.msk.f32.gmra.mxu3 %vm163_vm1, %v4709_v60 }
0x4181   : > { %v4702_v63 = vpop.f32.mrf.mxu0 }
0x4182   : > { %v4703_v51 = vadd.f32 %v6664_v34, %v4702_v63 }
0x4184   : > { %v4707_v11 = vmax.f32 %v4703_v51, 0.0  ;;  %v8988_v51 = vld [vmem:[#allocation22_spill] sm:$0xff] }
0x4186   : > { %v4710_v50 = vadd.f32 %v4707_v11, %v4631_v58 }
0x4188   : > { %5861 = vmatmul.msk.f32.gmra.mxu3 %vm163_vm1, %v4710_v50 }
0x41b9   : > { %v4737_v61 = vpop.f32.mrf.mxu3 }
0x41ba   : > { %v4738_v54 = vadd.f32 %v6699_v41, %v4737_v61 }
0x41bc   : > { %v4746_v35 = vmax.f32 %v4738_v54, 0.0  ;;  %v8989_v54 = vld [vmem:[#allocation20_spill] sm:$0xff] }
0x41be   : > { %5862 = vmatmul.msk.f32.vlgmr.msra.gmra.mxu1 %vm159_vm0, %v4746_v35 }
0x41bf   : > { %5390 = vmatpush.msra.mxu1 %v6694_v40 }
0x41c1   : > { %5391 = vmatpush.msra.mxu1 %v6689_v39 }
0x41c3   : > { %5392 = vmatpush.msra.mxu1 %v8922_v49  ;;  %v8983_v49 = vld [vmem:[#allocation21_spill] sm:$0xff] }
0x41c5   : > { %5393 = vmatpush.msra.mxu1 %v8925_v8 }
0x41c7   : > { %5394 = vmatpush.msra.mxu1 %v8981_v44  ;;  %v8990_v44 = vld [vmem:[#allocation19_spill] sm:$0xff] }
0x41c9   : > { %5395 = vmatpush.msra.mxu1 %v8982_v9  ;;  %v8991_v9 = vld [vmem:[#allocation18_spill] sm:$0xff] }
0x41eb   : > { %v4740_v58 = vpop.f32.mrf.mxu3 }
0x41ec   : > { %v4741_v13 = vadd.f32 %v6699_v41, %v4740_v58  ;;  %v8992_v58 = vld [vmem:[#allocation17_spill] sm:$0xff] }
0x41ee   : > { %v4747_v12 = vmax.f32 %v4741_v13, 0.0 }
0x41f0   : > { %5863 = vmatmul.msk.f32.gmra.mxu1 %vm159_vm0, %v4747_v12 }
0x420b   : > { %v4743_v36 = vpop.f32.mrf.mxu3 }
0x420c   : > { %v4744_v48 = vadd.f32 %v6699_v41, %v4743_v36 }
0x420e   : > { %v4748_v0 = vmax.f32 %v4744_v48, 0.0 }
0x4210   : > { %5864 = vmatmul.msk.f32.gmra.mxu1 %vm159_vm0, %v4748_v0 }
0x423b   : > { %v4775_v55 = vpop.f32.mrf.mxu1 }
0x423c   : > { %v4776_v38 = vadd.f32 %v8983_v49, %v4775_v55 }
0x423e   : > { %v4784_v8 = vmax.f32 %v4776_v38, 0.0 }
0x4240   : > { %5865 = vmatmul.msk.f32.vlgmr.msra.gmra.mxu2 %vm159_vm0, %v4784_v8 }
0x4241   : > { %5430 = vmatpush.msra.mxu2 %v8984_v1 }
0x4243   : > { %5431 = vmatpush.msra.mxu2 %v8985_v57 }
0x4245   : > { %5432 = vmatpush.msra.mxu2 %v8986_v47  ;;  %v8993_v47 = vld [vmem:[#allocation27_spill] sm:$0xff] }
0x4247   : > { %5433 = vmatpush.msra.mxu2 %v8987_v45 }
0x426d   : > { %v4778_v62 = vpop.f32.mrf.mxu1 }
0x426e   : > { %v4779_v43 = vadd.f32 %v8983_v49, %v4778_v62 }
0x4270   : > { %v4785_v56 = vmax.f32 %v4779_v43, 0.0  ;;  %v8994_v43 = vld [vmem:[#allocation34_spill] sm:$0xff] }
0x4272   : > { %5866 = vmatmul.msk.f32.gmra.mxu2 %vm159_vm0, %v4785_v56 }
0x428d   : > { %v4781_v42 = vpop.f32.mrf.mxu1 }
0x428e   : > { %v4782_v59 = vadd.f32 %v8983_v49, %v4781_v42 }
0x4290   : > { %v4786_v60 = vmax.f32 %v4782_v59, 0.0 }
0x4292   : > { %5867 = vmatmul.msk.f32.gmra.mxu2 %vm159_vm0, %v4786_v60  ;;  %v8995_v60 = vld [vmem:[#allocation33_spill] sm:$0xff] }
0x42c3   : > { %v4813_v63 = vpop.f32.mrf.mxu2 }
0x42c4   : > { %v4814_v11 = vadd.f32 %v8988_v51, %v4813_v63 }
0x42c6   : > { %v4822_v50 = vmax.f32 %v4814_v11, 0.0 }
0x42c8   : > { %v4825_v61 = vadd.f32 %v4822_v50, %v4746_v35 }
0x42ca   : > { %5868 = vmatmul.msk.f32.vlgmr.msra.gmra.mxu0 %vm159_vm0, %v4825_v61 }
0x42cb   : > { %5468 = vmatpush.msra.mxu0 %v8989_v54 }
0x42cd   : > { %5469 = vmatpush.msra.mxu0 %v8990_v44  ;;  %v8996_v44 = vld [vmem:[#allocation32_spill] sm:$0xff] }
0x42cf   : > { %5470 = vmatpush.msra.mxu0 %v8991_v9 }
0x42d1   : > { %5471 = vmatpush.msra.mxu0 %v8992_v58 }
0x42f5   : > { %v4816_v13 = vpop.f32.mrf.mxu2 }
0x42f6   : > { %v4817_v36 = vadd.f32 %v8988_v51, %v4816_v13 }
0x42f8   : > { %v4823_v48 = vmax.f32 %v4817_v36, 0.0  ;;  %v8997_v36 = vld [vmem:[#allocation31_spill] sm:$0xff] }
0x42fa   : > { %v4826_v55 = vadd.f32 %v4823_v48, %v4747_v12 }
0x42fc   : > { %5869 = vmatmul.msk.f32.gmra.mxu0 %vm159_vm0, %v4826_v55 }
0x4315   : > { %v4819_v38 = vpop.f32.mrf.mxu2 }
0x4316   : > { %v4820_v35 = vadd.f32 %v8988_v51, %v4819_v38 }
0x4318   : > { %v4824_v8 = vmax.f32 %v4820_v35, 0.0 }
0x431a   : > { %v4827_v1 = vadd.f32 %v4824_v8, %v4748_v0 }
0x431c   : > { %5870 = vmatmul.msk.f32.gmra.mxu0 %vm159_vm0, %v4827_v1 }
0x4347   : > { %v4854_v57 = vpop.f32.mrf.mxu0 }
0x4348   : > { %v4855_v45 = vadd.f32 %v8993_v47, %v4854_v57 }
0x434a   : > { %v4863_v62 = vmax.f32 %v4855_v45, 0.0 }
0x434c   : > { %v8465_v56 = vadd.f32 %v4863_v62, %v8994_v43 }
0x434e   : > { %5873 = vst.msk [vmem:[%s8025_s1 + $0x210] sm:$0xff] %vm184_vm3, %v8465_v56  ;;  %v4875_v12 = vsel %vm184_vm3, %v8465_v56, 0.0 }
0x434f   : > { %4876 = vadd.xlane.f32.xlu0 %v4875_v12 }
0x4379   : > { %v4857_v42 = vpop.f32.mrf.mxu0 }
0x437a   : > { %v4858_v0 = vadd.f32 %v8993_v47, %v4857_v42 }
0x437c   : > { %v4864_v59 = vmax.f32 %v4858_v0, 0.0 }
0x437e   : > { %v8474_v63 = vadd.f32 %v4864_v59, %v8995_v60 }
0x4380   : > { %5874 = vst.msk [vmem:[%s8025_s1 + $0x218] sm:$0xff] %vm184_vm3, %v8474_v63  ;;  %v4878_v11 = vsel %vm184_vm3, %v8474_v63, 0.0 }
0x4381   : > { %4879 = vadd.xlane.f32.xlu2 %v4878_v11 }
0x4399   : > { %v4860_v50 = vpop.f32.mrf.mxu0 }
0x439a   : > { %v4861_v61 = vadd.f32 %v8993_v47, %v4860_v50 }
0x439c   : > { %v4865_v54 = vmax.f32 %v4861_v61, 0.0 }
0x439e   : > { %v8483_v9 = vadd.f32 %v4865_v54, %v8996_v44 }
0x43a0   : > { %5875 = vst.msk [vmem:[%s8025_s1 + $0x220] sm:$0xf] %vm191_vm4, %v8483_v9  ;;  %v4881_v58 = vsel %vm191_vm4, %v8483_v9, 0.0 }
0x43a1   : > { %4882 = vadd.xlane.f32.xlu1 %v4881_v58 }
0x43ba   : > { %4943 = vrot.lane.b32.xlu1 %v8335_v52, %s6408_s0 }
0x43c2   : > { %v4877_v13 = vpop.xlane.xlu0 %4876 }
0x43c3   : > { %v4884_v48 = vmul.f32 %v4877_v13, %v8997_v36 }
0x43c5   : > { %v4887_v55 = vsub.f32 %v8465_v56, %v4884_v48 }
0x43c7   : > { %v4890_v38 = vmul.f32 %v4887_v55, %v4887_v55 }
0x43c9   : > { %v4893_v35 = vsel %vm184_vm3, %v4890_v38, 0.0 }
0x43ca   : > { %4894 = vadd.xlane.f32.xlu0 %v4893_v35 }
0x43f4   : > { %v4880_v8 = vpop.xlane.xlu2 %4879 }
0x43f5   : > { %v4885_v1 = vmul.f32 %v4880_v8, %v8997_v36 }
0x43f7   : > { %v4888_v57 = vsub.f32 %v8474_v63, %v4885_v1 }
0x43f9   : > { %v4891_v45 = vmul.f32 %v4888_v57, %v4888_v57 }
0x43fb   : > { %v4896_v62 = vsel %vm184_vm3, %v4891_v45, 0.0 }
0x43fc   : > { %4897 = vadd.xlane.f32.xlu2 %v4896_v62 }
0x4414   : > { %v4883_v43 = vpop.xlane.xlu1 %4882  ;;  %4941 = vrot.lane.b32.xlu2 %v8330_v46, %s6408_s0 }
0x4415   : > { %v4886_v12 = vmul.f32 %v4883_v43, %v8997_v36 }
0x4417   : > { %v4889_v42 = vsub.f32 %v8483_v9, %v4886_v12 }
0x4419   : > { %v4892_v0 = vmul.f32 %v4889_v42, %v4889_v42 }
0x441b   : > { %v4899_v59 = vsel %vm191_vm4, %v4892_v0, 0.0  ;;  %v8998_v0 = vld [vmem:[#allocation26_spill] sm:$0xff] }
0x441c   : > { %4900 = vadd.xlane.f32.xlu0 %v4899_v59 }
0x4430   : > { %4945 = vrot.lane.b32.xlu0 %v8341_v2, %s6408_s0 }
0x443d   : > { %v4895_v60 = vpop.xlane.xlu0 %4894 }
0x443e   : > { %v4902_v11 = vmul.f32 %v4895_v60, %v8997_v36  ;;  %v8999_v60 = vld [vmem:[#allocation25_spill] sm:$0xff] }
0x4440   : > { %v4905_v50 = vadd.f32 1e-05, %v4902_v11 }
0x4442   : > { %6259 = vrsqrt.f32 %v4905_v50  ;;  %vm4914_vm7 = vweird.f32 %v4905_v50 }
0x4448   : > { %v6260_v61 = vpop.eup %6259 }
0x4449   : > { %v4909_v54 = vmul.f32 %v6260_v61, %v4905_v50  ;;  %vm4915_vm6 = vweird.f32 %v6260_v61 }
0x444a   : > { %vm4916_vm8 = vmor %vm4914_vm7, %vm4915_vm6 }
0x444b   : > { %v4910_v44 = vmul.f32 %v6260_v61, %v4909_v54  ;;  %v9000_v54 = vld [vmem:[#allocation24_spill] sm:$0xff] }
0x444d   : > { %v4911_v58 = vmul.f32 0.5, %v4910_v44  ;;  %v9001_v44 = vld [vmem:[#allocation23_spill] sm:$0xff] }
0x444f   : > { %v4912_v13 = vsub.f32 1.5, %v4911_v58 }
0x4451   : > { %v4913_v38 = vmul.f32 %v6260_v61, %v4912_v13 }
0x4453   : > { %v4917_v1 = vsel %vm4916_vm8, %v6260_v61, %v4913_v38 }
0x4454   : > { %v4938_v45 = vmul.f32 %v4917_v1, %v4887_v55 }
0x446f   : > { %v4898_v48 = vpop.xlane.xlu2 %4897 }
0x4470   : > { %v4903_v35 = vmul.f32 %v4898_v48, %v8997_v36  ;;  %v4944_v48 = vpop.permute.xlu1 %4943 }
0x4472   : > { %v4906_v8 = vadd.f32 1e-05, %v4903_v35 }
0x4474   : > { %6261 = vrsqrt.f32 %v4906_v8  ;;  %vm4924_vm11 = vweird.f32 %v4906_v8 }
0x4477   : > { %v4942_v62 = vpop.permute.xlu2 %4941 }
0x4478   : > { %v4950_v43 = vsel %vm184_vm3, %v4938_v45, %v4942_v62 }
0x4479   : > { %5876 = vmatmul.msk.f32.vlgmr.msra.gmra.mxu3 %vm274_vm9, %v4950_v43 }
0x447a   : > { %v6262_v12 = vpop.eup %6261  ;;  %5509 = vmatpush.msra.mxu3 %v8998_v0 }
0x447b   : > { %v4919_v59 = vmul.f32 %v6262_v12, %v4906_v8  ;;  %vm4925_vm10 = vweird.f32 %v6262_v12 }
0x447c   : > { %5510 = vmatpush.msra.mxu3 %v8999_v60  ;;  %vm4926_vm12 = vmor %vm4924_vm11, %vm4925_vm10 }
0x447d   : > { %v4920_v11 = vmul.f32 %v6262_v12, %v4919_v59 }
0x447e   : > { %5511 = vmatpush.msra.mxu3 %v9000_v54 }
0x447f   : > { %v4921_v50 = vmul.f32 0.5, %v4920_v11 }
0x4480   : > { %5512 = vmatpush.msra.mxu3 %v9001_v44 }
0x4481   : > { %v4922_v61 = vsub.f32 1.5, %v4921_v50 }
0x4483   : > { %v4923_v55 = vmul.f32 %v6262_v12, %v4922_v61 }
0x4485   : > { %v4927_v58 = vsel %vm4926_vm12, %v6262_v12, %v4923_v55 }
0x4486   : > { %v4939_v13 = vmul.f32 %v4927_v58, %v4888_v57 }
0x4488   : > { %v4951_v38 = vsel %vm184_vm3, %v4939_v13, %v4944_v48 }
0x4489   : > { %5877 = vmatmul.msk.f32.gmra.mxu3 %vm274_vm9, %v4951_v38 }
0x448f   : > { %v4901_v35 = vpop.xlane.xlu0 %4900 }
0x4490   : > { %v4904_v1 = vmul.f32 %v4901_v35, %v8997_v36  ;;  %v9002_v36 = vld [vmem:[#allocation3_spill] sm:$0xff] }
0x4492   : > { %v4907_v45 = vadd.f32 1e-05, %v4904_v1 }
0x4494   : > { %6263 = vrsqrt.f32 %v4907_v45  ;;  %vm4934_vm14 = vweird.f32 %v4907_v45 }
0x449a   : > { %v6264_v62 = vpop.eup %6263 }
0x449b   : > { %v4929_v43 = vmul.f32 %v6264_v62, %v4907_v45  ;;  %vm4935_vm13 = vweird.f32 %v6264_v62 }
0x449c   : > { %vm4936_vm15 = vmor %vm4934_vm14, %vm4935_vm13 }
0x449d   : > { %v4930_v0 = vmul.f32 %v6264_v62, %v4929_v43 }
0x449f   : > { %v4931_v59 = vmul.f32 0.5, %v4930_v0 }
0x44a1   : > { %v4932_v60 = vsub.f32 1.5, %v4931_v59 }
0x44a2   : > { %v4946_v11 = vpop.permute.xlu0 %4945 }
0x44a3   : > { %v4933_v8 = vmul.f32 %v6264_v62, %v4932_v60 }
0x44a5   : > { %v4937_v57 = vsel %vm4936_vm15, %v6264_v62, %v4933_v8 }
0x44a6   : > { %v4940_v12 = vmul.f32 %v4937_v57, %v4889_v42 }
0x44a8   : > { %v4952_v54 = vsel %vm184_vm3, %v4940_v12, %v4946_v11 }
0x44a9   : > { %5878 = vmatmul.msk.f32.gmra.mxu3 %vm274_vm9, %v4952_v54 }
0x44fc   : > { %v4979_v50 = vpop.f32.mrf.mxu3 }
0x44fd   : > { %v8519_v44 = vadd.f32 %v9002_v36, %v4979_v50 }
0x44ff   : > { %5048 = vrot.lane.b32.xlu2 %v8519_v44, %s6409_s27  ;;  %v5879_v42 = vmul.f32 -1.442695, %v8519_v44 }
0x4501   : > { %6265 = vpow2.f32 %v5879_v42 }
0x4507   : > { %v6266_v48 = vpop.eup %6265 }
0x4508   : > { %v4997_v38 = vadd.f32 1.0, %v6266_v48 }
0x450a   : > { %6267 = vrcp.f32 %v4997_v38  ;;  %v5011_v0 = vand.u32 2147483648, %v4997_v38  ;;  %vm5005_vm6 = vweird.f32 %v4997_v38  ;;  %v5009_v60 = vand.u32 2147483647, %v4997_v38 }
0x450c   : > { %v4982_v61 = vpop.f32.mrf.mxu3  ;;  %v5012_v57 = vor.u32 1.1754944e-38, %v5011_v0  ;;  %vm5010_vm8 = vcmp.eq.f32.partialorder %v5009_v60, 8.507059e+37 }
0x450d   : > { %v8524_v55 = vadd.f32 %v9002_v36, %v4982_v61 }
0x450f   : > { %5050 = vrot.lane.b32.xlu0 %v8524_v55, %s6409_s27  ;;  %v5880_v59 = vmul.f32 -1.442695, %v8524_v55 }
0x4510   : > { %v6268_v35 = vpop.eup %6267 }
0x4511   : > { %v5001_v1 = vmul.f32 %v6268_v35, %v4997_v38  ;;  %vm5006_vm2 = vweird.f32 %v6268_v35  ;;  %6269 = vpow2.f32 %v5880_v59 }
0x4512   : > { %vm5007_vm7 = vmor %vm5005_vm6, %vm5006_vm2 }
0x4513   : > { %v5002_v45 = vsub.f32 1.0, %v5001_v1 }
0x4515   : > { %v5003_v62 = vmul.f32 %v6268_v35, %v5002_v45 }
0x4517   : > { %v5004_v43 = vadd.f32 %v6268_v35, %v5003_v62  ;;  %v6270_v50 = vpop.eup %6269 }
0x4519   : > { %v5008_v8 = vsel %vm5007_vm7, %v6268_v35, %v5004_v43 }
0x451a   : > { %v5013_v11 = vsel %vm5010_vm8, %v5012_v57, %v5008_v8 }
0x452c   : > { %v4985_v58 = vpop.f32.mrf.mxu3 }
0x452d   : > { %v8530_v13 = vadd.f32 %v9002_v36, %v4985_v58  ;;  %v4998_v36 = vadd.f32 1.0, %v6270_v50 }
0x452f   : > { %5052 = vrot.lane.b32.xlu1 %v8530_v13, %s6409_s27  ;;  %6271 = vrcp.f32 %v4998_v36  ;;  %v5881_v48 = vmul.f32 -1.442695, %v8530_v13  ;;  %v5026_v35 = vand.u32 2147483648, %v4998_v36  ;;  %vm5020_vm11 = vweird.f32 %v4998_v36 }
0x4530   : > { %v5024_v45 = vand.u32 2147483647, %v4998_v36 }
0x4531   : > { %6273 = vpow2.f32 %v5881_v48  ;;  %v5027_v0 = vor.u32 1.1754944e-38, %v5026_v35 }
0x4532   : > { %vm5025_vm13 = vcmp.eq.f32.partialorder %v5024_v45, 8.507059e+37 }
0x4535   : > { %v6272_v61 = vpop.eup %6271 }
0x4536   : > { %v5016_v42 = vmul.f32 %v6272_v61, %v4998_v36  ;;  %vm5021_vm10 = vweird.f32 %v6272_v61 }
0x4537   : > { %vm5022_vm12 = vmor %vm5020_vm11, %vm5021_vm10  ;;  %v6274_v62 = vpop.eup %6273 }
0x4538   : > { %v5017_v58 = vsub.f32 1.0, %v5016_v42  ;;  %v4999_v59 = vadd.f32 1.0, %v6274_v62 }
0x453a   : > { %v5018_v1 = vmul.f32 %v6272_v61, %v5017_v58  ;;  %6275 = vrcp.f32 %v4999_v59  ;;  %v5041_v48 = vand.u32 2147483648, %v4999_v59  ;;  %vm5035_vm15 = vweird.f32 %v4999_v59 }
0x453b   : > { %v5039_v36 = vand.u32 2147483647, %v4999_v59 }
0x453c   : > { %v5019_v38 = vadd.f32 %v6272_v61, %v5018_v1  ;;  %v5042_v1 = vor.u32 1.1754944e-38, %v5041_v48 }
0x453d   : > { %vm5040_vm6 = vcmp.eq.f32.partialorder %v5039_v36, 8.507059e+37 }
0x453e   : > { %v5023_v43 = vsel %vm5022_vm12, %v6272_v61, %v5019_v38 }
0x453f   : > { %v5028_v60 = vsel %vm5025_vm13, %v5027_v0, %v5023_v43 }
0x4559   : > { %v5049_v12 = vpop.permute.xlu2 %5048 }
0x455a   : > { %v5057_v54 = vmul.f32 %v5049_v12, %v5013_v11  ;;  %v6276_v12 = vpop.eup %6275 }
0x455b   : > { %vm5036_vm14 = vweird.f32 %v6276_v12 }
0x455c   : > { %5063 = vrot.lane.b32.xlu2 %v5057_v54, %s6410_s12  ;;  %v5031_v54 = vmul.f32 %v6276_v12, %v4999_v59  ;;  %vm5037_vm2 = vmor %vm5035_vm15, %vm5036_vm14 }
0x455e   : > { %v5032_v50 = vsub.f32 1.0, %v5031_v54 }
0x4560   : > { %v5033_v42 = vmul.f32 %v6276_v12, %v5032_v50  ;;  %v5078_v50 = vsub.f32 1.0, %v5013_v11 }
0x4562   : > { %v5034_v58 = vadd.f32 %v6276_v12, %v5033_v42 }
0x4564   : > { %v5038_v61 = vsel %vm5037_vm2, %v6276_v12, %v5034_v58  ;;  %v5096_v58 = vmul.f32 %v5013_v11, %v8330_v46 }
0x4565   : > { %v5043_v35 = vsel %vm5040_vm6, %v5042_v1, %v5038_v61  ;;  %v5097_v61 = vmul.f32 %v5028_v60, %v8335_v52 }
0x4566   : > { %v5080_v11 = vsub.f32 1.0, %v5043_v35 }
0x4581   : > { %v5051_v8 = vpop.permute.xlu0 %5050 }
0x4582   : > { %v5058_v57 = vmul.f32 %v5051_v8, %v5028_v60 }
0x4584   : > { %5065 = vrot.lane.b32.xlu0 %v5058_v57, %s6410_s12 }
0x45a1   : > { %v5053_v38 = vpop.permute.xlu1 %5052 }
0x45a2   : > { %v5059_v45 = vmul.f32 %v5053_v38, %v5043_v35 }
0x45a4   : > { %5067 = vrot.lane.b32.xlu1 %v5059_v45, %s6410_s12  ;;  %v5098_v45 = vmul.f32 %v5043_v35, %v8341_v2 }
0x45b6   : > { %v5064_v62 = vpop.permute.xlu2 %5063 }
0x45b7   : > { %v5072_v43 = vadd.f32 %v5064_v62, %v8519_v44 }
0x45b9   : > { %6277 = vtanh.f32 %v5072_v43 }
0x45bf   : > { %v6278_v0 = vpop.eup %6277 }
0x45c0   : > { %5084 = vrot.lane.b32.xlu2 %v6278_v0, %s6411_s28 }
0x45f6   : > { %v5066_v8 = vpop.permute.xlu0 %5065 }
0x45f7   : > { %v5073_v57 = vadd.f32 %v5066_v8, %v8524_v55  ;;  %v5079_v55 = vsub.f32 1.0, %v5028_v60 }
0x45f9   : > { %6279 = vtanh.f32 %v5073_v57 }
0x45ff   : > { %v6280_v59 = vpop.eup %6279 }
0x4600   : > { %5086 = vrot.lane.b32.xlu0 %v6280_v59, %s6411_s28 }
0x4616   : > { %v5068_v12 = vpop.permute.xlu1 %5067 }
0x4617   : > { %v5074_v54 = vadd.f32 %v5068_v12, %v8530_v13 }
0x4619   : > { %6281 = vtanh.f32 %v5074_v54 }
0x461a   : > { %v5085_v42 = vpop.permute.xlu2 %5084 }
0x461b   : > { %v5093_v44 = vmul.f32 %v5085_v42, %v5078_v50 }
0x461d   : > { %v8545_v0 = vadd.f32 %v5096_v58, %v5093_v44  }
0x461f   : > { %v6282_v48 = vpop.eup %6281  ;;  %5105 = vrot.lane.b32.xlu2 %v8545_v0, %s6411_s28 }
0x4620   : > { %5088 = vrot.lane.b32.xlu1 %v6282_v48, %s6411_s28 }
0x4672   : > { %v5087_v36 = vpop.permute.xlu0 %5086 }
0x4673   : > { %v5094_v1 = vmul.f32 %v5087_v36, %v5079_v55 }
0x4675   : > { %v8551_v55 = vadd.f32 %v5097_v61, %v5094_v1  }
0x4677   : > { %5107 = vrot.lane.b32.xlu0 %v8551_v55, %s6411_s28 }
0x4679   : > { %v5106_v46 = vpop.permute.xlu2 %5105 }
0x467a   : > { %v5114_v13 = vsel %vm159_vm0, %v5106_v46, 0.0 }
0x467b   : > { %5115 = vadd.xlane.f32.xlu2 %v5114_v13 }
0x4692   : > { %v5089_v38 = vpop.permute.xlu1 %5088 }
0x4693   : > { %v5095_v62 = vmul.f32 %v5089_v38, %v5080_v11 }
0x4695   : > { %v8557_v43 = vadd.f32 %v5098_v45, %v5095_v62  }
0x4697   : > { %5109 = vrot.lane.b32.xlu1 %v8557_v43, %s6411_s28 }
0x46e9   : > { %v5108_v52 = vpop.permute.xlu0 %5107 }
0x46ea   : > { %v5117_v60 = vsel %vm159_vm0, %v5108_v52, 0.0 }
0x46eb   : > { %5118 = vadd.xlane.f32.xlu0 %v5117_v60 }
0x46ee   : > { %v5116_v8 = vpop.xlane.xlu2 %5115 }
0x46ef   : > { %v5123_v57 = vmul.f32 %v5116_v8, %v8837_v37 }
0x46f1   : > { %v5126_v59 = vsub.f32 %v8545_v0, %v5123_v57 }
0x46f3   : > { %v5129_v12 = vmul.f32 %v5126_v59, %v5126_v59 }
0x46f5   : > { %5135 = vrot.lane.b32.xlu2 %v5129_v12, %s6411_s28 }
0x4709   : > { %v5110_v54 = vpop.permute.xlu1 %5109 }
0x470a   : > { %v5120_v2 = vsel %vm442_vm5, %v5110_v54, 0.0 }
0x470b   : > { %5121 = vadd.xlane.f32.xlu1 %v5120_v2 }
0x474f   : > { %v5136_v1 = vpop.permute.xlu2 %5135 }
0x4750   : > { %v5144_v46 = vsel %vm159_vm0, %v5136_v1, 0.0 }
0x475e   : > { %v5119_v35 = vpop.xlane.xlu0 %5118 }
0x475f   : > { %v5124_v50 = vmul.f32 %v5119_v35, %v8837_v37 }
0x4761   : > { %v5127_v42 = vsub.f32 %v8551_v55, %v5124_v50 }
0x4763   : > { %v5130_v58 = vmul.f32 %v5127_v42, %v5127_v42 }
0x4765   : > { %5137 = vrot.lane.b32.xlu0 %v5130_v58, %s6411_s28 }
0x477e   : > { %v5122_v44 = vpop.xlane.xlu1 %5121 }
0x477f   : > { %v5125_v48 = vmul.f32 %v5122_v44, %v8837_v37 }
0x4781   : > { %v8571_v36 = vsub.f32 %v8557_v43, %v5125_v48 }
0x4783   : > { %v5131_v61 = vmul.f32 %v8571_v36, %v8571_v36 }
0x4785   : > { %5139 = vrot.lane.b32.xlu1 %v5131_v61, %s6411_s28 }
0x478f   : > { %5145 = vadd.xlane.f32.xlu0 %v5144_v46 }
0x47d7   : > { %v5138_v13 = vpop.permute.xlu0 %5137 }
0x47d8   : > { %v5147_v11 = vsel %vm159_vm0, %v5138_v13, 0.0 }
0x47d9   : > { %5148 = vadd.xlane.f32.xlu2 %v5147_v11 }
0x47f7   : > { %v5140_v38 = vpop.permute.xlu1 %5139 }
0x47f8   : > { %v5150_v45 = vsel %vm442_vm5, %v5140_v38, 0.0 }
0x47f9   : > { %5151 = vadd.xlane.f32.xlu1 %v5150_v45 }
0x4802   : > { %v5146_v62 = vpop.xlane.xlu0 %5145 }
0x4803   : > { %v5153_v52 = vmul.f32 %v5146_v62, %v8837_v37 }
0x4805   : > { %v5156_v60 = vadd.f32 1e-05, %v5153_v52 }
0x4807   : > { %6283 = vrsqrt.f32 %v5156_v60  ;;  %vm5165_vm8 = vweird.f32 %v5156_v60 }
0x480d   : > { %v6284_v8 = vpop.eup %6283 }
0x480e   : > { %v5160_v57 = vmul.f32 %v6284_v8, %v5156_v60  ;;  %vm5166_vm7 = vweird.f32 %v6284_v8 }
0x480f   : > { %vm5167_vm10 = vmor %vm5165_vm8, %vm5166_vm7 }
0x4810   : > { %v5161_v12 = vmul.f32 %v6284_v8, %v5160_v57 }
0x4812   : > { %v5162_v54 = vmul.f32 0.5, %v5161_v12 }
0x4814   : > { %v5163_v2 = vsub.f32 1.5, %v5162_v54 }
0x4816   : > { %v5164_v35 = vmul.f32 %v6284_v8, %v5163_v2 }
0x4818   : > { %v5168_v50 = vsel %vm5167_vm10, %v6284_v8, %v5164_v35 }
0x4819   : > { %v5189_v58 = vmul.f32 %v5168_v50, %v5126_v59 }
0x481b   : > { %v5192_v44 = vmul.f32 %v5189_v58, %v7919_v10 }
0x481d   : > { %v5195_v48 = vadd.f32 %v5192_v44, %v7921_v53 }
0x481f   : > { %5201 = vrot.lane.b32.xlu0 %v5195_v48, %s6411_s28 }
0x484c   : > { %v5149_v61 = vpop.xlane.xlu2 %5148 }
0x484d   : > { %v5154_v1 = vmul.f32 %v5149_v61, %v8837_v37 }
0x484f   : > { %v5157_v46 = vadd.f32 1e-05, %v5154_v1 }
0x4851   : > { %6285 = vrsqrt.f32 %v5157_v46  ;;  %vm5175_vm12 = vweird.f32 %v5157_v46 }
0x4857   : > { %v6286_v13 = vpop.eup %6285 }
0x4858   : > { %v5170_v11 = vmul.f32 %v6286_v13, %v5157_v46  ;;  %vm5176_vm11 = vweird.f32 %v6286_v13 }
0x4859   : > { %vm5177_vm13 = vmor %vm5175_vm12, %vm5176_vm11 }
0x485a   : > { %v5171_v38 = vmul.f32 %v6286_v13, %v5170_v11 }
0x485c   : > { %v5172_v45 = vmul.f32 0.5, %v5171_v38 }
0x485e   : > { %v5173_v62 = vsub.f32 1.5, %v5172_v45 }
0x4860   : > { %v5174_v52 = vmul.f32 %v6286_v13, %v5173_v62 }
0x4862   : > { %v5178_v59 = vsel %vm5177_vm13, %v6286_v13, %v5174_v52 }
0x4863   : > { %v5190_v60 = vmul.f32 %v5178_v59, %v5127_v42 }
0x4865   : > { %v5193_v8 = vmul.f32 %v5190_v60, %v7919_v10 }
0x4867   : > { %v5196_v57 = vadd.f32 %v5193_v8, %v7921_v53 }
0x4869   : > { %5203 = vrot.lane.b32.xlu2 %v5196_v57, %s6411_s28 }
0x486c   : > { %v5152_v12 = vpop.xlane.xlu1 %5151 }
0x486d   : > { %v5155_v54 = vmul.f32 %v5152_v12, %v8837_v37 }
0x486f   : > { %v5158_v2 = vadd.f32 1e-05, %v5155_v54 }
0x4871   : > { %6287 = vrsqrt.f32 %v5158_v2  ;;  %vm5185_vm15 = vweird.f32 %v5158_v2 }
0x4877   : > { %v6288_v35 = vpop.eup %6287 }
0x4878   : > { %v5180_v50 = vmul.f32 %v6288_v35, %v5158_v2  ;;  %vm5186_vm14 = vweird.f32 %v6288_v35 }
0x4879   : > { %vm5187_vm2 = vmor %vm5185_vm15, %vm5186_vm14 }
0x487a   : > { %v5181_v58 = vmul.f32 %v6288_v35, %v5180_v50 }
0x487c   : > { %v5182_v44 = vmul.f32 0.5, %v5181_v58 }
0x487e   : > { %v5183_v48 = vsub.f32 1.5, %v5182_v44 }
0x4880   : > { %v5184_v61 = vmul.f32 %v6288_v35, %v5183_v48 }
0x4882   : > { %v5188_v42 = vsel %vm5187_vm2, %v6288_v35, %v5184_v61 }
0x4883   : > { %v5191_v1 = vmul.f32 %v5188_v42, %v8571_v36 }
0x4885   : > { %v5194_v46 = vmul.f32 %v5191_v1, %v7919_v10 }
0x4887   : > { %v5197_v13 = vadd.f32 %v5194_v46, %v7921_v53 }
0x4889   : > { %5205 = vrot.lane.b32.xlu1 %v5197_v13, %s6411_s28 }
0x4891   : > { %v5202_v11 = vpop.permute.xlu0 %5201 }
0x4892   : > { %5882 = vmatmul.msk.f32.vlgmr.msrb.gmra.mxu1 %vm159_vm0, %v5202_v11 }
0x48c3   : > { %v5204_v38 = vpop.permute.xlu2 %5203 }
0x48c4   : > { %5883 = vmatmul.msk.f32.gmra.mxu1 %vm159_vm0, %v5204_v38 }
0x48fb   : > { %v5206_v45 = vpop.permute.xlu1 %5205 }
0x48fc   : > { %5884 = vmatmul.msk.f32.gmra.mxu1 %vm159_vm0, %v5206_v45 }
0x490f   : > { %v5230_v62 = vpop.f32.mrf.mxu1 }
0x4910   : > { %v5231_v52 = vadd.f32 %v6589_v19, %v5230_v62 }
0x4912   : > { %v5239_v59 = vmax.f32 %v5231_v52, 0.0 }
0x4914   : > { %5885 = vmatmul.msk.f32.vlgmr.msrb.gmra.mxu2 %vm159_vm0, %v5239_v59 }
0x4941   : > { %v5233_v10 = vpop.f32.mrf.mxu1 }
0x4942   : > { %v5234_v53 = vadd.f32 %v6589_v19, %v5233_v10 }
0x4944   : > { %v5240_v36 = vmax.f32 %v5234_v53, 0.0 }
0x4946   : > { %5886 = vmatmul.msk.f32.gmra.mxu2 %vm159_vm0, %v5240_v36 }
0x4979   : > { %v5236_v60 = vpop.f32.mrf.mxu1 }
0x497a   : > { %v5237_v8 = vadd.f32 %v6589_v19, %v5236_v60 }
0x497c   : > { %v5241_v57 = vmax.f32 %v5237_v8, 0.0 }
0x497e   : > { %5887 = vmatmul.msk.f32.gmra.mxu2 %vm159_vm0, %v5241_v57 }
0x4997   : > { %v5268_v12 = vpop.f32.mrf.mxu2 }
0x4998   : > { %v5269_v54 = vadd.f32 %v6594_v20, %v5268_v12 }
0x499a   : > { %v5277_v2 = vmax.f32 %v5269_v54, 0.0 }
0x499c   : > { %v5283_v35 = vadd.f32 %v5277_v2, %v5202_v11 }
0x499e   : > { %5286 = vst.msk [vmem:[#allocation2] sm:$0xff] %vm159_vm0, %v5283_v35 }
0x49a5   : > { %v5289_v50 = vld [vmem:[#allocation2] sm:$0xff] }
0x49a6   : > { %5888 = vmatmul.msk.f32.vlgmr.msrb.gmra.mxu0 %vm163_vm1, %v5289_v50 }
0x49c9   : > { %v5271_v58 = vpop.f32.mrf.mxu2 }
0x49ca   : > { %v5272_v44 = vadd.f32 %v6594_v20, %v5271_v58 }
0x49cc   : > { %v5278_v48 = vmax.f32 %v5272_v44, 0.0 }
0x49ce   : > { %v5284_v61 = vadd.f32 %v5278_v48, %v5204_v38 }
0x49d0   : > { %5287 = vst.msk [vmem:[#allocation2 + $0x8] sm:$0xff] %vm159_vm0, %v5284_v61 }
0x49d7   : > { %v5290_v42 = vld [vmem:[#allocation2 + $0x8] sm:$0xff] }
0x49d8   : > { %5889 = vmatmul.msk.f32.gmra.mxu0 %vm163_vm1, %v5290_v42 }
0x4a01   : > { %v5274_v1 = vpop.f32.mrf.mxu2 }
0x4a02   : > { %v5275_v46 = vadd.f32 %v6594_v20, %v5274_v1 }
0x4a04   : > { %v5279_v13 = vmax.f32 %v5275_v46, 0.0 }
0x4a06   : > { %v5285_v11 = vadd.f32 %v5279_v13, %v5206_v45 }
0x4a08   : > { %5288 = vst.msk [vmem:[#allocation2 + $0x10] sm:$0xf] %vm442_vm5, %v5285_v11 }
0x4a0f   : > { %v5291_v62 = vld [vmem:[#allocation2 + $0x10] sm:$0xf] }
0x4a10   : > { %5890 = vmatmul.msk.f32.gmra.mxu0 %vm163_vm1, %v5291_v62 }
0x4a23   : > { %v5318_v52 = vpop.f32.mrf.mxu0 }
0x4a24   : > { %v5319_v59 = vadd.f32 %v6659_v33, %v5318_v52 }
0x4a26   : > { %v5327_v10 = vmax.f32 %v5319_v59, 0.0 }
0x4a28   : > { %5891 = vmatmul.msk.f32.vlgmr.msrb.gmra.mxu3 %vm163_vm1, %v5327_v10 }
0x4a55   : > { %v5321_v38 = vpop.f32.mrf.mxu0 }
0x4a56   : > { %v5322_v53 = vadd.f32 %v6659_v33, %v5321_v38 }
0x4a58   : > { %v5328_v36 = vmax.f32 %v5322_v53, 0.0 }
0x4a5a   : > { %5892 = vmatmul.msk.f32.gmra.mxu3 %vm163_vm1, %v5328_v36 }
0x4a8d   : > { %v5324_v60 = vpop.f32.mrf.mxu0 }
0x4a8e   : > { %v5325_v45 = vadd.f32 %v6659_v33, %v5324_v60 }
0x4a90   : > { %v5329_v8 = vmax.f32 %v5325_v45, 0.0 }
0x4a92   : > { %5893 = vmatmul.msk.f32.gmra.mxu3 %vm163_vm1, %v5329_v8 }
0x4aab   : > { %v5356_v57 = vpop.f32.mrf.mxu3 }
0x4aac   : > { %v5357_v12 = vadd.f32 %v6664_v34, %v5356_v57 }
0x4aae   : > { %v5365_v54 = vmax.f32 %v5357_v12, 0.0 }
0x4ab0   : > { %v5368_v2 = vadd.f32 %v5365_v54, %v5289_v50 }
0x4ab2   : > { %5894 = vmatmul.msk.f32.vlgmr.msra.gmra.mxu1 %vm163_vm1, %v5368_v2 }
0x4add   : > { %v5359_v35 = vpop.f32.mrf.mxu3 }
0x4ade   : > { %v5360_v58 = vadd.f32 %v6664_v34, %v5359_v35 }
0x4ae0   : > { %v5366_v44 = vmax.f32 %v5360_v58, 0.0 }
0x4ae2   : > { %v5369_v48 = vadd.f32 %v5366_v44, %v5290_v42 }
0x4ae4   : > { %5895 = vmatmul.msk.f32.gmra.mxu1 %vm163_vm1, %v5369_v48 }
0x4b15   : > { %v5362_v61 = vpop.f32.mrf.mxu3 }
0x4b16   : > { %v5363_v1 = vadd.f32 %v6664_v34, %v5362_v61 }
0x4b18   : > { %v5367_v46 = vmax.f32 %v5363_v1, 0.0 }
0x4b1a   : > { %v5370_v13 = vadd.f32 %v5367_v46, %v5291_v62 }
0x4b1c   : > { %5896 = vmatmul.msk.f32.gmra.mxu1 %vm163_vm1, %v5370_v13 }
0x4b2f   : > { %v5397_v11 = vpop.f32.mrf.mxu1 }
0x4b30   : > { %v5398_v52 = vadd.f32 %v6699_v41, %v5397_v11 }
0x4b32   : > { %v5406_v50 = vmax.f32 %v5398_v52, 0.0 }
0x4b34   : > { %5897 = vmatmul.msk.f32.vlgmr.msra.gmra.mxu2 %vm159_vm0, %v5406_v50 }
0x4b61   : > { %v5400_v59 = vpop.f32.mrf.mxu1 }
0x4b62   : > { %v5401_v10 = vadd.f32 %v6699_v41, %v5400_v59 }
0x4b64   : > { %v5407_v38 = vmax.f32 %v5401_v10, 0.0 }
0x4b66   : > { %5898 = vmatmul.msk.f32.gmra.mxu2 %vm159_vm0, %v5407_v38 }
0x4b99   : > { %v5403_v42 = vpop.f32.mrf.mxu1 }
0x4b9a   : > { %v5404_v53 = vadd.f32 %v6699_v41, %v5403_v42 }
0x4b9c   : > { %v5408_v36 = vmax.f32 %v5404_v53, 0.0 }
0x4b9e   : > { %5899 = vmatmul.msk.f32.gmra.mxu2 %vm159_vm0, %v5408_v36 }
0x4bb7   : > { %v5435_v62 = vpop.f32.mrf.mxu2 }
0x4bb8   : > { %v5436_v60 = vadd.f32 %v8983_v49, %v5435_v62 }
0x4bba   : > { %v5444_v45 = vmax.f32 %v5436_v60, 0.0 }
0x4bbc   : > { %5900 = vmatmul.msk.f32.vlgmr.msra.gmra.mxu0 %vm159_vm0, %v5444_v45 }
0x4be9   : > { %v5438_v8 = vpop.f32.mrf.mxu2 }
0x4bea   : > { %v5439_v57 = vadd.f32 %v8983_v49, %v5438_v8 }
0x4bec   : > { %v5445_v12 = vmax.f32 %v5439_v57, 0.0 }
0x4bee   : > { %5901 = vmatmul.msk.f32.gmra.mxu0 %vm159_vm0, %v5445_v12 }
0x4c21   : > { %v5441_v54 = vpop.f32.mrf.mxu2 }
0x4c22   : > { %v5442_v2 = vadd.f32 %v8983_v49, %v5441_v54 }
0x4c24   : > { %v5446_v35 = vmax.f32 %v5442_v2, 0.0 }
0x4c26   : > { %5902 = vmatmul.msk.f32.gmra.mxu0 %vm159_vm0, %v5446_v35 }
0x4c39   : > { %v5473_v58 = vpop.f32.mrf.mxu0 }
0x4c3a   : > { %v5474_v44 = vadd.f32 %v8988_v51, %v5473_v58 }
0x4c3c   : > { %v5482_v48 = vmax.f32 %v5474_v44, 0.0 }
0x4c3e   : > { %v5485_v61 = vadd.f32 %v5482_v48, %v5406_v50 }
0x4c40   : > { %5903 = vmatmul.msk.f32.vlgmr.msra.gmra.mxu3 %vm159_vm0, %v5485_v61 }
0x4c6b   : > { %v5476_v1 = vpop.f32.mrf.mxu0 }
0x4c6c   : > { %v5477_v46 = vadd.f32 %v8988_v51, %v5476_v1 }
0x4c6e   : > { %v5483_v13 = vmax.f32 %v5477_v46, 0.0 }
0x4c70   : > { %v5486_v11 = vadd.f32 %v5483_v13, %v5407_v38 }
0x4c72   : > { %5904 = vmatmul.msk.f32.gmra.mxu3 %vm159_vm0, %v5486_v11 }
0x4ca3   : > { %v5479_v49 = vpop.f32.mrf.mxu0 }
0x4ca4   : > { %v5480_v52 = vadd.f32 %v8988_v51, %v5479_v49 }
0x4ca6   : > { %v5484_v59 = vmax.f32 %v5480_v52, 0.0 }
0x4ca8   : > { %v5487_v10 = vadd.f32 %v5484_v59, %v5408_v36 }
0x4caa   : > { %5905 = vmatmul.msk.f32.gmra.mxu3 %vm159_vm0, %v5487_v10  ;;  %v9003_v10 = vmov %v8557_v43 }
0x4cc3   : > { %v5514_v50 = vpop.f32.mrf.mxu3 }
0x4cc4   : > { %v5515_v42 = vadd.f32 %v8993_v47, %v5514_v50 }
0x4cc6   : > { %v5523_v53 = vmax.f32 %v5515_v42, 0.0 }
0x4cc8   : > { %v5526_v48 = vadd.f32 %v5523_v53, %v8465_v56  }
0x4cca   : > { %5908 = vst.msk [vmem:[%s8025_s1 + $0x228] sm:$0xff] %vm184_vm3, %v5526_v48 }
0x4cf5   : > { %v5517_v38 = vpop.f32.mrf.mxu3 }
0x4cf6   : > { %v5518_v62 = vadd.f32 %v8993_v47, %v5517_v38 }
0x4cf8   : > { %v5524_v60 = vmax.f32 %v5518_v62, 0.0 }
0x4cfa   : > { %v5527_v36 = vadd.f32 %v5524_v60, %v8474_v63  }
0x4cfc   : > { %5909 = vst.msk [vmem:[%s8025_s1 + $0x230] sm:$0xff] %vm184_vm3, %v5527_v36 }
0x4d2d   : > { %v5520_v51 = vpop.f32.mrf.mxu3 }
0x4d2e   : > { %v5521_v45 = vadd.f32 %v8993_v47, %v5520_v51 }
0x4d30   : > { %v5525_v8 = vmax.f32 %v5521_v45, 0.0  ;;  %2858 = sbr.rel (!%p2856_p1) target bundleno = 9950 (0x26de), region = 124 }
0x4d32   : > { %v5528_v57 = vadd.f32 %v5525_v8, %v8483_v9  }
0x4d34   : > { %5910 = vst.msk [vmem:[%s8025_s1 + $0x238] sm:$0xf] %vm191_vm4, %v5528_v57 }

</bundles_post_ra>
